<compile_context>
chip_gen: v5e
topology: v5e:2x2
jax: 0.10.0
libtpu: 0.0.40
codegen_flags: <defaults>
</compile_context>

<pallas_src>
import functools

import jax
import jax.numpy as jnp
import numpy as np
from jax.experimental import pallas as pl
from jax.experimental.pallas import tpu as pltpu


def _basic_block_kernel(x_ref, w1_ref, b1_ref, w2_ref, b2_ref, o_ref,
                        ypad_ref, acc_ref, *, H, W):
    """Fused BasicBlock forward for one image.

    x_ref:   (flat_rows_p, Cp)   flat zero-padded (halo) input slab, lane-dense
    w1_ref:  (3, 3, Cp, Cp)      BN1 scale folded in
    w2_ref:  (3, 3, Cp, Cp)      BN2 scale folded in
    b1_ref:  (1, Cp) f32         b2_ref: (1, Cp) f32
    o_ref:   (H*(W+2), Cp)       flat output (pad columns contain garbage)
    ypad_ref:(flat_rows_p, Cp)   zero-padded intermediate activation (VMEM)
    acc_ref: (H*(W+2), Cp) f32   MXU accumulator (VMEM)
    """
    wp = W + 2
    m = H * wp
    cp = ypad_ref.shape[1]
    pad_rows = ypad_ref.shape[0]

    def conv3x3(src_ref, w_ref):
        # 9 accumulating MXU matmuls, contraction depth K = Cp (lane-dense).
        acc_ref[...] = jnp.zeros_like(acc_ref)
        for kh in range(3):
            for kw in range(3):
                acc_ref[...] += jnp.dot(
                    src_ref[pl.ds(kh * wp + kw, m), :], w_ref[kh, kw],
                    preferred_element_type=jnp.float32)

    # Column-validity mask over flat accumulator rows r = h*wp + w:
    # row is a real pixel iff (r mod wp) < W.  Computed once per grid step.
    valid = (jax.lax.broadcasted_iota(jnp.int32, (m, cp), 0) % wp) < W

    # ---- zero only the pad BORDER of ypad (top pad row + bottom pad/slack);
    # the interior pad columns are zeroed by the masked store below.  This is
    # done every grid step (no program_id gating -> megacore safe).
    ypad_ref[pl.ds(0, wp + 1), :] = jnp.zeros((wp + 1, cp), ypad_ref.dtype)
    tail = pad_rows - ((H + 1) * wp + 1)
    ypad_ref[pl.ds((H + 1) * wp + 1, tail), :] = jnp.zeros(
        (tail, cp), ypad_ref.dtype)

    # ---- conv1 + folded-BN bias + ReLU; ONE masked lane-dense wide store ----
    conv3x3(x_ref, w1_ref)
    y1 = jnp.maximum(acc_ref[...] + b1_ref[...], 0.0)
    ypad_ref[pl.ds(wp + 1, m), :] = jnp.where(valid, y1, 0.0).astype(
        ypad_ref.dtype)

    # ---- conv2 + folded-BN bias + identity skip + ReLU; ONE wide store ------
    conv3x3(ypad_ref, w2_ref)
    skip = x_ref[pl.ds(wp + 1, m), :].astype(jnp.float32)
    z = jnp.maximum(acc_ref[...] + b2_ref[...] + skip, 0.0)
    o_ref[...] = z.astype(o_ref.dtype)


def _fold_bn(gamma, beta, mean, var, eps=1e-5):
    scale = gamma / jnp.sqrt(var + eps)
    bias = beta - mean * scale
    return scale, bias


def basic_block_forward(x_nchw, params, *, compute_dtype=None):
    """BasicBlock forward (projection=None, stride=1). x is NCHW (PyTorch)."""
    x = jnp.transpose(x_nchw, (0, 2, 3, 1))               # -> NHWC
    N, H, W, cin = x.shape
    dtype = compute_dtype if compute_dtype is not None else x.dtype

    s1, b1 = _fold_bn(params["g1"], params["be1"], params["m1"], params["v1"])
    s2, b2 = _fold_bn(params["g2"], params["be2"], params["m2"], params["v2"])

    w1 = params["w1"] * s1                                  # (3,3,Cin,Cmid)
    w2 = params["w2"] * s2                                  # (3,3,Cmid,Cout)
    cmid, cout = w1.shape[-1], w2.shape[-1]
    assert cin == cmid == cout, "identity skip requires equal channel counts"

    LANE = 128
    cp = ((cin + LANE - 1) // LANE) * LANE                  # lane-dense channels
    wp = W + 2
    m = H * wp
    flat_rows = (H + 2) * wp + 2                            # +2 slack for last tap
    flat_rows_p = ((flat_rows + 7) // 8) * 8                # sublane-aligned

    # Channel-pad weights/biases (BN scale folded); MXU operands in compute dtype.
    w1p = jnp.zeros((3, 3, cp, cp), dtype).at[:, :, :cin, :cmid].set(
        w1.astype(dtype))
    w2p = jnp.zeros((3, 3, cp, cp), dtype).at[:, :, :cmid, :cout].set(
        w2.astype(dtype))
    b1p = jnp.zeros((1, cp), jnp.float32).at[0, :cmid].set(b1)
    b2p = jnp.zeros((1, cp), jnp.float32).at[0, :cout].set(b2)

    # Halo + channel pad in one wrapper-level pad, flattened to the slab layout.
    xp = jnp.pad(x.astype(dtype), ((0, 0), (1, 1), (1, 1), (0, cp - cin)))
    xp = xp.reshape(N, (H + 2) * wp, cp)
    xp = jnp.pad(xp, ((0, 0), (0, flat_rows_p - (H + 2) * wp), (0, 0)))

    kernel = functools.partial(_basic_block_kernel, H=H, W=W)
    out_flat = pl.pallas_call(
        kernel,
        out_shape=jax.ShapeDtypeStruct((N, m, cp), dtype),
        grid=(N,),
        in_specs=[
            pl.BlockSpec((None, flat_rows_p, cp), lambda n: (n, 0, 0)),
            pl.BlockSpec((3, 3, cp, cp), lambda n: (0, 0, 0, 0)),
            pl.BlockSpec((1, cp), lambda n: (0, 0)),
            pl.BlockSpec((3, 3, cp, cp), lambda n: (0, 0, 0, 0)),
            pl.BlockSpec((1, cp), lambda n: (0, 0)),
        ],
        out_specs=pl.BlockSpec((None, m, cp), lambda n: (n, 0, 0)),
        scratch_shapes=[
            pltpu.VMEM((flat_rows_p, cp), dtype),    # padded intermediate act.
            pltpu.VMEM((m, cp), jnp.float32),        # MXU accumulator
        ],
        compiler_params=pltpu.CompilerParams(
            dimension_semantics=("parallel",),
            vmem_limit_bytes=32 * 1024 * 1024),
    )(xp, w1p, b1p, w2p, b2p)

    # Drop pad columns / pad channels: flat row h*wp + w  ->  pixel (h, w).
    out = out_flat.reshape(N, H, wp, cp)[:, :, :W, :cout]
    return jnp.transpose(out.astype(x_nchw.dtype), (0, 3, 1, 2))   # -> NCHW


def basic_block_reference(x_nchw, params):
    """Pure-JAX reference (correctness check only)."""
    x = jnp.transpose(x_nchw, (0, 2, 3, 1))
    dn = ("NHWC", "HWIO", "NHWC")
    prec = jax.lax.Precision.HIGHEST
    s1, b1 = _fold_bn(params["g1"], params["be1"], params["m1"], params["v1"])
    s2, b2 = _fold_bn(params["g2"], params["be2"], params["m2"], params["v2"])
    y = jax.lax.conv_general_dilated(x, params["w1"], (1, 1), "SAME",
                                     dimension_numbers=dn, precision=prec)
    y = jnp.maximum(y * s1 + b1, 0.0)
    z = jax.lax.conv_general_dilated(y, params["w2"], (1, 1), "SAME",
                                     dimension_numbers=dn, precision=prec)
    z = z * s2 + b2 + x
    return jnp.transpose(jnp.maximum(z, 0.0), (0, 3, 1, 2))


if __name__ == "__main__":
    # Small shapes: batch=2, in_channels=inner_channels=4, spatial=16.
    N, C, H, W = 2, 4, 16, 16
    inner = C  # identity skip requires in_channels == inner_channels * expansion

    key = jax.random.PRNGKey(0)
    ks = jax.random.split(key, 11)
    x = jax.random.normal(ks[0], (N, C, H, W), jnp.float32)

    params = {
        "w1": 0.1 * jax.random.normal(ks[1], (3, 3, C, inner), jnp.float32),
        "g1": 1.0 + 0.1 * jax.random.normal(ks[2], (inner,), jnp.float32),
        "be1": 0.1 * jax.random.normal(ks[3], (inner,), jnp.float32),
        "m1": 0.1 * jax.random.normal(ks[4], (inner,), jnp.float32),
        "v1": jax.random.uniform(ks[5], (inner,), jnp.float32, 0.5, 1.5),
        "w2": 0.1 * jax.random.normal(ks[6], (3, 3, inner, inner), jnp.float32),
        "g2": 1.0 + 0.1 * jax.random.normal(ks[7], (inner,), jnp.float32),
        "be2": 0.1 * jax.random.normal(ks[8], (inner,), jnp.float32),
        "m2": 0.1 * jax.random.normal(ks[9], (inner,), jnp.float32),
        "v2": jax.random.uniform(ks[10], (inner,), jnp.float32, 0.5, 1.5),
    }

    ref = jax.block_until_ready(basic_block_reference(x, params))

    # f32 path.
    out = jax.block_until_ready(basic_block_forward(x, params))
    assert out.shape == (N, C, H, W), out.shape
    np.testing.assert_allclose(np.asarray(out), np.asarray(ref),
                               rtol=2e-3, atol=2e-3)

    # bf16 path (full MXU rate on v6e/v7x); f32 accumulation, looser tolerance
    # because the conv1->conv2 intermediate is rounded to bf16.
    out_bf16 = jax.block_until_ready(
        basic_block_forward(x, params, compute_dtype=jnp.bfloat16))
    np.testing.assert_allclose(np.asarray(out_bf16), np.asarray(ref),
                               rtol=5e-2, atol=5e-2)

    print("KERNEL_OK")
</pallas_src>

<mosaic_0001>
module attributes {stable_mosaic.version = 11 : i64} {
  func.func @_basic_block_kernel(%arg0: i32, %arg1: memref<1x328x128xf32, #tpu.memory_space<vmem>>, %arg2: memref<3x3x128x128xf32, #tpu.memory_space<vmem>>, %arg3: memref<1x128xf32, #tpu.memory_space<vmem>>, %arg4: memref<3x3x128x128xf32, #tpu.memory_space<vmem>>, %arg5: memref<1x128xf32, #tpu.memory_space<vmem>>, %arg6: memref<1x288x128xf32, #tpu.memory_space<vmem>>, %arg7: memref<328x128xf32, #tpu.memory_space<vmem>>, %arg8: memref<288x128xf32, #tpu.memory_space<vmem>>) attributes {dimension_semantics = [#tpu.dimension_semantics<parallel>], iteration_bounds = array<i64: 2>, scalar_prefetch = 0 : i64, scratch_operands = 2 : i64, tpu.core_type = #tpu.core_type<tc>, window_params = [{transform_indices = @transform_0, window_bounds = array<i64: 1, 328, 128>}, {pipeline_mode = #tpu.pipeline_mode<synchronous>, transform_indices = @transform_1, window_bounds = array<i64: 3, 3, 128, 128>}, {pipeline_mode = #tpu.pipeline_mode<synchronous>, transform_indices = @transform_2, window_bounds = array<i64: 1, 128>}, {pipeline_mode = #tpu.pipeline_mode<synchronous>, transform_indices = @transform_3, window_bounds = array<i64: 3, 3, 128, 128>}, {pipeline_mode = #tpu.pipeline_mode<synchronous>, transform_indices = @transform_4, window_bounds = array<i64: 1, 128>}, {transform_indices = @transform_5, window_bounds = array<i64: 1, 288, 128>}]} {
    %0 = tpu.iota {dimensions = array<i32: 0>} : vector<288x128xi32>
    %c18_i32 = arith.constant 18 : i32
    %c0_i32 = arith.constant 0 : i32
    %1 = arith.cmpi eq, %c18_i32, %c0_i32 : i32
    %c1_i32 = arith.constant 1 : i32
    %2 = arith.select %1, %c1_i32, %c18_i32 : i32
    %3 = vector.broadcast %2 : i32 to vector<288x128xi32>
    %4 = arith.remsi %0, %3 : vector<288x128xi32>
    %c0_i32_0 = arith.constant 0 : i32
    %5 = vector.broadcast %c0_i32_0 : i32 to vector<288x128xi32>
    %6 = arith.cmpi ne, %4, %5 : vector<288x128xi32>
    %c0_i32_1 = arith.constant 0 : i32
    %7 = vector.broadcast %c0_i32_1 : i32 to vector<288x128xi32>
    %8 = arith.cmpi slt, %4, %7 : vector<288x128xi32>
    %c0_i32_2 = arith.constant 0 : i32
    %9 = arith.cmpi slt, %2, %c0_i32_2 : i32
    %10 = vector.broadcast %9 : i1 to vector<288x128xi1>
    %11 = vector.broadcast %10 : vector<288x128xi1> to vector<288x128xi1>
    %12 = arith.xori %8, %11 : vector<288x128xi1>
    %13 = arith.andi %12, %6 : vector<288x128xi1>
    %14 = vector.broadcast %2 : i32 to vector<288x128xi32>
    %15 = arith.addi %4, %14 : vector<288x128xi32>
    %16 = arith.select %13, %15, %4 : vector<288x128xi1>, vector<288x128xi32>
    %c16_i32 = arith.constant 16 : i32
    %17 = vector.broadcast %c16_i32 : i32 to vector<288x128xi32>
    %18 = arith.cmpi slt, %16, %17 : vector<288x128xi32>
    %cst = arith.constant 0.000000e+00 : f32
    %19 = vector.broadcast %cst : f32 to vector<19x128xf32>
    %c0 = arith.constant 0 : index
    %c0_3 = arith.constant 0 : index
    %20 = vector.load %arg7[%c0, %c0_3] : memref<328x128xf32, #tpu.memory_space<vmem>>, vector<19x128xf32>
    tpu.vector_store %arg7[%c0, %c0_3], %19 {strides = array<i32>} : memref<328x128xf32, #tpu.memory_space<vmem>>, vector<19x128xf32>,
    %cst_4 = arith.constant 0.000000e+00 : f32
    %21 = vector.broadcast %cst_4 : f32 to vector<21x128xf32>
    %c307 = arith.constant 307 : index
    %c0_5 = arith.constant 0 : index
    %22 = vector.load %arg7[%c307, %c0_5] : memref<328x128xf32, #tpu.memory_space<vmem>>, vector<21x128xf32>
    tpu.vector_store %arg7[%c307, %c0_5], %21 {strides = array<i32>} : memref<328x128xf32, #tpu.memory_space<vmem>>, vector<21x128xf32>,
    %cst_6 = arith.constant 0.000000e+00 : f32
    %23 = vector.broadcast %cst_6 : f32 to vector<288x128xf32>
    %c0_7 = arith.constant 0 : index
    %c0_8 = arith.constant 0 : index
    %24 = vector.load %arg8[%c0_7, %c0_8] : memref<288x128xf32, #tpu.memory_space<vmem>>, vector<288x128xf32>
    tpu.vector_store %arg8[%c0_7, %c0_8], %23 {strides = array<i32>} : memref<288x128xf32, #tpu.memory_space<vmem>>, vector<288x128xf32>,
    %c0_9 = arith.constant 0 : index
    %c0_10 = arith.constant 0 : index
    %25 = vector.load %arg8[%c0_9, %c0_10] : memref<288x128xf32, #tpu.memory_space<vmem>>, vector<288x128xf32>
    %c0_11 = arith.constant 0 : index
    %c0_12 = arith.constant 0 : index
    %c0_13 = arith.constant 0 : index
    %26 = vector.load %arg1[%c0_11, %c0_12, %c0_13] : memref<1x328x128xf32, #tpu.memory_space<vmem>>, vector<1x288x128xf32>
    %27 = vector.shape_cast %26 : vector<1x288x128xf32> to vector<288x128xf32>
    %c0_14 = arith.constant 0 : index
    %c0_15 = arith.constant 0 : index
    %c0_16 = arith.constant 0 : index
    %c0_17 = arith.constant 0 : index
    %28 = vector.load %arg2[%c0_14, %c0_15, %c0_16, %c0_17] : memref<3x3x128x128xf32, #tpu.memory_space<vmem>>, vector<1x1x128x128xf32>
    %29 = vector.shape_cast %28 : vector<1x1x128x128xf32> to vector<128x128xf32>
    %cst_18 = arith.constant dense<0.000000e+00> : vector<288x128xf32>
    %30 = tpu.matmul %27, %29, %cst_18 {dimension_numbers = #tpu.dot_dimension_numbers<[1], [0], [0], [1], [0, 0, 1, 1], [], []>} : vector<288x128xf32>, vector<128x128xf32>, vector<288x128xf32> -> vector<288x128xf32>
    %31 = arith.addf %25, %30 : vector<288x128xf32>
    %c0_19 = arith.constant 0 : index
    %c0_20 = arith.constant 0 : index
    %32 = vector.load %arg8[%c0_19, %c0_20] : memref<288x128xf32, #tpu.memory_space<vmem>>, vector<288x128xf32>
    tpu.vector_store %arg8[%c0_19, %c0_20], %31 {strides = array<i32>} : memref<288x128xf32, #tpu.memory_space<vmem>>, vector<288x128xf32>,
    %c0_21 = arith.constant 0 : index
    %c0_22 = arith.constant 0 : index
    %33 = vector.load %arg8[%c0_21, %c0_22] : memref<288x128xf32, #tpu.memory_space<vmem>>, vector<288x128xf32>
    %c0_23 = arith.constant 0 : index
    %c1 = arith.constant 1 : index
    %c0_24 = arith.constant 0 : index
    %34 = vector.load %arg1[%c0_23, %c1, %c0_24] : memref<1x328x128xf32, #tpu.memory_space<vmem>>, vector<1x288x128xf32>
    %35 = vector.shape_cast %34 : vector<1x288x128xf32> to vector<288x128xf32>
    %c0_25 = arith.constant 0 : index
    %c1_26 = arith.constant 1 : index
    %c0_27 = arith.constant 0 : index
    %c0_28 = arith.constant 0 : index
    %36 = vector.load %arg2[%c0_25, %c1_26, %c0_27, %c0_28] : memref<3x3x128x128xf32, #tpu.memory_space<vmem>>, vector<1x1x128x128xf32>
    %37 = vector.shape_cast %36 : vector<1x1x128x128xf32> to vector<128x128xf32>
    %cst_29 = arith.constant dense<0.000000e+00> : vector<288x128xf32>
    %38 = tpu.matmul %35, %37, %cst_29 {dimension_numbers = #tpu.dot_dimension_numbers<[1], [0], [0], [1], [0, 0, 1, 1], [], []>} : vector<288x128xf32>, vector<128x128xf32>, vector<288x128xf32> -> vector<288x128xf32>
    %39 = arith.addf %33, %38 : vector<288x128xf32>
    %c0_30 = arith.constant 0 : index
    %c0_31 = arith.constant 0 : index
    %40 = vector.load %arg8[%c0_30, %c0_31] : memref<288x128xf32, #tpu.memory_space<vmem>>, vector<288x128xf32>
    tpu.vector_store %arg8[%c0_30, %c0_31], %39 {strides = array<i32>} : memref<288x128xf32, #tpu.memory_space<vmem>>, vector<288x128xf32>,
    %c0_32 = arith.constant 0 : index
    %c0_33 = arith.constant 0 : index
    %41 = vector.load %arg8[%c0_32, %c0_33] : memref<288x128xf32, #tpu.memory_space<vmem>>, vector<288x128xf32>
    %c0_34 = arith.constant 0 : index
    %c2 = arith.constant 2 : index
    %c0_35 = arith.constant 0 : index
    %42 = vector.load %arg1[%c0_34, %c2, %c0_35] : memref<1x328x128xf32, #tpu.memory_space<vmem>>, vector<1x288x128xf32>
    %43 = vector.shape_cast %42 : vector<1x288x128xf32> to vector<288x128xf32>
    %c0_36 = arith.constant 0 : index
    %c2_37 = arith.constant 2 : index
    %c0_38 = arith.constant 0 : index
    %c0_39 = arith.constant 0 : index
    %44 = vector.load %arg2[%c0_36, %c2_37, %c0_38, %c0_39] : memref<3x3x128x128xf32, #tpu.memory_space<vmem>>, vector<1x1x128x128xf32>
    %45 = vector.shape_cast %44 : vector<1x1x128x128xf32> to vector<128x128xf32>
    %cst_40 = arith.constant dense<0.000000e+00> : vector<288x128xf32>
    %46 = tpu.matmul %43, %45, %cst_40 {dimension_numbers = #tpu.dot_dimension_numbers<[1], [0], [0], [1], [0, 0, 1, 1], [], []>} : vector<288x128xf32>, vector<128x128xf32>, vector<288x128xf32> -> vector<288x128xf32>
    %47 = arith.addf %41, %46 : vector<288x128xf32>
    %c0_41 = arith.constant 0 : index
    %c0_42 = arith.constant 0 : index
    %48 = vector.load %arg8[%c0_41, %c0_42] : memref<288x128xf32, #tpu.memory_space<vmem>>, vector<288x128xf32>
    tpu.vector_store %arg8[%c0_41, %c0_42], %47 {strides = array<i32>} : memref<288x128xf32, #tpu.memory_space<vmem>>, vector<288x128xf32>,
    %c0_43 = arith.constant 0 : index
    %c0_44 = arith.constant 0 : index
    %49 = vector.load %arg8[%c0_43, %c0_44] : memref<288x128xf32, #tpu.memory_space<vmem>>, vector<288x128xf32>
    %c0_45 = arith.constant 0 : index
    %c18 = arith.constant 18 : index
    %c0_46 = arith.constant 0 : index
    %50 = vector.load %arg1[%c0_45, %c18, %c0_46] : memref<1x328x128xf32, #tpu.memory_space<vmem>>, vector<1x288x128xf32>
    %51 = vector.shape_cast %50 : vector<1x288x128xf32> to vector<288x128xf32>
    %c1_47 = arith.constant 1 : index
    %c0_48 = arith.constant 0 : index
    %c0_49 = arith.constant 0 : index
    %c0_50 = arith.constant 0 : index
    %52 = vector.load %arg2[%c1_47, %c0_48, %c0_49, %c0_50] : memref<3x3x128x128xf32, #tpu.memory_space<vmem>>, vector<1x1x128x128xf32>
    %53 = vector.shape_cast %52 : vector<1x1x128x128xf32> to vector<128x128xf32>
    %cst_51 = arith.constant dense<0.000000e+00> : vector<288x128xf32>
    %54 = tpu.matmul %51, %53, %cst_51 {dimension_numbers = #tpu.dot_dimension_numbers<[1], [0], [0], [1], [0, 0, 1, 1], [], []>} : vector<288x128xf32>, vector<128x128xf32>, vector<288x128xf32> -> vector<288x128xf32>
    %55 = arith.addf %49, %54 : vector<288x128xf32>
    %c0_52 = arith.constant 0 : index
    %c0_53 = arith.constant 0 : index
    %56 = vector.load %arg8[%c0_52, %c0_53] : memref<288x128xf32, #tpu.memory_space<vmem>>, vector<288x128xf32>
    tpu.vector_store %arg8[%c0_52, %c0_53], %55 {strides = array<i32>} : memref<288x128xf32, #tpu.memory_space<vmem>>, vector<288x128xf32>,
    %c0_54 = arith.constant 0 : index
    %c0_55 = arith.constant 0 : index
    %57 = vector.load %arg8[%c0_54, %c0_55] : memref<288x128xf32, #tpu.memory_space<vmem>>, vector<288x128xf32>
    %c0_56 = arith.constant 0 : index
    %c19 = arith.constant 19 : index
    %c0_57 = arith.constant 0 : index
    %58 = vector.load %arg1[%c0_56, %c19, %c0_57] : memref<1x328x128xf32, #tpu.memory_space<vmem>>, vector<1x288x128xf32>
    %59 = vector.shape_cast %58 : vector<1x288x128xf32> to vector<288x128xf32>
    %c1_58 = arith.constant 1 : index
    %c1_59 = arith.constant 1 : index
    %c0_60 = arith.constant 0 : index
    %c0_61 = arith.constant 0 : index
    %60 = vector.load %arg2[%c1_58, %c1_59, %c0_60, %c0_61] : memref<3x3x128x128xf32, #tpu.memory_space<vmem>>, vector<1x1x128x128xf32>
    %61 = vector.shape_cast %60 : vector<1x1x128x128xf32> to vector<128x128xf32>
    %cst_62 = arith.constant dense<0.000000e+00> : vector<288x128xf32>
    %62 = tpu.matmul %59, %61, %cst_62 {dimension_numbers = #tpu.dot_dimension_numbers<[1], [0], [0], [1], [0, 0, 1, 1], [], []>} : vector<288x128xf32>, vector<128x128xf32>, vector<288x128xf32> -> vector<288x128xf32>
    %63 = arith.addf %57, %62 : vector<288x128xf32>
    %c0_63 = arith.constant 0 : index
    %c0_64 = arith.constant 0 : index
    %64 = vector.load %arg8[%c0_63, %c0_64] : memref<288x128xf32, #tpu.memory_space<vmem>>, vector<288x128xf32>
    tpu.vector_store %arg8[%c0_63, %c0_64], %63 {strides = array<i32>} : memref<288x128xf32, #tpu.memory_space<vmem>>, vector<288x128xf32>,
    %c0_65 = arith.constant 0 : index
    %c0_66 = arith.constant 0 : index
    %65 = vector.load %arg8[%c0_65, %c0_66] : memref<288x128xf32, #tpu.memory_space<vmem>>, vector<288x128xf32>
    %c0_67 = arith.constant 0 : index
    %c20 = arith.constant 20 : index
    %c0_68 = arith.constant 0 : index
    %66 = vector.load %arg1[%c0_67, %c20, %c0_68] : memref<1x328x128xf32, #tpu.memory_space<vmem>>, vector<1x288x128xf32>
    %67 = vector.shape_cast %66 : vector<1x288x128xf32> to vector<288x128xf32>
    %c1_69 = arith.constant 1 : index
    %c2_70 = arith.constant 2 : index
    %c0_71 = arith.constant 0 : index
    %c0_72 = arith.constant 0 : index
    %68 = vector.load %arg2[%c1_69, %c2_70, %c0_71, %c0_72] : memref<3x3x128x128xf32, #tpu.memory_space<vmem>>, vector<1x1x128x128xf32>
    %69 = vector.shape_cast %68 : vector<1x1x128x128xf32> to vector<128x128xf32>
    %cst_73 = arith.constant dense<0.000000e+00> : vector<288x128xf32>
    %70 = tpu.matmul %67, %69, %cst_73 {dimension_numbers = #tpu.dot_dimension_numbers<[1], [0], [0], [1], [0, 0, 1, 1], [], []>} : vector<288x128xf32>, vector<128x128xf32>, vector<288x128xf32> -> vector<288x128xf32>
    %71 = arith.addf %65, %70 : vector<288x128xf32>
    %c0_74 = arith.constant 0 : index
    %c0_75 = arith.constant 0 : index
    %72 = vector.load %arg8[%c0_74, %c0_75] : memref<288x128xf32, #tpu.memory_space<vmem>>, vector<288x128xf32>
    tpu.vector_store %arg8[%c0_74, %c0_75], %71 {strides = array<i32>} : memref<288x128xf32, #tpu.memory_space<vmem>>, vector<288x128xf32>,
    %c0_76 = arith.constant 0 : index
    %c0_77 = arith.constant 0 : index
    %73 = vector.load %arg8[%c0_76, %c0_77] : memref<288x128xf32, #tpu.memory_space<vmem>>, vector<288x128xf32>
    %c0_78 = arith.constant 0 : index
    %c36 = arith.constant 36 : index
    %c0_79 = arith.constant 0 : index
    %74 = vector.load %arg1[%c0_78, %c36, %c0_79] : memref<1x328x128xf32, #tpu.memory_space<vmem>>, vector<1x288x128xf32>
    %75 = vector.shape_cast %74 : vector<1x288x128xf32> to vector<288x128xf32>
    %c2_80 = arith.constant 2 : index
    %c0_81 = arith.constant 0 : index
    %c0_82 = arith.constant 0 : index
    %c0_83 = arith.constant 0 : index
    %76 = vector.load %arg2[%c2_80, %c0_81, %c0_82, %c0_83] : memref<3x3x128x128xf32, #tpu.memory_space<vmem>>, vector<1x1x128x128xf32>
    %77 = vector.shape_cast %76 : vector<1x1x128x128xf32> to vector<128x128xf32>
    %cst_84 = arith.constant dense<0.000000e+00> : vector<288x128xf32>
    %78 = tpu.matmul %75, %77, %cst_84 {dimension_numbers = #tpu.dot_dimension_numbers<[1], [0], [0], [1], [0, 0, 1, 1], [], []>} : vector<288x128xf32>, vector<128x128xf32>, vector<288x128xf32> -> vector<288x128xf32>
    %79 = arith.addf %73, %78 : vector<288x128xf32>
    %c0_85 = arith.constant 0 : index
    %c0_86 = arith.constant 0 : index
    %80 = vector.load %arg8[%c0_85, %c0_86] : memref<288x128xf32, #tpu.memory_space<vmem>>, vector<288x128xf32>
    tpu.vector_store %arg8[%c0_85, %c0_86], %79 {strides = array<i32>} : memref<288x128xf32, #tpu.memory_space<vmem>>, vector<288x128xf32>,
    %c0_87 = arith.constant 0 : index
    %c0_88 = arith.constant 0 : index
    %81 = vector.load %arg8[%c0_87, %c0_88] : memref<288x128xf32, #tpu.memory_space<vmem>>, vector<288x128xf32>
    %c0_89 = arith.constant 0 : index
    %c37 = arith.constant 37 : index
    %c0_90 = arith.constant 0 : index
    %82 = vector.load %arg1[%c0_89, %c37, %c0_90] : memref<1x328x128xf32, #tpu.memory_space<vmem>>, vector<1x288x128xf32>
    %83 = vector.shape_cast %82 : vector<1x288x128xf32> to vector<288x128xf32>
    %c2_91 = arith.constant 2 : index
    %c1_92 = arith.constant 1 : index
    %c0_93 = arith.constant 0 : index
    %c0_94 = arith.constant 0 : index
    %84 = vector.load %arg2[%c2_91, %c1_92, %c0_93, %c0_94] : memref<3x3x128x128xf32, #tpu.memory_space<vmem>>, vector<1x1x128x128xf32>
    %85 = vector.shape_cast %84 : vector<1x1x128x128xf32> to vector<128x128xf32>
    %cst_95 = arith.constant dense<0.000000e+00> : vector<288x128xf32>
    %86 = tpu.matmul %83, %85, %cst_95 {dimension_numbers = #tpu.dot_dimension_numbers<[1], [0], [0], [1], [0, 0, 1, 1], [], []>} : vector<288x128xf32>, vector<128x128xf32>, vector<288x128xf32> -> vector<288x128xf32>
    %87 = arith.addf %81, %86 : vector<288x128xf32>
    %c0_96 = arith.constant 0 : index
    %c0_97 = arith.constant 0 : index
    %88 = vector.load %arg8[%c0_96, %c0_97] : memref<288x128xf32, #tpu.memory_space<vmem>>, vector<288x128xf32>
    tpu.vector_store %arg8[%c0_96, %c0_97], %87 {strides = array<i32>} : memref<288x128xf32, #tpu.memory_space<vmem>>, vector<288x128xf32>,
    %c0_98 = arith.constant 0 : index
    %c0_99 = arith.constant 0 : index
    %89 = vector.load %arg8[%c0_98, %c0_99] : memref<288x128xf32, #tpu.memory_space<vmem>>, vector<288x128xf32>
    %c0_100 = arith.constant 0 : index
    %c38 = arith.constant 38 : index
    %c0_101 = arith.constant 0 : index
    %90 = vector.load %arg1[%c0_100, %c38, %c0_101] : memref<1x328x128xf32, #tpu.memory_space<vmem>>, vector<1x288x128xf32>
    %91 = vector.shape_cast %90 : vector<1x288x128xf32> to vector<288x128xf32>
    %c2_102 = arith.constant 2 : index
    %c2_103 = arith.constant 2 : index
    %c0_104 = arith.constant 0 : index
    %c0_105 = arith.constant 0 : index
    %92 = vector.load %arg2[%c2_102, %c2_103, %c0_104, %c0_105] : memref<3x3x128x128xf32, #tpu.memory_space<vmem>>, vector<1x1x128x128xf32>
    %93 = vector.shape_cast %92 : vector<1x1x128x128xf32> to vector<128x128xf32>
    %cst_106 = arith.constant dense<0.000000e+00> : vector<288x128xf32>
    %94 = tpu.matmul %91, %93, %cst_106 {dimension_numbers = #tpu.dot_dimension_numbers<[1], [0], [0], [1], [0, 0, 1, 1], [], []>} : vector<288x128xf32>, vector<128x128xf32>, vector<288x128xf32> -> vector<288x128xf32>
    %95 = arith.addf %89, %94 : vector<288x128xf32>
    %c0_107 = arith.constant 0 : index
    %c0_108 = arith.constant 0 : index
    %96 = vector.load %arg8[%c0_107, %c0_108] : memref<288x128xf32, #tpu.memory_space<vmem>>, vector<288x128xf32>
    tpu.vector_store %arg8[%c0_107, %c0_108], %95 {strides = array<i32>} : memref<288x128xf32, #tpu.memory_space<vmem>>, vector<288x128xf32>,
    %c0_109 = arith.constant 0 : index
    %c0_110 = arith.constant 0 : index
    %97 = vector.load %arg8[%c0_109, %c0_110] : memref<288x128xf32, #tpu.memory_space<vmem>>, vector<288x128xf32>
    %c0_111 = arith.constant 0 : index
    %c0_112 = arith.constant 0 : index
    %98 = vector.load %arg3[%c0_111, %c0_112] : memref<1x128xf32, #tpu.memory_space<vmem>>, vector<1x128xf32>
    %99 = vector.broadcast %98 : vector<1x128xf32> to vector<288x128xf32>
    %100 = arith.addf %97, %99 : vector<288x128xf32>
    %cst_113 = arith.constant 0.000000e+00 : f32
    %101 = vector.broadcast %cst_113 : f32 to vector<288x128xf32>
    %102 = arith.maximumf %100, %101 : vector<288x128xf32>
    %cst_114 = arith.constant 0.000000e+00 : f32
    %103 = vector.broadcast %cst_114 : f32 to vector<288x128xf32>
    %104 = arith.select %18, %102, %103 : vector<288x128xi1>, vector<288x128xf32>
    %c19_115 = arith.constant 19 : index
    %c0_116 = arith.constant 0 : index
    %105 = vector.load %arg7[%c19_115, %c0_116] : memref<328x128xf32, #tpu.memory_space<vmem>>, vector<288x128xf32>
    tpu.vector_store %arg7[%c19_115, %c0_116], %104 {strides = array<i32>} : memref<328x128xf32, #tpu.memory_space<vmem>>, vector<288x128xf32>,
    %cst_117 = arith.constant 0.000000e+00 : f32
    %106 = vector.broadcast %cst_117 : f32 to vector<288x128xf32>
    %c0_118 = arith.constant 0 : index
    %c0_119 = arith.constant 0 : index
    %107 = vector.load %arg8[%c0_118, %c0_119] : memref<288x128xf32, #tpu.memory_space<vmem>>, vector<288x128xf32>
    tpu.vector_store %arg8[%c0_118, %c0_119], %106 {strides = array<i32>} : memref<288x128xf32, #tpu.memory_space<vmem>>, vector<288x128xf32>,
    %c0_120 = arith.constant 0 : index
    %c0_121 = arith.constant 0 : index
    %108 = vector.load %arg8[%c0_120, %c0_121] : memref<288x128xf32, #tpu.memory_space<vmem>>, vector<288x128xf32>
    %c0_122 = arith.constant 0 : index
    %c0_123 = arith.constant 0 : index
    %109 = vector.load %arg7[%c0_122, %c0_123] : memref<328x128xf32, #tpu.memory_space<vmem>>, vector<288x128xf32>
    %c0_124 = arith.constant 0 : index
    %c0_125 = arith.constant 0 : index
    %c0_126 = arith.constant 0 : index
    %c0_127 = arith.constant 0 : index
    %110 = vector.load %arg4[%c0_124, %c0_125, %c0_126, %c0_127] : memref<3x3x128x128xf32, #tpu.memory_space<vmem>>, vector<1x1x128x128xf32>
    %111 = vector.shape_cast %110 : vector<1x1x128x128xf32> to vector<128x128xf32>
    %cst_128 = arith.constant dense<0.000000e+00> : vector<288x128xf32>
    %112 = tpu.matmul %109, %111, %cst_128 {dimension_numbers = #tpu.dot_dimension_numbers<[1], [0], [0], [1], [0, 0, 1, 1], [], []>} : vector<288x128xf32>, vector<128x128xf32>, vector<288x128xf32> -> vector<288x128xf32>
    %113 = arith.addf %108, %112 : vector<288x128xf32>
    %c0_129 = arith.constant 0 : index
    %c0_130 = arith.constant 0 : index
    %114 = vector.load %arg8[%c0_129, %c0_130] : memref<288x128xf32, #tpu.memory_space<vmem>>, vector<288x128xf32>
    tpu.vector_store %arg8[%c0_129, %c0_130], %113 {strides = array<i32>} : memref<288x128xf32, #tpu.memory_space<vmem>>, vector<288x128xf32>,
    %c0_131 = arith.constant 0 : index
    %c0_132 = arith.constant 0 : index
    %115 = vector.load %arg8[%c0_131, %c0_132] : memref<288x128xf32, #tpu.memory_space<vmem>>, vector<288x128xf32>
    %c1_133 = arith.constant 1 : index
    %c0_134 = arith.constant 0 : index
    %116 = vector.load %arg7[%c1_133, %c0_134] : memref<328x128xf32, #tpu.memory_space<vmem>>, vector<288x128xf32>
    %c0_135 = arith.constant 0 : index
    %c1_136 = arith.constant 1 : index
    %c0_137 = arith.constant 0 : index
    %c0_138 = arith.constant 0 : index
    %117 = vector.load %arg4[%c0_135, %c1_136, %c0_137, %c0_138] : memref<3x3x128x128xf32, #tpu.memory_space<vmem>>, vector<1x1x128x128xf32>
    %118 = vector.shape_cast %117 : vector<1x1x128x128xf32> to vector<128x128xf32>
    %cst_139 = arith.constant dense<0.000000e+00> : vector<288x128xf32>
    %119 = tpu.matmul %116, %118, %cst_139 {dimension_numbers = #tpu.dot_dimension_numbers<[1], [0], [0], [1], [0, 0, 1, 1], [], []>} : vector<288x128xf32>, vector<128x128xf32>, vector<288x128xf32> -> vector<288x128xf32>
    %120 = arith.addf %115, %119 : vector<288x128xf32>
    %c0_140 = arith.constant 0 : index
    %c0_141 = arith.constant 0 : index
    %121 = vector.load %arg8[%c0_140, %c0_141] : memref<288x128xf32, #tpu.memory_space<vmem>>, vector<288x128xf32>
    tpu.vector_store %arg8[%c0_140, %c0_141], %120 {strides = array<i32>} : memref<288x128xf32, #tpu.memory_space<vmem>>, vector<288x128xf32>,
    %c0_142 = arith.constant 0 : index
    %c0_143 = arith.constant 0 : index
    %122 = vector.load %arg8[%c0_142, %c0_143] : memref<288x128xf32, #tpu.memory_space<vmem>>, vector<288x128xf32>
    %c2_144 = arith.constant 2 : index
    %c0_145 = arith.constant 0 : index
    %123 = vector.load %arg7[%c2_144, %c0_145] : memref<328x128xf32, #tpu.memory_space<vmem>>, vector<288x128xf32>
    %c0_146 = arith.constant 0 : index
    %c2_147 = arith.constant 2 : index
    %c0_148 = arith.constant 0 : index
    %c0_149 = arith.constant 0 : index
    %124 = vector.load %arg4[%c0_146, %c2_147, %c0_148, %c0_149] : memref<3x3x128x128xf32, #tpu.memory_space<vmem>>, vector<1x1x128x128xf32>
    %125 = vector.shape_cast %124 : vector<1x1x128x128xf32> to vector<128x128xf32>
    %cst_150 = arith.constant dense<0.000000e+00> : vector<288x128xf32>
    %126 = tpu.matmul %123, %125, %cst_150 {dimension_numbers = #tpu.dot_dimension_numbers<[1], [0], [0], [1], [0, 0, 1, 1], [], []>} : vector<288x128xf32>, vector<128x128xf32>, vector<288x128xf32> -> vector<288x128xf32>
    %127 = arith.addf %122, %126 : vector<288x128xf32>
    %c0_151 = arith.constant 0 : index
    %c0_152 = arith.constant 0 : index
    %128 = vector.load %arg8[%c0_151, %c0_152] : memref<288x128xf32, #tpu.memory_space<vmem>>, vector<288x128xf32>
    tpu.vector_store %arg8[%c0_151, %c0_152], %127 {strides = array<i32>} : memref<288x128xf32, #tpu.memory_space<vmem>>, vector<288x128xf32>,
    %c0_153 = arith.constant 0 : index
    %c0_154 = arith.constant 0 : index
    %129 = vector.load %arg8[%c0_153, %c0_154] : memref<288x128xf32, #tpu.memory_space<vmem>>, vector<288x128xf32>
    %c18_155 = arith.constant 18 : index
    %c0_156 = arith.constant 0 : index
    %130 = vector.load %arg7[%c18_155, %c0_156] : memref<328x128xf32, #tpu.memory_space<vmem>>, vector<288x128xf32>
    %c1_157 = arith.constant 1 : index
    %c0_158 = arith.constant 0 : index
    %c0_159 = arith.constant 0 : index
    %c0_160 = arith.constant 0 : index
    %131 = vector.load %arg4[%c1_157, %c0_158, %c0_159, %c0_160] : memref<3x3x128x128xf32, #tpu.memory_space<vmem>>, vector<1x1x128x128xf32>
    %132 = vector.shape_cast %131 : vector<1x1x128x128xf32> to vector<128x128xf32>
    %cst_161 = arith.constant dense<0.000000e+00> : vector<288x128xf32>
    %133 = tpu.matmul %130, %132, %cst_161 {dimension_numbers = #tpu.dot_dimension_numbers<[1], [0], [0], [1], [0, 0, 1, 1], [], []>} : vector<288x128xf32>, vector<128x128xf32>, vector<288x128xf32> -> vector<288x128xf32>
    %134 = arith.addf %129, %133 : vector<288x128xf32>
    %c0_162 = arith.constant 0 : index
    %c0_163 = arith.constant 0 : index
    %135 = vector.load %arg8[%c0_162, %c0_163] : memref<288x128xf32, #tpu.memory_space<vmem>>, vector<288x128xf32>
    tpu.vector_store %arg8[%c0_162, %c0_163], %134 {strides = array<i32>} : memref<288x128xf32, #tpu.memory_space<vmem>>, vector<288x128xf32>,
    %c0_164 = arith.constant 0 : index
    %c0_165 = arith.constant 0 : index
    %136 = vector.load %arg8[%c0_164, %c0_165] : memref<288x128xf32, #tpu.memory_space<vmem>>, vector<288x128xf32>
    %c19_166 = arith.constant 19 : index
    %c0_167 = arith.constant 0 : index
    %137 = vector.load %arg7[%c19_166, %c0_167] : memref<328x128xf32, #tpu.memory_space<vmem>>, vector<288x128xf32>
    %c1_168 = arith.constant 1 : index
    %c1_169 = arith.constant 1 : index
    %c0_170 = arith.constant 0 : index
    %c0_171 = arith.constant 0 : index
    %138 = vector.load %arg4[%c1_168, %c1_169, %c0_170, %c0_171] : memref<3x3x128x128xf32, #tpu.memory_space<vmem>>, vector<1x1x128x128xf32>
    %139 = vector.shape_cast %138 : vector<1x1x128x128xf32> to vector<128x128xf32>
    %cst_172 = arith.constant dense<0.000000e+00> : vector<288x128xf32>
    %140 = tpu.matmul %137, %139, %cst_172 {dimension_numbers = #tpu.dot_dimension_numbers<[1], [0], [0], [1], [0, 0, 1, 1], [], []>} : vector<288x128xf32>, vector<128x128xf32>, vector<288x128xf32> -> vector<288x128xf32>
    %141 = arith.addf %136, %140 : vector<288x128xf32>
    %c0_173 = arith.constant 0 : index
    %c0_174 = arith.constant 0 : index
    %142 = vector.load %arg8[%c0_173, %c0_174] : memref<288x128xf32, #tpu.memory_space<vmem>>, vector<288x128xf32>
    tpu.vector_store %arg8[%c0_173, %c0_174], %141 {strides = array<i32>} : memref<288x128xf32, #tpu.memory_space<vmem>>, vector<288x128xf32>,
    %c0_175 = arith.constant 0 : index
    %c0_176 = arith.constant 0 : index
    %143 = vector.load %arg8[%c0_175, %c0_176] : memref<288x128xf32, #tpu.memory_space<vmem>>, vector<288x128xf32>
    %c20_177 = arith.constant 20 : index
    %c0_178 = arith.constant 0 : index
    %144 = vector.load %arg7[%c20_177, %c0_178] : memref<328x128xf32, #tpu.memory_space<vmem>>, vector<288x128xf32>
    %c1_179 = arith.constant 1 : index
    %c2_180 = arith.constant 2 : index
    %c0_181 = arith.constant 0 : index
    %c0_182 = arith.constant 0 : index
    %145 = vector.load %arg4[%c1_179, %c2_180, %c0_181, %c0_182] : memref<3x3x128x128xf32, #tpu.memory_space<vmem>>, vector<1x1x128x128xf32>
    %146 = vector.shape_cast %145 : vector<1x1x128x128xf32> to vector<128x128xf32>
    %cst_183 = arith.constant dense<0.000000e+00> : vector<288x128xf32>
    %147 = tpu.matmul %144, %146, %cst_183 {dimension_numbers = #tpu.dot_dimension_numbers<[1], [0], [0], [1], [0, 0, 1, 1], [], []>} : vector<288x128xf32>, vector<128x128xf32>, vector<288x128xf32> -> vector<288x128xf32>
    %148 = arith.addf %143, %147 : vector<288x128xf32>
    %c0_184 = arith.constant 0 : index
    %c0_185 = arith.constant 0 : index
    %149 = vector.load %arg8[%c0_184, %c0_185] : memref<288x128xf32, #tpu.memory_space<vmem>>, vector<288x128xf32>
    tpu.vector_store %arg8[%c0_184, %c0_185], %148 {strides = array<i32>} : memref<288x128xf32, #tpu.memory_space<vmem>>, vector<288x128xf32>,
    %c0_186 = arith.constant 0 : index
    %c0_187 = arith.constant 0 : index
    %150 = vector.load %arg8[%c0_186, %c0_187] : memref<288x128xf32, #tpu.memory_space<vmem>>, vector<288x128xf32>
    %c36_188 = arith.constant 36 : index
    %c0_189 = arith.constant 0 : index
    %151 = vector.load %arg7[%c36_188, %c0_189] : memref<328x128xf32, #tpu.memory_space<vmem>>, vector<288x128xf32>
    %c2_190 = arith.constant 2 : index
    %c0_191 = arith.constant 0 : index
    %c0_192 = arith.constant 0 : index
    %c0_193 = arith.constant 0 : index
    %152 = vector.load %arg4[%c2_190, %c0_191, %c0_192, %c0_193] : memref<3x3x128x128xf32, #tpu.memory_space<vmem>>, vector<1x1x128x128xf32>
    %153 = vector.shape_cast %152 : vector<1x1x128x128xf32> to vector<128x128xf32>
    %cst_194 = arith.constant dense<0.000000e+00> : vector<288x128xf32>
    %154 = tpu.matmul %151, %153, %cst_194 {dimension_numbers = #tpu.dot_dimension_numbers<[1], [0], [0], [1], [0, 0, 1, 1], [], []>} : vector<288x128xf32>, vector<128x128xf32>, vector<288x128xf32> -> vector<288x128xf32>
    %155 = arith.addf %150, %154 : vector<288x128xf32>
    %c0_195 = arith.constant 0 : index
    %c0_196 = arith.constant 0 : index
    %156 = vector.load %arg8[%c0_195, %c0_196] : memref<288x128xf32, #tpu.memory_space<vmem>>, vector<288x128xf32>
    tpu.vector_store %arg8[%c0_195, %c0_196], %155 {strides = array<i32>} : memref<288x128xf32, #tpu.memory_space<vmem>>, vector<288x128xf32>,
    %c0_197 = arith.constant 0 : index
    %c0_198 = arith.constant 0 : index
    %157 = vector.load %arg8[%c0_197, %c0_198] : memref<288x128xf32, #tpu.memory_space<vmem>>, vector<288x128xf32>
    %c37_199 = arith.constant 37 : index
    %c0_200 = arith.constant 0 : index
    %158 = vector.load %arg7[%c37_199, %c0_200] : memref<328x128xf32, #tpu.memory_space<vmem>>, vector<288x128xf32>
    %c2_201 = arith.constant 2 : index
    %c1_202 = arith.constant 1 : index
    %c0_203 = arith.constant 0 : index
    %c0_204 = arith.constant 0 : index
    %159 = vector.load %arg4[%c2_201, %c1_202, %c0_203, %c0_204] : memref<3x3x128x128xf32, #tpu.memory_space<vmem>>, vector<1x1x128x128xf32>
    %160 = vector.shape_cast %159 : vector<1x1x128x128xf32> to vector<128x128xf32>
    %cst_205 = arith.constant dense<0.000000e+00> : vector<288x128xf32>
    %161 = tpu.matmul %158, %160, %cst_205 {dimension_numbers = #tpu.dot_dimension_numbers<[1], [0], [0], [1], [0, 0, 1, 1], [], []>} : vector<288x128xf32>, vector<128x128xf32>, vector<288x128xf32> -> vector<288x128xf32>
    %162 = arith.addf %157, %161 : vector<288x128xf32>
    %c0_206 = arith.constant 0 : index
    %c0_207 = arith.constant 0 : index
    %163 = vector.load %arg8[%c0_206, %c0_207] : memref<288x128xf32, #tpu.memory_space<vmem>>, vector<288x128xf32>
    tpu.vector_store %arg8[%c0_206, %c0_207], %162 {strides = array<i32>} : memref<288x128xf32, #tpu.memory_space<vmem>>, vector<288x128xf32>,
    %c0_208 = arith.constant 0 : index
    %c0_209 = arith.constant 0 : index
    %164 = vector.load %arg8[%c0_208, %c0_209] : memref<288x128xf32, #tpu.memory_space<vmem>>, vector<288x128xf32>
    %c38_210 = arith.constant 38 : index
    %c0_211 = arith.constant 0 : index
    %165 = vector.load %arg7[%c38_210, %c0_211] : memref<328x128xf32, #tpu.memory_space<vmem>>, vector<288x128xf32>
    %c2_212 = arith.constant 2 : index
    %c2_213 = arith.constant 2 : index
    %c0_214 = arith.constant 0 : index
    %c0_215 = arith.constant 0 : index
    %166 = vector.load %arg4[%c2_212, %c2_213, %c0_214, %c0_215] : memref<3x3x128x128xf32, #tpu.memory_space<vmem>>, vector<1x1x128x128xf32>
    %167 = vector.shape_cast %166 : vector<1x1x128x128xf32> to vector<128x128xf32>
    %cst_216 = arith.constant dense<0.000000e+00> : vector<288x128xf32>
    %168 = tpu.matmul %165, %167, %cst_216 {dimension_numbers = #tpu.dot_dimension_numbers<[1], [0], [0], [1], [0, 0, 1, 1], [], []>} : vector<288x128xf32>, vector<128x128xf32>, vector<288x128xf32> -> vector<288x128xf32>
    %169 = arith.addf %164, %168 : vector<288x128xf32>
    %c0_217 = arith.constant 0 : index
    %c0_218 = arith.constant 0 : index
    %170 = vector.load %arg8[%c0_217, %c0_218] : memref<288x128xf32, #tpu.memory_space<vmem>>, vector<288x128xf32>
    tpu.vector_store %arg8[%c0_217, %c0_218], %169 {strides = array<i32>} : memref<288x128xf32, #tpu.memory_space<vmem>>, vector<288x128xf32>,
    %c0_219 = arith.constant 0 : index
    %c19_220 = arith.constant 19 : index
    %c0_221 = arith.constant 0 : index
    %171 = vector.load %arg1[%c0_219, %c19_220, %c0_221] : memref<1x328x128xf32, #tpu.memory_space<vmem>>, vector<1x288x128xf32>
    %172 = vector.shape_cast %171 : vector<1x288x128xf32> to vector<288x128xf32>
    %c0_222 = arith.constant 0 : index
    %c0_223 = arith.constant 0 : index
    %173 = vector.load %arg8[%c0_222, %c0_223] : memref<288x128xf32, #tpu.memory_space<vmem>>, vector<288x128xf32>
    %c0_224 = arith.constant 0 : index
    %c0_225 = arith.constant 0 : index
    %174 = vector.load %arg5[%c0_224, %c0_225] : memref<1x128xf32, #tpu.memory_space<vmem>>, vector<1x128xf32>
    %175 = vector.broadcast %174 : vector<1x128xf32> to vector<288x128xf32>
    %176 = arith.addf %173, %175 : vector<288x128xf32>
    %177 = arith.addf %176, %172 : vector<288x128xf32>
    %cst_226 = arith.constant 0.000000e+00 : f32
    %178 = vector.broadcast %cst_226 : f32 to vector<288x128xf32>
    %179 = arith.maximumf %177, %178 : vector<288x128xf32>
    %c0_227 = arith.constant 0 : index
    %c0_228 = arith.constant 0 : index
    %c0_229 = arith.constant 0 : index
    %180 = vector.load %arg6[%c0_227, %c0_228, %c0_229] : memref<1x288x128xf32, #tpu.memory_space<vmem>>, vector<1x288x128xf32>
    %181 = vector.shape_cast %180 : vector<1x288x128xf32> to vector<288x128xf32>
    %182 = vector.shape_cast %179 : vector<288x128xf32> to vector<1x288x128xf32>
    tpu.vector_store %arg6[%c0_227, %c0_228, %c0_229], %182 {strides = array<i32>} : memref<1x288x128xf32, #tpu.memory_space<vmem>>, vector<1x288x128xf32>,
    return
  }
  func.func @transform_0(%arg0: i32) -> (i32, i32, i32) {
    %c0_i32 = arith.constant 0 : i32
    %c0_i32_0 = arith.constant 0 : i32
    %c0_i32_1 = arith.constant 0 : i32
    return %arg0, %c0_i32, %c0_i32_0 : i32, i32, i32
  }
  func.func @transform_1(%arg0: i32) -> (i32, i32, i32, i32) {
    %c0_i32 = arith.constant 0 : i32
    %c0_i32_0 = arith.constant 0 : i32
    %c0_i32_1 = arith.constant 0 : i32
    %c0_i32_2 = arith.constant 0 : i32
    %c0_i32_3 = arith.constant 0 : i32
    return %c0_i32, %c0_i32_0, %c0_i32_1, %c0_i32_2 : i32, i32, i32, i32
  }
  func.func @transform_2(%arg0: i32) -> (i32, i32) {
    %c0_i32 = arith.constant 0 : i32
    %c0_i32_0 = arith.constant 0 : i32
    %c0_i32_1 = arith.constant 0 : i32
    return %c0_i32, %c0_i32_0 : i32, i32
  }
  func.func @transform_3(%arg0: i32) -> (i32, i32, i32, i32) {
    %c0_i32 = arith.constant 0 : i32
    %c0_i32_0 = arith.constant 0 : i32
    %c0_i32_1 = arith.constant 0 : i32
    %c0_i32_2 = arith.constant 0 : i32
    %c0_i32_3 = arith.constant 0 : i32
    return %c0_i32, %c0_i32_0, %c0_i32_1, %c0_i32_2 : i32, i32, i32, i32
  }
  func.func @transform_4(%arg0: i32) -> (i32, i32) {
    %c0_i32 = arith.constant 0 : i32
    %c0_i32_0 = arith.constant 0 : i32
    %c0_i32_1 = arith.constant 0 : i32
    return %c0_i32, %c0_i32_0 : i32, i32
  }
  func.func @transform_5(%arg0: i32) -> (i32, i32, i32) {
    %c0_i32 = arith.constant 0 : i32
    %c0_i32_0 = arith.constant 0 : i32
    %c0_i32_1 = arith.constant 0 : i32
    return %arg0, %c0_i32, %c0_i32_0 : i32, i32, i32
  }
}

</mosaic_0001>

<bundles_post_ra>
// kernel: tpu_custom_call.1
= control target key start
LH: loop header
LB: loop body
LE: loop exit
PB: predicated region body
PF: predicated region fallthrough
CT: control target
= control target key end

     0   :  { %s10492_s0 = inlined_call_operand.hbm [shape: f32[2,328,128], index: 0, kind: input, shape index: {}]   ;;  %s10493_s1 = inlined_call_operand.hbm [shape: f32[3,3,128,128], index: 1, kind: input, shape index: {}]   ;;  %s10494_s2 = inlined_call_operand.vmem [shape: f32[1,128], index: 2, kind: input, shape index: {}]   ;;  %s10495_s3 = inlined_call_operand.hbm [shape: f32[3,3,128,128], index: 3, kind: input, shape index: {}]   ;;  %s10496_s4 = inlined_call_operand.vmem [shape: f32[1,128], index: 4, kind: input, shape index: {}]   ;;  %s10497_s5 = inlined_call_operand.hbm [shape: f32[2,288,128], index: 5, kind: output, shape index: {}]  }
   0x1   :  { %10502 = sst [smem:[#allocation27_spill]] %s10493_s1 }
   0x2   :  { %10 = vsyncpa [#allocation5], 0 }
   0x3   :  { %12 = vsyncpa [#allocation5 + $0x1], 0 }
   0x4   :  { %13 = vsyncpa [#allocation8], 0 }
   0x5   :  { %14 = vsyncpa [#allocation6], 0 }
   0x6   :  { %16 = vsyncpa [#allocation6 + $0x1], 0  ;;  %s7638_s18 = smov 0   ;;  %s7640_s19 = smov 0  }
   0x7   :  { %s7642_s20 = smov 0   ;;  %s7644_s21 = smov 0  }
   0x8 LB: > { %s7659_s22 = sadd.s32 4294967295, %s7598_s21   ;;  %s7311_s23 = sadd.s32 4294967294, %s7598_s21   ;;  %s7598_s21 = sphi %s7644_s21, %s10718_s21   ;;  %s7594_s20 = sphi %s7642_s20, %s10717_s20   ;;  %s7590_s19 = sphi %s7640_s19, %s10716_s19   ;;  %s7586_s18 = sphi %s7638_s18, %s10715_s18  }
   0x9   : > { %p42_p0 = scmp.ne.s32.totalorder %s7590_s19, %s7586_s18  ;;  %p43_p1 = scmp.eq.s32.totalorder %s7659_s22, 0 }
   0xa   : > { %p150_p2 = scmp.eq.s32.totalorder %s7659_s22, 1  ;;  %p156_p3 = scmp.eq.s32.totalorder %s7311_s23, 1 }
   0xb   : > { %p7668_p4 = por %p43_p1, %p42_p0  ;;  %p7312_p5 = scmp.ge.s32.totalorder %s7598_s21, 1 }
   0xc   : > { %p7673_p6 = por %p156_p3, %p42_p0  ;;  %p163_p7 = scmp.lt.s32.totalorder %s7598_s21, 3 }
   0xd   : > { %s10505_s1 = sld [smem:[#allocation27_spill]]  ;;  %s7600_s30 = smov [#allocation7]  }
   0xe   : > { %p7681_p8 = pnand %p7312_p5, %p163_p7  ;;  %s176_s6 = sshll.u32 %s7600_s30, 4  ;;  %s177_s6 = int_to_ptr.vmem [resolvable:$true] %s176_s6 }
   0xf   : > { %s191_s9 = sshll.u32 %s10495_s3, 4  ;;  %s10498_s10 = smov 128   ;;  %s192_s9 = int_to_ptr.hbm [resolvable:$true] %s191_s9 }
  0x10   : > { %p7372_p9 = pneg %p7681_p8  ;;  %s10499_s11 = smov 8  }
  0x11   : > { %s7603_s12 = smov [#allocation9]   ;;  %s7700_s14 = sadd.s32 1, %s7598_s21  }
  0x12   : > { %p7373_p10 = pnand %p7372_p9, %p43_p1  ;;  %s193_s13 = sshll.u32 %s7603_s12, 4  ;;  %s194_s13 = int_to_ptr.vmem [resolvable:$true] %s193_s13 }
  0x13   : > { %s174_s28 = sshll.u32 %s10505_s1, 4  ;;  %s29_s15 = sadd.s32 1, %s7594_s20  ;;  %s175_s28 = int_to_ptr.hbm [resolvable:$true] %s174_s28 }
  0x14   : > { %7375 = dma.hbm_to_vmem [thread:$0]  (!%p7373_p10), %s175_s28, 18432, %s177_s6, [#allocation8], %s10498_s10, %s10498_s10, %s10499_s11  }
  0x15   : > { %7378 = dma.hbm_to_vmem [thread:$0]  (!%p7373_p10), %s192_s9, 18432, %s194_s13, [#allocation8], %s10498_s10, %s10498_s10, %s10499_s11  }
  0x16   : > { %s26_s16 = ssub.s32 %s7598_s21, %s7700_s14  ;;  %p36_p12 = scmp.ne.s32.totalorder %s7594_s20, %s7590_s19 }
  0x17   : > { %p27_p13 = scmp.eq.s32.totalorder %s26_s16, 0  ;;  %p37_p0 = scmp.eq.s32.totalorder %s7598_s21, 0 }
  0x18   : > { %p7710_p3 = por %p150_p2, %p36_p12  ;;  %p7389_p5 = scmp.lt.s32.totalorder %s7598_s21, 2 }
  0x19   : > { %s7716_s23 = scalar_select %p27_p13, %s7594_s20, %s29_s15  }
  0x1a   : > { %p38_p7 = por %p37_p0, %p36_p12  ;;  %s210_s26 = sand.u32 1, %s7594_s20  }
  0x1b   : > { %s7355_s27 = smul.u32 328, %s210_s26  ;;  %s211_s15 = scalar_lea.sflag [#allocation5], %s210_s26 }
  0x1c   : > { %s7356_s28 = smul.u32 328, %s7598_s21  ;;  %p7720_p9 = pnand %p7389_p5, %p38_p7 }
  0x1d   : > { %s214_s9 = scalar_lea.vmem [#allocation4], %s7355_s27  ;;  %s7505_s6 = scalar_lea.hbm %s10492_s0, 656 }
  0x1e   : > { %s219_s8 = scalar_lea.hbm %s10492_s0, %s7356_s28  ;;  %s222_s12 = sshll.u32 %s214_s9, 4  ;;  %s223_s12 = int_to_ptr.vmem [resolvable:$true] %s222_s12 }
  0x1f   : > { %s220_s13 = sshll.u32 %s219_s8, 4  ;;  %p7502_p10 = pneg %p7720_p9  ;;  %s221_s13 = int_to_ptr.hbm [resolvable:$true] %s220_s13 }
  0x20   : > { %s7498_s16 = sshra.s32 %s221_s13, 4  ;;  %s7499_s16 = int_to_ptr.hbm [resolvable:$true] %s7498_s16 }
  0x21   : > { %s7500_s10 = scalar_lea.hbm %s7499_s16, 328  ;;  %p7506_p0 = scmp.lt.s32.totalorder %s7499_s16, %s10492_s0 }
  0x22   : > { %p7501_p2 = scmp.ne.s32.totalorder %s7499_s16, %s7500_s10  ;;  %p7507_p5 = scmp.lt.s32.totalorder %s7505_s6, %s7500_s10 }
  0x24   : > { %p7503_p12 = pnand %p7502_p10, %p7501_p2  ;;  %p7508_p7 = por %p7507_p5, %p7506_p0 }
  0x26   : > { %p7504_p13 = pneg %p7503_p12 }
  0x28   : > { %p7509_p11 = pnand %p7508_p7, %p7504_p13 }
  0x2a   : > { %7512 = shalt.err (!%p7509_p11)
}
  0x2b   : > { %s10509_s26 = smov 8   ;;  %s10510_s27 = smov 128  }
  0x2c   : > { %7382 = dma.hbm_to_vmem [thread:$0]  (!%p7720_p9), %s221_s13, 5248, %s223_s12, %s211_s15, %s10510_s27, %s10510_s27, %s10509_s26  }
  0x2d   : > { %234 = sbr.rel (%p7681_p8) target bundleno = 1651 (0x673), region = 40 }
  0x32   : > { %s7743_s1 = sand.u32 1, %s7590_s19  }
  0x33   : > { %s7357_s11 = smul.u32 328, %s7743_s1  ;;  %s237_s10 = scalar_lea.sflag [#allocation5], %s7743_s1 }
  0x35   : > { %s7747_s8 = scalar_lea.vmem [#allocation4], %s7357_s11 }
  0x36   : > { %7573 = dma.done.wait (%p7668_p4), %s237_s10, 5248  }
  0x37   : > { %7575 = vsyncadd (%p7668_p4), %s237_s10, 4294962048 }
  0x38   : > { %7577 = dma.done.wait (%p43_p1), [#allocation8], 36864  }
  0x39   : > { %7579 = vsyncadd (%p43_p1), [#allocation8], 4294930432  ;;  %v1704_v0 = vld [vmem:[#allocation7 + $0x78] sm:$0xff]  ;;  %v1703_v2 = vld [vmem:[#allocation7 + $0x70] sm:$0xff]  ;;  %s7358_s28 = smul.u32 288, %s7743_s1 }
  0x3a   : > { %v1990_v1 = vld [vmem:[#allocation7 + $0xf8] sm:$0xff]  ;;  %1705 = vmatpush.msra.mxu0 %v1704_v0  ;;  %7323 = vmatpush.msra.mxu2 %v1704_v0  ;;  %v1989_v3 = vld [vmem:[#allocation7 + $0xf0] sm:$0xff]  ;;  %v1702_v4 = vld [vmem:[#allocation7 + $0x68] sm:$0xff]  ;;  %s7359_s27 = smul.u32 288, %s7659_s22  ;;  %s7204_s22 = scalar_lea.sflag [#allocation6], %s7743_s1 }
  0x3b   : > { %7339 = vmatpush.msra.mxu3 %v1990_v1  ;;  %1991 = vmatpush.msra.mxu1 %v1990_v1  ;;  %v1988_v5 = vld [vmem:[#allocation7 + $0xe8] sm:$0xff]  ;;  %v1701_v6 = vld [vmem:[#allocation7 + $0x60] sm:$0xff]  ;;  %v1700_v8 = vld [vmem:[#allocation7 + $0x58] sm:$0xff]  ;;  %s10216_s26 = scalar_lea.vmem [#allocation10], %s7358_s28 }
  0x3c   : > { %1706 = vmatpush.msra.mxu0 %v1703_v2  ;;  %7324 = vmatpush.msra.mxu2 %v1703_v2  ;;  %v1987_v7 = vld [vmem:[#allocation7 + $0xe0] sm:$0xff]  ;;  %v1986_v9 = vld [vmem:[#allocation7 + $0xd8] sm:$0xff]  ;;  %v1699_v10 = vld [vmem:[#allocation7 + $0x50] sm:$0xff]  ;;  %s7215_s24 = scalar_lea.hbm %s10497_s5, %s7359_s27  ;;  %s7216_s29 = sshll.u32 %s10216_s26, 4  ;;  %s7217_s29 = int_to_ptr.vmem [resolvable:$true] %s7216_s29 }
  0x3d   : > { %7340 = vmatpush.msra.mxu3 %v1989_v3  ;;  %1992 = vmatpush.msra.mxu1 %v1989_v3  ;;  %v1985_v11 = vld [vmem:[#allocation7 + $0xd0] sm:$0xff]  ;;  %v1698_v12 = vld [vmem:[#allocation7 + $0x48] sm:$0xff]  ;;  %v1697_v14 = vld [vmem:[#allocation7 + $0x40] sm:$0xff]  ;;  %s7218_s30 = sshll.u32 %s7215_s24, 4  ;;  %s7219_s30 = int_to_ptr.hbm [resolvable:$true] %s7218_s30 }
  0x3e   : > { %1707 = vmatpush.msra.mxu0 %v1702_v4  ;;  %7325 = vmatpush.msra.mxu2 %v1702_v4  ;;  %v1984_v13 = vld [vmem:[#allocation7 + $0xc8] sm:$0xff]  ;;  %v1983_v15 = vld [vmem:[#allocation7 + $0xc0] sm:$0xff]  ;;  %v1696_v16 = vld [vmem:[#allocation7 + $0x38] sm:$0xff]  ;;  %s7542_s9 = sshra.s32 %s7219_s30, 4  ;;  %s7543_s9 = int_to_ptr.hbm [resolvable:$true] %s7542_s9 }
  0x3f   : > { %7341 = vmatpush.msra.mxu3 %v1988_v5  ;;  %1993 = vmatpush.msra.mxu1 %v1988_v5  ;;  %v1982_v17 = vld [vmem:[#allocation7 + $0xb8] sm:$0xff]  ;;  %v1695_v18 = vld [vmem:[#allocation7 + $0x30] sm:$0xff]  ;;  %v1694_v20 = vld [vmem:[#allocation7 + $0x28] sm:$0xff]  ;;  %s7544_s12 = scalar_lea.hbm %s7543_s9, 288  ;;  %p7549_p11 = scmp.lt.s32.totalorder %s7543_s9, %s10497_s5 }
  0x40   : > { %1708 = vmatpush.msra.mxu0 %v1701_v6  ;;  %7326 = vmatpush.msra.mxu2 %v1701_v6  ;;  %v1981_v19 = vld [vmem:[#allocation7 + $0xb0] sm:$0xff]  ;;  %v1980_v21 = vld [vmem:[#allocation7 + $0xa8] sm:$0xff]  ;;  %v1693_v22 = vld [vmem:[#allocation7 + $0x20] sm:$0xff]  ;;  %p7545_p1 = scmp.ne.s32.totalorder %s7543_s9, %s7544_s12 }
  0x41   : > { %7342 = vmatpush.msra.mxu3 %v1987_v7  ;;  %1994 = vmatpush.msra.mxu1 %v1987_v7  ;;  %v1979_v23 = vld [vmem:[#allocation7 + $0xa0] sm:$0xff]  ;;  %v1692_v24 = vld [vmem:[#allocation7 + $0x18] sm:$0xff]  ;;  %v1691_v26 = vld [vmem:[#allocation7 + $0x10] sm:$0xff] }
  0x42   : > { %1709 = vmatpush.msra.mxu0 %v1700_v8  ;;  %7327 = vmatpush.msra.mxu2 %v1700_v8  ;;  %v1978_v25 = vld [vmem:[#allocation7 + $0x98] sm:$0xff]  ;;  %v1977_v27 = vld [vmem:[#allocation7 + $0x90] sm:$0xff]  ;;  %v1690_v28 = vld [vmem:[#allocation7 + $0x8] sm:$0xff]  ;;  %p7546_p4 = pnand %p7545_p1, %p7710_p3 }
  0x43   : > { %7343 = vmatpush.msra.mxu3 %v1986_v9  ;;  %1995 = vmatpush.msra.mxu1 %v1986_v9  ;;  %v1976_v29 = vld [vmem:[#allocation7 + $0x88] sm:$0xff]  ;;  %v1689_v30 = vld [vmem:[#allocation7] sm:$0xff]  ;;  %v1653_v32 = vld [vmem:[%s7747_s8] sm:$0xff] }
  0x44   : > { %1710 = vmatpush.msra.mxu0 %v1699_v10  ;;  %7328 = vmatpush.msra.mxu2 %v1699_v10  ;;  %v1975_v31 = vld [vmem:[#allocation7 + $0x80] sm:$0xff]  ;;  %v2276_v35 = vld [vmem:[#allocation7 + $0x178] sm:$0xff]  ;;  %v2275_v38 = vld [vmem:[#allocation7 + $0x170] sm:$0xff]  ;;  %p7547_p8 = pneg %p7546_p4 }
  0x45   : > { %7344 = vmatpush.msra.mxu3 %v1985_v11  ;;  %1996 = vmatpush.msra.mxu1 %v1985_v11  ;;  %v1671_v33 = vld [vmem:[%s7747_s8 + $0x90] sm:$0xff]  ;;  %v2562_v36 = vld [vmem:[#allocation7 + $0x1f8] sm:$0xff]  ;;  %v2561_v40 = vld [vmem:[#allocation7 + $0x1f0] sm:$0xff] }
  0x46   : > { %1711 = vmatpush.msra.mxu0 %v1698_v12  ;;  %7329 = vmatpush.msra.mxu2 %v1698_v12  ;;  %v1956_v34 = vld [vmem:[%s7747_s8 + $0x91] sm:$0xff]  ;;  %v2848_v37 = vld [vmem:[#allocation7 + $0x278] sm:$0xff] }
  0x47   : > { %7345 = vmatpush.msra.mxu3 %v1984_v13  ;;  %1997 = vmatpush.msra.mxu1 %v1984_v13  ;;  %v1938_v39 = vld [vmem:[%s7747_s8 + $0x1] sm:$0xff]  ;;  %v2274_v42 = vld [vmem:[#allocation7 + $0x168] sm:$0xff] }
  0x48   : > { %1712 = vmatpush.msra.mxu0 %v1697_v14  ;;  %7330 = vmatpush.msra.mxu2 %v1697_v14  ;;  %v2847_v41 = vld [vmem:[#allocation7 + $0x270] sm:$0xff]  ;;  %v2560_v43 = vld [vmem:[#allocation7 + $0x1e8] sm:$0xff]  ;;  %v1654_v45 = vld [vmem:[%s7747_s8 + $0x8] sm:$0xff] }
  0x49   : > { %7346 = vmatpush.msra.mxu3 %v1983_v15  ;;  %1998 = vmatpush.msra.mxu1 %v1983_v15  ;;  %v2846_v44 = vld [vmem:[#allocation7 + $0x268] sm:$0xff]  ;;  %v2273_v46 = vld [vmem:[#allocation7 + $0x160] sm:$0xff]  ;;  %v2272_v50 = vld [vmem:[#allocation7 + $0x158] sm:$0xff] }
  0x4a   : > { %1713 = vmatpush.msra.mxu0 %v1696_v16  ;;  %7331 = vmatpush.msra.mxu2 %v1696_v16  ;;  %v1672_v47 = vld [vmem:[%s7747_s8 + $0x98] sm:$0xff]  ;;  %v2559_v49 = vld [vmem:[#allocation7 + $0x1e0] sm:$0xff]  ;;  %v2558_v53 = vld [vmem:[#allocation7 + $0x1d8] sm:$0xff] }
  0x4b   : > { %7347 = vmatpush.msra.mxu3 %v1982_v17  ;;  %1999 = vmatpush.msra.mxu1 %v1982_v17  ;;  %v1957_v48 = vld [vmem:[%s7747_s8 + $0x99] sm:$0xff]  ;;  %v2845_v51 = vld [vmem:[#allocation7 + $0x260] sm:$0xff] }
  0x4c   : > { %1714 = vmatpush.msra.mxu0 %v1695_v18  ;;  %7332 = vmatpush.msra.mxu2 %v1695_v18  ;;  %v1939_v52 = vld [vmem:[%s7747_s8 + $0x9] sm:$0xff]  ;;  %v2271_v54 = vld [vmem:[#allocation7 + $0x150] sm:$0xff] }
  0x4d   : > { %7348 = vmatpush.msra.mxu3 %v1981_v19  ;;  %2000 = vmatpush.msra.mxu1 %v1981_v19  ;;  %v2844_v55 = vld [vmem:[#allocation7 + $0x258] sm:$0xff]  ;;  %v2557_v56 = vld [vmem:[#allocation7 + $0x1d0] sm:$0xff]  ;;  %v1655_v57 = vld [vmem:[%s7747_s8 + $0x10] sm:$0xff] }
  0x4e   : > { %1715 = vmatpush.msra.mxu0 %v1694_v20  ;;  %7333 = vmatpush.msra.mxu2 %v1694_v20  ;;  %v1673_v58 = vld [vmem:[%s7747_s8 + $0xa0] sm:$0xff]  ;;  %v1940_v60 = vld [vmem:[%s7747_s8 + $0x11] sm:$0xff]  ;;  %v1674_v0 = vld [vmem:[%s7747_s8 + $0xa8] sm:$0xff] }
  0x4f   : > { %7349 = vmatpush.msra.mxu3 %v1980_v21  ;;  %2001 = vmatpush.msra.mxu1 %v1980_v21  ;;  %v1958_v59 = vld [vmem:[%s7747_s8 + $0xa1] sm:$0xff]  ;;  %v2270_v61 = vld [vmem:[#allocation7 + $0x148] sm:$0xff] }
  0x50   : > { %1716 = vmatpush.msra.mxu0 %v1693_v22  ;;  %7334 = vmatpush.msra.mxu2 %v1693_v22  ;;  %v2843_v62 = vld [vmem:[#allocation7 + $0x250] sm:$0xff]  ;;  %v1959_v1 = vld [vmem:[%s7747_s8 + $0xa9] sm:$0xff] }
  0x51   : > { %7350 = vmatpush.msra.mxu3 %v1979_v23  ;;  %2002 = vmatpush.msra.mxu1 %v1979_v23  ;;  %v1656_v63 = vld [vmem:[%s7747_s8 + $0x18] sm:$0xff]  ;;  %v2269_v4 = vld [vmem:[#allocation7 + $0x140] sm:$0xff]  ;;  %v1657_v5 = vld [vmem:[%s7747_s8 + $0x20] sm:$0xff] }
  0x52   : > { %1717 = vmatpush.msra.mxu0 %v1692_v24  ;;  %7335 = vmatpush.msra.mxu2 %v1692_v24  ;;  %v1941_v2 = vld [vmem:[%s7747_s8 + $0x19] sm:$0xff]  ;;  %v1675_v6 = vld [vmem:[%s7747_s8 + $0xb0] sm:$0xff]  ;;  %v1942_v8 = vld [vmem:[%s7747_s8 + $0x21] sm:$0xff] }
  0x53   : > { %7351 = vmatpush.msra.mxu3 %v1978_v25  ;;  %2003 = vmatpush.msra.mxu1 %v1978_v25  ;;  %v2556_v3 = vld [vmem:[#allocation7 + $0x1c8] sm:$0xff]  ;;  %v2555_v10 = vld [vmem:[#allocation7 + $0x1c0] sm:$0xff]  ;;  %v2268_v15 = vld [vmem:[#allocation7 + $0x138] sm:$0xff] }
  0x54   : > { %1718 = vmatpush.msra.mxu0 %v1691_v26  ;;  %7336 = vmatpush.msra.mxu2 %v1691_v26  ;;  %v1960_v7 = vld [vmem:[%s7747_s8 + $0xb1] sm:$0xff]  ;;  %v1658_v11 = vld [vmem:[%s7747_s8 + $0x28] sm:$0xff]  ;;  %v1961_v13 = vld [vmem:[%s7747_s8 + $0xb9] sm:$0xff] }
  0x55   : > { %7352 = vmatpush.msra.mxu3 %v1977_v27  ;;  %2004 = vmatpush.msra.mxu1 %v1977_v27  ;;  %v2842_v9 = vld [vmem:[#allocation7 + $0x248] sm:$0xff]  ;;  %v2841_v16 = vld [vmem:[#allocation7 + $0x240] sm:$0xff]  ;;  %v2554_v17 = vld [vmem:[#allocation7 + $0x1b8] sm:$0xff] }
  0x56   : > { %1719 = vmatpush.msra.mxu0 %v1690_v28  ;;  %7337 = vmatpush.msra.mxu2 %v1690_v28  ;;  %v1676_v12 = vld [vmem:[%s7747_s8 + $0xb8] sm:$0xff]  ;;  %v1943_v14 = vld [vmem:[%s7747_s8 + $0x29] sm:$0xff]  ;;  %v1677_v19 = vld [vmem:[%s7747_s8 + $0xc0] sm:$0xff] }
  0x57   : > { %7353 = vmatpush.msra.mxu3 %v1976_v29  ;;  %2005 = vmatpush.msra.mxu1 %v1976_v29  ;;  %v1659_v18 = vld [vmem:[%s7747_s8 + $0x30] sm:$0xff]  ;;  %v1962_v20 = vld [vmem:[%s7747_s8 + $0xc1] sm:$0xff]  ;;  %v1660_v25 = vld [vmem:[%s7747_s8 + $0x38] sm:$0xff] }
  0x58   : > { %1720 = vmatpush.msra.mxu0 %v1689_v30  ;;  %7338 = vmatpush.msra.mxu2 %v1689_v30  ;;  %v1944_v21 = vld [vmem:[%s7747_s8 + $0x31] sm:$0xff]  ;;  %v2840_v23 = vld [vmem:[#allocation7 + $0x238] sm:$0xff] }
  0x59   : > { %7354 = vmatpush.msra.mxu3 %v1975_v31  ;;  %1721 = vmatmul.f32.vlgmr.msra.gmra.mxu0 %v1653_v32  ;;  %v2267_v22 = vld [vmem:[#allocation7 + $0x130] sm:$0xff]  ;;  %v1678_v26 = vld [vmem:[%s7747_s8 + $0xc8] sm:$0xff]  ;;  %v2266_v29 = vld [vmem:[#allocation7 + $0x128] sm:$0xff] }
  0x5a   : > { %1775 = vmatmul.f32.vlgmr.msra.gmra.mxu2 %v1671_v33  ;;  %2061 = vmatmul.f32.vlgmr.msra.gmra.mxu3 %v1956_v34  ;;  %v2553_v24 = vld [vmem:[#allocation7 + $0x1b0] sm:$0xff]  ;;  %v1963_v27 = vld [vmem:[%s7747_s8 + $0xc9] sm:$0xff] }
  0x5b   : > { %2277 = vmatpush.msrb.mxu2 %v2276_v35  ;;  %2563 = vmatpush.msrb.mxu3 %v2562_v36  ;;  %v1945_v28 = vld [vmem:[%s7747_s8 + $0x39] sm:$0xff]  ;;  %v1679_v33 = vld [vmem:[%s7747_s8 + $0xd0] sm:$0xff]  ;;  %v1946_v35 = vld [vmem:[%s7747_s8 + $0x41] sm:$0xff] }
  0x5c   : > { %2006 = vmatpush.msra.mxu1 %v1975_v31  ;;  %2849 = vmatpush.msrb.mxu0 %v2848_v37  ;;  %v2839_v30 = vld [vmem:[#allocation7 + $0x230] sm:$0xff]  ;;  %v2552_v31 = vld [vmem:[#allocation7 + $0x1a8] sm:$0xff]  ;;  %v2265_v36 = vld [vmem:[#allocation7 + $0x120] sm:$0xff] }
  0x5d   : > { %2278 = vmatpush.msrb.mxu2 %v2275_v38  ;;  %2007 = vmatmul.f32.vlgmr.msra.gmra.mxu1 %v1938_v39  ;;  %v1661_v32 = vld [vmem:[%s7747_s8 + $0x40] sm:$0xff]  ;;  %v1964_v34 = vld [vmem:[%s7747_s8 + $0xd1] sm:$0xff]  ;;  %v1662_v39 = vld [vmem:[%s7747_s8 + $0x48] sm:$0xff] }
  0x5e   : > { %2564 = vmatpush.msrb.mxu3 %v2561_v40  ;;  %2850 = vmatpush.msrb.mxu0 %v2847_v41  ;;  %v2838_v37 = vld [vmem:[#allocation7 + $0x228] sm:$0xff]  ;;  %v2551_v38 = vld [vmem:[#allocation7 + $0x1a0] sm:$0xff] }
  0x5f   : > { %2279 = vmatpush.msrb.mxu2 %v2274_v42  ;;  %v1680_v40 = vld [vmem:[%s7747_s8 + $0xd8] sm:$0xff]  ;;  %v1947_v42 = vld [vmem:[%s7747_s8 + $0x49] sm:$0xff] }
  0x60   : > { %2565 = vmatpush.msrb.mxu3 %v2560_v43  ;;  %2851 = vmatpush.msrb.mxu0 %v2846_v44  ;;  %v1965_v41 = vld [vmem:[%s7747_s8 + $0xd9] sm:$0xff]  ;;  %v2837_v44 = vld [vmem:[#allocation7 + $0x220] sm:$0xff] }
  0x61   : > { %1724 = vmatmul.f32.gmra.mxu0 %v1654_v45  ;;  %2280 = vmatpush.msrb.mxu2 %v2273_v46  ;;  %v2264_v43 = vld [vmem:[#allocation7 + $0x118] sm:$0xff]  ;;  %v1663_v46 = vld [vmem:[%s7747_s8 + $0x50] sm:$0xff] }
  0x62   : > { %1778 = vmatmul.f32.gmra.mxu2 %v1672_v47  ;;  %2064 = vmatmul.f32.gmra.mxu3 %v1957_v48  ;;  %v2550_v45 = vld [vmem:[#allocation7 + $0x198] sm:$0xff] }
  0x63   : > { %2566 = vmatpush.msrb.mxu3 %v2559_v49  ;;  %2281 = vmatpush.msrb.mxu2 %v2272_v50  ;;  %v1681_v47 = vld [vmem:[%s7747_s8 + $0xe0] sm:$0xff]  ;;  %v1948_v49 = vld [vmem:[%s7747_s8 + $0x51] sm:$0xff] }
  0x64   : > { %2852 = vmatpush.msrb.mxu0 %v2845_v51  ;;  %v1966_v48 = vld [vmem:[%s7747_s8 + $0xe1] sm:$0xff] }
  0x65   : > { %2010 = vmatmul.f32.gmra.mxu1 %v1939_v52  ;;  %2567 = vmatpush.msrb.mxu3 %v2558_v53  ;;  %v2263_v50 = vld [vmem:[#allocation7 + $0x110] sm:$0xff]  ;;  %v2836_v51 = vld [vmem:[#allocation7 + $0x218] sm:$0xff] }
  0x66   : > { %2282 = vmatpush.msrb.mxu2 %v2271_v54  ;;  %2853 = vmatpush.msrb.mxu0 %v2844_v55  ;;  %v2549_v52 = vld [vmem:[#allocation7 + $0x190] sm:$0xff]  ;;  %v1682_v54 = vld [vmem:[%s7747_s8 + $0xe8] sm:$0xff] }
  0x67   : > { %2568 = vmatpush.msrb.mxu3 %v2557_v56  ;;  %v1664_v53 = vld [vmem:[%s7747_s8 + $0x58] sm:$0xff]  ;;  %v1967_v55 = vld [vmem:[%s7747_s8 + $0xe9] sm:$0xff] }
  0x68   : > { %2283 = vmatpush.msrb.mxu2 %v2270_v61  ;;  %2854 = vmatpush.msrb.mxu0 %v2843_v62  ;;  %v1949_v56 = vld [vmem:[%s7747_s8 + $0x59] sm:$0xff]  ;;  %v1683_v61 = vld [vmem:[%s7747_s8 + $0xf0] sm:$0xff] }
  0x69   : > { %1727 = vmatmul.f32.gmra.mxu0 %v1655_v57  ;;  %2569 = vmatpush.msrb.mxu3 %v2556_v3  ;;  %v1665_v57 = vld [vmem:[%s7747_s8 + $0x60] sm:$0xff]  ;;  %v1968_v62 = vld [vmem:[%s7747_s8 + $0xf1] sm:$0xff] }
  0x6a   : > { %1781 = vmatmul.f32.gmra.mxu2 %v1673_v58  ;;  %2067 = vmatmul.f32.gmra.mxu3 %v1958_v59  ;;  %v3134_v58 = vld [vmem:[#allocation7 + $0x2f8] sm:$0xff]  ;;  %v2262_v59 = vld [vmem:[#allocation7 + $0x108] sm:$0xff]  ;;  %v3131_v3 = vld [vmem:[#allocation7 + $0x2e0] sm:$0xff] }
  0x6b   : > { %2284 = vmatpush.msrb.mxu2 %v2269_v4  ;;  %2855 = vmatpush.msrb.mxu0 %v2842_v9  ;;  %v1666_v4 = vld [vmem:[%s7747_s8 + $0x68] sm:$0xff]  ;;  %v3129_v9 = vld [vmem:[#allocation7 + $0x2d0] sm:$0xff] }
  0x6c   : > { %2570 = vmatpush.msrb.mxu3 %v2555_v10  ;;  %3135 = vmatpush.msrb.mxu1 %v3134_v58  ;;  %v1951_v10 = vld [vmem:[%s7747_s8 + $0x69] sm:$0xff] }
  0x6d   : > { %2013 = vmatmul.f32.gmra.mxu1 %v1940_v60  ;;  %2285 = vmatpush.msrb.mxu2 %v2268_v15  ;;  %v2835_v60 = vld [vmem:[#allocation7 + $0x210] sm:$0xff]  ;;  %v1667_v15 = vld [vmem:[%s7747_s8 + $0x70] sm:$0xff] }
  0x6e   : > { %2856 = vmatpush.msrb.mxu0 %v2841_v16  ;;  %2571 = vmatpush.msrb.mxu3 %v2554_v17  ;;  %v2833_v16 = vld [vmem:[#allocation7 + $0x200] sm:$0xff]  ;;  %v1685_v17 = vld [vmem:[%s7747_s8 + $0x100] sm:$0xff] }
  0x6f   : > { %2286 = vmatpush.msrb.mxu2 %v2267_v22  ;;  %v3125_v22 = vld [vmem:[#allocation7 + $0x2b0] sm:$0xff] }
  0x70   : > { %2857 = vmatpush.msrb.mxu0 %v2840_v23  ;;  %2572 = vmatpush.msrb.mxu3 %v2553_v24  ;;  %v3706_v23 = vld [vmem:[#allocation7 + $0x3f8] sm:$0xff]  ;;  %v3124_v24 = vld [vmem:[#allocation7 + $0x2a8] sm:$0xff] }
  0x71   : > { %1730 = vmatmul.f32.gmra.mxu0 %v1656_v63  ;;  %2287 = vmatpush.msrb.mxu2 %v2266_v29  ;;  %v3133_v63 = vld [vmem:[#allocation7 + $0x2f0] sm:$0xff] }
  0x72   : > { %1784 = vmatmul.f32.gmra.mxu2 %v1674_v0  ;;  %2070 = vmatmul.f32.gmra.mxu3 %v1959_v1  ;;  %v1950_v0 = vld [vmem:[%s7747_s8 + $0x61] sm:$0xff]  ;;  %v2548_v1 = vld [vmem:[#allocation7 + $0x188] sm:$0xff] }
  0x73   : > { %2858 = vmatpush.msrb.mxu0 %v2839_v30  ;;  %2573 = vmatpush.msrb.mxu3 %v2552_v31  ;;  %v1953_v29 = vld [vmem:[%s7747_s8 + $0x79] sm:$0xff]  ;;  %v2224_v58 = vld [vmem:[%s7747_s8 + $0x2] sm:$0xff] }
  0x74   : > { %2288 = vmatpush.msrb.mxu2 %v2265_v36  ;;  %3136 = vmatpush.msrb.mxu1 %v3133_v63  ;;  %v3992_v30 = vld [vmem:[#allocation7 + $0x478] sm:$0xff]  ;;  %v1972_v36 = vld [vmem:[%s7747_s8 + $0x111] sm:$0xff] }
  0x75   : > { %2016 = vmatmul.f32.gmra.mxu1 %v1941_v2  ;;  %2859 = vmatpush.msrb.mxu0 %v2838_v37  ;;  %v3132_v2 = vld [vmem:[#allocation7 + $0x2e8] sm:$0xff]  ;;  %v3122_v31 = vld [vmem:[#allocation7 + $0x298] sm:$0xff] }
  0x76   : > { %2574 = vmatpush.msrb.mxu3 %v2551_v38  ;;  %2289 = vmatpush.msrb.mxu2 %v2264_v43  ;;  %v3120_v37 = vld [vmem:[#allocation7 + $0x288] sm:$0xff] }
  0x77   : > { %2860 = vmatpush.msrb.mxu0 %v2837_v44  ;;  %3137 = vmatpush.msrb.mxu1 %v3132_v2  ;;  %v2797_v2 = vld [vmem:[%s7747_s8 + $0x1b] sm:$0xff] }
  0x78   : > { %2575 = vmatpush.msrb.mxu3 %v2550_v45  ;;  %2290 = vmatpush.msrb.mxu2 %v2263_v50 }
  0x79   : > { %1733 = vmatmul.f32.gmra.mxu0 %v1657_v5  ;;  %3138 = vmatpush.msrb.mxu1 %v3131_v3  ;;  %v3130_v5 = vld [vmem:[#allocation7 + $0x2d8] sm:$0xff]  ;;  %v3418_v3 = vld [vmem:[#allocation7 + $0x368] sm:$0xff] }
  0x7a   : > { %1787 = vmatmul.f32.gmra.mxu2 %v1675_v6  ;;  %2073 = vmatmul.f32.gmra.mxu3 %v1960_v7  ;;  %v2261_v6 = vld [vmem:[#allocation7 + $0x100] sm:$0xff]  ;;  %v1684_v7 = vld [vmem:[%s7747_s8 + $0xf8] sm:$0xff] }
  0x7b   : > { %2861 = vmatpush.msrb.mxu0 %v2836_v51  ;;  %2576 = vmatpush.msrb.mxu3 %v2549_v52  ;;  %v1955_v51 = vld [vmem:[%s7747_s8 + $0x89] sm:$0xff] }
  0x7c   : > { %2291 = vmatpush.msrb.mxu2 %v2262_v59  ;;  %3139 = vmatpush.msrb.mxu1 %v3130_v5  ;;  %v2510_v59 = vld [vmem:[%s7747_s8 + $0x12] sm:$0xff]  ;;  %v2225_v5 = vld [vmem:[%s7747_s8 + $0xa] sm:$0xff] }
  0x7d   : > { %2019 = vmatmul.f32.gmra.mxu1 %v1942_v8  ;;  %2862 = vmatpush.msrb.mxu0 %v2835_v60  ;;  %v1969_v8 = vld [vmem:[%s7747_s8 + $0xf9] sm:$0xff] }
  0x7e   : > { %2577 = vmatpush.msrb.mxu3 %v2548_v1  ;;  %2292 = vmatpush.msrb.mxu2 %v2261_v6  ;;  %v2511_v6 = vld [vmem:[%s7747_s8 + $0x1a] sm:$0xff] }
  0x7f   : > { %3140 = vmatpush.msrb.mxu1 %v3129_v9 }
  0x81   : > { %1736 = vmatmul.f32.gmra.mxu0 %v1658_v11  ;;  %v2834_v11 = vld [vmem:[#allocation7 + $0x208] sm:$0xff] }
  0x82   : > { %1790 = vmatmul.f32.gmra.mxu2 %v1676_v12  ;;  %2076 = vmatmul.f32.gmra.mxu3 %v1961_v13  ;;  %v2547_v12 = vld [vmem:[#allocation7 + $0x180] sm:$0xff]  ;;  %v3128_v13 = vld [vmem:[#allocation7 + $0x2c8] sm:$0xff] }
  0x83   : > { %2863 = vmatpush.msrb.mxu0 %v2834_v11  ;;  %2578 = vmatpush.msrb.mxu3 %v2547_v12 }
  0x84   : > { %3141 = vmatpush.msrb.mxu1 %v3128_v13  ;;  %v2798_v13 = vld [vmem:[%s7747_s8 + $0x23] sm:$0xff] }
  0x85   : > { %2022 = vmatmul.f32.gmra.mxu1 %v1943_v14  ;;  %v3127_v14 = vld [vmem:[#allocation7 + $0x2c0] sm:$0xff]  ;;  %2864 = vmatpush.msrb.mxu0 %v2833_v16 }
  0x86   : > { %3142 = vmatpush.msrb.mxu1 %v3127_v14  ;;  %3707 = vmatpush.msra.mxu3 %v3706_v23  ;;  %v3990_v14 = vld [vmem:[#allocation7 + $0x468] sm:$0xff]  ;;  %v3417_v23 = vld [vmem:[#allocation7 + $0x360] sm:$0xff] }
  0x87   : > { %3993 = vmatpush.msra.mxu0 %v3992_v30 }
  0x89   : > { %1739 = vmatmul.f32.gmra.mxu0 %v1659_v18  ;;  %v1970_v18 = vld [vmem:[%s7747_s8 + $0x101] sm:$0xff] }
  0x8a   : > { %1793 = vmatmul.f32.gmra.mxu2 %v1677_v19  ;;  %2079 = vmatmul.f32.gmra.mxu3 %v1962_v20  ;;  %v3126_v19 = vld [vmem:[#allocation7 + $0x2b8] sm:$0xff]  ;;  %v1952_v20 = vld [vmem:[%s7747_s8 + $0x71] sm:$0xff] }
  0x8b   : > { %3143 = vmatpush.msrb.mxu1 %v3126_v19 }
  0x8d   : > { %2025 = vmatmul.f32.gmra.mxu1 %v1944_v21  ;;  %v3420_v21 = vld [vmem:[#allocation7 + $0x378] sm:$0xff] }
  0x8e   : > { %3421 = vmatpush.msra.mxu2 %v3420_v21  ;;  %3144 = vmatpush.msrb.mxu1 %v3125_v22  ;;  %v2799_v22 = vld [vmem:[%s7747_s8 + $0x2b] sm:$0xff] }
  0x90   : > { %3145 = vmatpush.msrb.mxu1 %v3124_v24  ;;  %v2513_v24 = vld [vmem:[%s7747_s8 + $0x2a] sm:$0xff] }
  0x91   : > { %1742 = vmatmul.f32.gmra.mxu0 %v1660_v25  ;;  %v1668_v25 = vld [vmem:[%s7747_s8 + $0x78] sm:$0xff] }
  0x92   : > { %1796 = vmatmul.f32.gmra.mxu2 %v1678_v26  ;;  %2082 = vmatmul.f32.gmra.mxu3 %v1963_v27  ;;  %v1686_v26 = vld [vmem:[%s7747_s8 + $0x108] sm:$0xff] }
  0x93   : > { %v1971_v27 = vld [vmem:[%s7747_s8 + $0x109] sm:$0xff] }
  0x95   : > { %2028 = vmatmul.f32.gmra.mxu1 %v1945_v28  ;;  %v3123_v28 = vld [vmem:[#allocation7 + $0x2a0] sm:$0xff] }
  0x96   : > { %3146 = vmatpush.msrb.mxu1 %v3123_v28 }
  0x98   : > { %3147 = vmatpush.msrb.mxu1 %v3122_v31 }
  0x99   : > { %1745 = vmatmul.f32.gmra.mxu0 %v1661_v32  ;;  %v3121_v32 = vld [vmem:[#allocation7 + $0x290] sm:$0xff] }
  0x9a   : > { %1799 = vmatmul.f32.gmra.mxu2 %v1679_v33  ;;  %2085 = vmatmul.f32.gmra.mxu3 %v1964_v34  ;;  %v1669_v34 = vld [vmem:[%s7747_s8 + $0x80] sm:$0xff] }
  0x9b   : > { %3148 = vmatpush.msrb.mxu1 %v3121_v32  ;;  %v2800_v32 = vld [vmem:[%s7747_s8 + $0x33] sm:$0xff] }
  0x9d   : > { %2031 = vmatmul.f32.gmra.mxu1 %v1946_v35  ;;  %v1687_v35 = vld [vmem:[%s7747_s8 + $0x110] sm:$0xff] }
  0x9e   : > { %3149 = vmatpush.msrb.mxu1 %v3120_v37  ;;  %v3989_v37 = vld [vmem:[#allocation7 + $0x460] sm:$0xff] }
  0xa1   : > { %1748 = vmatmul.f32.gmra.mxu0 %v1662_v39  ;;  %v1954_v39 = vld [vmem:[%s7747_s8 + $0x81] sm:$0xff] }
  0xa2   : > { %1802 = vmatmul.f32.gmra.mxu2 %v1680_v40  ;;  %2088 = vmatmul.f32.gmra.mxu3 %v1965_v41  ;;  %v3419_v40 = vld [vmem:[#allocation7 + $0x370] sm:$0xff]  ;;  %v3119_v41 = vld [vmem:[#allocation7 + $0x280] sm:$0xff] }
  0xa3   : > { %3422 = vmatpush.msra.mxu2 %v3419_v40  ;;  %3150 = vmatpush.msrb.mxu1 %v3119_v41 }
  0xa5   : > { %2034 = vmatmul.f32.gmra.mxu1 %v1947_v42  ;;  %3423 = vmatpush.msra.mxu2 %v3418_v3 }
  0xa7   : > { %3424 = vmatpush.msra.mxu2 %v3417_v23  ;;  %v2518_v23 = vld [vmem:[%s7747_s8 + $0x52] sm:$0xff] }
  0xa9   : > { %1751 = vmatmul.f32.gmra.mxu0 %v1663_v46  ;;  %v1670_v46 = vld [vmem:[%s7747_s8 + $0x88] sm:$0xff] }
  0xaa   : > { %1805 = vmatmul.f32.gmra.mxu2 %v1681_v47  ;;  %2091 = vmatmul.f32.gmra.mxu3 %v1966_v48  ;;  %v3705_v47 = vld [vmem:[#allocation7 + $0x3f0] sm:$0xff] }
  0xab   : > { %v1688_v48 = vld [vmem:[%s7747_s8 + $0x118] sm:$0xff]  ;;  %3708 = vmatpush.msra.mxu3 %v3705_v47 }
  0xad   : > { %2037 = vmatmul.f32.gmra.mxu1 %v1948_v49  ;;  %v1973_v49 = vld [vmem:[%s7747_s8 + $0x119] sm:$0xff] }
  0xb1   : > { %1754 = vmatmul.f32.gmra.mxu0 %v1664_v53 }
  0xb2   : > { %1808 = vmatmul.f32.gmra.mxu2 %v1682_v54  ;;  %2094 = vmatmul.f32.gmra.mxu3 %v1967_v55 }
  0xb5   : > { %2040 = vmatmul.f32.gmra.mxu1 %v1949_v56  ;;  %v2796_v56 = vld [vmem:[%s7747_s8 + $0x13] sm:$0xff] }
  0xb9   : > { %1757 = vmatmul.f32.gmra.mxu0 %v1665_v57  ;;  %v3991_v57 = vld [vmem:[#allocation7 + $0x470] sm:$0xff] }
  0xba   : > { %1811 = vmatmul.f32.gmra.mxu2 %v1683_v61  ;;  %2097 = vmatmul.f32.gmra.mxu3 %v1968_v62  ;;  %v3082_v61 = vld [vmem:[%s7747_s8 + $0x14] sm:$0xff] }
  0xbb   : > { %3994 = vmatpush.msra.mxu0 %v3991_v57 }
  0xbd   : > { %2043 = vmatmul.f32.gmra.mxu1 %v1950_v0  ;;  %3995 = vmatpush.msra.mxu0 %v3990_v14 }
  0xbf   : > { %3996 = vmatpush.msra.mxu0 %v3989_v37  ;;  %v2519_v37 = vld [vmem:[%s7747_s8 + $0x5a] sm:$0xff] }
  0xc1   : > { %1760 = vmatmul.f32.gmra.mxu0 %v1666_v4  ;;  %v3704_v4 = vld [vmem:[#allocation7 + $0x3e8] sm:$0xff] }
  0xc2   : > { %1814 = vmatmul.f32.gmra.mxu2 %v1684_v7  ;;  %2100 = vmatmul.f32.gmra.mxu3 %v1969_v8  ;;  %v3083_v8 = vld [vmem:[%s7747_s8 + $0x1c] sm:$0xff] }
  0xc3   : > { %3709 = vmatpush.msra.mxu3 %v3704_v4 }
  0xc5   : > { %2046 = vmatmul.f32.gmra.mxu1 %v1951_v10 }
  0xc9   : > { %1763 = vmatmul.f32.gmra.mxu0 %v1667_v15  ;;  %v2512_v15 = vld [vmem:[%s7747_s8 + $0x22] sm:$0xff] }
  0xca   : > { %1817 = vmatmul.f32.gmra.mxu2 %v1685_v17  ;;  %2103 = vmatmul.f32.gmra.mxu3 %v1970_v18  ;;  %v3084_v17 = vld [vmem:[%s7747_s8 + $0x24] sm:$0xff] }
  0xcd   : > { %2049 = vmatmul.f32.gmra.mxu1 %v1952_v20 }
  0xd1   : > { %1766 = vmatmul.f32.gmra.mxu0 %v1668_v25 }
  0xd2   : > { %1820 = vmatmul.f32.gmra.mxu2 %v1686_v26  ;;  %2106 = vmatmul.f32.gmra.mxu3 %v1971_v27  ;;  %v3085_v26 = vld [vmem:[%s7747_s8 + $0x2c] sm:$0xff] }
  0xd3   : > { %v3703_v27 = vld [vmem:[#allocation7 + $0x3e0] sm:$0xff] }
  0xd4   : > { %3710 = vmatpush.msra.mxu3 %v3703_v27 }
  0xd5   : > { %2052 = vmatmul.f32.gmra.mxu1 %v1953_v29 }
  0xd6   : > { %v7821_v33 = vpop.f32.mrf.mxu0 }
  0xd9   : > { %1769 = vmatmul.f32.gmra.mxu0 %v1669_v34  ;;  %v2514_v34 = vld [vmem:[%s7747_s8 + $0x32] sm:$0xff] }
  0xda   : > { %1823 = vmatmul.f32.gmra.mxu2 %v1687_v35  ;;  %2109 = vmatmul.f32.gmra.mxu3 %v1972_v36  ;;  %v7826_v38 = vpop.f32.mrf.mxu1  ;;  %v3086_v36 = vld [vmem:[%s7747_s8 + $0x34] sm:$0xff] }
  0xdd   : > { %v1776_v42 = vpop.f32.mrf.mxu2  ;;  %v2062_v43 = vpop.f32.mrf.mxu3  ;;  %2055 = vmatmul.f32.gmra.mxu1 %v1954_v39 }
  0xde   : > { %v7829_v44 = vadd.f32 %v2062_v43, %v1776_v42  ;;  %v7831_v45 = vpop.f32.mrf.mxu0  ;;  %v2801_v43 = vld [vmem:[%s7747_s8 + $0x3b] sm:$0xff] }
  0xe1   : > { %1772 = vmatmul.f32.gmra.mxu0 %v1670_v46  ;;  %v2515_v46 = vld [vmem:[%s7747_s8 + $0x3a] sm:$0xff] }
  0xe2   : > { %1826 = vmatmul.f32.gmra.mxu2 %v1688_v48  ;;  %2112 = vmatmul.f32.gmra.mxu3 %v1973_v49  ;;  %v7836_v50 = vpop.f32.mrf.mxu1  ;;  %v3087_v48 = vld [vmem:[%s7747_s8 + $0x3c] sm:$0xff] }
  0xe3   : > { %v3416_v49 = vld [vmem:[#allocation7 + $0x358] sm:$0xff] }
  0xe4   : > { %3425 = vmatpush.msra.mxu2 %v3416_v49 }
  0xe5   : > { %v1779_v52 = vpop.f32.mrf.mxu2  ;;  %v2065_v53 = vpop.f32.mrf.mxu3  ;;  %2058 = vmatmul.f32.gmra.mxu1 %v1955_v51  ;;  %v3702_v51 = vld [vmem:[#allocation7 + $0x3d8] sm:$0xff] }
  0xe6   : > { %v7839_v54 = vadd.f32 %v2065_v53, %v1779_v52  ;;  %v7841_v55 = vpop.f32.mrf.mxu0  ;;  %3711 = vmatpush.msra.mxu3 %v3702_v51  ;;  %v2806_v51 = vld [vmem:[%s7747_s8 + $0x63] sm:$0xff] }
  0xe9   : > { %2865 = vmatmul.f32.vlgmr.msrb.gmra.mxu0 %v2796_v56 }
  0xea   : > { %2293 = vmatmul.f32.vlgmr.msrb.gmra.mxu2 %v2224_v58  ;;  %2579 = vmatmul.f32.vlgmr.msrb.gmra.mxu3 %v2510_v59  ;;  %v7846_v60 = vpop.f32.mrf.mxu1  ;;  %v2802_v58 = vld [vmem:[%s7747_s8 + $0x43] sm:$0xff] }
  0xed   : > { %v1782_v62 = vpop.f32.mrf.mxu2  ;;  %v2068_v63 = vpop.f32.mrf.mxu3  ;;  %3151 = vmatmul.f32.vlgmr.msrb.gmra.mxu1 %v3082_v61 }
  0xee   : > { %v7849_v0 = vadd.f32 %v2068_v63, %v1782_v62  ;;  %v7851_v1 = vpop.f32.mrf.mxu0  ;;  %v3088_v62 = vld [vmem:[%s7747_s8 + $0x44] sm:$0xff] }
  0xef   : > { %v3988_v63 = vld [vmem:[#allocation7 + $0x458] sm:$0xff] }
  0xf0   : > { %3997 = vmatpush.msra.mxu0 %v3988_v63 }
  0xf1   : > { %2868 = vmatmul.f32.gmra.mxu0 %v2797_v2 }
  0xf2   : > { %2296 = vmatmul.f32.gmra.mxu2 %v2225_v5  ;;  %2582 = vmatmul.f32.gmra.mxu3 %v2511_v6  ;;  %v7856_v7 = vpop.f32.mrf.mxu1 }
  0xf5   : > { %v1785_v9 = vpop.f32.mrf.mxu2  ;;  %v2071_v10 = vpop.f32.mrf.mxu3  ;;  %3154 = vmatmul.f32.gmra.mxu1 %v3083_v8  ;;  %v2517_v8 = vld [vmem:[%s7747_s8 + $0x4a] sm:$0xff] }
  0xf6   : > { %v7859_v11 = vadd.f32 %v2071_v10, %v1785_v9  ;;  %v7861_v12 = vpop.f32.mrf.mxu0  ;;  %v3089_v10 = vld [vmem:[%s7747_s8 + $0x4c] sm:$0xff] }
  0xf9   : > { %2871 = vmatmul.f32.gmra.mxu0 %v2798_v13  ;;  %v3415_v13 = vld [vmem:[#allocation7 + $0x350] sm:$0xff] }
  0xfa   : > { %2299 = vmatmul.f32.gmra.mxu2 %v2510_v59  ;;  %2585 = vmatmul.f32.gmra.mxu3 %v2512_v15  ;;  %v7865_v16 = vpop.f32.mrf.mxu1  ;;  %v2516_v59 = vld [vmem:[%s7747_s8 + $0x42] sm:$0xff] }
  0xfb   : > { %3426 = vmatpush.msra.mxu2 %v3415_v13  ;;  %v2521_v13 = vld [vmem:[%s7747_s8 + $0x6a] sm:$0xff] }
  0xfd   : > { %v1788_v18 = vpop.f32.mrf.mxu2  ;;  %v2074_v19 = vpop.f32.mrf.mxu3  ;;  %3157 = vmatmul.f32.gmra.mxu1 %v3084_v17 }
  0xfe   : > { %v7868_v20 = vadd.f32 %v2074_v19, %v1788_v18  ;;  %v7870_v21 = vpop.f32.mrf.mxu0  ;;  %v2804_v19 = vld [vmem:[%s7747_s8 + $0x53] sm:$0xff] }
 0x101   : > { %2874 = vmatmul.f32.gmra.mxu0 %v2799_v22  ;;  %v3701_v22 = vld [vmem:[#allocation7 + $0x3d0] sm:$0xff] }
 0x102   : > { %2302 = vmatmul.f32.gmra.mxu2 %v2511_v6  ;;  %2588 = vmatmul.f32.gmra.mxu3 %v2513_v24  ;;  %v7874_v25 = vpop.f32.mrf.mxu1  ;;  %v2803_v6 = vld [vmem:[%s7747_s8 + $0x4b] sm:$0xff] }
 0x103   : > { %3712 = vmatpush.msra.mxu3 %v3701_v22 }
 0x105   : > { %v1791_v28 = vpop.f32.mrf.mxu2  ;;  %v2077_v29 = vpop.f32.mrf.mxu3  ;;  %3160 = vmatmul.f32.gmra.mxu1 %v3085_v26  ;;  %v3090_v26 = vld [vmem:[%s7747_s8 + $0x54] sm:$0xff] }
 0x106   : > { %v7877_v30 = vadd.f32 %v2077_v29, %v1791_v28  ;;  %v7879_v31 = vpop.f32.mrf.mxu0 }
 0x109   : > { %2877 = vmatmul.f32.gmra.mxu0 %v2800_v32 }
 0x10a   : > { %2305 = vmatmul.f32.gmra.mxu2 %v2512_v15  ;;  %2591 = vmatmul.f32.gmra.mxu3 %v2514_v34  ;;  %v7883_v35 = vpop.f32.mrf.mxu1 }
 0x10d   : > { %v1794_v39 = vpop.f32.mrf.mxu2  ;;  %v2080_v40 = vpop.f32.mrf.mxu3  ;;  %3163 = vmatmul.f32.gmra.mxu1 %v3086_v36  ;;  %v3987_v36 = vld [vmem:[#allocation7 + $0x450] sm:$0xff] }
 0x10e   : > { %v7886_v41 = vadd.f32 %v2080_v40, %v1794_v39  ;;  %v7888_v42 = vpop.f32.mrf.mxu0  ;;  %3998 = vmatpush.msra.mxu0 %v3987_v36  ;;  %v3091_v40 = vld [vmem:[%s7747_s8 + $0x5c] sm:$0xff] }
 0x111   : > { %2880 = vmatmul.f32.gmra.mxu0 %v2801_v43 }
 0x112   : > { %2308 = vmatmul.f32.gmra.mxu2 %v2513_v24  ;;  %2594 = vmatmul.f32.gmra.mxu3 %v2515_v46  ;;  %v7892_v47 = vpop.f32.mrf.mxu1 }
 0x115   : > { %v1797_v52 = vpop.f32.mrf.mxu2  ;;  %v2083_v53 = vpop.f32.mrf.mxu3  ;;  %3166 = vmatmul.f32.gmra.mxu1 %v3087_v48 }
 0x116   : > { %v7895_v56 = vadd.f32 %v2083_v53, %v1797_v52  ;;  %v7897_v57 = vpop.f32.mrf.mxu0  ;;  %v3414_v52 = vld [vmem:[#allocation7 + $0x348] sm:$0xff] }
 0x117   : > { %v3700_v53 = vld [vmem:[#allocation7 + $0x3c8] sm:$0xff]  ;;  %3427 = vmatpush.msra.mxu2 %v3414_v52 }
 0x118   : > { %3713 = vmatpush.msra.mxu3 %v3700_v53  ;;  %v2809_v53 = vld [vmem:[%s7747_s8 + $0x7b] sm:$0xff] }
 0x119   : > { %2883 = vmatmul.f32.gmra.mxu0 %v2802_v58  ;;  %v2520_v58 = vld [vmem:[%s7747_s8 + $0x62] sm:$0xff] }
 0x11a   : > { %2311 = vmatmul.f32.gmra.mxu2 %v2514_v34  ;;  %2597 = vmatmul.f32.gmra.mxu3 %v2516_v59  ;;  %v7901_v61 = vpop.f32.mrf.mxu1  ;;  %v2805_v34 = vld [vmem:[%s7747_s8 + $0x5b] sm:$0xff] }
 0x11d   : > { %v1800_v2 = vpop.f32.mrf.mxu2  ;;  %v2086_v3 = vpop.f32.mrf.mxu3  ;;  %3169 = vmatmul.f32.gmra.mxu1 %v3088_v62  ;;  %v3092_v62 = vld [vmem:[%s7747_s8 + $0x64] sm:$0xff] }
 0x11e   : > { %v7904_v4 = vadd.f32 %v2086_v3, %v1800_v2  ;;  %v7906_v5 = vpop.f32.mrf.mxu0 }
 0x121   : > { %2886 = vmatmul.f32.gmra.mxu0 %v2803_v6 }
 0x122   : > { %2314 = vmatmul.f32.gmra.mxu2 %v2515_v46  ;;  %2600 = vmatmul.f32.gmra.mxu3 %v2517_v8  ;;  %v7910_v9 = vpop.f32.mrf.mxu1 }
 0x125   : > { %v1803_v14 = vpop.f32.mrf.mxu2  ;;  %v2089_v15 = vpop.f32.mrf.mxu3  ;;  %3172 = vmatmul.f32.gmra.mxu1 %v3089_v10  ;;  %v3986_v10 = vld [vmem:[#allocation7 + $0x448] sm:$0xff] }
 0x126   : > { %v7913_v17 = vadd.f32 %v2089_v15, %v1803_v14  ;;  %v7915_v18 = vpop.f32.mrf.mxu0  ;;  %3999 = vmatpush.msra.mxu0 %v3986_v10  ;;  %v3093_v15 = vld [vmem:[%s7747_s8 + $0x6c] sm:$0xff] }
 0x129   : > { %2889 = vmatmul.f32.gmra.mxu0 %v2804_v19 }
 0x12a   : > { %2317 = vmatmul.f32.gmra.mxu2 %v2516_v59  ;;  %2603 = vmatmul.f32.gmra.mxu3 %v2518_v23  ;;  %v7919_v24 = vpop.f32.mrf.mxu1 }
 0x12d   : > { %v1806_v27 = vpop.f32.mrf.mxu2  ;;  %v2092_v28 = vpop.f32.mrf.mxu3  ;;  %3175 = vmatmul.f32.gmra.mxu1 %v3090_v26 }
 0x12e   : > { %v7922_v29 = vadd.f32 %v2092_v28, %v1806_v27  ;;  %v7924_v32 = vpop.f32.mrf.mxu0  ;;  %v2808_v27 = vld [vmem:[%s7747_s8 + $0x73] sm:$0xff] }
 0x12f   : > { %v3413_v28 = vld [vmem:[#allocation7 + $0x340] sm:$0xff] }
 0x130   : > { %10511 = vst [vmem:[#allocation14_spill] sm:$0xff] %v7922_v29  ;;  %3428 = vmatpush.msra.mxu2 %v3413_v28  ;;  %v2524_v28 = vld [vmem:[%s7747_s8 + $0x82] sm:$0xff] }
 0x131   : > { %2892 = vmatmul.f32.gmra.mxu0 %v2805_v34  ;;  %v2522_v34 = vld [vmem:[%s7747_s8 + $0x72] sm:$0xff]  ;;  %v2528_v29 = vld [vmem:[%s7747_s8 + $0xa2] sm:$0xff] }
 0x132   : > { %2320 = vmatmul.f32.gmra.mxu2 %v2517_v8  ;;  %2606 = vmatmul.f32.gmra.mxu3 %v2519_v37  ;;  %v7928_v39 = vpop.f32.mrf.mxu1  ;;  %v2807_v8 = vld [vmem:[%s7747_s8 + $0x6b] sm:$0xff] }
 0x135   : > { %v1809_v43 = vpop.f32.mrf.mxu2  ;;  %v2095_v46 = vpop.f32.mrf.mxu3  ;;  %3178 = vmatmul.f32.gmra.mxu1 %v3091_v40  ;;  %v3699_v40 = vld [vmem:[#allocation7 + $0x3c0] sm:$0xff] }
 0x136   : > { %v7931_v48 = vadd.f32 %v2095_v46, %v1809_v43  ;;  %v7933_v49 = vpop.f32.mrf.mxu0  ;;  %3714 = vmatpush.msra.mxu3 %v3699_v40  ;;  %v3412_v40 = vld [vmem:[#allocation7 + $0x338] sm:$0xff] }
 0x137   : > { %3429 = vmatpush.msra.mxu2 %v3412_v40  ;;  %v3984_v40 = vld [vmem:[#allocation7 + $0x438] sm:$0xff] }
 0x138   : > { %10512 = vst [vmem:[#allocation15_spill] sm:$0xff] %v7931_v48  ;;  %v2117_v48 = vadd.f32 %v7836_v50, %v7831_v45 }
 0x139   : > { %2895 = vmatmul.f32.gmra.mxu0 %v2806_v51 }
 0x13a   : > { %2323 = vmatmul.f32.gmra.mxu2 %v2518_v23  ;;  %2609 = vmatmul.f32.gmra.mxu3 %v2520_v58  ;;  %v7937_v59 = vpop.f32.mrf.mxu1 }
 0x13d   : > { %v1812_v63 = vpop.f32.mrf.mxu2  ;;  %v2098_v2 = vpop.f32.mrf.mxu3  ;;  %3181 = vmatmul.f32.gmra.mxu1 %v3092_v62  ;;  %v2523_v62 = vld [vmem:[%s7747_s8 + $0x7a] sm:$0xff] }
 0x13e   : > { %v7940_v3 = vadd.f32 %v2098_v2, %v1812_v63  ;;  %v7942_v6 = vpop.f32.mrf.mxu0  ;;  %v4497_v63 = vld [vmem:[#allocation9 + $0x78] sm:$0xff] }
 0x13f   : > { %4498 = vmatpush.msra.mxu1 %v4497_v63  ;;  %v3095_v2 = vld [vmem:[%s7747_s8 + $0x7c] sm:$0xff] }
 0x140   : > { %10513 = vst [vmem:[#allocation16_spill] sm:$0xff] %v7940_v3 }
 0x141   : > { %2898 = vmatmul.f32.gmra.mxu0 %v2807_v8  ;;  %v3985_v8 = vld [vmem:[#allocation7 + $0x440] sm:$0xff] }
 0x142   : > { %2326 = vmatmul.f32.gmra.mxu2 %v2519_v37  ;;  %2612 = vmatmul.f32.gmra.mxu3 %v2521_v13  ;;  %v7946_v14 = vpop.f32.mrf.mxu1  ;;  %v3094_v37 = vld [vmem:[%s7747_s8 + $0x74] sm:$0xff] }
 0x143   : > { %4000 = vmatpush.msra.mxu0 %v3985_v8  ;;  %v2811_v8 = vld [vmem:[%s7747_s8 + $0x8b] sm:$0xff] }
 0x145   : > { %v1815_v19 = vpop.f32.mrf.mxu2  ;;  %v2101_v22 = vpop.f32.mrf.mxu3  ;;  %3184 = vmatmul.f32.gmra.mxu1 %v3093_v15  ;;  %4001 = vmatpush.msra.mxu0 %v3984_v40 }
 0x146   : > { %v7949_v23 = vadd.f32 %v2101_v22, %v1815_v19  ;;  %v7951_v26 = vpop.f32.mrf.mxu0 }
 0x148   : > { %10514 = vst [vmem:[#allocation17_spill] sm:$0xff] %v7949_v23  ;;  %v3411_v23 = vld [vmem:[#allocation7 + $0x330] sm:$0xff] }
 0x149   : > { %2901 = vmatmul.f32.gmra.mxu0 %v2808_v27  ;;  %v2810_v27 = vld [vmem:[%s7747_s8 + $0x83] sm:$0xff]  ;;  %3430 = vmatpush.msra.mxu2 %v3411_v23 }
 0x14a   : > { %2329 = vmatmul.f32.gmra.mxu2 %v2520_v58  ;;  %2615 = vmatmul.f32.gmra.mxu3 %v2522_v34  ;;  %v7955_v36 = vpop.f32.mrf.mxu1 }
 0x14d   : > { %v1818_v43 = vpop.f32.mrf.mxu2  ;;  %v2104_v46 = vpop.f32.mrf.mxu3  ;;  %3187 = vmatmul.f32.gmra.mxu1 %v3094_v37  ;;  %v3096_v37 = vld [vmem:[%s7747_s8 + $0x84] sm:$0xff] }
 0x14e   : > { %v7958_v51 = vadd.f32 %v2104_v46, %v1818_v43  ;;  %v7960_v52 = vpop.f32.mrf.mxu0  ;;  %v3698_v43 = vld [vmem:[#allocation7 + $0x3b8] sm:$0xff] }
 0x14f   : > { %3715 = vmatpush.msra.mxu3 %v3698_v43 }
 0x150   : > { %10515 = vst [vmem:[#allocation18_spill] sm:$0xff] %v7958_v51  ;;  %v2116_v51 = vadd.f32 %v7826_v38, %v7821_v33  ;;  %v3099_v38 = vld [vmem:[%s7747_s8 + $0x9c] sm:$0xff] }
 0x151   : > { %2904 = vmatmul.f32.gmra.mxu0 %v2809_v53 }
 0x152   : > { %2332 = vmatmul.f32.gmra.mxu2 %v2521_v13  ;;  %2618 = vmatmul.f32.gmra.mxu3 %v2523_v62  ;;  %v7964_v58 = vpop.f32.mrf.mxu1 }
 0x155   : > { %v1821_v10 = vpop.f32.mrf.mxu2  ;;  %v2107_v15 = vpop.f32.mrf.mxu3  ;;  %3190 = vmatmul.f32.gmra.mxu1 %v3095_v2 }
 0x156   : > { %v7967_v19 = vadd.f32 %v2107_v15, %v1821_v10  ;;  %v7969_v22 = vpop.f32.mrf.mxu0  ;;  %v2525_v10 = vld [vmem:[%s7747_s8 + $0x8a] sm:$0xff] }
 0x157   : > { %v3097_v15 = vld [vmem:[%s7747_s8 + $0x8c] sm:$0xff] }
 0x158   : > { %10516 = vst [vmem:[#allocation19_spill] sm:$0xff] %v7967_v19 }
 0x159   : > { %2907 = vmatmul.f32.gmra.mxu0 %v2810_v27  ;;  %v4496_v27 = vld [vmem:[#allocation9 + $0x70] sm:$0xff] }
 0x15a   : > { %2335 = vmatmul.f32.gmra.mxu2 %v2522_v34  ;;  %2621 = vmatmul.f32.gmra.mxu3 %v2524_v28  ;;  %v7973_v13 = vpop.f32.mrf.mxu1 }
 0x15b   : > { %4499 = vmatpush.msra.mxu1 %v4496_v27  ;;  %v2527_v27 = vld [vmem:[%s7747_s8 + $0x9a] sm:$0xff] }
 0x15d   : > { %v1824_v46 = vpop.f32.mrf.mxu2  ;;  %v2110_v53 = vpop.f32.mrf.mxu3  ;;  %3193 = vmatmul.f32.gmra.mxu1 %v3096_v37 }
 0x15e   : > { %v7976_v63 = vadd.f32 %v2110_v53, %v1824_v46  ;;  %v7978_v2 = vpop.f32.mrf.mxu0  ;;  %v2812_v53 = vld [vmem:[%s7747_s8 + $0x93] sm:$0xff] }
 0x160   : > { %10517 = vst [vmem:[#allocation20_spill] sm:$0xff] %v7976_v63  ;;  %v3098_v63 = vld [vmem:[%s7747_s8 + $0x94] sm:$0xff] }
 0x161   : > { %2910 = vmatmul.f32.gmra.mxu0 %v2811_v8  ;;  %v2526_v8 = vld [vmem:[%s7747_s8 + $0x92] sm:$0xff] }
 0x162   : > { %2338 = vmatmul.f32.gmra.mxu2 %v2523_v62  ;;  %2624 = vmatmul.f32.gmra.mxu3 %v2525_v10  ;;  %v7982_v34 = vpop.f32.mrf.mxu1 }
 0x165   : > { %v1827_v19 = vpop.f32.mrf.mxu2  ;;  %v2113_v37 = vpop.f32.mrf.mxu3  ;;  %3196 = vmatmul.f32.gmra.mxu1 %v3097_v15 }
 0x166   : > { %v7985_v43 = vadd.f32 %v2113_v37, %v1827_v19  ;;  %v2866_v46 = vpop.f32.mrf.mxu0  ;;  %v2813_v37 = vld [vmem:[%s7747_s8 + $0x9b] sm:$0xff] }
 0x168   : > { %10518 = vst [vmem:[#allocation21_spill] sm:$0xff] %v7985_v43 }
 0x169   : > { %2913 = vmatmul.f32.gmra.mxu0 %v2812_v53  ;;  %v3697_v53 = vld [vmem:[#allocation7 + $0x3b0] sm:$0xff] }
 0x16a   : > { %2341 = vmatmul.f32.gmra.mxu2 %v2524_v28  ;;  %2627 = vmatmul.f32.gmra.mxu3 %v2526_v8  ;;  %v3152_v62 = vpop.f32.mrf.mxu1 }
 0x16b   : > { %3716 = vmatpush.msra.mxu3 %v3697_v53  ;;  %v4495_v53 = vld [vmem:[#allocation9 + $0x68] sm:$0xff] }
 0x16c   : > { %4500 = vmatpush.msra.mxu1 %v4495_v53  ;;  %v3696_v53 = vld [vmem:[#allocation7 + $0x3a8] sm:$0xff] }
 0x16d   : > { %v2294_v3 = vpop.f32.mrf.mxu2  ;;  %v2580_v15 = vpop.f32.mrf.mxu3  ;;  %3199 = vmatmul.f32.gmra.mxu1 %v3098_v63  ;;  %3717 = vmatpush.msra.mxu3 %v3696_v53 }
 0x16e   : > { %v2402_v19 = vadd.f32 %v2294_v3, %v2116_v51  ;;  %v2869_v40 = vpop.f32.mrf.mxu0 }
 0x170   : > { %v2688_v43 = vadd.f32 %v2580_v15, %v2402_v19  ;;  %v2814_v19 = vld [vmem:[%s7747_s8 + $0xa3] sm:$0xff] }
 0x171   : > { %2916 = vmatmul.f32.gmra.mxu0 %v2813_v37 }
 0x172   : > { %2344 = vmatmul.f32.gmra.mxu2 %v2525_v10  ;;  %2630 = vmatmul.f32.gmra.mxu3 %v2527_v27  ;;  %v2974_v28 = vadd.f32 %v2866_v46, %v2688_v43  ;;  %v3155_v33 = vpop.f32.mrf.mxu1  ;;  %v3983_v10 = vld [vmem:[#allocation7 + $0x430] sm:$0xff]  ;;  %v2118_v46 = vadd.f32 %v7846_v60, %v7841_v55 }
 0x173   : > { %v3100_v43 = vld [vmem:[%s7747_s8 + $0xa4] sm:$0xff]  ;;  %4002 = vmatpush.msra.mxu0 %v3983_v10 }
 0x174   : > { %v7997_v63 = vadd.f32 %v3152_v62, %v2974_v28 }
 0x175   : > { %v2297_v3 = vpop.f32.mrf.mxu2  ;;  %v2583_v23 = vpop.f32.mrf.mxu3  ;;  %3202 = vmatmul.f32.gmra.mxu1 %v3099_v38 }
 0x176   : > { %v2403_v51 = vadd.f32 %v2297_v3, %v2117_v48  ;;  %v2872_v15 = vpop.f32.mrf.mxu0 }
 0x178   : > { %v2689_v37 = vadd.f32 %v2583_v23, %v2403_v51  ;;  %v2815_v23 = vld [vmem:[%s7747_s8 + $0xab] sm:$0xff] }
 0x179   : > { %2919 = vmatmul.f32.gmra.mxu0 %v2814_v19  ;;  %v2529_v51 = vld [vmem:[%s7747_s8 + $0xaa] sm:$0xff] }
 0x17a   : > { %2347 = vmatmul.f32.gmra.mxu2 %v2526_v8  ;;  %2633 = vmatmul.f32.gmra.mxu3 %v2528_v29  ;;  %v2975_v45 = vadd.f32 %v2869_v40, %v2689_v37  ;;  %v3158_v50 = vpop.f32.mrf.mxu1  ;;  %v3410_v8 = vld [vmem:[#allocation7 + $0x328] sm:$0xff] }
 0x17b   : > { %3431 = vmatpush.msra.mxu2 %v3410_v8  ;;  %v3101_v40 = vld [vmem:[%s7747_s8 + $0xac] sm:$0xff] }
 0x17c   : > { %v8004_v48 = vadd.f32 %v3155_v33, %v2975_v45  ;;  %v2119_v33 = vadd.f32 %v7856_v7, %v7851_v1 }
 0x17d   : > { %v2300_v62 = vpop.f32.mrf.mxu2  ;;  %v2586_v28 = vpop.f32.mrf.mxu3  ;;  %3205 = vmatmul.f32.gmra.mxu1 %v3100_v43 }
 0x17e   : > { %v2404_v38 = vadd.f32 %v2300_v62, %v2118_v46  ;;  %v2875_v3 = vpop.f32.mrf.mxu0  ;;  %v2816_v62 = vld [vmem:[%s7747_s8 + $0xb3] sm:$0xff] }
 0x180   : > { %v2690_v19 = vadd.f32 %v2586_v28, %v2404_v38  ;;  %v2530_v28 = vld [vmem:[%s7747_s8 + $0xb2] sm:$0xff] }
 0x181   : > { %2922 = vmatmul.f32.gmra.mxu0 %v2815_v23  ;;  %v3982_v23 = vld [vmem:[#allocation7 + $0x428] sm:$0xff] }
 0x182   : > { %2350 = vmatmul.f32.gmra.mxu2 %v2527_v27  ;;  %2636 = vmatmul.f32.gmra.mxu3 %v2529_v51  ;;  %v2976_v55 = vadd.f32 %v2872_v15, %v2690_v19  ;;  %v3161_v60 = vpop.f32.mrf.mxu1  ;;  %v4494_v27 = vld [vmem:[#allocation9 + $0x60] sm:$0xff] }
 0x183   : > { %4501 = vmatpush.msra.mxu1 %v4494_v27  ;;  %v3102_v15 = vld [vmem:[%s7747_s8 + $0xb4] sm:$0xff]  ;;  %4003 = vmatpush.msra.mxu0 %v3982_v23 }
 0x184   : > { %v8011_v37 = vadd.f32 %v3158_v50, %v2976_v55  ;;  %v2120_v50 = vadd.f32 %v7865_v16, %v7861_v12  ;;  %v3103_v16 = vld [vmem:[%s7747_s8 + $0xbc] sm:$0xff] }
 0x185   : > { %v2303_v10 = vpop.f32.mrf.mxu2  ;;  %v2589_v45 = vpop.f32.mrf.mxu3  ;;  %3208 = vmatmul.f32.gmra.mxu1 %v3101_v40 }
 0x186   : > { %v2405_v43 = vadd.f32 %v2303_v10, %v2119_v33  ;;  %v2878_v46 = vpop.f32.mrf.mxu0  ;;  %v2817_v33 = vld [vmem:[%s7747_s8 + $0xbb] sm:$0xff] }
 0x187   : > { %v2531_v10 = vld [vmem:[%s7747_s8 + $0xba] sm:$0xff] }
 0x188   : > { %v2691_v38 = vadd.f32 %v2589_v45, %v2405_v43  ;;  %v2121_v43 = vadd.f32 %v7874_v25, %v7870_v21  ;;  %v3104_v25 = vld [vmem:[%s7747_s8 + $0xc4] sm:$0xff] }
 0x189   : > { %2925 = vmatmul.f32.gmra.mxu0 %v2816_v62 }
 0x18a   : > { %2353 = vmatmul.f32.gmra.mxu2 %v2528_v29  ;;  %2639 = vmatmul.f32.gmra.mxu3 %v2530_v28  ;;  %v2977_v1 = vadd.f32 %v2875_v3, %v2691_v38  ;;  %v3164_v7 = vpop.f32.mrf.mxu1  ;;  %v3409_v29 = vld [vmem:[#allocation7 + $0x320] sm:$0xff] }
 0x18b   : > { %3432 = vmatpush.msra.mxu2 %v3409_v29 }
 0x18c   : > { %v8018_v19 = vadd.f32 %v3161_v60, %v2977_v1  ;;  %v3695_v60 = vld [vmem:[#allocation7 + $0x3a0] sm:$0xff] }
 0x18d   : > { %v2306_v8 = vpop.f32.mrf.mxu2  ;;  %v2592_v53 = vpop.f32.mrf.mxu3  ;;  %3211 = vmatmul.f32.gmra.mxu1 %v3102_v15  ;;  %3718 = vmatpush.msra.mxu3 %v3695_v60  ;;  %v2818_v15 = vld [vmem:[%s7747_s8 + $0xc3] sm:$0xff] }
 0x18e   : > { %v2406_v55 = vadd.f32 %v2306_v8, %v2120_v50  ;;  %v2881_v40 = vpop.f32.mrf.mxu0  ;;  %v2532_v50 = vld [vmem:[%s7747_s8 + $0xc2] sm:$0xff]  ;;  %v2533_v60 = vld [vmem:[%s7747_s8 + $0xca] sm:$0xff] }
 0x18f   : > { %v4493_v8 = vld [vmem:[#allocation9 + $0x58] sm:$0xff] }
 0x190   : > { %v2692_v45 = vadd.f32 %v2592_v53, %v2406_v55  ;;  %4502 = vmatpush.msra.mxu1 %v4493_v8  ;;  %v2122_v53 = vadd.f32 %v7883_v35, %v7879_v31  ;;  %v2123_v31 = vadd.f32 %v7892_v47, %v7888_v42  ;;  %v2820_v8 = vld [vmem:[%s7747_s8 + $0xd3] sm:$0xff] }
 0x191   : > { %2928 = vmatmul.f32.gmra.mxu0 %v2817_v33  ;;  %v3106_v47 = vld [vmem:[%s7747_s8 + $0xd4] sm:$0xff] }
 0x192   : > { %2356 = vmatmul.f32.gmra.mxu2 %v2529_v51  ;;  %2642 = vmatmul.f32.gmra.mxu3 %v2531_v10  ;;  %v2978_v3 = vadd.f32 %v2878_v46, %v2692_v45  ;;  %v3167_v12 = vpop.f32.mrf.mxu1 }
 0x194   : > { %v8025_v62 = vadd.f32 %v3164_v7, %v2978_v3  ;;  %v3981_v7 = vld [vmem:[#allocation7 + $0x420] sm:$0xff] }
 0x195   : > { %v2309_v38 = vpop.f32.mrf.mxu2  ;;  %v2595_v27 = vpop.f32.mrf.mxu3  ;;  %3214 = vmatmul.f32.gmra.mxu1 %v3103_v16  ;;  %4004 = vmatpush.msra.mxu0 %v3981_v7  ;;  %v2819_v16 = vld [vmem:[%s7747_s8 + $0xcb] sm:$0xff] }
 0x196   : > { %v2407_v23 = vadd.f32 %v2309_v38, %v2121_v43  ;;  %v2884_v1 = vpop.f32.mrf.mxu0  ;;  %v3105_v38 = vld [vmem:[%s7747_s8 + $0xcc] sm:$0xff] }
 0x198   : > { %v2693_v51 = vadd.f32 %v2595_v27, %v2407_v23  ;;  %v3408_v27 = vld [vmem:[#allocation7 + $0x318] sm:$0xff] }
 0x199   : > { %2931 = vmatmul.f32.gmra.mxu0 %v2818_v15  ;;  %3433 = vmatpush.msra.mxu2 %v3408_v27 }
 0x19a   : > { %2359 = vmatmul.f32.gmra.mxu2 %v2530_v28  ;;  %2645 = vmatmul.f32.gmra.mxu3 %v2532_v50  ;;  %v2979_v46 = vadd.f32 %v2881_v40, %v2693_v51  ;;  %v3170_v21 = vpop.f32.mrf.mxu1 }
 0x19c   : > { %v8032_v55 = vadd.f32 %v3167_v12, %v2979_v46  ;;  %v3694_v12 = vld [vmem:[#allocation7 + $0x398] sm:$0xff]  ;;  %v2534_v46 = vld [vmem:[%s7747_s8 + $0xd2] sm:$0xff] }
 0x19d   : > { %v2312_v33 = vpop.f32.mrf.mxu2  ;;  %v2598_v45 = vpop.f32.mrf.mxu3  ;;  %3217 = vmatmul.f32.gmra.mxu1 %v3104_v25  ;;  %3719 = vmatpush.msra.mxu3 %v3694_v12 }
 0x19e   : > { %v2408_v29 = vadd.f32 %v2312_v33, %v2122_v53  ;;  %v2887_v3 = vpop.f32.mrf.mxu0  ;;  %v4492_v53 = vld [vmem:[#allocation9 + $0x50] sm:$0xff]  ;;  %v3980_v33 = vld [vmem:[#allocation7 + $0x418] sm:$0xff] }
 0x19f   : > { %4005 = vmatpush.msra.mxu0 %v3980_v33  ;;  %4503 = vmatpush.msra.mxu1 %v4492_v53 }
 0x1a0   : > { %v2694_v28 = vadd.f32 %v2598_v45, %v2408_v29 }
 0x1a1   : > { %2934 = vmatmul.f32.gmra.mxu0 %v2819_v16 }
 0x1a2   : > { %2362 = vmatmul.f32.gmra.mxu2 %v2531_v10  ;;  %2648 = vmatmul.f32.gmra.mxu3 %v2533_v60  ;;  %v2980_v40 = vadd.f32 %v2884_v1, %v2694_v28  ;;  %v3173_v43 = vpop.f32.mrf.mxu1 }
 0x1a4   : > { %v8039_v35 = vadd.f32 %v3170_v21, %v2980_v40  ;;  %v2124_v21 = vadd.f32 %v7901_v61, %v7897_v57  ;;  %v2535_v40 = vld [vmem:[%s7747_s8 + $0xda] sm:$0xff] }
 0x1a5   : > { %v2315_v23 = vpop.f32.mrf.mxu2  ;;  %v2601_v15 = vpop.f32.mrf.mxu3  ;;  %3220 = vmatmul.f32.gmra.mxu1 %v3105_v38  ;;  %v3107_v61 = vld [vmem:[%s7747_s8 + $0xdc] sm:$0xff] }
 0x1a6   : > { %v2409_v10 = vadd.f32 %v2315_v23, %v2123_v31  ;;  %v2890_v51 = vpop.f32.mrf.mxu0  ;;  %v3407_v31 = vld [vmem:[#allocation7 + $0x310] sm:$0xff] }
 0x1a7   : > { %3434 = vmatpush.msra.mxu2 %v3407_v31 }
 0x1a8   : > { %v2695_v1 = vadd.f32 %v2601_v15, %v2409_v10 }
 0x1a9   : > { %2937 = vmatmul.f32.gmra.mxu0 %v2820_v8  ;;  %v2822_v8 = vld [vmem:[%s7747_s8 + $0xe3] sm:$0xff] }
 0x1aa   : > { %2365 = vmatmul.f32.gmra.mxu2 %v2532_v50  ;;  %2651 = vmatmul.f32.gmra.mxu3 %v2534_v46  ;;  %v2981_v25 = vadd.f32 %v2887_v3, %v2695_v1  ;;  %v3176_v42 = vpop.f32.mrf.mxu1  ;;  %v2821_v50 = vld [vmem:[%s7747_s8 + $0xdb] sm:$0xff] }
 0x1ab   : > { %v2536_v1 = vld [vmem:[%s7747_s8 + $0xe2] sm:$0xff] }
 0x1ac   : > { %v8046_v7 = vadd.f32 %v3173_v43, %v2981_v25  ;;  %v2125_v43 = vadd.f32 %v7910_v9, %v7906_v5  ;;  %v3108_v9 = vld [vmem:[%s7747_s8 + $0xe4] sm:$0xff]  ;;  %v2126_v25 = vadd.f32 %v7919_v24, %v7915_v18  ;;  %v3109_v24 = vld [vmem:[%s7747_s8 + $0xec] sm:$0xff] }
 0x1ad   : > { %v2318_v45 = vpop.f32.mrf.mxu2  ;;  %v2604_v29 = vpop.f32.mrf.mxu3  ;;  %3223 = vmatmul.f32.gmra.mxu1 %v3106_v47 }
 0x1ae   : > { %10519 = vst [vmem:[#allocation22_spill] sm:$0xff] %v8046_v7  ;;  %v2410_v16 = vadd.f32 %v2318_v45, %v2124_v21  ;;  %v2893_v28 = vpop.f32.mrf.mxu0  ;;  %v2823_v45 = vld [vmem:[%s7747_s8 + $0xeb] sm:$0xff] }
 0x1b0   : > { %v2696_v3 = vadd.f32 %v2604_v29, %v2410_v16  ;;  %v2537_v29 = vld [vmem:[%s7747_s8 + $0xea] sm:$0xff] }
 0x1b1   : > { %2940 = vmatmul.f32.gmra.mxu0 %v2821_v50 }
 0x1b2   : > { %2368 = vmatmul.f32.gmra.mxu2 %v2533_v60  ;;  %2654 = vmatmul.f32.gmra.mxu3 %v2535_v40  ;;  %v2982_v57 = vadd.f32 %v2890_v51, %v2696_v3  ;;  %v3179_v27 = vpop.f32.mrf.mxu1  ;;  %v3693_v51 = vld [vmem:[#allocation7 + $0x390] sm:$0xff]  ;;  %v4491_v3 = vld [vmem:[#allocation9 + $0x48] sm:$0xff] }
 0x1b3   : > { %3720 = vmatpush.msra.mxu3 %v3693_v51  ;;  %4504 = vmatpush.msra.mxu1 %v4491_v3 }
 0x1b4   : > { %v8053_v38 = vadd.f32 %v3176_v42, %v2982_v57 }
 0x1b5   : > { %v2321_v12 = vpop.f32.mrf.mxu2  ;;  %v2607_v23 = vpop.f32.mrf.mxu3  ;;  %3226 = vmatmul.f32.gmra.mxu1 %v3107_v61 }
 0x1b6   : > { %10520 = vst [vmem:[#allocation23_spill] sm:$0xff] %v8053_v38  ;;  %v2411_v15 = vadd.f32 %v2321_v12, %v2125_v43  ;;  %v2896_v10 = vpop.f32.mrf.mxu0  ;;  %v2824_v12 = vld [vmem:[%s7747_s8 + $0xf3] sm:$0xff] }
 0x1b8   : > { %v2697_v60 = vadd.f32 %v2607_v23, %v2411_v15  ;;  %v2538_v23 = vld [vmem:[%s7747_s8 + $0xf2] sm:$0xff] }
 0x1b9   : > { %2943 = vmatmul.f32.gmra.mxu0 %v2822_v8  ;;  %v3406_v8 = vld [vmem:[#allocation7 + $0x308] sm:$0xff] }
 0x1ba   : > { %2371 = vmatmul.f32.gmra.mxu2 %v2534_v46  ;;  %2657 = vmatmul.f32.gmra.mxu3 %v2536_v1  ;;  %v2983_v5 = vadd.f32 %v2893_v28, %v2697_v60  ;;  %v3182_v16 = vpop.f32.mrf.mxu1  ;;  %v3979_v46 = vld [vmem:[#allocation7 + $0x410] sm:$0xff]  ;;  %v2127_v28 = vadd.f32 %v7928_v39, %v7924_v32  ;;  %v2128_v60 = vadd.f32 %v7937_v59, %v7933_v49 }
 0x1bb   : > { %4006 = vmatpush.msra.mxu0 %v3979_v46  ;;  %3435 = vmatpush.msra.mxu2 %v3406_v8  ;;  %v3110_v39 = vld [vmem:[%s7747_s8 + $0xf4] sm:$0xff]  ;;  %v3111_v59 = vld [vmem:[%s7747_s8 + $0xfc] sm:$0xff] }
 0x1bc   : > { %v8060_v42 = vadd.f32 %v3179_v27, %v2983_v5 }
 0x1bd   : > { %v2324_v47 = vpop.f32.mrf.mxu2  ;;  %v2610_v21 = vpop.f32.mrf.mxu3  ;;  %3229 = vmatmul.f32.gmra.mxu1 %v3108_v9 }
 0x1be   : > { %10521 = vst [vmem:[#allocation24_spill] sm:$0xff] %v8060_v42  ;;  %v2412_v53 = vadd.f32 %v2324_v47, %v2126_v25  ;;  %v2899_v33 = vpop.f32.mrf.mxu0 }
 0x1c0   : > { %v2698_v50 = vadd.f32 %v2610_v21, %v2412_v53  ;;  %v2825_v21 = vld [vmem:[%s7747_s8 + $0xfb] sm:$0xff] }
 0x1c1   : > { %2946 = vmatmul.f32.gmra.mxu0 %v2823_v45  ;;  %v2539_v53 = vld [vmem:[%s7747_s8 + $0xfa] sm:$0xff] }
 0x1c2   : > { %2374 = vmatmul.f32.gmra.mxu2 %v2535_v40  ;;  %2660 = vmatmul.f32.gmra.mxu3 %v2537_v29  ;;  %v2984_v18 = vadd.f32 %v2896_v10, %v2698_v50  ;;  %v3692_v40 = vld [vmem:[#allocation7 + $0x388] sm:$0xff]  ;;  %v3185_v10 = vpop.f32.mrf.mxu1 }
 0x1c3   : > { %3721 = vmatpush.msra.mxu3 %v3692_v40  ;;  %v2827_v40 = vld [vmem:[%s7747_s8 + $0x10b] sm:$0xff] }
 0x1c4   : > { %v8067_v57 = vadd.f32 %v3182_v16, %v2984_v18  ;;  %v2129_v16 = vadd.f32 %v7946_v14, %v7942_v6  ;;  %v2130_v6 = vadd.f32 %v7955_v36, %v7951_v26  ;;  %v3977_v26 = vld [vmem:[#allocation7 + $0x400] sm:$0xff]  ;;  %v2131_v36 = vadd.f32 %v7964_v58, %v7960_v52 }
 0x1c5   : > { %v2327_v61 = vpop.f32.mrf.mxu2  ;;  %v2613_v43 = vpop.f32.mrf.mxu3  ;;  %3232 = vmatmul.f32.gmra.mxu1 %v3109_v24  ;;  %v2826_v24 = vld [vmem:[%s7747_s8 + $0x103] sm:$0xff]  ;;  %v2132_v52 = vadd.f32 %v7973_v13, %v7969_v22  ;;  %v2133_v22 = vadd.f32 %v7982_v34, %v7978_v2 }
 0x1c6   : > { %10522 = vst [vmem:[#allocation25_spill] sm:$0xff] %v8067_v57  ;;  %v2413_v27 = vadd.f32 %v2327_v61, %v2127_v28  ;;  %v2902_v31 = vpop.f32.mrf.mxu0  ;;  %v2540_v28 = vld [vmem:[%s7747_s8 + $0x102] sm:$0xff] }
 0x1c7   : > { %v4488_v13 = vld [vmem:[#allocation9 + $0x30] sm:$0xff] }
 0x1c8   : > { %v2699_v15 = vadd.f32 %v2613_v43, %v2413_v27  ;;  %v3405_v43 = vld [vmem:[#allocation7 + $0x300] sm:$0xff] }
 0x1c9   : > { %2949 = vmatmul.f32.gmra.mxu0 %v2824_v12  ;;  %3436 = vmatpush.msra.mxu2 %v3405_v43  ;;  %v3112_v27 = vld [vmem:[%s7747_s8 + $0x104] sm:$0xff] }
 0x1ca   : > { %2377 = vmatmul.f32.gmra.mxu2 %v2536_v1  ;;  %2663 = vmatmul.f32.gmra.mxu3 %v2538_v23  ;;  %v2985_v32 = vadd.f32 %v2899_v33, %v2699_v15  ;;  %v4490_v1 = vld [vmem:[#allocation9 + $0x40] sm:$0xff]  ;;  %v3978_v33 = vld [vmem:[#allocation7 + $0x408] sm:$0xff] }
 0x1cb   : > { %4505 = vmatpush.msra.mxu1 %v4490_v1  ;;  %4007 = vmatpush.msra.mxu0 %v3978_v33  ;;  %v3114_v33 = vld [vmem:[%s7747_s8 + $0x114] sm:$0xff] }
 0x1cc   : > { %v8074_v51 = vadd.f32 %v3185_v10, %v2985_v32  ;;  %v2541_v10 = vld [vmem:[%s7747_s8 + $0x10a] sm:$0xff] }
 0x1cd   : > { %v2330_v5 = vpop.f32.mrf.mxu2  ;;  %v2616_v9 = vpop.f32.mrf.mxu3  ;;  %3235 = vmatmul.f32.gmra.mxu1 %v3110_v39  ;;  %4008 = vmatpush.msra.mxu0 %v3977_v26 }
 0x1ce   : > { %10523 = vst [vmem:[#allocation26_spill] sm:$0xff] %v8074_v51  ;;  %v2414_v25 = vadd.f32 %v2330_v5, %v2128_v60  ;;  %v2905_v47 = vpop.f32.mrf.mxu0  ;;  %v3113_v60 = vld [vmem:[%s7747_s8 + $0x10c] sm:$0xff] }
 0x1cf   : > { %v5069_v51 = vld [vmem:[#allocation9 + $0x178] sm:$0xff] }
 0x1d0   : > { %v2700_v45 = vadd.f32 %v2616_v9, %v2414_v25 }
 0x1d1   : > { %2952 = vmatmul.f32.gmra.mxu0 %v2825_v21  ;;  %v2828_v21 = vld [vmem:[%s7747_s8 + $0x113] sm:$0xff] }
 0x1d2   : > { %2380 = vmatmul.f32.gmra.mxu2 %v2537_v29  ;;  %2666 = vmatmul.f32.gmra.mxu3 %v2539_v53  ;;  %v8078_v49 = vadd.f32 %v2902_v31, %v2700_v45  ;;  %v3691_v31 = vld [vmem:[#allocation7 + $0x380] sm:$0xff] }
 0x1d3   : > { %3722 = vmatpush.msra.mxu3 %v3691_v31  ;;  %v2542_v45 = vld [vmem:[%s7747_s8 + $0x112] sm:$0xff] }
 0x1d5   : > { %v2333_v50 = vpop.f32.mrf.mxu2  ;;  %v2619_v3 = vpop.f32.mrf.mxu3  ;;  %3238 = vmatmul.f32.gmra.mxu1 %v3111_v59  ;;  %5070 = vmatpush.msrb.mxu3 %v5069_v51  ;;  %v3953_v51 = vld [vmem:[%s7747_s8 + $0x8e] sm:$0xff] }
 0x1d6   : > { %v2415_v46 = vadd.f32 %v2333_v50, %v2129_v16  ;;  %v2908_v18 = vpop.f32.mrf.mxu0 }
 0x1d8   : > { %v2701_v61 = vadd.f32 %v2619_v3, %v2415_v46  ;;  %v2829_v3 = vld [vmem:[%s7747_s8 + $0x11b] sm:$0xff] }
 0x1d9   : > { %2955 = vmatmul.f32.gmra.mxu0 %v2826_v24  ;;  %v2543_v46 = vld [vmem:[%s7747_s8 + $0x11a] sm:$0xff] }
 0x1da   : > { %2383 = vmatmul.f32.gmra.mxu2 %v2538_v23  ;;  %2669 = vmatmul.f32.gmra.mxu3 %v2540_v28  ;;  %v8085_v29 = vadd.f32 %v2905_v47, %v2701_v61  ;;  %v4489_v23 = vld [vmem:[#allocation9 + $0x38] sm:$0xff] }
 0x1db   : > { %4506 = vmatpush.msra.mxu1 %v4489_v23  ;;  %v2545_v23 = vld [vmem:[%s7747_s8 + $0x12a] sm:$0xff] }
 0x1dd   : > { %v2336_v14 = vpop.f32.mrf.mxu2  ;;  %v2622_v12 = vpop.f32.mrf.mxu3  ;;  %3241 = vmatmul.f32.gmra.mxu1 %v3112_v27 }
 0x1de   : > { %v2416_v15 = vadd.f32 %v2336_v14, %v2130_v6  ;;  %v2911_v8 = vpop.f32.mrf.mxu0  ;;  %v2830_v6 = vld [vmem:[%s7747_s8 + $0x123] sm:$0xff]  ;;  %4507 = vmatpush.msra.mxu1 %v4488_v13 }
 0x1df   : > { %v2544_v14 = vld [vmem:[%s7747_s8 + $0x122] sm:$0xff] }
 0x1e0   : > { %v2702_v32 = vadd.f32 %v2622_v12, %v2416_v15 }
 0x1e1   : > { %2958 = vmatmul.f32.gmra.mxu0 %v2827_v40 }
 0x1e2   : > { %2386 = vmatmul.f32.gmra.mxu2 %v2539_v53  ;;  %2672 = vmatmul.f32.gmra.mxu3 %v2541_v10  ;;  %v8092_v39 = vadd.f32 %v2908_v18, %v2702_v32  ;;  %v2831_v32 = vld [vmem:[%s7747_s8 + $0x12b] sm:$0xff] }
 0x1e5   : > { %v2339_v5 = vpop.f32.mrf.mxu2  ;;  %v2625_v9 = vpop.f32.mrf.mxu3  ;;  %3244 = vmatmul.f32.gmra.mxu1 %v3113_v60 }
 0x1e6   : > { %v2417_v25 = vadd.f32 %v2339_v5, %v2131_v36  ;;  %v2914_v47 = vpop.f32.mrf.mxu0  ;;  %v3117_v36 = vld [vmem:[%s7747_s8 + $0x12c] sm:$0xff] }
 0x1e8   : > { %v2703_v53 = vadd.f32 %v2625_v9, %v2417_v25 }
 0x1e9   : > { %2961 = vmatmul.f32.gmra.mxu0 %v2828_v21  ;;  %v3368_v21 = vld [vmem:[%s7747_s8 + $0x24] sm:$0xff] }
 0x1ea   : > { %2389 = vmatmul.f32.gmra.mxu2 %v2540_v28  ;;  %2675 = vmatmul.f32.gmra.mxu3 %v2542_v45  ;;  %v8099_v1 = vadd.f32 %v2911_v8, %v2703_v53  ;;  %v3115_v28 = vld [vmem:[%s7747_s8 + $0x11c] sm:$0xff]  ;;  %v3116_v8 = vld [vmem:[%s7747_s8 + $0x124] sm:$0xff] }
 0x1ed   : > { %v2342_v58 = vpop.f32.mrf.mxu2  ;;  %v2628_v59 = vpop.f32.mrf.mxu3  ;;  %3247 = vmatmul.f32.gmra.mxu1 %v3114_v33  ;;  %v4487_v33 = vld [vmem:[#allocation9 + $0x28] sm:$0xff] }
 0x1ee   : > { %v2418_v16 = vadd.f32 %v2342_v58, %v2132_v52  ;;  %v2917_v50 = vpop.f32.mrf.mxu0  ;;  %4508 = vmatpush.msra.mxu1 %v4487_v33 }
 0x1f0   : > { %v2704_v18 = vadd.f32 %v2628_v59, %v2418_v16 }
 0x1f1   : > { %2964 = vmatmul.f32.gmra.mxu0 %v2829_v3  ;;  %v3369_v3 = vld [vmem:[%s7747_s8 + $0x2c] sm:$0xff] }
 0x1f2   : > { %2392 = vmatmul.f32.gmra.mxu2 %v2541_v10  ;;  %2678 = vmatmul.f32.gmra.mxu3 %v2543_v46  ;;  %v8106_v24 = vadd.f32 %v2914_v47, %v2704_v18  ;;  %v8132_v18 = vpop.f32.mrf.mxu1 }
 0x1f5   : > { %v2345_v61 = vpop.f32.mrf.mxu2  ;;  %v2631_v43 = vpop.f32.mrf.mxu3  ;;  %3250 = vmatmul.f32.gmra.mxu1 %v3115_v28 }
 0x1f6   : > { %v2419_v27 = vadd.f32 %v2345_v61, %v2133_v22  ;;  %v2920_v31 = vpop.f32.mrf.mxu0 }
 0x1f8   : > { %v2705_v12 = vadd.f32 %v2631_v43, %v2419_v27 }
 0x1f9   : > { %2967 = vmatmul.f32.gmra.mxu0 %v2830_v6  ;;  %v3656_v6 = vld [vmem:[%s7747_s8 + $0x35] sm:$0xff] }
 0x1fa   : > { %2395 = vmatmul.f32.gmra.mxu2 %v2542_v45  ;;  %2681 = vmatmul.f32.gmra.mxu3 %v2544_v14  ;;  %v8113_v15 = vadd.f32 %v2917_v50, %v2705_v12  ;;  %v3654_v45 = vld [vmem:[%s7747_s8 + $0x25] sm:$0xff]  ;;  %v3941_v50 = vld [vmem:[%s7747_s8 + $0x2e] sm:$0xff] }
 0x1fb   : > { %v4486_v12 = vld [vmem:[#allocation9 + $0x20] sm:$0xff] }
 0x1fc   : > { %4509 = vmatpush.msra.mxu1 %v4486_v12  ;;  %v3660_v12 = vld [vmem:[%s7747_s8 + $0x55] sm:$0xff] }
 0x1fd   : > { %v2348_v2 = vpop.f32.mrf.mxu2  ;;  %v2634_v34 = vpop.f32.mrf.mxu3  ;;  %3253 = vmatmul.f32.gmra.mxu1 %v3116_v8 }
 0x1fe   : > { %v2420_v40 = vadd.f32 %v2348_v2, %v7829_v44  ;;  %v2923_v10 = vpop.f32.mrf.mxu0  ;;  %v3940_v44 = vld [vmem:[%s7747_s8 + $0x26] sm:$0xff]  ;;  %v8140_v8 = vpop.f32.mrf.mxu1 }
 0x200   : > { %v2706_v60 = vadd.f32 %v2634_v34, %v2420_v40 }
 0x201   : > { %2970 = vmatmul.f32.gmra.mxu0 %v2831_v32  ;;  %v3943_v32 = vld [vmem:[%s7747_s8 + $0x3e] sm:$0xff] }
 0x202   : > { %2398 = vmatmul.f32.gmra.mxu2 %v2543_v46  ;;  %2684 = vmatmul.f32.gmra.mxu3 %v2545_v23  ;;  %v8119_v26 = vadd.f32 %v2920_v31, %v2706_v60  ;;  %v3655_v46 = vld [vmem:[%s7747_s8 + $0x2d] sm:$0xff]  ;;  %v3371_v23 = vld [vmem:[%s7747_s8 + $0x3c] sm:$0xff] }
 0x203   : > { %v3370_v31 = vld [vmem:[%s7747_s8 + $0x34] sm:$0xff]  ;;  %v3657_v60 = vld [vmem:[%s7747_s8 + $0x3d] sm:$0xff] }
 0x205   : > { %v2351_v5 = vpop.f32.mrf.mxu2  ;;  %v2637_v9 = vpop.f32.mrf.mxu3  ;;  %3256 = vmatmul.f32.gmra.mxu1 %v3117_v36 }
 0x206   : > { %v2421_v25 = vadd.f32 %v2351_v5, %v7839_v54  ;;  %v2926_v47 = vpop.f32.mrf.mxu0 }
 0x208   : > { %v2707_v53 = vadd.f32 %v2637_v9, %v2421_v25  ;;  %v8150_v9 = vpop.f32.mrf.mxu1 }
 0x209   : > { %4009 = vmatmul.f32.vlgmr.msra.gmra.mxu0 %v3940_v44 }
 0x20a   : > { %3437 = vmatmul.f32.vlgmr.msra.gmra.mxu2 %v3368_v21  ;;  %3723 = vmatmul.f32.vlgmr.msra.gmra.mxu3 %v3654_v45  ;;  %v8126_v52 = vadd.f32 %v2923_v10, %v2707_v53  ;;  %v3372_v45 = vld [vmem:[%s7747_s8 + $0x44] sm:$0xff] }
 0x20b   : > { %v3658_v53 = vld [vmem:[%s7747_s8 + $0x45] sm:$0xff] }
 0x20d   : > { %v2354_v58 = vpop.f32.mrf.mxu2  ;;  %v2640_v59 = vpop.f32.mrf.mxu3 }
 0x20e   : > { %v2422_v54 = vadd.f32 %v2354_v58, %v7849_v0  ;;  %v2929_v16 = vpop.f32.mrf.mxu0  ;;  %v3942_v0 = vld [vmem:[%s7747_s8 + $0x36] sm:$0xff]  ;;  %v4485_v58 = vld [vmem:[#allocation9 + $0x18] sm:$0xff] }
 0x20f   : > { %4510 = vmatpush.msra.mxu1 %v4485_v58  ;;  %v3948_v58 = vld [vmem:[%s7747_s8 + $0x66] sm:$0xff] }
 0x210   : > { %v2708_v28 = vadd.f32 %v2640_v59, %v2422_v54 }
 0x211   : > { %4012 = vmatmul.f32.gmra.mxu0 %v3941_v50  ;;  %v8158_v50 = vpop.f32.mrf.mxu1 }
 0x212   : > { %3440 = vmatmul.f32.gmra.mxu2 %v3369_v3  ;;  %3726 = vmatmul.f32.gmra.mxu3 %v3655_v46  ;;  %v8134_v22 = vadd.f32 %v2926_v47, %v2708_v28  ;;  %v3945_v46 = vld [vmem:[%s7747_s8 + $0x4e] sm:$0xff] }
 0x213   : > { %v3373_v28 = vld [vmem:[%s7747_s8 + $0x4c] sm:$0xff] }
 0x215   : > { %v2357_v13 = vpop.f32.mrf.mxu2  ;;  %v2643_v61 = vpop.f32.mrf.mxu3 }
 0x216   : > { %v2423_v43 = vadd.f32 %v2357_v13, %v7859_v11  ;;  %v2932_v27 = vpop.f32.mrf.mxu0  ;;  %v3659_v13 = vld [vmem:[%s7747_s8 + $0x4d] sm:$0xff] }
 0x218   : > { %v2709_v14 = vadd.f32 %v2643_v61, %v2423_v43 }
 0x219   : > { %4015 = vmatmul.f32.gmra.mxu0 %v3942_v0 }
 0x21a   : > { %3443 = vmatmul.f32.gmra.mxu2 %v3370_v31  ;;  %3729 = vmatmul.f32.gmra.mxu3 %v3656_v6  ;;  %v8142_v2 = vadd.f32 %v2929_v16, %v2709_v14  ;;  %v3946_v14 = vld [vmem:[%s7747_s8 + $0x56] sm:$0xff] }
 0x21d   : > { %v2360_v34 = vpop.f32.mrf.mxu2  ;;  %v2646_v40 = vpop.f32.mrf.mxu3 }
 0x21e   : > { %v2424_v11 = vadd.f32 %v2360_v34, %v7868_v20  ;;  %v2935_v10 = vpop.f32.mrf.mxu0  ;;  %v3944_v20 = vld [vmem:[%s7747_s8 + $0x46] sm:$0xff]  ;;  %v8170_v34 = vpop.f32.mrf.mxu1 }
 0x220   : > { %v2710_v36 = vadd.f32 %v2646_v40, %v2424_v11 }
 0x221   : > { %4018 = vmatmul.f32.gmra.mxu0 %v3943_v32 }
 0x222   : > { %3446 = vmatmul.f32.gmra.mxu2 %v3371_v23  ;;  %3732 = vmatmul.f32.gmra.mxu3 %v3657_v60  ;;  %v8148_v5 = vadd.f32 %v2932_v27, %v2710_v36  ;;  %v3947_v36 = vld [vmem:[%s7747_s8 + $0x5e] sm:$0xff] }
 0x225   : > { %v2363_v25 = vpop.f32.mrf.mxu2  ;;  %v2649_v47 = vpop.f32.mrf.mxu3 }
 0x226   : > { %v2425_v44 = vadd.f32 %v2363_v25, %v7877_v30  ;;  %v2938_v21 = vpop.f32.mrf.mxu0  ;;  %v3375_v25 = vld [vmem:[%s7747_s8 + $0x5c] sm:$0xff] }
 0x228   : > { %v2711_v33 = vadd.f32 %v2649_v47, %v2425_v44  ;;  %v3661_v47 = vld [vmem:[%s7747_s8 + $0x5d] sm:$0xff] }
 0x229   : > { %4021 = vmatmul.f32.gmra.mxu0 %v3944_v20 }
 0x22a   : > { %3449 = vmatmul.f32.gmra.mxu2 %v3372_v45  ;;  %3735 = vmatmul.f32.gmra.mxu3 %v3658_v53  ;;  %v8156_v59 = vadd.f32 %v2935_v10, %v2711_v33  ;;  %v4484_v10 = vld [vmem:[#allocation9 + $0x10] sm:$0xff] }
 0x22b   : > { %4511 = vmatpush.msra.mxu1 %v4484_v10 }
 0x22d   : > { %v2366_v54 = vpop.f32.mrf.mxu2  ;;  %v2652_v16 = vpop.f32.mrf.mxu3 }
 0x22e   : > { %v2426_v30 = vadd.f32 %v2366_v54, %v7886_v41  ;;  %v2941_v3 = vpop.f32.mrf.mxu0  ;;  %v3374_v41 = vld [vmem:[%s7747_s8 + $0x54] sm:$0xff]  ;;  %v3376_v54 = vld [vmem:[%s7747_s8 + $0x64] sm:$0xff] }
 0x230   : > { %v2712_v61 = vadd.f32 %v2652_v16, %v2426_v30  ;;  %v3662_v16 = vld [vmem:[%s7747_s8 + $0x65] sm:$0xff] }
 0x231   : > { %4024 = vmatmul.f32.gmra.mxu0 %v3945_v46 }
 0x232   : > { %3452 = vmatmul.f32.gmra.mxu2 %v3373_v28  ;;  %3738 = vmatmul.f32.gmra.mxu3 %v3659_v13  ;;  %v8164_v43 = vadd.f32 %v2938_v21, %v2712_v61  ;;  %v8178_v21 = vpop.f32.mrf.mxu1  ;;  %v10524_v61 = vld [vmem:[#allocation14_spill] sm:$0xff] }
 0x235   : > { %v2369_v27 = vpop.f32.mrf.mxu2  ;;  %v2655_v0 = vpop.f32.mrf.mxu3 }
 0x236   : > { %v2427_v31 = vadd.f32 %v2369_v27, %v7895_v56  ;;  %v2944_v6 = vpop.f32.mrf.mxu0 }
 0x238   : > { %v2713_v40 = vadd.f32 %v2655_v0, %v2427_v31  ;;  %v3377_v31 = vld [vmem:[%s7747_s8 + $0x6c] sm:$0xff] }
 0x239   : > { %4027 = vmatmul.f32.gmra.mxu0 %v3946_v14 }
 0x23a   : > { %3455 = vmatmul.f32.gmra.mxu2 %v3374_v41  ;;  %3741 = vmatmul.f32.gmra.mxu3 %v3660_v12  ;;  %v8172_v11 = vadd.f32 %v2941_v3, %v2713_v40  ;;  %v8188_v46 = vpop.f32.mrf.mxu1  ;;  %v4483_v41 = vld [vmem:[#allocation9 + $0x8] sm:$0xff] }
 0x23b   : > { %4512 = vmatpush.msra.mxu1 %v4483_v41 }
 0x23d   : > { %v2372_v32 = vpop.f32.mrf.mxu2  ;;  %v2658_v23 = vpop.f32.mrf.mxu3 }
 0x23e   : > { %v2428_v56 = vadd.f32 %v2372_v32, %v7904_v4  ;;  %v2947_v60 = vpop.f32.mrf.mxu0 }
 0x240   : > { %v2714_v44 = vadd.f32 %v2658_v23, %v2428_v56  ;;  %v10526_v23 = vld [vmem:[#allocation15_spill] sm:$0xff] }
 0x241   : > { %4030 = vmatmul.f32.gmra.mxu0 %v3947_v36  ;;  %v3950_v36 = vld [vmem:[%s7747_s8 + $0x76] sm:$0xff] }
 0x242   : > { %3458 = vmatmul.f32.gmra.mxu2 %v3375_v25  ;;  %3744 = vmatmul.f32.gmra.mxu3 %v3661_v47  ;;  %v8180_v20 = vadd.f32 %v2944_v6, %v2714_v44  ;;  %v3663_v6 = vld [vmem:[%s7747_s8 + $0x6d] sm:$0xff]  ;;  %v8196_v32 = vpop.f32.mrf.mxu1  ;;  %v3664_v47 = vld [vmem:[%s7747_s8 + $0x75] sm:$0xff] }
 0x243   : > { %v3378_v25 = vld [vmem:[%s7747_s8 + $0x74] sm:$0xff] }
 0x245   : > { %v2375_v45 = vpop.f32.mrf.mxu2  ;;  %v2661_v53 = vpop.f32.mrf.mxu3 }
 0x246   : > { %v2429_v33 = vadd.f32 %v2375_v45, %v7913_v17  ;;  %v2950_v4 = vpop.f32.mrf.mxu0  ;;  %v3949_v17 = vld [vmem:[%s7747_s8 + $0x6e] sm:$0xff] }
 0x248   : > { %v2715_v30 = vadd.f32 %v2661_v53, %v2429_v33  ;;  %v278_v53 = vlaneseq }
 0x249   : > { %4033 = vmatmul.f32.gmra.mxu0 %v3948_v58 }
 0x24a   : > { %3461 = vmatmul.f32.gmra.mxu2 %v3376_v54  ;;  %3747 = vmatmul.f32.gmra.mxu3 %v3662_v16  ;;  %v8186_v3 = vadd.f32 %v2947_v60, %v2715_v30  ;;  %v8204_v33 = vshrl.u32 %v278_v53, 7  ;;  %v10528_v54 = vld [vmem:[#allocation16_spill] sm:$0xff] }
 0x24c   : > { %v8220_v53 = vadd.s32 8, %v8204_v33 }
 0x24d   : > { %v2378_v28 = vpop.f32.mrf.mxu2  ;;  %v2664_v13 = vpop.f32.mrf.mxu3 }
 0x24e   : > { %v2430_v27 = vadd.f32 %v2378_v28, %v10524_v61  ;;  %v2953_v0 = vpop.f32.mrf.mxu0  ;;  %v3951_v28 = vld [vmem:[%s7747_s8 + $0x7e] sm:$0xff] }
 0x24f   : > { %v3379_v61 = vld [vmem:[%s7747_s8 + $0x7c] sm:$0xff] }
 0x250   : > { %v2716_v14 = vadd.f32 %v2664_v13, %v2430_v27  ;;  %v318_v13 = vand.u32 65535, %v8204_v33  ;;  %v3665_v27 = vld [vmem:[%s7747_s8 + $0x7d] sm:$0xff] }
 0x251   : > { %4036 = vmatmul.f32.gmra.mxu0 %v3949_v17  ;;  %v8211_v17 = vpop.f32.mrf.mxu1 }
 0x252   : > { %3464 = vmatmul.f32.gmra.mxu2 %v3377_v31  ;;  %3750 = vmatmul.f32.gmra.mxu3 %v3663_v6  ;;  %v8194_v12 = vadd.f32 %v2950_v4, %v2716_v14  ;;  %v4482_v6 = vld [vmem:[#allocation9] sm:$0xff]  ;;  %v322_v14 = vmul.u32 58254, %v318_v13 }
 0x253   : > { %4513 = vmatpush.msra.mxu1 %v4482_v6 }
 0x254   : > { %10525 = vst [vmem:[#allocation14_spill] sm:$0xff] %v8194_v12 }
 0x255   : > { %v2381_v40 = vpop.f32.mrf.mxu2  ;;  %v2667_v10 = vpop.f32.mrf.mxu3 }
 0x256   : > { %v2431_v56 = vadd.f32 %v2381_v40, %v10526_v23  ;;  %v2956_v60 = vpop.f32.mrf.mxu0  ;;  %v321_v40 = vmul.u32 14564, %v318_v13  ;;  %v325_v23 = vshll.u32 %v322_v14, 16  ;;  %v3380_v13 = vld [vmem:[%s7747_s8 + $0x84] sm:$0xff] }
 0x258   : > { %v2717_v44 = vadd.f32 %v2667_v10, %v2431_v56  ;;  %vm329_vm0 = vc.u32 %v321_v40, %v325_v23 }
 0x259   : > { %4039 = vmatmul.f32.gmra.mxu0 %v3950_v36 }
 0x25a   : > { %3467 = vmatmul.f32.gmra.mxu2 %v3378_v25  ;;  %3753 = vmatmul.f32.gmra.mxu3 %v3664_v47  ;;  %v8202_v45 = vadd.f32 %v2953_v0, %v2717_v44  ;;  %v319_v0 = vshrl.u32 %v8204_v33, 16  ;;  %v331_v44 = vadd.s32 %v325_v23, %v321_v40  ;;  %v348_v23 = vshrl.u32 %v8220_v53, 16 }
 0x25c   : > { %10527 = vst [vmem:[#allocation15_spill] sm:$0xff] %v8202_v45  ;;  %v8216_v10 = vmul.u32 14564, %v319_v0  ;;  %v324_v56 = vmul.u32 58254, %v319_v0  ;;  %v4783_v0 = vld [vmem:[#allocation9 + $0xf8] sm:$0xff] }
 0x25d   : > { %v2384_v4 = vpop.f32.mrf.mxu2  ;;  %v2670_v58 = vpop.f32.mrf.mxu3  ;;  %4784 = vmatpush.msrb.mxu2 %v4783_v0  ;;  %v8238_v0 = vadd.s32 16, %v8204_v33 }
 0x25e   : > { %v2432_v16 = vadd.f32 %v2384_v4, %v10528_v54  ;;  %v2959_v30 = vpop.f32.mrf.mxu0  ;;  %v327_v36 = vshll.u32 %v8216_v10, 16  ;;  %v10530_v4 = vld [vmem:[#allocation17_spill] sm:$0xff] }
 0x25f   : > { %v3952_v54 = vld [vmem:[%s7747_s8 + $0x86] sm:$0xff] }
 0x260   : > { %v2718_v31 = vadd.f32 %v2670_v58, %v2432_v16  ;;  %v10500_v16 = vmov 0   ;;  %vm333_vm1 = vc.u32 %v331_v44, %v327_v36  ;;  %v8234_v36 = vmul.u32 14564, %v348_v23 }
 0x261   : > { %4042 = vmatmul.f32.gmra.mxu0 %v3951_v28  ;;  %v330_v28 = vsel %vm329_vm0, 1, %v10500_v16  ;;  %v334_v40 = vsel %vm333_vm1, 1, %v10500_v16 }
 0x262   : > { %3470 = vmatmul.f32.gmra.mxu2 %v3379_v61  ;;  %3756 = vmatmul.f32.gmra.mxu3 %v3665_v27  ;;  %v8214_v41 = vadd.f32 %v2956_v60, %v2718_v31  ;;  %v3666_v61 = vld [vmem:[%s7747_s8 + $0x85] sm:$0xff]  ;;  %v332_v27 = vadd.s32 %v330_v28, %v324_v56  ;;  %v347_v31 = vand.u32 65535, %v8220_v53  ;;  %v353_v28 = vmul.u32 58254, %v348_v23  ;;  %v3667_v23 = vld [vmem:[%s7747_s8 + $0x8d] sm:$0xff] }
 0x264   : > { %10529 = vst [vmem:[#allocation16_spill] sm:$0xff] %v8214_v41  ;;  %v350_v56 = vmul.u32 14564, %v347_v31  ;;  %v336_v44 = vadd.s32 %v334_v40, %v332_v27  ;;  %v376_v27 = vand.u32 65535, %v8238_v0  ;;  %v3381_v40 = vld [vmem:[%s7747_s8 + $0x8c] sm:$0xff]  ;;  %v328_v41 = vshrl.u32 %v8216_v10, 16 }
 0x265   : > { %v2387_v25 = vpop.f32.mrf.mxu2  ;;  %v2673_v47 = vpop.f32.mrf.mxu3 }
 0x266   : > { %v2433_v58 = vadd.f32 %v2387_v25, %v10530_v4  ;;  %v2962_v60 = vpop.f32.mrf.mxu0  ;;  %v351_v25 = vmul.u32 58254, %v347_v31  ;;  %v8230_v4 = vpop.f32.mrf.mxu1  ;;  %v379_v10 = vmul.u32 14564, %v376_v27 }
 0x268   : > { %v2719_v6 = vadd.f32 %v2673_v47, %v2433_v58  ;;  %v326_v47 = vshrl.u32 %v322_v14, 16  ;;  %v354_v58 = vshll.u32 %v351_v25, 16  ;;  %v355_v7 = vshrl.u32 %v351_v25, 16 }
 0x269   : > { %4045 = vmatmul.f32.gmra.mxu0 %v3952_v54  ;;  %v356_v54 = vshll.u32 %v8234_v36, 16  ;;  %v357_v25 = vshrl.u32 %v8234_v36, 16 }
 0x26a   : > { %3473 = vmatmul.f32.gmra.mxu2 %v3380_v13  ;;  %3759 = vmatmul.f32.gmra.mxu3 %v3666_v61  ;;  %v8232_v57 = vadd.f32 %v2959_v30, %v2719_v6  ;;  %vm358_vm2 = vc.u32 %v350_v56, %v354_v58  ;;  %v360_v30 = vadd.s32 %v354_v58, %v350_v56  ;;  %v10532_v6 = vld [vmem:[#allocation18_spill] sm:$0xff]  ;;  %v7605_v58 = vmov 0.0  }
 0x26b   : > { %v337_v45 = vadd.s32 %v336_v44, %v326_v47  ;;  %1575 = vst [vmem:[#allocation2] sm:$0xff] %v7605_v58  ;;  %4514 = vmatmul.f32.vlgmr.msra.gmra.mxu1 %v7605_v58  ;;  %v8253_v47 = vmul.u32 58254, %v376_v27 }
 0x26c   : > { %10531 = vst [vmem:[#allocation17_spill] sm:$0xff] %v8232_v57  ;;  %v10533_v57 = vmov 0   ;;  %vm362_vm3 = vc.u32 %v360_v30, %v356_v54 }
 0x26d   : > { %v2390_v13 = vpop.f32.mrf.mxu2  ;;  %v2676_v61 = vpop.f32.mrf.mxu3  ;;  %v359_v14 = vsel %vm358_vm2, 1, %v10533_v57  ;;  %v363_v56 = vsel %vm362_vm3, 1, %v10533_v57  ;;  %1576 = vst [vmem:[#allocation2 + $0x8] sm:$0xff] %v7605_v58  ;;  %v338_v44 = vadd.s32 %v337_v45, %v328_v41  ;;  %v383_v30 = vshll.u32 %v8253_v47, 16 }
 0x26e   : > { %v2434_v31 = vadd.f32 %v2390_v13, %v10532_v6  ;;  %v8241_v16 = vpop.f32.mrf.mxu0  ;;  %v361_v42 = vadd.s32 %v359_v14, %v353_v28  ;;  %v377_v6 = vshrl.u32 %v8238_v0, 16  ;;  %1577 = vst [vmem:[#allocation2 + $0x10] sm:$0x7] %v7605_v58  ;;  %v8258_v54 = vpop.f32.mrf.mxu1  ;;  %v8266_v45 = vadd.f32 %v8132_v18, %v8078_v49  ;;  %v3954_v14 = vld [vmem:[%s7747_s8 + $0x96] sm:$0xff] }
 0x26f   : > { %1578 = vst [vmem:[#allocation2 + $0x133] sm:$0xff] %v7605_v58  ;;  %v8270_v41 = vadd.f32 %v8140_v8, %v8085_v29  ;;  %vm387_vm4 = vc.u32 %v379_v10, %v383_v30  ;;  %v8279_v49 = vadd.f32 %v8150_v9, %v8092_v39  ;;  %v8283_v29 = vadd.f32 %v8158_v50, %v8099_v1  ;;  %v3382_v18 = vld [vmem:[%s7747_s8 + $0x94] sm:$0xff] }
 0x270   : > { %v2720_v38 = vadd.f32 %v2676_v61, %v2434_v31  ;;  %v365_v13 = vadd.s32 %v363_v56, %v361_v42  ;;  %v8256_v28 = vmul.u32 14564, %v377_v6  ;;  %v382_v61 = vmul.u32 58254, %v377_v6  ;;  %1579 = vst [vmem:[#allocation2 + $0x13b] sm:$0xff] %v7605_v58  ;;  %v3668_v8 = vld [vmem:[%s7747_s8 + $0x95] sm:$0xff] }
 0x271   : > { %4048 = vmatmul.f32.gmra.mxu0 %v3953_v51  ;;  %1580 = vst [vmem:[#allocation2 + $0x143] sm:$0x1f] %v7605_v58  ;;  %v339_v6 = vshrl.u32 %v338_v44, 4  ;;  %v384_v39 = vshrl.u32 %v8253_v47, 16  ;;  %v8295_v50 = vadd.f32 %v8170_v34, %v8106_v24 }
 0x272   : > { %3476 = vmatmul.f32.gmra.mxu2 %v3381_v40  ;;  %3762 = vmatmul.f32.gmra.mxu3 %v3667_v23  ;;  %v8251_v12 = vadd.f32 %v2962_v60, %v2720_v38  ;;  %v366_v42 = vadd.s32 %v365_v13, %v355_v7  ;;  %v8262_v38 = vadd.s32 24, %v8204_v33  ;;  %v10534_v7 = vld [vmem:[#allocation19_spill] sm:$0xff]  ;;  %v385_v27 = vshll.u32 %v8256_v28, 16 }
 0x273   : > { %v389_v40 = vadd.s32 %v383_v30, %v379_v10  ;;  %v388_v23 = vsel %vm387_vm4, 1, %v10533_v57  ;;  %v5355_v10 = vld [vmem:[#allocation9 + $0x1f8] sm:$0xff]  ;;  %4517 = vmatmul.f32.gmra.mxu1 %v7605_v58  ;;  %v386_v58 = vshrl.u32 %v8256_v28, 16  ;;  %v340_v24 = vmul.u32 18, %v339_v6 }
 0x274   : > { %v405_v56 = vand.u32 65535, %v8262_v38  ;;  %v5641_v30 = vld [vmem:[#allocation9 + $0x278] sm:$0xff]  ;;  %v406_v1 = vshrl.u32 %v8262_v38, 16  ;;  %5356 = vmatpush.msrb.mxu0 %v5355_v10  ;;  %v8314_v28 = vadd.f32 %v8188_v46, %v8119_v26  ;;  %v8329_v26 = vadd.f32 %v8211_v17, %v8134_v22 }
 0x275   : > { %v2393_v60 = vpop.f32.mrf.mxu2  ;;  %v2679_v36 = vpop.f32.mrf.mxu3  ;;  %vm391_vm5 = vc.u32 %v389_v40, %v385_v27  ;;  %5642 = vmatpush.msrb.mxu1 %v5641_v30  ;;  %v8318_v27 = vadd.f32 %v8196_v32, %v8126_v52  ;;  %v3383_v52 = vld [vmem:[%s7747_s8 + $0x9c] sm:$0xff] }
 0x276   : > { %v2435_v31 = vadd.f32 %v2393_v60, %v10534_v7  ;;  %v8273_v51 = vpop.f32.mrf.mxu0  ;;  %v367_v60 = vadd.s32 %v366_v42, %v357_v25  ;;  %v390_v7 = vadd.s32 %v388_v23, %v382_v61  ;;  %v8291_v9 = vmul.u32 58254, %v405_v56  ;;  %v8320_v23 = vpop.f32.mrf.mxu1  ;;  %v3669_v46 = vld [vmem:[%s7747_s8 + $0x9d] sm:$0xff] }
 0x277   : > { %v392_v25 = vsel %vm391_vm5, 1, %v10533_v57  ;;  %v408_v42 = vmul.u32 14564, %v405_v56  ;;  %v8302_v61 = vmul.u32 14564, %v406_v1  ;;  %v10536_v56 = vld [vmem:[#allocation20_spill] sm:$0xff] }
 0x278   : > { %v2721_v13 = vadd.f32 %v2679_v36, %v2435_v31  ;;  %v394_v47 = vadd.s32 %v392_v25, %v390_v7  ;;  %v412_v36 = vshll.u32 %v8291_v9, 16  ;;  %v368_v34 = vshrl.u32 %v367_v60, 4  ;;  %v3955_v60 = vld [vmem:[%s7747_s8 + $0x9e] sm:$0xff] }
 0x279   : > { %4051 = vmatmul.f32.gmra.mxu0 %v3954_v14  ;;  %v411_v31 = vmul.u32 58254, %v406_v1  ;;  %v8310_v14 = vadd.f32 %v8178_v21, %v8113_v15  ;;  %v414_v15 = vshll.u32 %v8302_v61, 16 }
 0x27a   : > { %3479 = vmatmul.f32.gmra.mxu2 %v3382_v18  ;;  %3765 = vmatmul.f32.gmra.mxu3 %v3668_v8  ;;  %v8298_v44 = vadd.f32 %v8241_v16, %v2721_v13  ;;  %v8306_v16 = vadd.s32 32, %v8204_v33  ;;  %v395_v8 = vadd.s32 %v394_v47, %v384_v39  ;;  %vm416_vm6 = vc.u32 %v408_v42, %v412_v36  ;;  %v4782_v47 = vld [vmem:[#allocation9 + $0xf0] sm:$0xff] }
 0x27b   : > { %v418_v21 = vadd.s32 %v412_v36, %v408_v42  ;;  %v417_v7 = vsel %vm416_vm6, 1, %v10533_v57  ;;  %v8336_v39 = vsub.s32 %v8204_v33, %v340_v24  ;;  %v369_v1 = vmul.u32 18, %v368_v34  ;;  %v5068_v42 = vld [vmem:[#allocation9 + $0x170] sm:$0xff]  ;;  %4785 = vmatpush.msrb.mxu2 %v4782_v47 }
 0x27c   : > { %10535 = vst [vmem:[#allocation18_spill] sm:$0xff] %v8298_v44  ;;  %v396_v32 = vadd.s32 %v395_v8, %v386_v58  ;;  %v434_v10 = vand.u32 65535, %v8306_v16  ;;  %v419_v25 = vadd.s32 %v417_v7, %v411_v31  ;;  %v413_v36 = vshrl.u32 %v8291_v9, 16  ;;  %5071 = vmatpush.msrb.mxu3 %v5068_v42  ;;  %v3956_v7 = vld [vmem:[%s7747_s8 + $0xa6] sm:$0xff] }
 0x27d   : > { %v2396_v40 = vpop.f32.mrf.mxu2  ;;  %v2682_v18 = vpop.f32.mrf.mxu3  ;;  %vm420_vm7 = vc.u32 %v418_v21, %v414_v15  ;;  %v435_v22 = vshrl.u32 %v8306_v16, 16  ;;  %v415_v31 = vshrl.u32 %v8302_v61, 16  ;;  %vm1359_vm8 = vcmp.ne.s32.totalorder %v8336_v39, 0 }
 0x27e   : > { %v2436_v13 = vadd.f32 %v2396_v40, %v10536_v56  ;;  %v8323_v6 = vpop.f32.mrf.mxu0  ;;  %v8340_v17 = vmul.u32 58254, %v434_v10  ;;  %v397_v40 = vshrl.u32 %v396_v32, 4  ;;  %v421_v24 = vsel %vm420_vm7, 1, %v10533_v57 }
 0x27f   : > { %v437_v34 = vmul.u32 14564, %v434_v10  ;;  %v423_v9 = vadd.s32 %v421_v24, %v419_v25  ;;  %vm1395_vm9 = vcmp.lt.s32.totalorder %v8336_v39, 0  ;;  %v8353_v56 = vadd.s32 40, %v8204_v33 }
 0x280   : > { %v2722_v30 = vadd.f32 %v2682_v18, %v2436_v13  ;;  %v8347_v18 = vmul.u32 14564, %v435_v22  ;;  %v441_v8 = vshll.u32 %v8340_v17, 16  ;;  %v8356_v61 = vsub.s32 %v8220_v53, %v369_v1  ;;  %v3384_v53 = vld [vmem:[%s7747_s8 + $0xa4] sm:$0xff]  ;;  %vm8375_vm11 = vmand %vm1395_vm9, %vm1359_vm8 }
 0x281   : > { %4054 = vmatmul.f32.gmra.mxu0 %v3955_v60  ;;  %v424_v15 = vadd.s32 %v423_v9, %v413_v36  ;;  %v1467_v10 = vadd.s32 18, %v8336_v39  ;;  %v8367_v47 = vadd.f32 %v8230_v4, %v8142_v2  ;;  %v3670_v1 = vld [vmem:[%s7747_s8 + $0xa5] sm:$0xff]  ;;  %v398_v36 = vmul.u32 18, %v397_v40  ;;  %v3224_v9 = vpop.f32.mrf.mxu1 }
 0x282   : > { %3482 = vmatmul.f32.gmra.mxu2 %v3383_v52  ;;  %3768 = vmatmul.f32.gmra.mxu3 %v3669_v46  ;;  %v8343_v58 = vadd.f32 %v8273_v51, %v2722_v30  ;;  %v440_v51 = vmul.u32 58254, %v435_v22  ;;  %v443_v21 = vshll.u32 %v8347_v18, 16  ;;  %vm445_vm10 = vc.u32 %v437_v34, %v441_v8  ;;  %v10538_v52 = vld [vmem:[#allocation21_spill] sm:$0xff]  ;;  %v5354_v4 = vld [vmem:[#allocation9 + $0x1f0] sm:$0xff] }
 0x283   : > { %v446_v30 = vsel %vm445_vm10, 1, %v10533_v57  ;;  %v447_v25 = vadd.s32 %v441_v8, %v437_v34  ;;  %v425_v22 = vadd.s32 %v424_v15, %v415_v31  ;;  %v463_v24 = vand.u32 65535, %v8353_v56  ;;  %5357 = vmatpush.msrb.mxu0 %v5354_v4  ;;  %v8444_v4 = vld [vmem:[%s10494_s2] ss:$0 sm:$0xff] }
 0x284   : > { %10537 = vst [vmem:[#allocation19_spill] sm:$0xff] %v8343_v58  ;;  %v442_v8 = vshrl.u32 %v8340_v17, 16  ;;  %v448_v2 = vadd.s32 %v446_v30, %v440_v51  ;;  %vm1360_vm13 = vcmp.ne.s32.totalorder %v8356_v61, 0  ;;  %vm1396_vm14 = vcmp.lt.s32.totalorder %v8356_v61, 0 }
 0x285   : > { %v2399_v13 = vpop.f32.mrf.mxu2  ;;  %v2685_v60 = vpop.f32.mrf.mxu3  ;;  %vm449_vm12 = vc.u32 %v447_v25, %v443_v21  ;;  %v464_v40 = vshrl.u32 %v8353_v56, 16  ;;  %v1503_v17 = vsel %vm8375_vm11, %v1467_v10, %v8336_v39  ;;  %v426_v51 = vshrl.u32 %v425_v22, 4  ;;  %vm8402_vm15 = vmand %vm1396_vm14, %vm1360_vm13 }
 0x286   : > { %v2437_v46 = vadd.f32 %v2399_v13, %v10538_v52  ;;  %v8360_v32 = vpop.f32.mrf.mxu0  ;;  %v5640_v13 = vld [vmem:[#allocation9 + $0x270] sm:$0xff]  ;;  %v450_v52 = vsel %vm449_vm12, 1, %v10533_v57  ;;  %v8392_v15 = vadd.s32 18, %v8356_v61  ;;  %v466_v21 = vmul.u32 14564, %v463_v24 }
 0x287   : > { %5643 = vmatpush.msrb.mxu1 %v5640_v13  ;;  %v8407_v39 = vsub.s32 %v8238_v0, %v398_v36  ;;  %v444_v10 = vshrl.u32 %v8347_v18, 16  ;;  %v8411_v25 = vadd.s32 48, %v8204_v33  ;;  %v469_v0 = vmul.u32 58254, %v464_v40 }
 0x288   : > { %v2723_v34 = vadd.f32 %v2685_v60, %v2437_v46  ;;  %v452_v60 = vadd.s32 %v450_v52, %v448_v2  ;;  %v8394_v46 = vmul.u32 58254, %v463_v24  ;;  %v8423_v18 = vadd.f32 %v3224_v9, %v8164_v43 }
 0x289   : > { %4057 = vmatmul.f32.gmra.mxu0 %v3956_v7  ;;  %v8396_v7 = vmul.u32 14564, %v464_v40  ;;  %vm8426_vm0 = vcmp.lt.s32.totalorder %v1503_v17, 16  ;;  %v1504_v2 = vsel %vm8402_vm15, %v8392_v15, %v8356_v61  ;;  %vm1361_vm2 = vcmp.ne.s32.totalorder %v8407_v39, 0  ;;  %v4781_v61 = vld [vmem:[#allocation9 + $0xe8] sm:$0xff]  ;;  %v8450_v15 = vpop.f32.mrf.mxu1 }
 0x28a   : > { %3485 = vmatmul.f32.gmra.mxu2 %v3384_v53  ;;  %3771 = vmatmul.f32.gmra.mxu3 %v3670_v1  ;;  %v8386_v31 = vadd.f32 %v8323_v6, %v2723_v34  ;;  %v453_v30 = vadd.s32 %v452_v60, %v442_v8  ;;  %v8415_v53 = vadd.f32 %v8258_v54, %v8148_v5  ;;  %v470_v36 = vshll.u32 %v8394_v46, 16  ;;  %v3957_v54 = vld [vmem:[%s7747_s8 + $0xae] sm:$0xff] }
 0x28b   : > { %v8419_v1 = vadd.f32 %v8320_v23, %v8156_v59  ;;  %v427_v8 = vmul.u32 18, %v426_v51  ;;  %v3385_v59 = vld [vmem:[%s7747_s8 + $0xac] sm:$0xff]  ;;  %v472_v43 = vshll.u32 %v8396_v7, 16  ;;  %vm1397_vm3 = vcmp.lt.s32.totalorder %v8407_v39, 0  ;;  %4786 = vmatpush.msrb.mxu2 %v4781_v61 }
 0x28c   : > { %10541 = vst [vmem:[#allocation20_spill] sm:$0xff] %v8386_v31  ;;  %v3671_v23 = vld [vmem:[%s7747_s8 + $0xad] sm:$0xff]  ;;  %vm474_vm1 = vc.u32 %v466_v21, %v470_v36  ;;  %v454_v13 = vadd.s32 %v453_v30, %v444_v10  ;;  %v476_v17 = vadd.s32 %v470_v36, %v466_v21  ;;  %v493_v60 = vshrl.u32 %v8411_v25, 16  ;;  %vm8469_vm5 = vmand %vm1397_vm3, %vm1361_vm2 }
 0x28d   : > { %v3438_v42 = vpop.f32.mrf.mxu2  ;;  %v3724_v22 = vpop.f32.mrf.mxu3  ;;  %v475_v52 = vsel %vm474_vm1, 1, %v10533_v57  ;;  %v5067_v40 = vld [vmem:[#allocation9 + $0x168] sm:$0xff]  ;;  %v8457_v10 = vsub.s32 %v8262_v38, %v427_v8  ;;  %v471_v30 = vshrl.u32 %v8394_v46, 16  ;;  %v473_v36 = vshrl.u32 %v8396_v7, 16 }
 0x28e   : > { %v3546_v24 = vadd.f32 %v3438_v42, %v7997_v63  ;;  %v8430_v5 = vpop.f32.mrf.mxu0  ;;  %v492_v63 = vand.u32 65535, %v8411_v25  ;;  %v477_v51 = vadd.s32 %v475_v52, %v469_v0  ;;  %v8454_v42 = vadd.s32 18, %v8407_v39  ;;  %5072 = vmatpush.msrb.mxu3 %v5067_v40  ;;  %v3958_v7 = vld [vmem:[%s7747_s8 + $0xb6] sm:$0xff] }
 0x28f   : > { %vm478_vm4 = vc.u32 %v476_v17, %v472_v43  ;;  %v8462_v0 = vmul.u32 14564, %v493_v60  ;;  %v455_v46 = vshrl.u32 %v454_v13, 4  ;;  %vm8480_vm6 = vcmp.lt.s32.totalorder %v1504_v2, 16  ;;  %v3386_v17 = vld [vmem:[%s7747_s8 + $0xb4] sm:$0xff] }
 0x290   : > { %v3832_v9 = vadd.f32 %v3724_v22, %v3546_v24  ;;  %v495_v21 = vmul.u32 14564, %v492_v63  ;;  %v8460_v22 = vmul.u32 58254, %v492_v63  ;;  %v479_v24 = vsel %vm478_vm4, 1, %v10533_v57  ;;  %v5353_v31 = vld [vmem:[#allocation9 + $0x1e8] sm:$0xff] }
 0x291   : > { %4060 = vmatmul.f32.gmra.mxu0 %v3957_v54  ;;  %v8477_v63 = vadd.s32 56, %v8204_v33  ;;  %v501_v40 = vshll.u32 %v8462_v0, 16  ;;  %vm1362_vm8 = vcmp.ne.s32.totalorder %v8457_v10, 0  ;;  %vm1398_vm9 = vcmp.lt.s32.totalorder %v8457_v10, 0 }
 0x292   : > { %v4118_v6 = vadd.f32 %v8360_v32, %v3832_v9  ;;  %3488 = vmatmul.f32.gmra.mxu2 %v3385_v59  ;;  %3774 = vmatmul.f32.gmra.mxu3 %v3671_v23  ;;  %v481_v59 = vadd.s32 %v479_v24, %v477_v51  ;;  %v498_v23 = vmul.u32 58254, %v493_v60  ;;  %v499_v43 = vshll.u32 %v8460_v22, 16  ;;  %v3672_v51 = vld [vmem:[%s7747_s8 + $0xb5] sm:$0xff]  ;;  %vm8525_vm11 = vmand %vm1398_vm9, %vm1362_vm8 }
 0x293   : > { %v1505_v60 = vsel %vm8469_vm5, %v8454_v42, %v8407_v39  ;;  %v521_v38 = vand.u32 65535, %v8477_v63  ;;  %v500_v34 = vshrl.u32 %v8460_v22, 16  ;;  %v1470_v42 = vadd.s32 18, %v8457_v10  ;;  %5358 = vmatpush.msrb.mxu0 %v5353_v31 }
 0x294   : > { %v4230_v32 = vadd.f32 %v8444_v4, %v4118_v6  ;;  %v482_v6 = vadd.s32 %v481_v59, %v471_v30  ;;  %vm503_vm7 = vc.u32 %v495_v21, %v499_v43  ;;  %v502_v30 = vshrl.u32 %v8462_v0, 16 }
 0x295   : > { %v3441_v54 = vpop.f32.mrf.mxu2  ;;  %v3727_v8 = vpop.f32.mrf.mxu3  ;;  %v504_v24 = vsel %vm503_vm7, 1, %v10533_v57  ;;  %v524_v0 = vmul.u32 14564, %v521_v38  ;;  %vm8537_vm12 = vcmp.lt.s32.totalorder %v1505_v60, 16 }
 0x296   : > { %v4266_v9 = vmax.f32 %v4230_v32, 0.0  ;;  %v3547_v52 = vadd.f32 %v3441_v54, %v8004_v48  ;;  %v8484_v13 = vpop.f32.mrf.mxu0  ;;  %v505_v32 = vadd.s32 %v499_v43, %v495_v21  ;;  %v456_v54 = vmul.u32 18, %v455_v46 }
 0x297   : > { %v483_v58 = vadd.s32 %v482_v6, %v473_v36  ;;  %v506_v44 = vadd.s32 %v504_v24, %v498_v23  ;;  %v522_v46 = vshrl.u32 %v8477_v63, 16  ;;  %v3230_v36 = vpop.f32.mrf.mxu1  ;;  %v8507_v23 = vmul.u32 58254, %v521_v38 }
 0x298   : > { %v4302_v48 = vsel %vm8426_vm0, %v4266_v9, 0.0  ;;  %v3833_v2 = vadd.f32 %v3727_v8, %v3547_v52  ;;  %vm507_vm10 = vc.u32 %v505_v32, %v501_v40  ;;  %v8510_v31 = vsub.s32 %v8306_v16, %v456_v54 }
 0x299   : > { %4338 = vst [vmem:[#allocation2 + $0x13] sm:$0xff] %v4302_v48  ;;  %4063 = vmatmul.f32.gmra.mxu0 %v3958_v7  ;;  %v508_v21 = vsel %vm507_vm10, 1, %v10533_v57  ;;  %v484_v8 = vshrl.u32 %v483_v58, 4  ;;  %v8512_v9 = vmul.u32 14564, %v522_v46  ;;  %v8515_v52 = vadd.s32 64, %v8204_v33  ;;  %v3387_v48 = vld [vmem:[%s7747_s8 + $0xbc] sm:$0xff] }
 0x29a   : > { %v4119_v39 = vadd.f32 %v8430_v5, %v3833_v2  ;;  %3491 = vmatmul.f32.gmra.mxu2 %v3386_v17  ;;  %3777 = vmatmul.f32.gmra.mxu3 %v3672_v51  ;;  %v510_v59 = vadd.s32 %v508_v21, %v506_v44  ;;  %v3959_v44 = vld [vmem:[%s7747_s8 + $0xbe] sm:$0xff]  ;;  %v528_v51 = vshll.u32 %v8507_v23, 16  ;;  %v8532_v6 = vadd.f32 %v8450_v15, %v8172_v11  ;;  %v4780_v15 = vld [vmem:[#allocation9 + $0xe0] sm:$0xff] }
 0x29b   : > { %v3673_v2 = vld [vmem:[%s7747_s8 + $0xbd] sm:$0xff]  ;;  %v527_v24 = vmul.u32 58254, %v522_v46  ;;  %v1506_v11 = vsel %vm8525_vm11, %v1470_v42, %v8457_v10  ;;  %v530_v60 = vshll.u32 %v8512_v9, 16  ;;  %v550_v46 = vand.u32 65535, %v8515_v52  ;;  %4787 = vmatpush.msrb.mxu2 %v4780_v15 }
 0x29c   : > { %v4231_v5 = vadd.f32 %v8444_v4, %v4119_v39  ;;  %v511_v16 = vadd.s32 %v510_v59, %v500_v34  ;;  %v485_v34 = vmul.u32 18, %v484_v8  ;;  %vm532_vm13 = vc.u32 %v524_v0, %v528_v51 }
 0x29d   : > { %v3444_v43 = vpop.f32.mrf.mxu2  ;;  %v3730_v22 = vpop.f32.mrf.mxu3  ;;  %vm1363_vm14 = vcmp.ne.s32.totalorder %v8510_v31, 0  ;;  %vm1399_vm15 = vcmp.lt.s32.totalorder %v8510_v31, 0  ;;  %v534_v10 = vadd.s32 %v528_v51, %v524_v0  ;;  %vm8563_vm0 = vcmp.lt.s32.totalorder %v1506_v11, 16 }
 0x29e   : > { %v4267_v7 = vmax.f32 %v4231_v5, 0.0  ;;  %v3548_v40 = vadd.f32 %v3444_v43, %v8011_v37  ;;  %v8518_v58 = vpop.f32.mrf.mxu0  ;;  %v8535_v37 = vadd.f32 %v3230_v36, %v8180_v20  ;;  %v512_v21 = vadd.s32 %v511_v16, %v502_v30  ;;  %v5639_v20 = vld [vmem:[#allocation9 + $0x268] sm:$0xff]  ;;  %vm8571_vm1 = vmand %vm1399_vm15, %vm1363_vm14 }
 0x29f   : > { %v533_v30 = vsel %vm532_vm13, 1, %v10533_v57  ;;  %v8555_v36 = vadd.s32 18, %v8510_v31  ;;  %5644 = vmatpush.msrb.mxu1 %v5639_v20  ;;  %v551_v5 = vshrl.u32 %v8515_v52, 16  ;;  %v8560_v8 = vsub.s32 %v8353_v56, %v485_v34 }
 0x2a0   : > { %v4303_v54 = vsel %vm8480_vm6, %v4267_v7, 0.0  ;;  %v3834_v38 = vadd.f32 %v3730_v22, %v3548_v40  ;;  %v4448_v39 = vld [vmem:[#allocation2 + $0x10] sm:$0xff]  ;;  %v535_v42 = vadd.s32 %v533_v30, %v527_v24  ;;  %v513_v59 = vshrl.u32 %v512_v21, 4  ;;  %v5352_v7 = vld [vmem:[#allocation9 + $0x1e0] sm:$0xff] }
 0x2a1   : > { %4339 = vst [vmem:[#allocation2 + $0x1b] sm:$0xff] %v4303_v54  ;;  %4520 = vmatmul.f32.gmra.mxu1 %v4448_v39  ;;  %4066 = vmatmul.f32.gmra.mxu0 %v3959_v44  ;;  %v529_v43 = vshrl.u32 %v8507_v23, 16  ;;  %vm536_vm2 = vc.u32 %v534_v10, %v530_v60  ;;  %v553_v56 = vmul.u32 14564, %v550_v46  ;;  %v8575_v44 = vmul.u32 58254, %v550_v46  ;;  %v3388_v54 = vld [vmem:[%s7747_s8 + $0xc4] sm:$0xff] }
 0x2a2   : > { %v4120_v61 = vadd.f32 %v8484_v13, %v3834_v38  ;;  %3494 = vmatmul.f32.gmra.mxu2 %v3387_v48  ;;  %3780 = vmatmul.f32.gmra.mxu3 %v3673_v2  ;;  %v8577_v23 = vmul.u32 14564, %v551_v5  ;;  %v3960_v48 = vld [vmem:[%s7747_s8 + $0xc6] sm:$0xff]  ;;  %v531_v2 = vshrl.u32 %v8512_v9, 16  ;;  %v537_v24 = vsel %vm536_vm2, 1, %v10533_v57 }
 0x2a3   : > { %v3674_v38 = vld [vmem:[%s7747_s8 + $0xc5] sm:$0xff]  ;;  %v539_v39 = vadd.s32 %v537_v24, %v535_v42  ;;  %v556_v34 = vmul.u32 58254, %v551_v5  ;;  %v557_v21 = vshll.u32 %v8575_v44, 16  ;;  %v8589_v11 = vadd.s32 72, %v8204_v33  ;;  %5359 = vmatpush.msrb.mxu0 %v5352_v7 }
 0x2a4   : > { %v4232_v13 = vadd.f32 %v8444_v4, %v4120_v61  ;;  %v1507_v9 = vsel %vm8571_vm1, %v8555_v36, %v8510_v31  ;;  %v559_v60 = vshll.u32 %v8577_v23, 16  ;;  %vm1364_vm3 = vcmp.ne.s32.totalorder %v8560_v8, 0  ;;  %v5066_v46 = vld [vmem:[#allocation9 + $0x160] sm:$0xff] }
 0x2a5   : > { %v3447_v22 = vpop.f32.mrf.mxu2  ;;  %v3733_v0 = vpop.f32.mrf.mxu3  ;;  %vm1400_vm4 = vcmp.lt.s32.totalorder %v8560_v8, 0  ;;  %v540_v61 = vadd.s32 %v539_v39, %v529_v43  ;;  %vm561_vm5 = vc.u32 %v553_v56, %v557_v21  ;;  %v514_v30 = vmul.u32 18, %v513_v59  ;;  %5073 = vmatpush.msrb.mxu3 %v5066_v46  ;;  %v3389_v39 = vld [vmem:[%s7747_s8 + $0xcc] sm:$0xff] }
 0x2a6   : > { %v4268_v17 = vmax.f32 %v4232_v13, 0.0  ;;  %v3549_v16 = vadd.f32 %v3447_v22, %v8018_v19  ;;  %v8580_v51 = vpop.f32.mrf.mxu0  ;;  %v562_v10 = vsel %vm561_vm5, 1, %v10533_v57  ;;  %v563_v31 = vadd.s32 %v557_v21, %v553_v56  ;;  %vm8636_vm7 = vmand %vm1400_vm4, %vm1364_vm3 }
 0x2a7   : > { %v541_v36 = vadd.s32 %v540_v61, %v531_v2  ;;  %v558_v42 = vshrl.u32 %v8575_v44, 16  ;;  %v564_v5 = vadd.s32 %v562_v10, %v556_v34  ;;  %v579_v13 = vand.u32 65535, %v8589_v11  ;;  %v3675_v34 = vld [vmem:[%s7747_s8 + $0xcd] sm:$0xff] }
 0x2a8   : > { %v4304_v20 = vsel %vm8537_vm12, %v4268_v17, 0.0  ;;  %v3835_v19 = vadd.f32 %v3733_v0, %v3549_v16  ;;  %v4449_v15 = vld [vmem:[#allocation2 + $0x18] sm:$0xff]  ;;  %v560_v43 = vshrl.u32 %v8577_v23, 16  ;;  %vm565_vm6 = vc.u32 %v563_v31, %v559_v60  ;;  %v8610_v16 = vpop.f32.mrf.mxu1 }
 0x2a9   : > { %4340 = vst [vmem:[#allocation2 + $0x23] sm:$0xff] %v4304_v20  ;;  %4523 = vmatmul.f32.gmra.mxu1 %v4449_v15  ;;  %4069 = vmatmul.f32.gmra.mxu0 %v3960_v48  ;;  %v542_v40 = vshrl.u32 %v541_v36, 4  ;;  %v566_v56 = vsel %vm565_vm6, 1, %v10533_v57  ;;  %v582_v17 = vmul.u32 14564, %v579_v13  ;;  %v8608_v44 = vmul.u32 58254, %v579_v13  ;;  %v3961_v23 = vld [vmem:[%s7747_s8 + $0xce] sm:$0xff] }
 0x2aa   : > { %v4121_v32 = vadd.f32 %v8518_v58, %v3835_v19  ;;  %3497 = vmatmul.f32.gmra.mxu2 %v3388_v54  ;;  %3783 = vmatmul.f32.gmra.mxu3 %v3674_v38  ;;  %v580_v58 = vshrl.u32 %v8589_v11, 16  ;;  %v568_v54 = vadd.s32 %v566_v56, %v564_v5  ;;  %v8621_v21 = vadd.s32 18, %v8560_v8  ;;  %v5638_v10 = vld [vmem:[#allocation9 + $0x260] sm:$0xff] }
 0x2ab   : > { %v8624_v20 = vsub.s32 %v8411_v25, %v514_v30  ;;  %v586_v19 = vshll.u32 %v8608_v44, 16  ;;  %v8628_v15 = vadd.s32 80, %v8204_v33  ;;  %vm8640_vm8 = vcmp.lt.s32.totalorder %v1507_v9, 16  ;;  %5645 = vmatpush.msrb.mxu1 %v5638_v10 }
 0x2ac   : > { %v4233_v22 = vadd.f32 %v8444_v4, %v4121_v32  ;;  %v8616_v38 = vmul.u32 14564, %v580_v58  ;;  %v569_v25 = vadd.s32 %v568_v54, %v558_v42  ;;  %v585_v32 = vmul.u32 58254, %v580_v58 }
 0x2ad   : > { %v3450_v59 = vpop.f32.mrf.mxu2  ;;  %v3736_v0 = vpop.f32.mrf.mxu3  ;;  %vm590_vm9 = vc.u32 %v582_v17, %v586_v19  ;;  %v608_v36 = vand.u32 65535, %v8628_v15  ;;  %v543_v42 = vmul.u32 18, %v542_v40  ;;  %vm1365_vm10 = vcmp.ne.s32.totalorder %v8624_v20, 0 }
 0x2ae   : > { %v4269_v48 = vmax.f32 %v4233_v22, 0.0  ;;  %v3550_v2 = vadd.f32 %v3450_v59, %v8025_v62  ;;  %v8613_v24 = vpop.f32.mrf.mxu0  ;;  %v588_v31 = vshll.u32 %v8616_v38, 16  ;;  %v570_v13 = vadd.s32 %v569_v25, %v560_v43 }
 0x2af   : > { %v591_v9 = vsel %vm590_vm9, 1, %v10533_v57  ;;  %v1508_v22 = vsel %vm8636_vm7, %v8621_v21, %v8560_v8  ;;  %vm1401_vm11 = vcmp.lt.s32.totalorder %v8624_v20, 0  ;;  %v592_v58 = vadd.s32 %v586_v19, %v582_v17  ;;  %v3390_v19 = vld [vmem:[%s7747_s8 + $0xd4] sm:$0xff] }
 0x2b0   : > { %v4305_v62 = vsel %vm8563_vm0, %v4269_v48, 0.0  ;;  %v3836_v60 = vadd.f32 %v3736_v0, %v3550_v2  ;;  %v4450_v46 = vld [vmem:[#allocation2 + $0x20] sm:$0xff]  ;;  %v8656_v43 = vadd.s32 18, %v8624_v20  ;;  %v593_v59 = vadd.s32 %v591_v9, %v585_v32  ;;  %vm8675_vm13 = vmand %vm1401_vm11, %vm1365_vm10  ;;  %v3236_v25 = vpop.f32.mrf.mxu1 }
 0x2b1   : > { %4341 = vst [vmem:[#allocation2 + $0x2b] sm:$0xff] %v4305_v62  ;;  %4526 = vmatmul.f32.gmra.mxu1 %v4450_v46  ;;  %4072 = vmatmul.f32.gmra.mxu0 %v3961_v23  ;;  %v609_v0 = vshrl.u32 %v8628_v15, 16  ;;  %v571_v56 = vshrl.u32 %v570_v13, 4  ;;  %vm594_vm12 = vc.u32 %v592_v58, %v588_v31  ;;  %v611_v48 = vmul.u32 14564, %v608_v36  ;;  %v3676_v62 = vld [vmem:[%s7747_s8 + $0xd5] sm:$0xff] }
 0x2b2   : > { %v4122_v5 = vadd.f32 %v8580_v51, %v3836_v60  ;;  %3500 = vmatmul.f32.gmra.mxu2 %v3389_v39  ;;  %3786 = vmatmul.f32.gmra.mxu3 %v3675_v34  ;;  %v8659_v2 = vmul.u32 58254, %v608_v36  ;;  %v3962_v39 = vld [vmem:[%s7747_s8 + $0xd6] sm:$0xff]  ;;  %v8666_v34 = vsub.s32 %v8477_v63, %v543_v42  ;;  %v587_v21 = vshrl.u32 %v8608_v44, 16 }
 0x2b3   : > { %v595_v46 = vsel %vm594_vm12, 1, %v10533_v57  ;;  %v8681_v61 = vmul.u32 14564, %v609_v0  ;;  %v614_v31 = vmul.u32 58254, %v609_v0  ;;  %v572_v36 = vmul.u32 18, %v571_v56 }
 0x2b4   : > { %v4234_v51 = vadd.f32 %v8444_v4, %v4122_v5  ;;  %v615_v63 = vshll.u32 %v8659_v2, 16  ;;  %v597_v10 = vadd.s32 %v595_v46, %v593_v59  ;;  %v4779_v5 = vld [vmem:[#allocation9 + $0xd8] sm:$0xff]  ;;  %v8689_v9 = vadd.f32 %v8610_v16, %v8186_v3 }
 0x2b5   : > { %v3453_v40 = vpop.f32.mrf.mxu2  ;;  %v3739_v8 = vpop.f32.mrf.mxu3  ;;  %v617_v42 = vshll.u32 %v8681_v61, 16  ;;  %vm8691_vm15 = vcmp.lt.s32.totalorder %v1508_v22, 16  ;;  %vm1366_vm0 = vcmp.ne.s32.totalorder %v8666_v34, 0  ;;  %4788 = vmatpush.msrb.mxu2 %v4779_v5  ;;  %vm1402_vm2 = vcmp.lt.s32.totalorder %v8666_v34, 0  ;;  %v5351_v5 = vld [vmem:[#allocation9 + $0x1d8] sm:$0xff] }
 0x2b6   : > { %v4270_v23 = vmax.f32 %v4234_v51, 0.0  ;;  %v3551_v17 = vadd.f32 %v3453_v40, %v8032_v55  ;;  %v8662_v54 = vpop.f32.mrf.mxu0  ;;  %v589_v55 = vshrl.u32 %v8616_v38, 16  ;;  %v5065_v38 = vld [vmem:[#allocation9 + $0x158] sm:$0xff]  ;;  %vm619_vm14 = vc.u32 %v611_v48, %v615_v63  ;;  %vm8742_vm5 = vmand %vm1402_vm2, %vm1366_vm0  ;;  %5360 = vmatpush.msrb.mxu0 %v5351_v5 }
 0x2b7   : > { %v621_v13 = vadd.s32 %v615_v63, %v611_v48  ;;  %v1509_v51 = vsel %vm8675_vm13, %v8656_v43, %v8624_v20  ;;  %5074 = vmatpush.msrb.mxu3 %v5065_v38  ;;  %v598_v59 = vadd.s32 %v597_v10, %v587_v21  ;;  %v620_v3 = vsel %vm619_vm14, 1, %v10533_v57  ;;  %v5637_v38 = vld [vmem:[#allocation9 + $0x258] sm:$0xff] }
 0x2b8   : > { %v4306_v44 = vsel %vm8640_vm8, %v4270_v23, 0.0  ;;  %v3837_v32 = vadd.f32 %v3739_v8, %v3551_v17  ;;  %v4451_v7 = vld [vmem:[#allocation2 + $0x28] sm:$0xff]  ;;  %v622_v22 = vadd.s32 %v620_v3, %v614_v31  ;;  %v8707_v43 = vsub.s32 %v8515_v52, %v572_v36  ;;  %5646 = vmatpush.msrb.mxu1 %v5637_v38 }
 0x2b9   : > { %4342 = vst [vmem:[#allocation2 + $0x33] sm:$0xff] %v4306_v44  ;;  %4529 = vmatmul.f32.gmra.mxu1 %v4451_v7  ;;  %4075 = vmatmul.f32.gmra.mxu0 %v3962_v39  ;;  %vm623_vm1 = vc.u32 %v621_v13, %v617_v42  ;;  %v599_v8 = vadd.s32 %v598_v59, %v589_v55  ;;  %v8710_v56 = vadd.s32 88, %v8204_v33  ;;  %v618_v39 = vshrl.u32 %v8681_v61, 16  ;;  %v10568_v7 = vld [vmem:[#allocation14_spill] sm:$0xff]  ;;  %v8735_v42 = vpop.f32.mrf.mxu1 }
 0x2ba   : > { %v4123_v58 = vadd.f32 %v8613_v24, %v3837_v32  ;;  %3503 = vmatmul.f32.gmra.mxu2 %v3390_v19  ;;  %3789 = vmatmul.f32.gmra.mxu3 %v3676_v62  ;;  %v616_v24 = vshrl.u32 %v8659_v2, 16  ;;  %v624_v0 = vsel %vm623_vm1, 1, %v10533_v57  ;;  %v3963_v2 = vld [vmem:[%s7747_s8 + $0xde] sm:$0xff]  ;;  %v8722_v55 = vadd.s32 96, %v8204_v33 }
 0x2bb   : > { %v626_v21 = vadd.s32 %v624_v0, %v622_v22  ;;  %v3391_v19 = vld [vmem:[%s7747_s8 + $0xdc] sm:$0xff]  ;;  %v600_v60 = vshrl.u32 %v599_v8, 4  ;;  %v637_v46 = vand.u32 65535, %v8710_v56  ;;  %v638_v52 = vshrl.u32 %v8710_v56, 16 }
 0x2bc   : > { %v4235_v16 = vadd.f32 %v8444_v4, %v4123_v58  ;;  %v3677_v62 = vld [vmem:[%s7747_s8 + $0xdd] sm:$0xff]  ;;  %vm8726_vm3 = vcmp.lt.s32.totalorder %v1509_v51, 16  ;;  %v8731_v10 = vadd.f32 %v3236_v25, %v10568_v7  ;;  %v1474_v31 = vadd.s32 18, %v8666_v34 }
 0x2bd   : > { %v3456_v40 = vpop.f32.mrf.mxu2  ;;  %v3742_v20 = vpop.f32.mrf.mxu3  ;;  %v627_v32 = vadd.s32 %v626_v21, %v616_v24  ;;  %vm1367_vm4 = vcmp.ne.s32.totalorder %v8707_v43, 0  ;;  %v601_v36 = vmul.u32 18, %v600_v60  ;;  %v8746_v58 = vmul.u32 58254, %v637_v46  ;;  %v3392_v60 = vld [vmem:[%s7747_s8 + $0xe4] sm:$0xff] }
 0x2be   : > { %v4271_v48 = vmax.f32 %v4235_v16, 0.0  ;;  %v3552_v23 = vadd.f32 %v3456_v40, %v8039_v35  ;;  %v8713_v17 = vpop.f32.mrf.mxu0  ;;  %v8748_v51 = vmul.u32 14564, %v638_v52  ;;  %vm1403_vm6 = vcmp.lt.s32.totalorder %v8707_v43, 0  ;;  %v4778_v35 = vld [vmem:[#allocation9 + $0xd0] sm:$0xff] }
 0x2bf   : > { %v628_v30 = vadd.s32 %v627_v32, %v618_v39  ;;  %v8752_v59 = vsub.s32 %v8589_v11, %v601_v36  ;;  %v666_v3 = vand.u32 65535, %v8722_v55  ;;  %v644_v22 = vshll.u32 %v8746_v58, 16  ;;  %vm8775_vm9 = vmand %vm1403_vm6, %vm1367_vm4  ;;  %4789 = vmatpush.msrb.mxu2 %v4778_v35 }
 0x2c0   : > { %v4307_v63 = vsel %vm8691_vm15, %v4271_v48, 0.0  ;;  %v3838_v44 = vadd.f32 %v3742_v20, %v3552_v23  ;;  %v4452_v61 = vld [vmem:[#allocation2 + $0x30] sm:$0xff]  ;;  %v667_v0 = vshrl.u32 %v8722_v55, 16  ;;  %v1510_v11 = vsel %vm8742_vm5, %v1474_v31, %v8666_v34 }
 0x2c1   : > { %4343 = vst [vmem:[#allocation2 + $0x3b] sm:$0xff] %v4307_v63  ;;  %4532 = vmatmul.f32.gmra.mxu1 %v4452_v61  ;;  %4078 = vmatmul.f32.gmra.mxu0 %v3963_v2  ;;  %v629_v24 = vshrl.u32 %v628_v30, 4  ;;  %v1475_v8 = vadd.s32 18, %v8707_v43  ;;  %vm1368_vm7 = vcmp.ne.s32.totalorder %v8752_v59, 0  ;;  %v646_v48 = vshll.u32 %v8748_v51, 16  ;;  %v10571_v2 = vld [vmem:[#allocation22_spill] sm:$0xff] }
 0x2c2   : > { %v4124_v13 = vadd.f32 %v8662_v54, %v3838_v44  ;;  %3506 = vmatmul.f32.gmra.mxu2 %v3391_v19  ;;  %3792 = vmatmul.f32.gmra.mxu3 %v3677_v62  ;;  %v640_v54 = vmul.u32 14564, %v637_v46  ;;  %v3964_v19 = vld [vmem:[%s7747_s8 + $0xe6] sm:$0xff]  ;;  %vm1404_vm8 = vcmp.lt.s32.totalorder %v8752_v59, 0  ;;  %v643_v63 = vmul.u32 58254, %v638_v52 }
 0x2c3   : > { %v630_v62 = vmul.u32 18, %v629_v24  ;;  %v3678_v46 = vld [vmem:[%s7747_s8 + $0xe5] sm:$0xff]  ;;  %v8779_v61 = vmul.u32 58254, %v666_v3  ;;  %v8784_v36 = vadd.s32 18, %v8752_v59  ;;  %v8786_v5 = vmul.u32 14564, %v667_v0  ;;  %vm8796_vm12 = vmand %vm1404_vm8, %vm1368_vm7 }
 0x2c4   : > { %v4236_v16 = vadd.f32 %v8444_v4, %v4124_v13  ;;  %vm648_vm10 = vc.u32 %v640_v54, %v644_v22  ;;  %v650_v44 = vadd.s32 %v644_v22, %v640_v54  ;;  %vm8788_vm11 = vcmp.lt.s32.totalorder %v1510_v11, 16  ;;  %v5064_v13 = vld [vmem:[#allocation9 + $0x150] sm:$0xff] }
 0x2c5   : > { %v3459_v40 = vpop.f32.mrf.mxu2  ;;  %v3745_v20 = vpop.f32.mrf.mxu3  ;;  %v649_v25 = vsel %vm648_vm10, 1, %v10533_v57  ;;  %v669_v30 = vmul.u32 14564, %v666_v3  ;;  %v8806_v24 = vsub.s32 %v8628_v15, %v630_v62  ;;  %v645_v22 = vshrl.u32 %v8746_v58, 16  ;;  %5075 = vmatpush.msrb.mxu3 %v5064_v13 }
 0x2c6   : > { %v4272_v23 = vmax.f32 %v4236_v16, 0.0  ;;  %v3553_v39 = vadd.f32 %v3459_v40, %v10571_v2  ;;  %v8765_v21 = vpop.f32.mrf.mxu0  ;;  %vm652_vm13 = vc.u32 %v650_v44, %v646_v48  ;;  %v1511_v16 = vsel %vm8775_vm9, %v1475_v8, %v8707_v43 }
 0x2c7   : > { %v651_v40 = vadd.s32 %v649_v25, %v643_v63  ;;  %v653_v11 = vsel %vm652_vm13, 1, %v10533_v57  ;;  %v673_v3 = vshll.u32 %v8779_v61, 16  ;;  %v1512_v15 = vsel %vm8796_vm12, %v8784_v36, %v8752_v59  ;;  %v3967_v59 = vld [vmem:[%s7747_s8 + $0xfe] sm:$0xff] }
 0x2c8   : > { %v4308_v32 = vsel %vm8726_vm3, %v4272_v23, 0.0  ;;  %v3839_v7 = vadd.f32 %v3745_v20, %v3553_v39  ;;  %v4453_v31 = vld [vmem:[#allocation2 + $0x38] sm:$0xff]  ;;  %v672_v20 = vmul.u32 58254, %v667_v0  ;;  %v647_v43 = vshrl.u32 %v8748_v51, 16 }
 0x2c9   : > { %4344 = vst [vmem:[#allocation2 + $0x43] sm:$0xff] %v4308_v32  ;;  %4535 = vmatmul.f32.gmra.mxu1 %v4453_v31  ;;  %4081 = vmatmul.f32.gmra.mxu0 %v3964_v19  ;;  %v675_v58 = vshll.u32 %v8786_v5, 16  ;;  %vm8820_vm14 = vcmp.lt.s32.totalorder %v1511_v16, 16  ;;  %v655_v2 = vadd.s32 %v653_v11, %v651_v40  ;;  %v674_v39 = vshrl.u32 %v8779_v61, 16  ;;  %v3965_v51 = vld [vmem:[%s7747_s8 + $0xee] sm:$0xff]  ;;  %v5350_v11 = vld [vmem:[#allocation9 + $0x1d0] sm:$0xff] }
 0x2ca   : > { %v4125_v54 = vadd.f32 %v8713_v17, %v3839_v7  ;;  %3509 = vmatmul.f32.gmra.mxu2 %v3392_v60  ;;  %3795 = vmatmul.f32.gmra.mxu3 %v3678_v46  ;;  %v8811_v17 = vpop.f32.mrf.mxu1  ;;  %vm677_vm15 = vc.u32 %v669_v30, %v673_v3  ;;  %v679_v19 = vadd.s32 %v673_v3, %v669_v30  ;;  %v10580_v60 = vld [vmem:[#allocation23_spill] sm:$0xff]  ;;  %v8831_v44 = vadd.s32 104, %v8204_v33 }
 0x2cb   : > { %v678_v63 = vsel %vm677_vm15, 1, %v10533_v57  ;;  %v3393_v32 = vld [vmem:[%s7747_s8 + $0xec] sm:$0xff]  ;;  %vm1369_vm0 = vcmp.ne.s32.totalorder %v8806_v24, 0  ;;  %vm1405_vm1 = vcmp.lt.s32.totalorder %v8806_v24, 0  ;;  %v656_v61 = vadd.s32 %v655_v2, %v645_v22  ;;  %v5636_v22 = vld [vmem:[#allocation9 + $0x250] sm:$0xff]  ;;  %5361 = vmatpush.msrb.mxu0 %v5350_v11 }
 0x2cc   : > { %v4237_v48 = vadd.f32 %v8444_v4, %v4125_v54  ;;  %v3679_v7 = vld [vmem:[%s7747_s8 + $0xed] sm:$0xff]  ;;  %v680_v31 = vadd.s32 %v678_v63, %v672_v20  ;;  %vm681_vm2 = vc.u32 %v679_v19, %v675_v58  ;;  %v8838_v35 = vadd.s32 112, %v8204_v33  ;;  %5647 = vmatpush.msrb.mxu1 %v5636_v22  ;;  %v3680_v22 = vld [vmem:[%s7747_s8 + $0xf5] sm:$0xff]  ;;  %vm8883_vm7 = vmand %vm1405_vm1, %vm1369_vm0 }
 0x2cd   : > { %v3462_v8 = vpop.f32.mrf.mxu2  ;;  %v3748_v23 = vpop.f32.mrf.mxu3  ;;  %v682_v54 = vsel %vm681_vm2, 1, %v10533_v57  ;;  %v695_v16 = vand.u32 65535, %v8831_v44  ;;  %v657_v40 = vadd.s32 %v656_v61, %v647_v43  ;;  %v676_v20 = vshrl.u32 %v8786_v5, 16  ;;  %v3394_v11 = vld [vmem:[%s7747_s8 + $0xf4] sm:$0xff] }
 0x2ce   : > { %v4273_v62 = vmax.f32 %v4237_v48, 0.0  ;;  %v3554_v46 = vadd.f32 %v3462_v8, %v10580_v60  ;;  %v8826_v34 = vpop.f32.mrf.mxu0  ;;  %v684_v3 = vadd.s32 %v682_v54, %v680_v31  ;;  %v696_v48 = vshrl.u32 %v8831_v44, 16  ;;  %v3966_v54 = vld [vmem:[%s7747_s8 + $0xf6] sm:$0xff] }
 0x2cf   : > { %v8848_v58 = vadd.s32 18, %v8806_v24  ;;  %v698_v8 = vmul.u32 14564, %v695_v16  ;;  %v658_v2 = vshrl.u32 %v657_v40, 4  ;;  %v724_v5 = vand.u32 65535, %v8838_v35 }
 0x2d0   : > { %v4309_v13 = vsel %vm8788_vm11, %v4273_v62, 0.0  ;;  %v3840_v25 = vadd.f32 %v3748_v23, %v3554_v46  ;;  %v4454_v30 = vld [vmem:[#allocation2 + $0x40] sm:$0xff]  ;;  %v8850_v23 = vmul.u32 58254, %v695_v16  ;;  %v685_v43 = vadd.s32 %v684_v3, %v674_v39 }
 0x2d1   : > { %4345 = vst [vmem:[#allocation2 + $0x4b] sm:$0xff] %v4309_v13  ;;  %4538 = vmatmul.f32.gmra.mxu1 %v4454_v30  ;;  %4084 = vmatmul.f32.gmra.mxu0 %v3965_v51  ;;  %v8852_v19 = vmul.u32 14564, %v696_v48  ;;  %v725_v46 = vshrl.u32 %v8838_v35, 16  ;;  %v10581_v13 = vld [vmem:[#allocation24_spill] sm:$0xff]  ;;  %vm8916_vm9 = vcmp.lt.s32.totalorder %v1512_v15, 16 }
 0x2d2   : > { %v4126_v38 = vadd.f32 %v8765_v21, %v3840_v25  ;;  %3512 = vmatmul.f32.gmra.mxu2 %v3393_v32  ;;  %3798 = vmatmul.f32.gmra.mxu3 %v3679_v7  ;;  %v701_v21 = vmul.u32 58254, %v696_v48  ;;  %v702_v60 = vshll.u32 %v8850_v23, 16  ;;  %v659_v32 = vmul.u32 18, %v658_v2  ;;  %v8864_v40 = vpop.f32.mrf.mxu1  ;;  %v3395_v15 = vld [vmem:[%s7747_s8 + $0xfc] sm:$0xff] }
 0x2d3   : > { %v686_v7 = vadd.s32 %v685_v43, %v676_v20  ;;  %v703_v39 = vshrl.u32 %v8850_v23, 16  ;;  %v704_v61 = vshll.u32 %v8852_v19, 16 }
 0x2d4   : > { %v4238_v62 = vadd.f32 %v8444_v4, %v4126_v38  ;;  %vm706_vm3 = vc.u32 %v698_v8, %v702_v60  ;;  %v708_v16 = vadd.s32 %v702_v60, %v698_v8  ;;  %v8869_v3 = vsub.s32 %v8710_v56, %v659_v32  ;;  %v4777_v8 = vld [vmem:[#allocation9 + $0xc8] sm:$0xff] }
 0x2d5   : > { %v3465_v51 = vpop.f32.mrf.mxu2  ;;  %v3751_v63 = vpop.f32.mrf.mxu3  ;;  %v687_v20 = vshrl.u32 %v686_v7, 4  ;;  %v707_v48 = vsel %vm706_vm3, 1, %v10533_v57  ;;  %v8872_v38 = vmul.u32 58254, %v724_v5  ;;  %v727_v60 = vmul.u32 14564, %v724_v5  ;;  %v10584_v5 = vld [vmem:[#allocation15_spill] sm:$0xff]  ;;  %4790 = vmatpush.msrb.mxu2 %v4777_v8 }
 0x2d6   : > { %v4274_v31 = vmax.f32 %v4238_v62, 0.0  ;;  %v3555_v25 = vadd.f32 %v3465_v51, %v10581_v13  ;;  %v8861_v30 = vpop.f32.mrf.mxu0  ;;  %v709_v62 = vadd.s32 %v707_v48, %v701_v21  ;;  %vm710_vm4 = vc.u32 %v708_v16, %v704_v61 }
 0x2d7   : > { %vm1370_vm5 = vcmp.ne.s32.totalorder %v8869_v3, 0  ;;  %vm1406_vm6 = vcmp.lt.s32.totalorder %v8869_v3, 0  ;;  %v688_v56 = vmul.u32 18, %v687_v20  ;;  %v8888_v21 = vadd.s32 18, %v8869_v3 }
 0x2d8   : > { %v4310_v23 = vsel %vm8820_vm14, %v4274_v31, 0.0  ;;  %v3841_v2 = vadd.f32 %v3751_v63, %v3555_v25  ;;  %v4455_v43 = vld [vmem:[#allocation2 + $0x48] sm:$0xff]  ;;  %v5063_v63 = vld [vmem:[#allocation9 + $0x148] sm:$0xff]  ;;  %v711_v32 = vsel %vm710_vm4, 1, %v10533_v57  ;;  %v8891_v7 = vmul.u32 14564, %v725_v46  ;;  %vm8897_vm8 = vmand %vm1406_vm6, %vm1370_vm5 }
 0x2d9   : > { %4346 = vst [vmem:[#allocation2 + $0x53] sm:$0xff] %v4310_v23  ;;  %4541 = vmatmul.f32.gmra.mxu1 %v4455_v43  ;;  %4087 = vmatmul.f32.gmra.mxu0 %v3966_v54  ;;  %v705_v31 = vshrl.u32 %v8852_v19, 16  ;;  %v713_v13 = vadd.s32 %v711_v32, %v709_v62  ;;  %v731_v25 = vshll.u32 %v8872_v38, 16  ;;  %v10587_v54 = vld [vmem:[#allocation16_spill] sm:$0xff]  ;;  %v10590_v23 = vld [vmem:[#allocation25_spill] sm:$0xff]  ;;  %v1514_v36 = vsel %vm8897_vm8, %v8888_v21, %v8869_v3  ;;  %v5349_v21 = vld [vmem:[#allocation9 + $0x1c8] sm:$0xff] }
 0x2da   : > { %v4127_v51 = vadd.f32 %v8826_v34, %v3841_v2  ;;  %3515 = vmatmul.f32.gmra.mxu2 %v3394_v11  ;;  %3801 = vmatmul.f32.gmra.mxu3 %v3680_v22  ;;  %v8895_v34 = vadd.f32 %v8735_v42, %v10584_v5  ;;  %v8905_v16 = vadd.f32 %v8811_v17, %v10587_v54  ;;  %v730_v22 = vmul.u32 58254, %v725_v46  ;;  %v3681_v43 = vld [vmem:[%s7747_s8 + $0xfd] sm:$0xff]  ;;  %v8966_v19 = vld [vmem:[%s10494_s2] ss:$0 sm:$0xff] }
 0x2db   : > { %5076 = vmatpush.msrb.mxu3 %v5063_v63  ;;  %v8909_v11 = vsub.s32 %v8722_v55, %v688_v56  ;;  %v714_v48 = vadd.s32 %v713_v13, %v703_v39  ;;  %v733_v55 = vshll.u32 %v8891_v7, 16  ;;  %vm735_vm10 = vc.u32 %v727_v60, %v731_v25  ;;  %v3248_v63 = vpop.f32.mrf.mxu1  ;;  %5362 = vmatpush.msrb.mxu0 %v5349_v21 }
 0x2dc   : > { %v4239_v42 = vadd.f32 %v8444_v4, %v4127_v51  ;;  %v1513_v4 = vsel %vm8883_vm7, %v8848_v58, %v8806_v24  ;;  %v732_v24 = vshrl.u32 %v8872_v38, 16  ;;  %v736_v58 = vsel %vm735_vm10, 1, %v10533_v57 }
 0x2dd   : > { %v3468_v20 = vpop.f32.mrf.mxu2  ;;  %v3754_v17 = vpop.f32.mrf.mxu3  ;;  %v715_v62 = vadd.s32 %v714_v48, %v705_v31  ;;  %v737_v39 = vadd.s32 %v731_v25, %v727_v60  ;;  %vm1371_vm11 = vcmp.ne.s32.totalorder %v8909_v11, 0  ;;  %v738_v0 = vadd.s32 %v736_v58, %v730_v22  ;;  %v3682_v58 = vld [vmem:[%s7747_s8 + $0x105] sm:$0xff] }
 0x2de   : > { %v4275_v46 = vmax.f32 %v4239_v42, 0.0  ;;  %v3556_v52 = vadd.f32 %v3468_v20, %v10590_v23  ;;  %v8926_v2 = vpop.f32.mrf.mxu0  ;;  %vm1407_vm12 = vcmp.lt.s32.totalorder %v8909_v11, 0  ;;  %v8942_v38 = vadd.s32 120, %v8204_v33  ;;  %v10591_v42 = vld [vmem:[#allocation17_spill] sm:$0xff] }
 0x2df   : > { %v716_v3 = vshrl.u32 %v715_v62, 4  ;;  %vm739_vm13 = vc.u32 %v737_v39, %v733_v55  ;;  %v734_v32 = vshrl.u32 %v8891_v7, 16  ;;  %v8948_v61 = vadd.s32 128, %v8204_v33  ;;  %vm8987_vm0 = vmand %vm1407_vm12, %vm1371_vm11 }
 0x2e0   : > { %v4311_v56 = vsel %vm8916_vm9, %v4275_v46, 0.0  ;;  %v3842_v8 = vadd.f32 %v3754_v17, %v3556_v52  ;;  %v4456_v51 = vld [vmem:[#allocation2 + $0x50] sm:$0xff]  ;;  %v740_v5 = vsel %vm739_vm13, 1, %v10533_v57  ;;  %v753_v25 = vand.u32 65535, %v8942_v38  ;;  %v10596_v52 = vld [vmem:[#allocation26_spill] sm:$0xff] }
 0x2e1   : > { %4347 = vst [vmem:[#allocation2 + $0x5b] sm:$0xff] %v4311_v56  ;;  %4544 = vmatmul.f32.gmra.mxu1 %v4456_v51  ;;  %4090 = vmatmul.f32.gmra.mxu0 %v3967_v59  ;;  %v717_v31 = vmul.u32 18, %v716_v3  ;;  %v742_v13 = vadd.s32 %v740_v5, %v738_v0  ;;  %v754_v54 = vshrl.u32 %v8942_v38, 16  ;;  %v8957_v22 = vadd.f32 %v3248_v63, %v8251_v12  ;;  %v5635_v5 = vld [vmem:[#allocation9 + $0x248] sm:$0xff] }
 0x2e2   : > { %v4128_v60 = vadd.f32 %v8861_v30, %v3842_v8  ;;  %3518 = vmatmul.f32.gmra.mxu2 %v3395_v15  ;;  %3804 = vmatmul.f32.gmra.mxu3 %v3681_v43  ;;  %v8954_v30 = vadd.f32 %v8864_v40, %v10591_v42  ;;  %vm8959_vm14 = vcmp.lt.s32.totalorder %v1513_v4, 16  ;;  %vm8969_vm15 = vcmp.lt.s32.totalorder %v1514_v36, 16  ;;  %v3968_v43 = vld [vmem:[%s7747_s8 + $0x106] sm:$0xff] }
 0x2e3   : > { %v1479_v4 = vadd.s32 18, %v8909_v11  ;;  %v8975_v48 = vsub.s32 %v8831_v44, %v717_v31  ;;  %v743_v55 = vadd.s32 %v742_v13, %v732_v24  ;;  %v8977_v46 = vmul.u32 58254, %v753_v25  ;;  %v3396_v24 = vld [vmem:[%s7747_s8 + $0x104] sm:$0xff]  ;;  %5648 = vmatpush.msrb.mxu1 %v5635_v5 }
 0x2e4   : > { %v4240_v20 = vadd.f32 %v8966_v19, %v4128_v60  ;;  %v756_v62 = vmul.u32 14564, %v753_v25  ;;  %v8991_v44 = vmul.u32 14564, %v754_v54  ;;  %v759_v56 = vmul.u32 58254, %v754_v54  ;;  %v4776_v31 = vld [vmem:[#allocation9 + $0xc0] sm:$0xff] }
 0x2e5   : > { %v3471_v17 = vpop.f32.mrf.mxu2  ;;  %v3757_v12 = vpop.f32.mrf.mxu3  ;;  %v744_v39 = vadd.s32 %v743_v55, %v734_v32  ;;  %v782_v8 = vand.u32 65535, %v8948_v61  ;;  %v783_v51 = vshrl.u32 %v8948_v61, 16  ;;  %vm1372_vm1 = vcmp.ne.s32.totalorder %v8975_v48, 0  ;;  %4791 = vmatpush.msrb.mxu2 %v4776_v31 }
 0x2e6   : > { %v4276_v23 = vmax.f32 %v4240_v20, 0.0  ;;  %v3557_v59 = vadd.f32 %v3471_v17, %v10596_v52  ;;  %v8980_v15 = vpop.f32.mrf.mxu0  ;;  %v760_v21 = vshll.u32 %v8977_v46, 16  ;;  %v1515_v60 = vsel %vm8987_vm0, %v1479_v4, %v8909_v11 }
 0x2e7   : > { %vm1408_vm2 = vcmp.lt.s32.totalorder %v8975_v48, 0  ;;  %v745_v32 = vshrl.u32 %v744_v39, 4  ;;  %v762_v13 = vshll.u32 %v8991_v44, 16  ;;  %v1480_v54 = vadd.s32 18, %v8975_v48 }
 0x2e8   : > { %v4312_v0 = vsel %vm8959_vm14, %v4276_v23, 0.0  ;;  %v3843_v63 = vadd.f32 %v3757_v12, %v3557_v59  ;;  %v4457_v3 = vld [vmem:[#allocation2 + $0x58] sm:$0xff]  ;;  %vm764_vm3 = vc.u32 %v756_v62, %v760_v21  ;;  %v766_v42 = vadd.s32 %v760_v21, %v756_v62  ;;  %vm9019_vm5 = vmand %vm1408_vm2, %vm1372_vm1  ;;  %v9028_v62 = vpop.f32.mrf.mxu1 }
 0x2e9   : > { %4348 = vst [vmem:[#allocation2 + $0x63] sm:$0xff] %v4312_v0  ;;  %4547 = vmatmul.f32.gmra.mxu1 %v4457_v3  ;;  %4093 = vmatmul.f32.gmra.mxu0 %v3968_v43  ;;  %v746_v7 = vmul.u32 18, %v745_v32  ;;  %v761_v11 = vshrl.u32 %v8977_v46, 16  ;;  %v765_v20 = vsel %vm764_vm3, 1, %v10533_v57  ;;  %v9010_v17 = vmul.u32 58254, %v782_v8  ;;  %v3683_v21 = vld [vmem:[%s7747_s8 + $0x10d] sm:$0xff] }
 0x2ea   : > { %v4129_v25 = vadd.f32 %v8926_v2, %v3843_v63  ;;  %3521 = vmatmul.f32.gmra.mxu2 %v3396_v24  ;;  %3807 = vmatmul.f32.gmra.mxu3 %v3682_v58  ;;  %v767_v4 = vadd.s32 %v765_v20, %v759_v56  ;;  %vm768_vm4 = vc.u32 %v766_v42, %v762_v13  ;;  %v9013_v2 = vmul.u32 14564, %v783_v51  ;;  %v3969_v56 = vld [vmem:[%s7747_s8 + $0x10e] sm:$0xff] }
 0x2eb   : > { %v9024_v52 = vsub.s32 %v8838_v35, %v746_v7  ;;  %v769_v59 = vsel %vm768_vm4, 1, %v10533_v57  ;;  %v785_v43 = vmul.u32 14564, %v782_v8  ;;  %v789_v36 = vshll.u32 %v9010_v17, 16  ;;  %v3397_v35 = vld [vmem:[%s7747_s8 + $0x10c] sm:$0xff] }
 0x2ec   : > { %v4241_v12 = vadd.f32 %v8966_v19, %v4129_v25  ;;  %v763_v0 = vshrl.u32 %v8991_v44, 16  ;;  %v771_v63 = vadd.s32 %v769_v59, %v767_v4  ;;  %vm9035_vm6 = vcmp.lt.s32.totalorder %v1515_v60, 16 }
 0x2ed   : > { %v3474_v55 = vpop.f32.mrf.mxu2  ;;  %v3760_v23 = vpop.f32.mrf.mxu3  ;;  %v788_v8 = vmul.u32 58254, %v783_v51  ;;  %v791_v32 = vshll.u32 %v9013_v2, 16  ;;  %v9043_v5 = vadd.s32 136, %v8204_v33  ;;  %v1516_v44 = vsel %vm9019_vm5, %v1480_v54, %v8975_v48  ;;  %v5062_v51 = vld [vmem:[#allocation9 + $0x140] sm:$0xff] }
 0x2ee   : > { %v4277_v24 = vmax.f32 %v4241_v12, 0.0  ;;  %v3558_v58 = vadd.f32 %v3474_v55, %v8266_v45  ;;  %v9031_v39 = vpop.f32.mrf.mxu0  ;;  %v772_v60 = vadd.s32 %v771_v63, %v761_v11  ;;  %vm1373_vm7 = vcmp.ne.s32.totalorder %v9024_v52, 0  ;;  %5077 = vmatpush.msrb.mxu3 %v5062_v51 }
 0x2ef   : > { %v790_v25 = vshrl.u32 %v9010_v17, 16  ;;  %vm793_vm8 = vc.u32 %v785_v43, %v789_v36  ;;  %v795_v42 = vadd.s32 %v789_v36, %v785_v43  ;;  %vm1409_vm9 = vcmp.lt.s32.totalorder %v9024_v52, 0 }
 0x2f0   : > { %v4313_v45 = vsel %vm8969_vm15, %v4277_v24, 0.0  ;;  %v3844_v31 = vadd.f32 %v3760_v23, %v3558_v58  ;;  %v4458_v13 = vld [vmem:[#allocation2 + $0x60] sm:$0xff]  ;;  %v773_v7 = vadd.s32 %v772_v60, %v763_v0  ;;  %v794_v48 = vsel %vm793_vm8, 1, %v10533_v57  ;;  %vm9081_vm12 = vmand %vm1409_vm9, %vm1373_vm7 }
 0x2f1   : > { %4349 = vst [vmem:[#allocation2 + $0x6b] sm:$0xff] %v4313_v45  ;;  %4550 = vmatmul.f32.gmra.mxu1 %v4458_v13  ;;  %4096 = vmatmul.f32.gmra.mxu0 %v3969_v56  ;;  %v796_v54 = vadd.s32 %v794_v48, %v788_v8  ;;  %vm797_vm10 = vc.u32 %v795_v42, %v791_v32  ;;  %v811_v11 = vand.u32 65535, %v9043_v5  ;;  %v812_v20 = vshrl.u32 %v9043_v5, 16  ;;  %v3684_v8 = vld [vmem:[%s7747_s8 + $0x115] sm:$0xff] }
 0x2f2   : > { %v4130_v40 = vadd.f32 %v8980_v15, %v3844_v31  ;;  %3524 = vmatmul.f32.gmra.mxu2 %v3397_v35  ;;  %3810 = vmatmul.f32.gmra.mxu3 %v3683_v21  ;;  %v774_v12 = vshrl.u32 %v773_v7, 4  ;;  %v792_v15 = vshrl.u32 %v9013_v2, 16  ;;  %v798_v4 = vsel %vm797_vm10, 1, %v10533_v57  ;;  %v3970_v2 = vld [vmem:[%s7747_s8 + $0x116] sm:$0xff] }
 0x2f3   : > { %vm9060_vm11 = vcmp.lt.s32.totalorder %v1516_v44, 16  ;;  %v800_v59 = vadd.s32 %v798_v4, %v796_v54  ;;  %v814_v43 = vmul.u32 14564, %v811_v11  ;;  %v9064_v36 = vmul.u32 58254, %v811_v11  ;;  %v3398_v21 = vld [vmem:[%s7747_s8 + $0x114] sm:$0xff]  ;;  %v9090_v44 = vpop.f32.mrf.mxu1 }
 0x2f4   : > { %v4242_v17 = vadd.f32 %v8966_v19, %v4130_v40  ;;  %v9066_v24 = vmul.u32 14564, %v812_v20  ;;  %v9073_v63 = vadd.s32 18, %v9024_v52  ;;  %v775_v35 = vmul.u32 18, %v774_v12  ;;  %v5348_v7 = vld [vmem:[#allocation9 + $0x1c0] sm:$0xff] }
 0x2f5   : > { %v3477_v55 = vpop.f32.mrf.mxu2  ;;  %v3763_v46 = vpop.f32.mrf.mxu3  ;;  %v801_v45 = vadd.s32 %v800_v59, %v790_v25  ;;  %v9088_v13 = vadd.s32 144, %v8204_v33  ;;  %v817_v48 = vmul.u32 58254, %v812_v20  ;;  %v5634_v54 = vld [vmem:[#allocation9 + $0x240] sm:$0xff]  ;;  %v5061_v20 = vld [vmem:[#allocation9 + $0x138] sm:$0xff]  ;;  %5363 = vmatpush.msrb.mxu0 %v5348_v7  ;;  %v5059_v7 = vld [vmem:[#allocation9 + $0x128] sm:$0xff] }
 0x2f6   : > { %v4278_v58 = vmax.f32 %v4242_v17, 0.0  ;;  %v3559_v56 = vadd.f32 %v3477_v55, %v8270_v41  ;;  %v9069_v0 = vpop.f32.mrf.mxu0  ;;  %v818_v41 = vshll.u32 %v9064_v36, 16  ;;  %v820_v31 = vshll.u32 %v9066_v24, 16  ;;  %5649 = vmatpush.msrb.mxu1 %v5634_v54  ;;  %5078 = vmatpush.msrb.mxu3 %v5061_v20 }
 0x2f7   : > { %v9095_v40 = vsub.s32 %v8942_v38, %v775_v35  ;;  %v802_v25 = vadd.s32 %v801_v45, %v792_v15  ;;  %v1517_v3 = vsel %vm9081_vm12, %v9073_v63, %v9024_v52  ;;  %v4775_v38 = vld [vmem:[#allocation9 + $0xb8] sm:$0xff]  ;;  %v840_v4 = vand.u32 65535, %v9088_v13 }
 0x2f8   : > { %v4314_v60 = vsel %vm9035_vm6, %v4278_v58, 0.0  ;;  %v3845_v51 = vadd.f32 %v3763_v46, %v3559_v56  ;;  %v4459_v42 = vld [vmem:[#allocation2 + $0x68] sm:$0xff]  ;;  %vm822_vm13 = vc.u32 %v814_v43, %v818_v41  ;;  %v824_v11 = vadd.s32 %v818_v41, %v814_v43  ;;  %4792 = vmatpush.msrb.mxu2 %v4775_v38 }
 0x2f9   : > { %4350 = vst [vmem:[#allocation2 + $0x73] sm:$0xff] %v4314_v60  ;;  %4553 = vmatmul.f32.gmra.mxu1 %v4459_v42  ;;  %4099 = vmatmul.f32.gmra.mxu0 %v3970_v2  ;;  %vm1374_vm14 = vcmp.ne.s32.totalorder %v9095_v40, 0  ;;  %vm1410_vm15 = vcmp.lt.s32.totalorder %v9095_v40, 0  ;;  %v803_v12 = vshrl.u32 %v802_v25, 4  ;;  %v823_v15 = vsel %vm822_vm13, 1, %v10533_v57  ;;  %v4774_v43 = vld [vmem:[#allocation9 + $0xb0] sm:$0xff] }
 0x2fa   : > { %v4131_v17 = vadd.f32 %v9031_v39, %v3845_v51  ;;  %3527 = vmatmul.f32.gmra.mxu2 %v3398_v21  ;;  %3813 = vmatmul.f32.gmra.mxu3 %v3684_v8  ;;  %vm826_vm0 = vc.u32 %v824_v11, %v820_v31  ;;  %v5347_v39 = vld [vmem:[#allocation9 + $0x1b8] sm:$0xff]  ;;  %v819_v52 = vshrl.u32 %v9064_v36, 16  ;;  %v825_v46 = vadd.s32 %v823_v15, %v817_v48  ;;  %v5060_v58 = vld [vmem:[#allocation9 + $0x130] sm:$0xff]  ;;  %vm9122_vm1 = vmand %vm1410_vm15, %vm1374_vm14 }
 0x2fb   : > { %v827_v59 = vsel %vm826_vm0, 1, %v10533_v57  ;;  %v5346_v56 = vld [vmem:[#allocation9 + $0x1b0] sm:$0xff]  ;;  %v9111_v21 = vadd.s32 18, %v9095_v40  ;;  %v804_v8 = vmul.u32 18, %v803_v12  ;;  %v821_v32 = vshrl.u32 %v9066_v24, 16  ;;  %5364 = vmatpush.msrb.mxu0 %v5347_v39  ;;  %4793 = vmatpush.msrb.mxu2 %v4774_v43  ;;  %v4773_v24 = vld [vmem:[#allocation9 + $0xa8] sm:$0xff] }
 0x2fc   : > { %v4243_v55 = vadd.f32 %v8966_v19, %v4131_v17  ;;  %v3971_v35 = vld [vmem:[%s7747_s8 + $0x11e] sm:$0xff]  ;;  %v841_v36 = vshrl.u32 %v9088_v13, 16  ;;  %v829_v51 = vadd.s32 %v827_v59, %v825_v46  ;;  %v9126_v42 = vmul.u32 58254, %v840_v4  ;;  %5079 = vmatpush.msrb.mxu3 %v5060_v58  ;;  %v5058_v46 = vld [vmem:[#allocation9 + $0x120] sm:$0xff]  ;;  %v9150_v59 = vpop.f32.mrf.mxu1 }
 0x2fd   : > { %v3480_v2 = vpop.f32.mrf.mxu2  ;;  %v3766_v63 = vpop.f32.mrf.mxu3  ;;  %v3399_v48 = vld [vmem:[%s7747_s8 + $0x11c] sm:$0xff]  ;;  %v843_v54 = vmul.u32 14564, %v840_v4  ;;  %5365 = vmatpush.msrb.mxu0 %v5346_v56  ;;  %v9136_v17 = vadd.s32 152, %v8204_v33  ;;  %4794 = vmatpush.msrb.mxu2 %v4773_v24  ;;  %vm9141_vm2 = vcmp.lt.s32.totalorder %v1517_v3, 16  ;;  %v1518_v23 = vsel %vm9122_vm1, %v9111_v21, %v9095_v40  ;;  %v5344_v56 = vld [vmem:[#allocation9 + $0x1a0] sm:$0xff] }
 0x2fe   : > { %v4279_v45 = vmax.f32 %v4243_v55, 0.0  ;;  %v3560_v41 = vadd.f32 %v3480_v2, %v8279_v49  ;;  %v9116_v31 = vpop.f32.mrf.mxu0  ;;  %v3685_v25 = vld [vmem:[%s7747_s8 + $0x11d] sm:$0xff]  ;;  %v9131_v49 = vsub.s32 %v8948_v61, %v804_v8  ;;  %v9133_v11 = vmul.u32 14564, %v841_v36  ;;  %5080 = vmatpush.msrb.mxu3 %v5059_v7  ;;  %v4772_v61 = vld [vmem:[#allocation9 + $0xa0] sm:$0xff] }
 0x2ff   : > { %v830_v15 = vadd.s32 %v829_v51, %v819_v52  ;;  %v847_v39 = vshll.u32 %v9126_v42, 16  ;;  %v5345_v55 = vld [vmem:[#allocation9 + $0x1a8] sm:$0xff]  ;;  %v846_v52 = vmul.u32 58254, %v841_v36  ;;  %4795 = vmatpush.msrb.mxu2 %v4772_v61  ;;  %v5057_v8 = vld [vmem:[#allocation9 + $0x118] sm:$0xff]  ;;  %v869_v36 = vand.u32 65535, %v9136_v17  ;;  %v4770_v24 = vld [vmem:[#allocation9 + $0x90] sm:$0xff] }
 0x300   : > { %v4315_v38 = vsel %vm9060_vm11, %v4279_v45, 0.0  ;;  %v3846_v20 = vadd.f32 %v3766_v63, %v3560_v41  ;;  %v4460_v12 = vld [vmem:[#allocation2 + $0x70] sm:$0xff]  ;;  %vm1375_vm3 = vcmp.ne.s32.totalorder %v9131_v49, 0  ;;  %vm1411_vm4 = vcmp.lt.s32.totalorder %v9131_v49, 0  ;;  %5366 = vmatpush.msrb.mxu0 %v5345_v55  ;;  %5081 = vmatpush.msrb.mxu3 %v5058_v46 }
 0x301   : > { %4351 = vst [vmem:[#allocation2 + $0x7b] sm:$0xff] %v4315_v38  ;;  %4556 = vmatmul.f32.gmra.mxu1 %v4460_v12  ;;  %4102 = vmatmul.f32.gmra.mxu0 %v3971_v35  ;;  %v831_v3 = vadd.s32 %v830_v15, %v821_v32  ;;  %v849_v58 = vshll.u32 %v9133_v11, 16  ;;  %v9156_v2 = vadd.s32 18, %v9131_v49  ;;  %vm851_vm5 = vc.u32 %v843_v54, %v847_v39  ;;  %v4771_v35 = vld [vmem:[#allocation9 + $0x98] sm:$0xff]  ;;  %vm9175_vm7 = vmand %vm1411_vm4, %vm1375_vm3 }
 0x302   : > { %v4132_v43 = vadd.f32 %v9069_v0, %v3846_v20  ;;  %3530 = vmatmul.f32.gmra.mxu2 %v3399_v48  ;;  %3816 = vmatmul.f32.gmra.mxu3 %v3685_v25  ;;  %v853_v63 = vadd.s32 %v847_v39, %v843_v54  ;;  %v848_v41 = vshrl.u32 %v9126_v42, 16  ;;  %v852_v32 = vsel %vm851_vm5, 1, %v10533_v57  ;;  %v5343_v51 = vld [vmem:[#allocation9 + $0x198] sm:$0xff]  ;;  %v5056_v20 = vld [vmem:[#allocation9 + $0x110] sm:$0xff] }
 0x303   : > { %v832_v45 = vshrl.u32 %v831_v3, 4  ;;  %v850_v25 = vshrl.u32 %v9133_v11, 16  ;;  %v854_v54 = vadd.s32 %v852_v32, %v846_v52  ;;  %5367 = vmatpush.msrb.mxu0 %v5344_v56  ;;  %4796 = vmatpush.msrb.mxu2 %v4771_v35  ;;  %v870_v38 = vshrl.u32 %v9136_v17, 16  ;;  %v3972_v39 = vld [vmem:[%s7747_s8 + $0x126] sm:$0xff] }
 0x304   : > { %v4244_v0 = vadd.f32 %v8966_v19, %v4132_v43  ;;  %vm855_vm6 = vc.u32 %v853_v63, %v849_v58  ;;  %5082 = vmatpush.msrb.mxu3 %v5057_v8  ;;  %v3400_v46 = vld [vmem:[%s7747_s8 + $0x124] sm:$0xff]  ;;  %v9179_v3 = vmul.u32 58254, %v869_v36  ;;  %v9189_v32 = vadd.s32 160, %v8204_v33 }
 0x305   : > { %v3483_v7 = vpop.f32.mrf.mxu2  ;;  %v3769_v48 = vpop.f32.mrf.mxu3  ;;  %v833_v55 = vmul.u32 18, %v832_v45  ;;  %v856_v61 = vsel %vm855_vm6, 1, %v10533_v57  ;;  %v3686_v43 = vld [vmem:[%s7747_s8 + $0x125] sm:$0xff]  ;;  %5368 = vmatpush.msrb.mxu0 %v5343_v51  ;;  %v9181_v58 = vmul.u32 14564, %v870_v38  ;;  %4797 = vmatpush.msrb.mxu2 %v4770_v24  ;;  %v4769_v45 = vld [vmem:[#allocation9 + $0x88] sm:$0xff]  ;;  %v875_v24 = vmul.u32 58254, %v870_v38 }
 0x306   : > { %v4280_v42 = vmax.f32 %v4244_v0, 0.0  ;;  %v3561_v12 = vadd.f32 %v3483_v7, %v8283_v29  ;;  %v9165_v15 = vpop.f32.mrf.mxu0  ;;  %v858_v52 = vadd.s32 %v856_v61, %v854_v54  ;;  %v872_v29 = vmul.u32 14564, %v869_v36  ;;  %5083 = vmatpush.msrb.mxu3 %v5056_v20  ;;  %v5342_v0 = vld [vmem:[#allocation9 + $0x190] sm:$0xff]  ;;  %v5633_v51 = vld [vmem:[#allocation9 + $0x238] sm:$0xff]  ;;  %v9207_v38 = vpop.f32.mrf.mxu1  ;;  %v5341_v20 = vld [vmem:[#allocation9 + $0x188] sm:$0xff] }
 0x307   : > { %v9186_v8 = vsub.s32 %v9043_v5, %v833_v55  ;;  %v876_v4 = vshll.u32 %v9179_v3, 16  ;;  %v878_v7 = vshll.u32 %v9181_v58, 16  ;;  %vm9198_vm8 = vcmp.lt.s32.totalorder %v1518_v23, 16  ;;  %5650 = vmatpush.msrb.mxu1 %v5633_v51  ;;  %5369 = vmatpush.msrb.mxu0 %v5342_v0  ;;  %v5054_v23 = vld [vmem:[#allocation9 + $0x100] sm:$0xff] }
 0x308   : > { %v4316_v56 = vsel %vm9141_vm2, %v4280_v42, 0.0  ;;  %v3847_v63 = vadd.f32 %v3769_v48, %v3561_v12  ;;  %v4461_v35 = vld [vmem:[#allocation2 + $0x78] sm:$0xff]  ;;  %v859_v36 = vadd.s32 %v858_v52, %v848_v41  ;;  %v5055_v48 = vld [vmem:[#allocation9 + $0x108] sm:$0xff]  ;;  %v1519_v41 = vsel %vm9175_vm7, %v9156_v2, %v9131_v49  ;;  %4798 = vmatpush.msrb.mxu2 %v4769_v45 }
 0x309   : > { %4352 = vst [vmem:[#allocation2 + $0x83] sm:$0xff] %v4316_v56  ;;  %4559 = vmatmul.f32.gmra.mxu1 %v4461_v35  ;;  %4105 = vmatmul.f32.gmra.mxu0 %v3972_v39  ;;  %v877_v60 = vshrl.u32 %v9179_v3, 16  ;;  %vm1376_vm9 = vcmp.ne.s32.totalorder %v9186_v8, 0  ;;  %vm880_vm10 = vc.u32 %v872_v29, %v876_v4  ;;  %v882_v21 = vadd.s32 %v876_v4, %v872_v29  ;;  %v5340_v2 = vld [vmem:[#allocation9 + $0x180] sm:$0xff] }
 0x30a   : > { %v4133_v54 = vadd.f32 %v9116_v31, %v3847_v63  ;;  %3533 = vmatmul.f32.gmra.mxu2 %v3400_v46  ;;  %3819 = vmatmul.f32.gmra.mxu3 %v3686_v43  ;;  %v860_v40 = vadd.s32 %v859_v36, %v850_v25  ;;  %v4768_v31 = vld [vmem:[#allocation9 + $0x80] sm:$0xff]  ;;  %vm1412_vm11 = vcmp.lt.s32.totalorder %v9186_v8, 0  ;;  %v881_v49 = vsel %vm880_vm10, 1, %v10533_v57 }
 0x30b   : > { %5084 = vmatpush.msrb.mxu3 %v5055_v48  ;;  %v898_v12 = vand.u32 65535, %v9189_v32  ;;  %v9216_v55 = vadd.s32 18, %v9186_v8  ;;  %v883_v46 = vadd.s32 %v881_v49, %v875_v24  ;;  %vm884_vm12 = vc.u32 %v882_v21, %v878_v7  ;;  %5370 = vmatpush.msrb.mxu0 %v5341_v20  ;;  %v3973_v29 = vld [vmem:[%s7747_s8 + $0x12e] sm:$0xff]  ;;  %vm9230_vm13 = vmand %vm1412_vm11, %vm1376_vm9 }
 0x30c   : > { %v4245_v42 = vadd.f32 %v8966_v19, %v4133_v54  ;;  %v861_v61 = vshrl.u32 %v860_v40, 4  ;;  %v885_v3 = vsel %vm884_vm12, 1, %v10533_v57  ;;  %4799 = vmatpush.msrb.mxu2 %v4768_v31  ;;  %v899_v56 = vshrl.u32 %v9189_v32, 16  ;;  %v3401_v63 = vld [vmem:[%s7747_s8 + $0x12c] sm:$0xff] }
 0x30d   : > { %v3486_v25 = vpop.f32.mrf.mxu2  ;;  %v3772_v39 = vpop.f32.mrf.mxu3  ;;  %5085 = vmatpush.msrb.mxu3 %v5054_v23  ;;  %v3687_v35 = vld [vmem:[%s7747_s8 + $0x12d] sm:$0xff]  ;;  %v879_v45 = vshrl.u32 %v9181_v58, 16  ;;  %v887_v36 = vadd.s32 %v885_v3, %v883_v46  ;;  %5371 = vmatpush.msrb.mxu0 %v5340_v2  ;;  %v9235_v51 = vmul.u32 58254, %v898_v12  ;;  %v901_v48 = vmul.u32 14564, %v898_v12 }
 0x30e   : > { %v4281_v43 = vmax.f32 %v4245_v42, 0.0  ;;  %v3562_v11 = vadd.f32 %v3486_v25, %v8295_v50  ;;  %v9219_v52 = vpop.f32.mrf.mxu0  ;;  %v862_v50 = vmul.u32 18, %v861_v61  ;;  %v9239_v54 = vmul.u32 14564, %v899_v56  ;;  %v9261_v42 = vpop.f32.mrf.mxu1 }
 0x30f   : > { %vm9241_vm14 = vcmp.lt.s32.totalorder %v1519_v41, 16  ;;  %v888_v40 = vadd.s32 %v887_v36, %v877_v60  ;;  %v905_v21 = vshll.u32 %v9235_v51, 16  ;;  %v1520_v41 = vsel %vm9230_vm13, %v9216_v55, %v9186_v8 }
 0x310   : > { %v4317_v24 = vsel %vm9198_vm8, %v4281_v43, 0.0  ;;  %v3848_v4 = vadd.f32 %v3772_v39, %v3562_v11  ;;  %v4462_v7 = vld [vmem:[#allocation2 + $0x80] sm:$0xff]  ;;  %v9246_v58 = vsub.s32 %v9088_v13, %v862_v50  ;;  %v904_v31 = vmul.u32 58254, %v899_v56 }
 0x311   : > { %4353 = vst [vmem:[#allocation2 + $0x8b] sm:$0xff] %v4317_v24  ;;  %4562 = vmatmul.f32.gmra.mxu1 %v4462_v7  ;;  %4108 = vmatmul.f32.gmra.mxu0 %v3973_v29  ;;  %v9255_v23 = vadd.s32 168, %v8204_v33  ;;  %v889_v13 = vadd.s32 %v888_v40, %v879_v45  ;;  %v907_v60 = vshll.u32 %v9239_v54, 16  ;;  %vm909_vm1 = vc.u32 %v901_v48, %v905_v21  ;;  %v3974_v29 = vld [vmem:[%s7747_s8 + $0x136] sm:$0xff] }
 0x312   : > { %v4134_v5 = vadd.f32 %v9165_v15, %v3848_v4  ;;  %3536 = vmatmul.f32.gmra.mxu2 %v3401_v63  ;;  %3822 = vmatmul.f32.gmra.mxu3 %v3687_v35  ;;  %vm1377_vm15 = vcmp.ne.s32.totalorder %v9246_v58, 0  ;;  %vm1413_vm0 = vcmp.lt.s32.totalorder %v9246_v58, 0  ;;  %v911_v8 = vadd.s32 %v905_v21, %v901_v48  ;;  %v3402_v63 = vld [vmem:[%s7747_s8 + $0x134] sm:$0xff] }
 0x313   : > { %v927_v49 = vand.u32 65535, %v9255_v23  ;;  %v890_v25 = vshrl.u32 %v889_v13, 4  ;;  %v906_v39 = vshrl.u32 %v9235_v51, 16  ;;  %v910_v55 = vsel %vm909_vm1, 1, %v10533_v57  ;;  %v3688_v35 = vld [vmem:[%s7747_s8 + $0x135] sm:$0xff]  ;;  %vm9278_vm2 = vmand %vm1413_vm0, %vm1377_vm15 }
 0x314   : > { %v4246_v15 = vadd.f32 %v8966_v19, %v4134_v5  ;;  %v928_v61 = vshrl.u32 %v9255_v23, 16  ;;  %v1485_v3 = vadd.s32 18, %v9246_v58  ;;  %v912_v56 = vadd.s32 %v910_v55, %v904_v31  ;;  %v5632_v5 = vld [vmem:[#allocation9 + $0x230] sm:$0xff] }
 0x315   : > { %v3489_v2 = vpop.f32.mrf.mxu2  ;;  %v3775_v12 = vpop.f32.mrf.mxu3  ;;  %v891_v50 = vmul.u32 18, %v890_v25  ;;  %vm913_vm3 = vc.u32 %v911_v8, %v907_v60  ;;  %v930_v45 = vmul.u32 14564, %v927_v49  ;;  %v908_v40 = vshrl.u32 %v9239_v54, 16  ;;  %5651 = vmatpush.msrb.mxu1 %v5632_v5 }
 0x316   : > { %v4282_v46 = vmax.f32 %v4246_v15, 0.0  ;;  %v3563_v43 = vadd.f32 %v3489_v2, %v8310_v14  ;;  %v9268_v11 = vpop.f32.mrf.mxu0  ;;  %v9282_v14 = vmul.u32 58254, %v927_v49  ;;  %v914_v4 = vsel %vm913_vm3, 1, %v10533_v57 }
 0x317   : > { %v9287_v7 = vmul.u32 14564, %v928_v61  ;;  %v9290_v48 = vsub.s32 %v9136_v17, %v891_v50  ;;  %v916_v21 = vadd.s32 %v914_v4, %v912_v56  ;;  %vm9294_vm4 = vcmp.lt.s32.totalorder %v1520_v41, 16 }
 0x318   : > { %v4318_v36 = vsel %vm9241_vm14, %v4282_v46, 0.0  ;;  %v3849_v51 = vadd.f32 %v3775_v12, %v3563_v43  ;;  %v4463_v24 = vld [vmem:[#allocation2 + $0x88] sm:$0xff]  ;;  %v934_v31 = vshll.u32 %v9282_v14, 16  ;;  %v1521_v60 = vsel %vm9278_vm2, %v1485_v3, %v9246_v58 }
 0x319   : > { %4354 = vst [vmem:[#allocation2 + $0x93] sm:$0xff] %v4318_v36  ;;  %4565 = vmatmul.f32.gmra.mxu1 %v4463_v24  ;;  %4111 = vmatmul.f32.gmra.mxu0 %v3974_v29  ;;  %v933_v17 = vmul.u32 58254, %v928_v61  ;;  %vm1378_vm5 = vcmp.ne.s32.totalorder %v9290_v48, 0  ;;  %vm1414_vm6 = vcmp.lt.s32.totalorder %v9290_v48, 0  ;;  %v917_v54 = vadd.s32 %v916_v21, %v906_v39  ;;  %v3975_v29 = vld [vmem:[%s7747_s8 + $0x13e] sm:$0xff] }
 0x31a   : > { %v4135_v13 = vadd.f32 %v9219_v52, %v3849_v51  ;;  %3539 = vmatmul.f32.gmra.mxu2 %v3402_v63  ;;  %3825 = vmatmul.f32.gmra.mxu3 %v3688_v35  ;;  %v936_v41 = vshll.u32 %v9287_v7, 16  ;;  %vm938_vm7 = vc.u32 %v930_v45, %v934_v31  ;;  %v940_v52 = vadd.s32 %v934_v31, %v930_v45  ;;  %v3403_v63 = vld [vmem:[%s7747_s8 + $0x13c] sm:$0xff]  ;;  %vm9327_vm8 = vmand %vm1414_vm6, %vm1378_vm5 }
 0x31b   : > { %v9307_v8 = vadd.s32 176, %v8204_v33  ;;  %v1486_v2 = vadd.s32 18, %v9290_v48  ;;  %v918_v12 = vadd.s32 %v917_v54, %v908_v40  ;;  %v935_v25 = vshrl.u32 %v9282_v14, 16  ;;  %v3689_v35 = vld [vmem:[%s7747_s8 + $0x13d] sm:$0xff] }
 0x31c   : > { %v4247_v15 = vadd.f32 %v8966_v19, %v4135_v13  ;;  %v939_v39 = vsel %vm938_vm7, 1, %v10533_v57  ;;  %v9319_v56 = vadd.s32 184, %v8204_v33  ;;  %vm942_vm9 = vc.u32 %v940_v52, %v936_v41 }
 0x31d   : > { %v3492_v58 = vpop.f32.mrf.mxu2  ;;  %v3778_v49 = vpop.f32.mrf.mxu3  ;;  %v941_v3 = vadd.s32 %v939_v39, %v933_v17  ;;  %v956_v50 = vand.u32 65535, %v9307_v8  ;;  %v957_v45 = vshrl.u32 %v9307_v8, 16  ;;  %vm9335_vm10 = vcmp.lt.s32.totalorder %v1521_v60, 16 }
 0x31e   : > { %v4283_v55 = vmax.f32 %v4247_v15, 0.0  ;;  %v3564_v61 = vadd.f32 %v3492_v58, %v8314_v28  ;;  %v9313_v46 = vpop.f32.mrf.mxu1  ;;  %v9315_v43 = vpop.f32.mrf.mxu0  ;;  %v919_v28 = vshrl.u32 %v918_v12, 4  ;;  %v943_v4 = vsel %vm942_vm9, 1, %v10533_v57 }
 0x31f   : > { %v937_v21 = vshrl.u32 %v9287_v7, 16  ;;  %v945_v5 = vadd.s32 %v943_v4, %v941_v3  ;;  %v9341_v31 = vmul.u32 58254, %v956_v50  ;;  %v1522_v13 = vsel %vm9327_vm8, %v1486_v2, %v9290_v48  ;;  %v9381_v4 = vld [vmem:[#allocation2 + $0x12] sm:$0xff] }
 0x320   : > { %v4319_v14 = vsel %vm9294_vm4, %v4283_v55, 0.0  ;;  %v3850_v51 = vadd.f32 %v3778_v49, %v3564_v61  ;;  %v4464_v24 = vld [vmem:[#allocation2 + $0x90] sm:$0xff]  ;;  %v920_v40 = vmul.u32 18, %v919_v28  ;;  %v959_v60 = vmul.u32 14564, %v956_v50 }
 0x321   : > { %4355 = vst [vmem:[#allocation2 + $0x9b] sm:$0xff] %v4319_v14  ;;  %4568 = vmatmul.f32.gmra.mxu1 %v4464_v24  ;;  %4114 = vmatmul.f32.gmra.mxu0 %v3975_v29  ;;  %v9347_v17 = vmul.u32 14564, %v957_v45  ;;  %v946_v41 = vadd.s32 %v945_v5, %v935_v25  ;;  %v963_v7 = vshll.u32 %v9341_v31, 16  ;;  %v985_v15 = vand.u32 65535, %v9319_v56 }
 0x322   : > { %v4136_v20 = vadd.f32 %v9268_v11, %v3850_v51  ;;  %3542 = vmatmul.f32.gmra.mxu2 %v3403_v63  ;;  %3828 = vmatmul.f32.gmra.mxu3 %v3689_v35  ;;  %v9350_v54 = vsub.s32 %v9189_v32, %v920_v40  ;;  %v962_v11 = vmul.u32 58254, %v957_v45  ;;  %v986_v49 = vshrl.u32 %v9319_v56, 16  ;;  %v4731_v63 = vld [vmem:[#allocation2 + $0x1] sm:$0xff] }
 0x323   : > { %v965_v58 = vshll.u32 %v9347_v17, 16  ;;  %vm9357_vm11 = vcmp.lt.s32.totalorder %v1522_v13, 16  ;;  %v947_v25 = vadd.s32 %v946_v41, %v937_v21  ;;  %vm967_vm14 = vc.u32 %v959_v60, %v963_v7  ;;  %v5017_v35 = vld [vmem:[#allocation2 + $0x2] sm:$0xff] }
 0x324   : > { %v4248_v52 = vadd.f32 %v8966_v19, %v4136_v20  ;;  %vm1379_vm12 = vcmp.ne.s32.totalorder %v9350_v54, 0  ;;  %vm1415_vm13 = vcmp.lt.s32.totalorder %v9350_v54, 0  ;;  %v9364_v32 = vadd.s32 18, %v9350_v54 }
 0x325   : > { %v3495_v12 = vpop.f32.mrf.mxu2  ;;  %v3781_v2 = vpop.f32.mrf.mxu3  ;;  %v969_v3 = vadd.s32 %v963_v7, %v959_v60  ;;  %vm9371_vm15 = vmand %vm1415_vm13, %vm1379_vm12  ;;  %v948_v28 = vshrl.u32 %v947_v25, 4  ;;  %v964_v50 = vshrl.u32 %v9341_v31, 16  ;;  %v968_v45 = vsel %vm967_vm14, 1, %v10533_v57 }
 0x326   : > { %v4284_v39 = vmax.f32 %v4248_v52, 0.0  ;;  %v3565_v55 = vadd.f32 %v3495_v12, %v8318_v27  ;;  %v9367_v61 = vpop.f32.mrf.mxu1  ;;  %v9369_v29 = vpop.f32.mrf.mxu0  ;;  %v9377_v14 = vmul.u32 58254, %v985_v15  ;;  %v970_v40 = vadd.s32 %v968_v45, %v962_v11 }
 0x327   : > { %v988_v21 = vmul.u32 14564, %v985_v15  ;;  %v949_v5 = vmul.u32 18, %v948_v28  ;;  %v966_v31 = vshrl.u32 %v9347_v17, 16  ;;  %vm971_vm0 = vc.u32 %v969_v3, %v965_v58  ;;  %v5018_v3 = vld [vmem:[#allocation2 + $0xa] sm:$0xff] }
 0x328   : > { %v4320_v27 = vsel %vm9335_vm10, %v4284_v39, 0.0  ;;  %v3851_v51 = vadd.f32 %v3781_v2, %v3565_v55  ;;  %v4465_v24 = vld [vmem:[#allocation2 + $0x98] sm:$0xff]  ;;  %v9385_v20 = vmul.u32 14564, %v986_v49  ;;  %v1523_v36 = vsel %vm9371_vm15, %v9364_v32, %v9350_v54  ;;  %v4732_v55 = vld [vmem:[#allocation2 + $0x9] sm:$0xff] }
 0x329   : > { %4356 = vst [vmem:[#allocation2 + $0xa3] sm:$0xff] %v4320_v27  ;;  %4571 = vmatmul.f32.gmra.mxu1 %v4465_v24  ;;  %5372 = vmatmul.f32.vlgmr.msrb.gmra.mxu0 %v9381_v4  ;;  %v972_v60 = vsel %vm971_vm0, 1, %v10533_v57  ;;  %v992_v41 = vshll.u32 %v9377_v14, 16  ;;  %v9395_v7 = vsub.s32 %v9255_v23, %v949_v5  ;;  %v991_v15 = vmul.u32 58254, %v986_v49  ;;  %v9464_v27 = vld [vmem:[#allocation2 + $0x22] sm:$0xff] }
 0x32a   : > { %v4137_v13 = vadd.f32 %v9315_v43, %v3851_v51  ;;  %4800 = vmatmul.f32.vlgmr.msrb.gmra.mxu2 %v4731_v63  ;;  %5086 = vmatmul.f32.vlgmr.msrb.gmra.mxu3 %v5017_v35  ;;  %v974_v17 = vadd.s32 %v972_v60, %v970_v40  ;;  %v994_v52 = vshll.u32 %v9385_v20, 16  ;;  %v9400_v58 = vadd.s32 192, %v8204_v33 }
 0x32b   : > { %vm996_vm1 = vc.u32 %v988_v21, %v992_v41  ;;  %v998_v11 = vadd.s32 %v992_v41, %v988_v21  ;;  %vm1380_vm2 = vcmp.ne.s32.totalorder %v9395_v7, 0  ;;  %vm1416_vm3 = vcmp.lt.s32.totalorder %v9395_v7, 0  ;;  %v5631_v21 = vld [vmem:[#allocation9 + $0x228] sm:$0xff] }
 0x32c   : > { %v4249_v43 = vadd.f32 %v8966_v19, %v4137_v13  ;;  %v975_v2 = vadd.s32 %v974_v17, %v964_v50  ;;  %v993_v23 = vshrl.u32 %v9377_v14, 16  ;;  %v997_v39 = vsel %vm996_vm1, 1, %v10533_v57  ;;  %v9417_v14 = vld [vmem:[#allocation2 + $0x1a] sm:$0xff]  ;;  %vm9423_vm5 = vmand %vm1416_vm3, %vm1380_vm2  ;;  %5652 = vmatpush.msrb.mxu1 %v5631_v21 }
 0x32d   : > { %v3498_v12 = vpop.f32.mrf.mxu2  ;;  %v3784_v54 = vpop.f32.mrf.mxu3  ;;  %vm1000_vm4 = vc.u32 %v998_v11, %v994_v52  ;;  %v9412_v63 = vadd.s32 18, %v9395_v7  ;;  %v999_v0 = vadd.s32 %v997_v39, %v991_v15  ;;  %v995_v51 = vshrl.u32 %v9385_v20, 16  ;;  %v5630_v13 = vld [vmem:[#allocation9 + $0x220] sm:$0xff] }
 0x32e   : > { %v4285_v32 = vmax.f32 %v4249_v43, 0.0  ;;  %v3566_v49 = vadd.f32 %v3498_v12, %v8329_v26  ;;  %v9406_v25 = vpop.f32.mrf.mxu1  ;;  %v9408_v19 = vpop.f32.mrf.mxu0  ;;  %v976_v35 = vadd.s32 %v975_v2, %v966_v31  ;;  %v1001_v28 = vsel %vm1000_vm4, 1, %v10533_v57  ;;  %5653 = vmatpush.msrb.mxu1 %v5630_v13 }
 0x32f   : > { %v1014_v24 = vand.u32 65535, %v9400_v58  ;;  %v1003_v40 = vadd.s32 %v1001_v28, %v999_v0  ;;  %v1015_v5 = vshrl.u32 %v9400_v58, 16  ;;  %v9432_v31 = vadd.s32 200, %v8204_v33 }
 0x330   : > { %v4321_v50 = vsel %vm9357_vm11, %v4285_v32, 0.0  ;;  %v3852_v26 = vadd.f32 %v3784_v54, %v3566_v49  ;;  %v4466_v45 = vld [vmem:[#allocation2 + $0xa0] sm:$0xff]  ;;  %v977_v48 = vshrl.u32 %v976_v35, 4  ;;  %vm9434_vm6 = vcmp.lt.s32.totalorder %v1523_v36, 16 }
 0x331   : > { %4357 = vst [vmem:[#allocation2 + $0xab] sm:$0xff] %v4321_v50  ;;  %4574 = vmatmul.f32.gmra.mxu1 %v4466_v45  ;;  %5375 = vmatmul.f32.gmra.mxu0 %v9417_v14  ;;  %v1017_v60 = vmul.u32 14564, %v1014_v24  ;;  %v1018_v41 = vmul.u32 58254, %v1014_v24  ;;  %v1524_v17 = vsel %vm9423_vm5, %v9412_v63, %v9395_v7  ;;  %v1004_v52 = vadd.s32 %v1003_v40, %v993_v23  ;;  %v9448_v36 = vld [vmem:[%s10494_s2] ss:$0 sm:$0xff]  ;;  %v4733_v24 = vld [vmem:[#allocation2 + $0x11] sm:$0xff] }
 0x332   : > { %v4138_v20 = vadd.f32 %v9369_v29, %v3852_v26  ;;  %4803 = vmatmul.f32.gmra.mxu2 %v4732_v55  ;;  %5089 = vmatmul.f32.gmra.mxu3 %v5018_v3  ;;  %v978_v15 = vmul.u32 18, %v977_v48  ;;  %v9443_v43 = vmul.u32 14564, %v1015_v5  ;;  %v1020_v11 = vmul.u32 58254, %v1015_v5 }
 0x333   : > { %v1021_v12 = vshll.u32 %v1018_v41, 16  ;;  %v9452_v54 = vadd.s32 208, %v8204_v33  ;;  %v1005_v23 = vadd.s32 %v1004_v52, %v995_v51  ;;  %v1043_v39 = vand.u32 65535, %v9432_v31  ;;  %v9511_v51 = vld [vmem:[#allocation2 + $0x2a] sm:$0xff] }
 0x334   : > { %v4250_v29 = vadd.f32 %v9448_v36, %v4138_v20  ;;  %v979_v7 = vsub.s32 %v9307_v8, %v978_v15  ;;  %v1023_v49 = vshll.u32 %v9443_v43, 16  ;;  %v1022_v40 = vshrl.u32 %v1018_v41, 16 }
 0x335   : > { %v3501_v2 = vpop.f32.mrf.mxu2  ;;  %v3787_v32 = vpop.f32.mrf.mxu3  ;;  %vm1025_vm7 = vc.u32 %v1017_v60, %v1021_v12  ;;  %v1027_v0 = vadd.s32 %v1021_v12, %v1017_v60  ;;  %v1006_v50 = vshrl.u32 %v1005_v23, 4  ;;  %vm9473_vm12 = vcmp.lt.s32.totalorder %v1524_v17, 16 }
 0x336   : > { %v4286_v55 = vmax.f32 %v4250_v29, 0.0  ;;  %v3567_v3 = vadd.f32 %v3501_v2, %v8367_v47  ;;  %v9458_v63 = vpop.f32.mrf.mxu1  ;;  %v9460_v35 = vpop.f32.mrf.mxu0  ;;  %vm1381_vm8 = vcmp.ne.s32.totalorder %v979_v7, 0  ;;  %vm1417_vm9 = vcmp.lt.s32.totalorder %v979_v7, 0 }
 0x337   : > { %v1489_v28 = vadd.s32 18, %v979_v7  ;;  %vm9466_vm10 = vmand %vm1417_vm9, %vm1381_vm8  ;;  %v1026_v47 = vsel %vm1025_vm7, 1, %v10533_v57  ;;  %vm1029_vm11 = vc.u32 %v1027_v0, %v1023_v49  ;;  %v1007_v48 = vmul.u32 18, %v1006_v50 }
 0x338   : > { %v4322_v8 = vsel %vm9434_vm6, %v4286_v55, 0.0  ;;  %v3853_v26 = vadd.f32 %v3787_v32, %v3567_v3  ;;  %v4467_v45 = vld [vmem:[#allocation2 + $0xa8] sm:$0xff]  ;;  %v1028_v21 = vadd.s32 %v1026_v47, %v1020_v11  ;;  %v1030_v5 = vsel %vm1029_vm11, 1, %v10533_v57  ;;  %v9547_v47 = vld [vmem:[#allocation2 + $0x32] sm:$0xff] }
 0x339   : > { %4358 = vst [vmem:[#allocation2 + $0xb3] sm:$0xff] %v4322_v8  ;;  %4577 = vmatmul.f32.gmra.mxu1 %v4467_v45  ;;  %5378 = vmatmul.f32.gmra.mxu0 %v9464_v27  ;;  %v1024_v60 = vshrl.u32 %v9443_v43, 16  ;;  %v1044_v15 = vshrl.u32 %v9432_v31, 16  ;;  %v1525_v52 = vsel %vm9466_vm10, %v1489_v28, %v979_v7  ;;  %v9484_v41 = vsub.s32 %v9319_v56, %v1007_v48  ;;  %v4734_v48 = vld [vmem:[#allocation2 + $0x19] sm:$0xff] }
 0x33a   : > { %v4139_v20 = vadd.f32 %v9408_v19, %v3853_v26  ;;  %4806 = vmatmul.f32.gmra.mxu2 %v4733_v24  ;;  %5092 = vmatmul.f32.gmra.mxu3 %v9381_v4  ;;  %v1032_v29 = vadd.s32 %v1030_v5, %v1028_v21  ;;  %v9486_v17 = vmul.u32 58254, %v1043_v39  ;;  %v1046_v12 = vmul.u32 14564, %v1043_v39 }
 0x33b   : > { %v9489_v19 = vmul.u32 14564, %v1044_v15  ;;  %v1072_v4 = vand.u32 65535, %v9452_v54  ;;  %vm1382_vm13 = vcmp.ne.s32.totalorder %v9484_v41, 0  ;;  %vm1418_vm14 = vcmp.lt.s32.totalorder %v9484_v41, 0 }
 0x33c   : > { %v4251_v11 = vadd.f32 %v9448_v36, %v4139_v20  ;;  %v1033_v32 = vadd.s32 %v1032_v29, %v1022_v40  ;;  %v1049_v7 = vmul.u32 58254, %v1044_v15  ;;  %v1050_v39 = vshll.u32 %v9486_v17, 16  ;;  %vm9517_vm0 = vmand %vm1418_vm14, %vm1382_vm13 }
 0x33d   : > { %v3504_v2 = vpop.f32.mrf.mxu2  ;;  %v3790_v43 = vpop.f32.mrf.mxu3  ;;  %v1073_v3 = vshrl.u32 %v9452_v54, 16  ;;  %vm9501_vm15 = vcmp.lt.s32.totalorder %v1525_v52, 16  ;;  %v9506_v28 = vadd.s32 18, %v9484_v41  ;;  %v1052_v8 = vshll.u32 %v9489_v19, 16 }
 0x33e   : > { %v4287_v56 = vmax.f32 %v4251_v11, 0.0  ;;  %v3568_v23 = vadd.f32 %v3504_v2, %v8415_v53  ;;  %v9495_v49 = vpop.f32.mrf.mxu1  ;;  %v9497_v55 = vpop.f32.mrf.mxu0  ;;  %v1034_v50 = vadd.s32 %v1033_v32, %v1024_v60  ;;  %v1051_v24 = vshrl.u32 %v9486_v17, 16 }
 0x33f   : > { %vm1054_vm1 = vc.u32 %v1046_v12, %v1050_v39  ;;  %v1056_v5 = vadd.s32 %v1050_v39, %v1046_v12  ;;  %v1075_v20 = vmul.u32 14564, %v1072_v4  ;;  %v1076_v52 = vmul.u32 58254, %v1072_v4 }
 0x340   : > { %v4323_v53 = vsel %vm9473_vm12, %v4287_v56, 0.0  ;;  %v3854_v26 = vadd.f32 %v3790_v43, %v3568_v23  ;;  %v4468_v45 = vld [vmem:[#allocation2 + $0xb0] sm:$0xff]  ;;  %v1035_v40 = vshrl.u32 %v1034_v50, 4  ;;  %v1055_v21 = vsel %vm1054_vm1, 1, %v10533_v57 }
 0x341   : > { %4359 = vst [vmem:[#allocation2 + $0xbb] sm:$0xff] %v4323_v53  ;;  %4580 = vmatmul.f32.gmra.mxu1 %v4468_v45  ;;  %5381 = vmatmul.f32.gmra.mxu0 %v9511_v51  ;;  %v1057_v15 = vadd.s32 %v1055_v21, %v1049_v7  ;;  %v9526_v29 = vmul.u32 14564, %v1073_v3  ;;  %v1526_v17 = vsel %vm9517_vm0, %v9506_v28, %v9484_v41  ;;  %v1053_v2 = vshrl.u32 %v9489_v19, 16 }
 0x342   : > { %v4140_v60 = vadd.f32 %v9460_v35, %v3854_v26  ;;  %4809 = vmatmul.f32.gmra.mxu2 %v4734_v48  ;;  %5095 = vmatmul.f32.gmra.mxu3 %v9417_v14  ;;  %v1036_v11 = vmul.u32 18, %v1035_v40  ;;  %vm1058_vm2 = vc.u32 %v1056_v5, %v1052_v8  ;;  %v1078_v43 = vmul.u32 58254, %v1073_v3  ;;  %v4735_v40 = vld [vmem:[#allocation2 + $0x21] sm:$0xff] }
 0x343   : > { %v1059_v35 = vsel %vm1058_vm2, 1, %v10533_v57  ;;  %v1079_v14 = vshll.u32 %v1076_v52, 16  ;;  %v1081_v23 = vshll.u32 %v9526_v29, 16  ;;  %v9538_v41 = vadd.s32 216, %v8204_v33 }
 0x344   : > { %v4252_v12 = vadd.f32 %v9448_v36, %v4140_v60  ;;  %v1037_v7 = vsub.s32 %v9400_v58, %v1036_v11  ;;  %v1061_v56 = vadd.s32 %v1059_v35, %v1057_v15  ;;  %v1080_v21 = vshrl.u32 %v1076_v52, 16 }
 0x345   : > { %v3507_v32 = vpop.f32.mrf.mxu2  ;;  %v3793_v4 = vpop.f32.mrf.mxu3  ;;  %vm1083_vm3 = vc.u32 %v1075_v20, %v1079_v14  ;;  %v1085_v3 = vadd.s32 %v1079_v14, %v1075_v20  ;;  %v1101_v60 = vand.u32 65535, %v9538_v41  ;;  %v1082_v11 = vshrl.u32 %v9526_v29, 16 }
 0x346   : > { %v4288_v39 = vmax.f32 %v4252_v12, 0.0  ;;  %v3569_v19 = vadd.f32 %v3507_v32, %v8419_v1  ;;  %v9541_v28 = vpop.f32.mrf.mxu1  ;;  %v9543_v50 = vpop.f32.mrf.mxu0  ;;  %vm1383_vm4 = vcmp.ne.s32.totalorder %v1037_v7, 0  ;;  %vm1419_vm5 = vcmp.lt.s32.totalorder %v1037_v7, 0 }
 0x347   : > { %v1491_v8 = vadd.s32 18, %v1037_v7  ;;  %v1062_v53 = vadd.s32 %v1061_v56, %v1051_v24  ;;  %vm9549_vm6 = vmand %vm1419_vm5, %vm1383_vm4  ;;  %v1084_v1 = vsel %vm1083_vm3, 1, %v10533_v57  ;;  %vm1087_vm7 = vc.u32 %v1085_v3, %v1081_v23 }
 0x348   : > { %v4324_v58 = vsel %vm9501_vm15, %v4288_v39, 0.0  ;;  %v3855_v26 = vadd.f32 %v3793_v4, %v3569_v19  ;;  %v4469_v45 = vld [vmem:[#allocation2 + $0xb8] sm:$0xff]  ;;  %v1086_v0 = vadd.s32 %v1084_v1, %v1078_v43  ;;  %v1088_v20 = vsel %vm1087_vm7, 1, %v10533_v57 }
 0x349   : > { %4360 = vst [vmem:[#allocation2 + $0xc3] sm:$0xff] %v4324_v58  ;;  %4583 = vmatmul.f32.gmra.mxu1 %v4469_v45  ;;  %5384 = vmatmul.f32.gmra.mxu0 %v9547_v47  ;;  %v1063_v24 = vadd.s32 %v1062_v53, %v1053_v2  ;;  %v1527_v13 = vsel %vm9549_vm6, %v1491_v8, %v1037_v7  ;;  %v1102_v2 = vshrl.u32 %v9538_v41, 16  ;;  %vm9563_vm8 = vcmp.lt.s32.totalorder %v1526_v17, 16 }
 0x34a   : > { %v4141_v5 = vadd.f32 %v9497_v55, %v3855_v26  ;;  %4812 = vmatmul.f32.gmra.mxu2 %v4735_v40  ;;  %5098 = vmatmul.f32.gmra.mxu3 %v9464_v27  ;;  %v1090_v12 = vadd.s32 %v1088_v20, %v1086_v0  ;;  %v1104_v27 = vmul.u32 14564, %v1101_v60  ;;  %v9568_v35 = vmul.u32 58254, %v1101_v60  ;;  %v4736_v40 = vld [vmem:[#allocation2 + $0x29] sm:$0xff] }
 0x34b   : > { %v1064_v15 = vshrl.u32 %v1063_v24, 4  ;;  %vm9570_vm9 = vcmp.lt.s32.totalorder %v1527_v13, 16  ;;  %v9574_v7 = vmul.u32 14564, %v1102_v2  ;;  %v9577_v17 = vadd.s32 224, %v8204_v33  ;;  %v9592_v24 = vld [vmem:[#allocation2 + $0x3a] sm:$0xff] }
 0x34c   : > { %v4253_v55 = vadd.f32 %v9448_v36, %v4141_v5  ;;  %v1091_v29 = vadd.s32 %v1090_v12, %v1080_v21  ;;  %v1108_v3 = vshll.u32 %v9568_v35, 16  ;;  %v9586_v8 = vadd.s32 232, %v8204_v33  ;;  %v5629_v5 = vld [vmem:[#allocation9 + $0x218] sm:$0xff] }
 0x34d   : > { %v3510_v43 = vpop.f32.mrf.mxu2  ;;  %v3796_v32 = vpop.f32.mrf.mxu3  ;;  %v1065_v4 = vmul.u32 18, %v1064_v15  ;;  %v1107_v26 = vmul.u32 58254, %v1102_v2  ;;  %v1110_v45 = vshll.u32 %v9574_v7, 16  ;;  %v1130_v15 = vand.u32 65535, %v9577_v17  ;;  %5654 = vmatpush.msrb.mxu1 %v5629_v5  ;;  %v4737_v5 = vld [vmem:[#allocation2 + $0x31] sm:$0xff] }
 0x34e   : > { %v4289_v56 = vmax.f32 %v4253_v55, 0.0  ;;  %v3570_v23 = vadd.f32 %v3510_v43, %v8423_v18  ;;  %v9580_v39 = vpop.f32.mrf.mxu1  ;;  %v9582_v19 = vpop.f32.mrf.mxu0  ;;  %v1092_v58 = vadd.s32 %v1091_v29, %v1082_v11  ;;  %vm1112_vm10 = vc.u32 %v1104_v27, %v1108_v3 }
 0x34f   : > { %v1066_v53 = vsub.s32 %v9432_v31, %v1065_v4  ;;  %v1114_v21 = vadd.s32 %v1108_v3, %v1104_v27  ;;  %v1113_v60 = vsel %vm1112_vm10, 1, %v10533_v57  ;;  %v1109_v12 = vshrl.u32 %v9568_v35, 16 }
 0x350   : > { %v4325_v48 = vsel %vm9563_vm8, %v4289_v56, 0.0  ;;  %v3856_v1 = vadd.f32 %v3796_v32, %v3570_v23  ;;  %v4470_v18 = vld [vmem:[#allocation2 + $0xc0] sm:$0xff]  ;;  %v1093_v0 = vshrl.u32 %v1092_v58, 4  ;;  %v1115_v2 = vadd.s32 %v1113_v60, %v1107_v26 }
 0x351   : > { %4361 = vst [vmem:[#allocation2 + $0xcb] sm:$0xff] %v4325_v48  ;;  %4586 = vmatmul.f32.gmra.mxu1 %v4470_v18  ;;  %5387 = vmatmul.f32.gmra.mxu0 %v9592_v24  ;;  %vm1384_vm11 = vcmp.ne.s32.totalorder %v1066_v53, 0  ;;  %vm1420_vm12 = vcmp.lt.s32.totalorder %v1066_v53, 0  ;;  %v1492_v31 = vadd.s32 18, %v1066_v53  ;;  %vm1116_vm14 = vc.u32 %v1114_v21, %v1110_v45 }
 0x352   : > { %v4142_v13 = vadd.f32 %v9543_v50, %v3856_v1  ;;  %4815 = vmatmul.f32.gmra.mxu2 %v4736_v40  ;;  %5101 = vmatmul.f32.gmra.mxu3 %v9511_v51  ;;  %vm9597_vm13 = vmand %vm1420_vm12, %vm1384_vm11  ;;  %v1094_v11 = vmul.u32 18, %v1093_v0  ;;  %v1117_v52 = vsel %vm1116_vm14, 1, %v10533_v57  ;;  %v1111_v55 = vshrl.u32 %v9574_v7, 16  ;;  %v9621_v40 = vld [vmem:[#allocation2 + $0x42] sm:$0xff] }
 0x353   : > { %v1528_v51 = vsel %vm9597_vm13, %v1492_v31, %v1066_v53  ;;  %v1131_v27 = vshrl.u32 %v9577_v17, 16  ;;  %v1119_v29 = vadd.s32 %v1117_v52, %v1115_v2  ;;  %v1133_v56 = vmul.u32 14564, %v1130_v15 }
 0x354   : > { %v4254_v50 = vadd.f32 %v9448_v36, %v4142_v13  ;;  %v1095_v4 = vsub.s32 %v9452_v54, %v1094_v11  ;;  %v1134_v35 = vmul.u32 58254, %v1130_v15  ;;  %v1159_v7 = vand.u32 65535, %v9586_v8 }
 0x355   : > { %v3513_v43 = vpop.f32.mrf.mxu2  ;;  %v3799_v32 = vpop.f32.mrf.mxu3  ;;  %v9616_v45 = vmul.u32 14564, %v1131_v27  ;;  %v1120_v48 = vadd.s32 %v1119_v29, %v1109_v12  ;;  %v1136_v21 = vmul.u32 58254, %v1131_v27  ;;  %vm9627_vm2 = vcmp.lt.s32.totalorder %v1528_v51, 16 }
 0x356   : > { %v4290_v23 = vmax.f32 %v4254_v50, 0.0  ;;  %v3571_v3 = vadd.f32 %v3513_v43, %v8532_v6  ;;  %v9612_v58 = vpop.f32.mrf.mxu1  ;;  %v9614_v26 = vpop.f32.mrf.mxu0  ;;  %vm1385_vm15 = vcmp.ne.s32.totalorder %v1095_v4, 0  ;;  %vm1421_vm0 = vcmp.lt.s32.totalorder %v1095_v4, 0 }
 0x357   : > { %v1493_v53 = vadd.s32 18, %v1095_v4  ;;  %vm9623_vm1 = vmand %vm1421_vm0, %vm1385_vm15  ;;  %v1137_v31 = vshll.u32 %v1134_v35, 16  ;;  %v1121_v13 = vadd.s32 %v1120_v48, %v1111_v55  ;;  %v1139_v20 = vshll.u32 %v9616_v45, 16 }
 0x358   : > { %v4326_v54 = vsel %vm9570_vm9, %v4290_v23, 0.0  ;;  %v3857_v1 = vadd.f32 %v3799_v32, %v3571_v3  ;;  %v4471_v18 = vld [vmem:[#allocation2 + $0xc8] sm:$0xff]  ;;  %v1138_v15 = vshrl.u32 %v1134_v35, 16  ;;  %v1160_v52 = vshrl.u32 %v9586_v8, 16 }
 0x359   : > { %4362 = vst [vmem:[#allocation2 + $0xd3] sm:$0xff] %v4326_v54  ;;  %4589 = vmatmul.f32.gmra.mxu1 %v4471_v18  ;;  %5390 = vmatmul.f32.gmra.mxu0 %v9621_v40  ;;  %v1529_v14 = vsel %vm9623_vm1, %v1493_v53, %v1095_v4  ;;  %vm1141_vm3 = vc.u32 %v1133_v56, %v1137_v31  ;;  %v1122_v12 = vshrl.u32 %v1121_v13, 4  ;;  %v1162_v50 = vmul.u32 14564, %v1159_v7  ;;  %v5628_v13 = vld [vmem:[#allocation9 + $0x210] sm:$0xff] }
 0x35a   : > { %v4143_v60 = vadd.f32 %v9582_v19, %v3857_v1  ;;  %4818 = vmatmul.f32.gmra.mxu2 %v4737_v5  ;;  %5104 = vmatmul.f32.gmra.mxu3 %v9547_v47  ;;  %v1143_v11 = vadd.s32 %v1137_v31, %v1133_v56  ;;  %v1142_v2 = vsel %vm1141_vm3, 1, %v10533_v57  ;;  %v9640_v55 = vmul.u32 58254, %v1159_v7  ;;  %v9660_v31 = vld [vmem:[#allocation2 + $0x4a] sm:$0xff] }
 0x35b   : > { %v1144_v27 = vadd.s32 %v1142_v2, %v1136_v21  ;;  %v1123_v32 = vmul.u32 18, %v1122_v12  ;;  %v1140_v47 = vshrl.u32 %v9616_v45, 16  ;;  %v9644_v29 = vmul.u32 14564, %v1160_v52  ;;  %v4738_v21 = vld [vmem:[#allocation2 + $0x39] sm:$0xff]  ;;  %5655 = vmatpush.msrb.mxu1 %v5628_v13 }
 0x35c   : > { %v4255_v51 = vadd.f32 %v9448_v36, %v4143_v60  ;;  %vm1145_vm4 = vc.u32 %v1143_v11, %v1139_v20  ;;  %v1166_v7 = vshll.u32 %v9640_v55, 16  ;;  %vm9652_vm5 = vcmp.lt.s32.totalorder %v1529_v14, 16 }
 0x35d   : > { %v3516_v43 = vpop.f32.mrf.mxu2  ;;  %v3802_v19 = vpop.f32.mrf.mxu3  ;;  %v1146_v4 = vsel %vm1145_vm4, 1, %v10533_v57  ;;  %v1124_v45 = vsub.s32 %v9538_v41, %v1123_v32  ;;  %v1165_v54 = vmul.u32 58254, %v1160_v52  ;;  %v1168_v1 = vshll.u32 %v9644_v29, 16 }
 0x35e   : > { %v4291_v56 = vmax.f32 %v4255_v51, 0.0  ;;  %v3572_v35 = vadd.f32 %v3516_v43, %v8535_v37  ;;  %v9647_v23 = vpop.f32.mrf.mxu1  ;;  %v9649_v3 = vpop.f32.mrf.mxu0  ;;  %v1148_v53 = vadd.s32 %v1146_v4, %v1144_v27  ;;  %vm1170_vm6 = vc.u32 %v1162_v50, %v1166_v7 }
 0x35f   : > { %vm1386_vm7 = vcmp.ne.s32.totalorder %v1124_v45, 0  ;;  %vm1422_vm8 = vcmp.lt.s32.totalorder %v1124_v45, 0  ;;  %v1494_v41 = vadd.s32 18, %v1124_v45  ;;  %v1171_v14 = vsel %vm1170_vm6, 1, %v10533_v57 }
 0x360   : > { %v4327_v18 = vsel %vm9627_vm2, %v4291_v56, 0.0  ;;  %v3858_v37 = vadd.f32 %v3802_v19, %v3572_v35  ;;  %v4472_v6 = vld [vmem:[#allocation2 + $0xd0] sm:$0xff]  ;;  %v1149_v5 = vadd.s32 %v1148_v53, %v1138_v15  ;;  %vm9666_vm9 = vmand %vm1422_vm8, %vm1386_vm7  ;;  %v1172_v15 = vadd.s32 %v1166_v7, %v1162_v50 }
 0x361   : > { %4363 = vst [vmem:[#allocation2 + $0xdb] sm:$0xff] %v4327_v18  ;;  %4592 = vmatmul.f32.gmra.mxu1 %v4472_v6  ;;  %5393 = vmatmul.f32.gmra.mxu0 %v9660_v31  ;;  %v9671_v11 = vadd.s32 240, %v8204_v33  ;;  %v1530_v12 = vsel %vm9666_vm9, %v1494_v41, %v1124_v45  ;;  %v1167_v2 = vshrl.u32 %v9640_v55, 16  ;;  %v1169_v52 = vshrl.u32 %v9644_v29, 16 }
 0x362   : > { %v4144_v0 = vadd.f32 %v9614_v26, %v3858_v37  ;;  %4821 = vmatmul.f32.gmra.mxu2 %v4738_v21  ;;  %5107 = vmatmul.f32.gmra.mxu3 %v9592_v24  ;;  %v1150_v60 = vadd.s32 %v1149_v5, %v1140_v47  ;;  %v1173_v26 = vadd.s32 %v1171_v14, %v1165_v54  ;;  %v9679_v27 = vadd.s32 248, %v8204_v33  ;;  %v4739_v14 = vld [vmem:[#allocation2 + $0x41] sm:$0xff] }
 0x363   : > { %vm1174_vm10 = vc.u32 %v1172_v15, %v1168_v1  ;;  %v1188_v32 = vand.u32 65535, %v9671_v11  ;;  %v1189_v47 = vshrl.u32 %v9671_v11, 16  ;;  %v9685_v55 = vadd.s32 256, %v8204_v33 }
 0x364   : > { %v4256_v24 = vadd.f32 %v9448_v36, %v4144_v0  ;;  %v1151_v51 = vshrl.u32 %v1150_v60, 4  ;;  %v1175_v19 = vsel %vm1174_vm10, 1, %v10533_v57  ;;  %vm9692_vm11 = vcmp.lt.s32.totalorder %v1530_v12, 16 }
 0x365   : > { %v3519_v50 = vpop.f32.mrf.mxu2  ;;  %v3805_v43 = vpop.f32.mrf.mxu3  ;;  %v1177_v7 = vadd.s32 %v1175_v19, %v1173_v26  ;;  %v1191_v54 = vmul.u32 14564, %v1188_v32  ;;  %v1192_v1 = vmul.u32 58254, %v1188_v32  ;;  %v9696_v18 = vmul.u32 14564, %v1189_v47 }
 0x366   : > { %v4292_v4 = vmax.f32 %v4256_v24, 0.0  ;;  %v3573_v29 = vadd.f32 %v3519_v50, %v8689_v9  ;;  %v9688_v56 = vpop.f32.mrf.mxu1  ;;  %v9690_v35 = vpop.f32.mrf.mxu0  ;;  %v1152_v53 = vmul.u32 18, %v1151_v51  ;;  %v9700_v9 = vld [vmem:[#allocation2 + $0x52] sm:$0xff]  ;;  %v1194_v13 = vmul.u32 58254, %v1189_v47 }
 0x367   : > { %v1178_v41 = vadd.s32 %v1177_v7, %v1167_v2  ;;  %v1195_v0 = vshll.u32 %v1192_v1, 16  ;;  %v1197_v20 = vshll.u32 %v9696_v18, 16  ;;  %v1217_v60 = vand.u32 65535, %v9679_v27 }
 0x368   : > { %v4328_v37 = vsel %vm9652_vm5, %v4292_v4, 0.0  ;;  %v3859_v6 = vadd.f32 %v3805_v43, %v3573_v29  ;;  %v4473_v21 = vld [vmem:[#allocation2 + $0xd8] sm:$0xff]  ;;  %v1153_v5 = vsub.s32 %v9577_v17, %v1152_v53  ;;  %v1218_v26 = vshrl.u32 %v9679_v27, 16 }
 0x369   : > { %4364 = vst [vmem:[#allocation2 + $0xe3] sm:$0xff] %v4328_v37  ;;  %4595 = vmatmul.f32.gmra.mxu1 %v4473_v21  ;;  %5396 = vmatmul.f32.gmra.mxu0 %v9700_v9  ;;  %v1179_v12 = vadd.s32 %v1178_v41, %v1169_v52  ;;  %vm1199_vm15 = vc.u32 %v1191_v54, %v1195_v0  ;;  %v1196_v51 = vshrl.u32 %v1192_v1, 16  ;;  %v1220_v47 = vmul.u32 14564, %v1217_v60 }
 0x36a   : > { %v4145_v48 = vadd.f32 %v9649_v3, %v3859_v6  ;;  %4824 = vmatmul.f32.gmra.mxu2 %v4739_v14  ;;  %5110 = vmatmul.f32.gmra.mxu3 %v9621_v40  ;;  %vm1387_vm12 = vcmp.ne.s32.totalorder %v1153_v5, 0  ;;  %vm1423_vm13 = vcmp.lt.s32.totalorder %v1153_v5, 0  ;;  %v1495_v17 = vadd.s32 18, %v1153_v5 }
 0x36b   : > { %vm9708_vm14 = vmand %vm1423_vm13, %vm1387_vm12  ;;  %v1201_v2 = vadd.s32 %v1195_v0, %v1191_v54  ;;  %v1200_v40 = vsel %vm1199_vm15, 1, %v10533_v57  ;;  %v1180_v19 = vshrl.u32 %v1179_v12, 4  ;;  %v9723_v54 = vmul.u32 58254, %v1217_v60 }
 0x36c   : > { %v4257_v24 = vadd.f32 %v9448_v36, %v4145_v48  ;;  %v1531_v3 = vsel %vm9708_vm14, %v1495_v17, %v1153_v5  ;;  %v1202_v32 = vadd.s32 %v1200_v40, %v1194_v13  ;;  %v1198_v37 = vshrl.u32 %v9696_v18, 16  ;;  %v9734_v13 = vld [vmem:[#allocation2 + $0x5a] sm:$0xff] }
 0x36d   : > { %v3522_v50 = vpop.f32.mrf.mxu2  ;;  %v3808_v43 = vpop.f32.mrf.mxu3  ;;  %vm1203_vm0 = vc.u32 %v1201_v2, %v1197_v20  ;;  %v1181_v1 = vmul.u32 18, %v1180_v19  ;;  %v9726_v21 = vmul.u32 14564, %v1218_v26  ;;  %vm9730_vm1 = vcmp.lt.s32.totalorder %v1531_v3, 16  ;;  %v4740_v20 = vld [vmem:[#allocation2 + $0x49] sm:$0xff] }
 0x36e   : > { %v4293_v4 = vmax.f32 %v4257_v24, 0.0  ;;  %v3574_v52 = vadd.f32 %v3522_v50, %v8731_v10  ;;  %v9718_v29 = vpop.f32.mrf.mxu1  ;;  %v9720_v53 = vpop.f32.mrf.mxu0  ;;  %v1204_v7 = vsel %vm1203_vm0, 1, %v10533_v57  ;;  %v1224_v0 = vshll.u32 %v9723_v54, 16 }
 0x36f   : > { %v1206_v6 = vadd.s32 %v1204_v7, %v1202_v32  ;;  %v1182_v18 = vsub.s32 %v9586_v8, %v1181_v1  ;;  %v1223_v45 = vmul.u32 58254, %v1218_v26  ;;  %v1226_v48 = vshll.u32 %v9726_v21, 16 }
 0x370   : > { %v4329_v5 = vsel %vm9692_vm11, %v4293_v4, 0.0  ;;  %v3860_v10 = vadd.f32 %v3808_v43, %v3574_v52  ;;  %v4474_v14 = vld [vmem:[#allocation2 + $0xe0] sm:$0xff]  ;;  %vm1228_vm2 = vc.u32 %v1220_v47, %v1224_v0  ;;  %v1230_v15 = vadd.s32 %v1224_v0, %v1220_v47 }
 0x371   : > { %4365 = vst [vmem:[#allocation2 + $0xeb] sm:$0xff] %v4329_v5  ;;  %4598 = vmatmul.f32.gmra.mxu1 %v4474_v14  ;;  %5399 = vmatmul.f32.gmra.mxu0 %v9734_v13  ;;  %v1207_v60 = vadd.s32 %v1206_v6, %v1196_v51  ;;  %v1246_v12 = vand.u32 65535, %v9685_v55  ;;  %vm1388_vm3 = vcmp.ne.s32.totalorder %v1182_v18, 0  ;;  %vm1424_vm4 = vcmp.lt.s32.totalorder %v1182_v18, 0  ;;  %v9766_v0 = vld [vmem:[#allocation2 + $0x62] sm:$0xff] }
 0x372   : > { %v4146_v17 = vadd.f32 %v9690_v35, %v3860_v10  ;;  %4827 = vmatmul.f32.gmra.mxu2 %v4740_v20  ;;  %5113 = vmatmul.f32.gmra.mxu3 %v9660_v31  ;;  %v1496_v2 = vadd.s32 18, %v1182_v18  ;;  %vm9744_vm5 = vmand %vm1424_vm4, %vm1388_vm3  ;;  %v1229_v26 = vsel %vm1228_vm2, 1, %v10533_v57  ;;  %vm1232_vm6 = vc.u32 %v1230_v15, %v1226_v48 }
 0x373   : > { %v1208_v24 = vadd.s32 %v1207_v60, %v1198_v37  ;;  %v1247_v35 = vshrl.u32 %v9685_v55, 16  ;;  %v1225_v50 = vshrl.u32 %v9723_v54, 16  ;;  %v1231_v43 = vadd.s32 %v1229_v26, %v1223_v45  ;;  %v4741_v60 = vld [vmem:[#allocation2 + $0x51] sm:$0xff] }
 0x374   : > { %v4258_v3 = vadd.f32 %v9448_v36, %v4146_v17  ;;  %v1233_v19 = vsel %vm1232_vm6, 1, %v10533_v57  ;;  %v1532_v4 = vsel %vm9744_vm5, %v1496_v2, %v1182_v18  ;;  %v1227_v1 = vshrl.u32 %v9726_v21, 16  ;;  %v5627_v17 = vld [vmem:[#allocation9 + $0x208] sm:$0xff] }
 0x375   : > { %v3525_v31 = vpop.f32.mrf.mxu2  ;;  %v3811_v51 = vpop.f32.mrf.mxu3  ;;  %v1209_v40 = vshrl.u32 %v1208_v24, 4  ;;  %v1235_v6 = vadd.s32 %v1233_v19, %v1231_v43  ;;  %v9760_v5 = vmul.u32 58254, %v1246_v12  ;;  %v9762_v54 = vmul.u32 14564, %v1247_v35  ;;  %5656 = vmatpush.msrb.mxu1 %v5627_v17 }
 0x376   : > { %v4294_v32 = vmax.f32 %v4258_v3, 0.0  ;;  %v3575_v47 = vadd.f32 %v3525_v31, %v8895_v34  ;;  %v9755_v52 = vpop.f32.mrf.mxu1  ;;  %v9757_v7 = vpop.f32.mrf.mxu0  ;;  %v1249_v20 = vmul.u32 14564, %v1246_v12  ;;  %v9769_v18 = vadd.s32 264, %v8204_v33 }
 0x377   : > { %v1210_v37 = vmul.u32 18, %v1209_v40  ;;  %vm9771_vm7 = vcmp.lt.s32.totalorder %v1532_v4, 16  ;;  %v1236_v45 = vadd.s32 %v1235_v6, %v1225_v50  ;;  %v1253_v48 = vshll.u32 %v9760_v5, 16 }
 0x378   : > { %v4330_v10 = vsel %vm9730_vm1, %v4294_v32, 0.0  ;;  %v3861_v14 = vadd.f32 %v3811_v51, %v3575_v47  ;;  %v4475_v34 = vld [vmem:[#allocation2 + $0xe8] sm:$0xff]  ;;  %v1252_v12 = vmul.u32 58254, %v1247_v35  ;;  %v1255_v2 = vshll.u32 %v9762_v54, 16 }
 0x379   : > { %4366 = vst [vmem:[#allocation2 + $0xf3] sm:$0xff] %v4330_v10  ;;  %4601 = vmatmul.f32.gmra.mxu1 %v4475_v34  ;;  %5402 = vmatmul.f32.gmra.mxu0 %v9766_v0  ;;  %v1211_v41 = vsub.s32 %v9671_v11, %v1210_v37  ;;  %v1275_v24 = vand.u32 65535, %v9769_v18  ;;  %v1237_v8 = vadd.s32 %v1236_v45, %v1227_v1  ;;  %v1254_v40 = vshrl.u32 %v9760_v5, 16  ;;  %v4742_v45 = vld [vmem:[#allocation2 + $0x59] sm:$0xff] }
 0x37a   : > { %v4147_v15 = vadd.f32 %v9720_v53, %v3861_v14  ;;  %4830 = vmatmul.f32.gmra.mxu2 %v4741_v60  ;;  %5116 = vmatmul.f32.gmra.mxu3 %v9700_v9  ;;  %vm1257_vm11 = vc.u32 %v1249_v20, %v1253_v48  ;;  %v1259_v53 = vadd.s32 %v1253_v48, %v1249_v20  ;;  %v1276_v9 = vshrl.u32 %v9769_v18, 16 }
 0x37b   : > { %vm1389_vm8 = vcmp.ne.s32.totalorder %v1211_v41, 0  ;;  %vm1425_vm9 = vcmp.lt.s32.totalorder %v1211_v41, 0  ;;  %v1497_v3 = vadd.s32 18, %v1211_v41  ;;  %v1238_v51 = vshrl.u32 %v1237_v8, 4 }
 0x37c   : > { %v4259_v11 = vadd.f32 %v9448_v36, %v4147_v15  ;;  %vm9783_vm10 = vmand %vm1425_vm9, %vm1389_vm8  ;;  %v1256_v50 = vshrl.u32 %v9762_v54, 16  ;;  %v1258_v43 = vsel %vm1257_vm11, 1, %v10533_v57  ;;  %vm1261_vm12 = vc.u32 %v1259_v53, %v1255_v2 }
 0x37d   : > { %v3528_v35 = vpop.f32.mrf.mxu2  ;;  %v3814_v31 = vpop.f32.mrf.mxu3  ;;  %v1533_v47 = vsel %vm9783_vm10, %v1497_v3, %v1211_v41  ;;  %v1260_v37 = vadd.s32 %v1258_v43, %v1252_v12  ;;  %v1239_v6 = vmul.u32 18, %v1238_v51  ;;  %v9798_v10 = vmul.u32 58254, %v1275_v24 }
 0x37e   : > { %v4295_v19 = vmax.f32 %v4259_v11, 0.0  ;;  %v3576_v32 = vadd.f32 %v3528_v35, %v8905_v16  ;;  %v9794_v4 = vpop.f32.mrf.mxu1  ;;  %v9796_v1 = vpop.f32.mrf.mxu0  ;;  %v9800_v5 = vmul.u32 14564, %v1276_v9  ;;  %v9804_v16 = vld [vmem:[#allocation2 + $0x6a] sm:$0xff]  ;;  %v1262_v20 = vsel %vm1261_vm12, 1, %v10533_v57 }
 0x37f   : > { %v1278_v60 = vmul.u32 14564, %v1275_v24  ;;  %vm9807_vm13 = vcmp.lt.s32.totalorder %v1533_v47, 16  ;;  %v1240_v48 = vsub.s32 %v9679_v27, %v1239_v6  ;;  %v1264_v21 = vadd.s32 %v1262_v20, %v1260_v37  ;;  %v9840_v20 = vld [vmem:[#allocation2 + $0x72] sm:$0xff] }
 0x380   : > { %v4331_v54 = vsel %vm9771_vm7, %v4295_v19, 0.0  ;;  %v3862_v14 = vadd.f32 %v3814_v31, %v3576_v32  ;;  %v4476_v34 = vld [vmem:[#allocation2 + $0xf0] sm:$0xff]  ;;  %v1282_v17 = vshll.u32 %v9798_v10, 16  ;;  %v1281_v12 = vmul.u32 58254, %v1276_v9 }
 0x381   : > { %4367 = vst [vmem:[#allocation2 + $0xfb] sm:$0xff] %v4331_v54  ;;  %4604 = vmatmul.f32.gmra.mxu1 %v4476_v34  ;;  %5405 = vmatmul.f32.gmra.mxu0 %v9804_v16  ;;  %v1284_v2 = vshll.u32 %v9800_v5, 16  ;;  %v9818_v24 = vadd.s32 272, %v8204_v33  ;;  %vm1390_vm14 = vcmp.ne.s32.totalorder %v1240_v48, 0  ;;  %vm1426_vm15 = vcmp.lt.s32.totalorder %v1240_v48, 0 }
 0x382   : > { %v4148_v15 = vadd.f32 %v9757_v7, %v3862_v14  ;;  %4833 = vmatmul.f32.gmra.mxu2 %v4742_v45  ;;  %5119 = vmatmul.f32.gmra.mxu3 %v9734_v13  ;;  %v1498_v3 = vadd.s32 18, %v1240_v48  ;;  %v1265_v8 = vadd.s32 %v1264_v21, %v1254_v40  ;;  %vm9821_vm0 = vmand %vm1426_vm15, %vm1390_vm14  ;;  %vm1286_vm1 = vc.u32 %v1278_v60, %v1282_v17  ;;  %v4743_v45 = vld [vmem:[#allocation2 + $0x61] sm:$0xff] }
 0x383   : > { %v1288_v7 = vadd.s32 %v1282_v17, %v1278_v60  ;;  %v1304_v13 = vand.u32 65535, %v9818_v24  ;;  %v1283_v35 = vshrl.u32 %v9798_v10, 16  ;;  %v1287_v31 = vsel %vm1286_vm1, 1, %v10533_v57 }
 0x384   : > { %v4260_v27 = vadd.f32 %v9448_v36, %v4148_v15  ;;  %v1266_v9 = vadd.s32 %v1265_v8, %v1256_v50  ;;  %v1305_v51 = vshrl.u32 %v9818_v24, 16  ;;  %v1534_v19 = vsel %vm9821_vm0, %v1498_v3, %v1240_v48  ;;  %v5626_v15 = vld [vmem:[#allocation9 + $0x200] sm:$0xff] }
 0x385   : > { %v3531_v26 = vpop.f32.mrf.mxu2  ;;  %v3817_v53 = vpop.f32.mrf.mxu3  ;;  %v1289_v37 = vadd.s32 %v1287_v31, %v1281_v12  ;;  %vm1290_vm2 = vc.u32 %v1288_v7, %v1284_v2  ;;  %v1307_v50 = vmul.u32 14564, %v1304_v13  ;;  %v9836_v54 = vmul.u32 58254, %v1304_v13  ;;  %5657 = vmatpush.msrb.mxu1 %v5626_v15  ;;  %v6213_v15 = vld [vmem:[#allocation9 + $0x378] sm:$0xff] }
 0x386   : > { %v4296_v40 = vmax.f32 %v4260_v27, 0.0  ;;  %v3577_v43 = vadd.f32 %v3531_v26, %v8954_v30  ;;  %v9832_v32 = vpop.f32.mrf.mxu1  ;;  %v9834_v47 = vpop.f32.mrf.mxu0  ;;  %v1267_v6 = vshrl.u32 %v1266_v9, 4  ;;  %v1291_v30 = vsel %vm1290_vm2, 1, %v10533_v57  ;;  %v6499_v12 = vld [vmem:[#allocation9 + $0x3f8] sm:$0xff]  ;;  %6214 = vmatpush.msra.mxu3 %v6213_v15 }
 0x387   : > { %v9843_v60 = vmul.u32 14564, %v1305_v51  ;;  %v1285_v21 = vshrl.u32 %v9800_v5, 16  ;;  %v1293_v17 = vadd.s32 %v1291_v30, %v1289_v37  ;;  %v1311_v41 = vshll.u32 %v9836_v54, 16  ;;  %v4744_v30 = vld [vmem:[#allocation2 + $0x69] sm:$0xff]  ;;  %6500 = vmatpush.msra.mxu0 %v6499_v12 }
 0x388   : > { %v4332_v10 = vsel %vm9807_vm13, %v4296_v40, 0.0  ;;  %v3863_v14 = vadd.f32 %v3817_v53, %v3577_v43  ;;  %v4477_v34 = vld [vmem:[#allocation2 + $0xf8] sm:$0xff]  ;;  %v1268_v48 = vmul.u32 18, %v1267_v6  ;;  %vm9848_vm3 = vcmp.lt.s32.totalorder %v1534_v19, 16 }
 0x389   : > { %4368 = vst [vmem:[#allocation2 + $0x103] sm:$0xff] %v4332_v10  ;;  %4607 = vmatmul.f32.gmra.mxu1 %v4477_v34  ;;  %5408 = vmatmul.f32.gmra.mxu0 %v9840_v20  ;;  %v1310_v3 = vmul.u32 58254, %v1305_v51  ;;  %v1313_v8 = vshll.u32 %v9843_v60, 16  ;;  %v1294_v11 = vadd.s32 %v1293_v17, %v1283_v35  ;;  %vm1315_vm4 = vc.u32 %v1307_v50, %v1311_v41  ;;  %v5927_v17 = vld [vmem:[#allocation9 + $0x2f8] sm:$0xff] }
 0x38a   : > { %v4149_v2 = vadd.f32 %v9796_v1, %v3863_v14  ;;  %4836 = vmatmul.f32.gmra.mxu2 %v4743_v45  ;;  %5122 = vmatmul.f32.gmra.mxu3 %v9766_v0  ;;  %v1269_v27 = vsub.s32 %v9685_v55, %v1268_v48  ;;  %v1317_v5 = vadd.s32 %v1311_v41, %v1307_v50  ;;  %v1312_v13 = vshrl.u32 %v9836_v54, 16  ;;  %v9875_v54 = vld [vmem:[#allocation2 + $0x7a] sm:$0xff] }
 0x38b   : > { %v1316_v26 = vsel %vm1315_vm4, 1, %v10533_v57  ;;  %v9860_v1 = vadd.s32 280, %v8204_v33  ;;  %v1295_v31 = vadd.s32 %v1294_v11, %v1285_v21  ;;  %v1314_v10 = vshrl.u32 %v9843_v60, 16  ;;  %5928 = vmatpush.msra.mxu2 %v5927_v17 }
 0x38c   : > { %v4261_v7 = vadd.f32 %v9448_v36, %v4149_v2  ;;  %vm1391_vm5 = vcmp.ne.s32.totalorder %v1269_v27, 0  ;;  %vm1427_vm6 = vcmp.lt.s32.totalorder %v1269_v27, 0  ;;  %v1499_v0 = vadd.s32 18, %v1269_v27  ;;  %v6785_v2 = vld [vmem:[#allocation9 + $0x478] sm:$0xff] }
 0x38d   : > { %v3534_v53 = vpop.f32.mrf.mxu2  ;;  %v3820_v9 = vpop.f32.mrf.mxu3  ;;  %vm9863_vm7 = vmand %vm1427_vm6, %vm1391_vm5  ;;  %v1318_v43 = vadd.s32 %v1316_v26, %v1310_v3  ;;  %vm1319_vm8 = vc.u32 %v1317_v5, %v1313_v8  ;;  %v1296_v33 = vshrl.u32 %v1295_v31, 4  ;;  %v1333_v37 = vand.u32 65535, %v9860_v1  ;;  %v10679_v5 = vld [vmem:[#allocation18_spill] sm:$0xff]  ;;  %6786 = vmatpush.msra.mxu1 %v6785_v2  ;;  %v10684_v2 = vld [vmem:[#allocation19_spill] sm:$0xff] }
 0x38e   : > { %v4297_v55 = vmax.f32 %v4261_v7, 0.0  ;;  %v3578_v35 = vadd.f32 %v3534_v53, %v8957_v22  ;;  %v9867_v36 = vpop.f32.mrf.mxu1  ;;  %v9869_v40 = vpop.f32.mrf.mxu0  ;;  %v1320_v19 = vsel %vm1319_vm8, 1, %v10533_v57  ;;  %v1535_v34 = vsel %vm9863_vm7, %v1499_v0, %v1269_v27 }
 0x38f   : > { %v1322_v14 = vadd.s32 %v1320_v19, %v1318_v43  ;;  %v1297_v45 = vmul.u32 18, %v1296_v33  ;;  %v1334_v48 = vshrl.u32 %v9860_v1, 16  ;;  %v9882_v21 = vmul.u32 58254, %v1333_v37 }
 0x390   : > { %v4333_v6 = vsel %vm9848_vm3, %v4297_v55, 0.0  ;;  %v3864_v50 = vadd.f32 %v3820_v9, %v3578_v35  ;;  %v4478_v22 = vld [vmem:[#allocation2 + $0x100] sm:$0xff]  ;;  %v1336_v8 = vmul.u32 14564, %v1333_v37  ;;  %v3293_v7 = vadd.f32 %v9028_v62, %v10679_v5 }
 0x391   : > { %4369 = vst [vmem:[#allocation2 + $0x10b] sm:$0xff] %v4333_v6  ;;  %4610 = vmatmul.f32.gmra.mxu1 %v4478_v22  ;;  %5411 = vmatmul.f32.gmra.mxu0 %v9875_v54  ;;  %v1323_v60 = vadd.s32 %v1322_v14, %v1312_v13  ;;  %v1298_v3 = vsub.s32 %v9769_v18, %v1297_v45  ;;  %v9887_v27 = vmul.u32 14564, %v1334_v48  ;;  %v1340_v11 = vshll.u32 %v9882_v21, 16  ;;  %v9911_v22 = vld [vmem:[#allocation2 + $0x82] sm:$0xff] }
 0x392   : > { %v4150_v41 = vadd.f32 %v9834_v47, %v3864_v50  ;;  %4839 = vmatmul.f32.gmra.mxu2 %v4744_v30  ;;  %5125 = vmatmul.f32.gmra.mxu3 %v9804_v16  ;;  %vm9892_vm9 = vcmp.lt.s32.totalorder %v1535_v34, 16  ;;  %v9899_v16 = vld [vmem:[%s10494_s2] ss:$0 sm:$0xff]  ;;  %v1339_v33 = vmul.u32 58254, %v1334_v48  ;;  %v5926_v14 = vld [vmem:[#allocation9 + $0x2f0] sm:$0xff]  ;;  %v4745_v30 = vld [vmem:[#allocation2 + $0x71] sm:$0xff] }
 0x393   : > { %v1324_v13 = vadd.s32 %v1323_v60, %v1314_v10  ;;  %vm1392_vm10 = vcmp.ne.s32.totalorder %v1298_v3, 0  ;;  %vm1428_vm11 = vcmp.lt.s32.totalorder %v1298_v3, 0  ;;  %v1500_v53 = vadd.s32 18, %v1298_v3  ;;  %v6212_v48 = vld [vmem:[#allocation9 + $0x370] sm:$0xff]  ;;  %5929 = vmatpush.msra.mxu2 %v5926_v14 }
 0x394   : > { %v4262_v18 = vadd.f32 %v9899_v16, %v4150_v41  ;;  %v1342_v62 = vshll.u32 %v9887_v27, 16  ;;  %vm9903_vm12 = vmand %vm1428_vm11, %vm1392_vm10  ;;  %vm1344_vm13 = vc.u32 %v1336_v8, %v1340_v11  ;;  %v1346_v19 = vadd.s32 %v1340_v11, %v1336_v8  ;;  %6215 = vmatpush.msra.mxu3 %v6212_v48 }
 0x395   : > { %v3537_v26 = vpop.f32.mrf.mxu2  ;;  %v3823_v0 = vpop.f32.mrf.mxu3  ;;  %v1325_v43 = vshrl.u32 %v1324_v13, 4  ;;  %v1536_v34 = vsel %vm9903_vm12, %v1500_v53, %v1298_v3  ;;  %v1345_v45 = vsel %vm1344_vm13, 1, %v10533_v57  ;;  %v1341_v12 = vshrl.u32 %v9882_v21, 16 }
 0x396   : > { %v4298_v9 = vmax.f32 %v4262_v18, 0.0  ;;  %v3579_v31 = vadd.f32 %v3537_v26, %v3293_v7  ;;  %v9907_v35 = vpop.f32.mrf.mxu1  ;;  %v4112_v51 = vpop.f32.mrf.mxu0  ;;  %vm1348_vm14 = vc.u32 %v1346_v19, %v1342_v62  ;;  %v1347_v60 = vadd.s32 %v1345_v45, %v1339_v33  ;;  %v4746_v62 = vld [vmem:[#allocation2 + $0x79] sm:$0xff]  ;;  %v10687_v19 = vld [vmem:[#allocation20_spill] sm:$0xff] }
 0x397   : > { %v1326_v10 = vmul.u32 18, %v1325_v43  ;;  %v1349_v15 = vsel %vm1348_vm14, 1, %v10533_v57  ;;  %v3294_v3 = vadd.f32 %v9090_v44, %v10684_v2  ;;  %vm1572_vm1 = vcmp.lt.s32.totalorder %v1536_v34, 16  ;;  %v6784_v43 = vld [vmem:[#allocation9 + $0x470] sm:$0xff]  ;;  %v5589_v18 = vld [vmem:[#allocation2 + $0x13] sm:$0xff] }
 0x398   : > { %v4334_v37 = vsel %vm9892_vm9, %v4298_v9, 0.0  ;;  %v3865_v6 = vadd.f32 %v3823_v0, %v3579_v31  ;;  %v4479_v50 = vld [vmem:[#allocation2 + $0x108] sm:$0xff]  ;;  %6787 = vmatpush.msra.mxu1 %v6784_v43  ;;  %v6783_v43 = vld [vmem:[#allocation9 + $0x468] sm:$0xff] }
 0x399   : > { %4370 = vst [vmem:[#allocation2 + $0x113] sm:$0xff] %v4334_v37  ;;  %4613 = vmatmul.f32.gmra.mxu1 %v4479_v50  ;;  %5414 = vmatmul.f32.gmra.mxu0 %v9911_v22  ;;  %v1327_v41 = vsub.s32 %v9818_v24, %v1326_v10  ;;  %v1351_v24 = vadd.s32 %v1349_v15, %v1347_v60  ;;  %v5318_v0 = vld [vmem:[#allocation2 + $0x8a] sm:$0xff]  ;;  %v5319_v60 = vld [vmem:[#allocation2 + $0x92] sm:$0xff]  ;;  %v4747_v15 = vld [vmem:[#allocation2 + $0x81] sm:$0xff] }
 0x39a   : > { %v4151_v17 = vadd.f32 %v9869_v40, %v3865_v6  ;;  %4842 = vmatmul.f32.gmra.mxu2 %v4745_v30  ;;  %5128 = vmatmul.f32.gmra.mxu3 %v9840_v20  ;;  %v1343_v20 = vshrl.u32 %v9887_v27, 16  ;;  %v6498_v9 = vld [vmem:[#allocation9 + $0x3f0] sm:$0xff]  ;;  %v3295_v37 = vadd.f32 %v9150_v59, %v10687_v19 }
 0x39b   : > { %vm1393_vm15 = vcmp.ne.s32.totalorder %v1327_v41, 0  ;;  %vm1429_vm0 = vcmp.lt.s32.totalorder %v1327_v41, 0  ;;  %v1501_v57 = vadd.s32 18, %v1327_v41  ;;  %v1352_v44 = vadd.s32 %v1351_v24, %v1341_v12  ;;  %6501 = vmatpush.msra.mxu0 %v6498_v9  ;;  %v5925_v12 = vld [vmem:[#allocation9 + $0x2e8] sm:$0xff]  ;;  %6788 = vmatpush.msra.mxu1 %v6783_v43 }
 0x39c   : > { %v4263_v8 = vadd.f32 %v9899_v16, %v4151_v17  ;;  %vm9928_vm2 = vmand %vm1429_vm0, %vm1393_vm15  ;;  %5930 = vmatpush.msra.mxu2 %v5925_v12  ;;  %v5325_v43 = vld [vmem:[#allocation2 + $0xc2] sm:$0xff] }
 0x39d   : > { %v3540_v40 = vpop.f32.mrf.mxu2  ;;  %v3826_v11 = vpop.f32.mrf.mxu3  ;;  %v1353_v27 = vadd.s32 %v1352_v44, %v1343_v20  ;;  %v1537_v31 = vsel %vm9928_vm2, %v1501_v57, %v1327_v41  ;;  %v5320_v44 = vld [vmem:[#allocation2 + $0x9a] sm:$0xff] }
 0x39e   : > { %v4299_v5 = vmax.f32 %v4263_v8, 0.0  ;;  %v3580_v7 = vadd.f32 %v3540_v40, %v3294_v3  ;;  %v9926_v47 = vpop.f32.mrf.mxu1  ;;  %v4115_v21 = vpop.f32.mrf.mxu0  ;;  %vm1573_vm3 = vcmp.lt.s32.totalorder %v1537_v31, 16  ;;  %v6211_v3 = vld [vmem:[#allocation9 + $0x368] sm:$0xff] }
 0x39f   : > { %v1354_v33 = vshrl.u32 %v1353_v27, 4  ;;  %6216 = vmatpush.msra.mxu3 %v6211_v3  ;;  %v5590_v31 = vld [vmem:[#allocation2 + $0x1b] sm:$0xff] }
 0x3a0   : > { %v4335_v13 = vsel %vm1572_vm1, %v4299_v5, 0.0  ;;  %v3866_v26 = vadd.f32 %v3826_v11, %v3580_v7  ;;  %v4480_v53 = vld [vmem:[#allocation2 + $0x110] sm:$0xff]  ;;  %v6496_v3 = vld [vmem:[#allocation9 + $0x3e0] sm:$0xff] }
 0x3a1   : > { %4371 = vst [vmem:[#allocation2 + $0x11b] sm:$0xff] %v4335_v13  ;;  %4616 = vmatmul.f32.gmra.mxu1 %v4480_v53  ;;  %5417 = vmatmul.f32.gmra.mxu0 %v5318_v0  ;;  %v1355_v10 = vmul.u32 18, %v1354_v33  ;;  %v4749_v33 = vld [vmem:[#allocation2 + $0x91] sm:$0xff] }
 0x3a2   : > { %v4152_v55 = vadd.f32 %v4112_v51, %v3866_v26  ;;  %4845 = vmatmul.f32.gmra.mxu2 %v4746_v62  ;;  %5131 = vmatmul.f32.gmra.mxu3 %v9875_v54 }
 0x3a3   : > { %v1356_v54 = vsub.s32 %v9860_v1, %v1355_v10 }
 0x3a4   : > { %v4264_v6 = vadd.f32 %v9899_v16, %v4152_v55  ;;  %v5321_v55 = vld [vmem:[#allocation2 + $0xa2] sm:$0xff] }
 0x3a5   : > { %v3543_v50 = vpop.f32.mrf.mxu2  ;;  %v3829_v14 = vpop.f32.mrf.mxu3  ;;  %vm1394_vm4 = vcmp.ne.s32.totalorder %v1356_v54, 0  ;;  %vm1430_vm5 = vcmp.lt.s32.totalorder %v1356_v54, 0  ;;  %v1502_v59 = vadd.s32 18, %v1356_v54 }
 0x3a6   : > { %v4300_v34 = vmax.f32 %v4264_v6, 0.0  ;;  %v3581_v30 = vadd.f32 %v3543_v50, %v3295_v37  ;;  %v9938_v45 = vpop.f32.mrf.mxu1  ;;  %v5373_v51 = vpop.f32.mrf.mxu0  ;;  %vm1466_vm6 = vmand %vm1430_vm5, %vm1394_vm4 }
 0x3a7   : > { %v1538_v8 = vsel %vm1466_vm6, %v1502_v59, %v1356_v54  ;;  %v4750_v54 = vld [vmem:[#allocation2 + $0x99] sm:$0xff] }
 0x3a8   : > { %v4336_v48 = vsel %vm1573_vm3, %v4300_v34, 0.0  ;;  %v3867_v17 = vadd.f32 %v3829_v14, %v3581_v30  ;;  %v4481_v41 = vld [vmem:[#allocation2 + $0x118] sm:$0xff]  ;;  %vm1574_vm7 = vcmp.lt.s32.totalorder %v1538_v8, 16  ;;  %v5591_v34 = vld [vmem:[#allocation2 + $0x23] sm:$0xff] }
 0x3a9   : > { %4372 = vst [vmem:[#allocation2 + $0x123] sm:$0xff] %v4336_v48  ;;  %4619 = vmatmul.f32.gmra.mxu1 %v4481_v41  ;;  %5420 = vmatmul.f32.gmra.mxu0 %v5319_v60  ;;  %v5322_v30 = vld [vmem:[#allocation2 + $0xaa] sm:$0xff]  ;;  %v6782_v8 = vld [vmem:[#allocation9 + $0x460] sm:$0xff] }
 0x3aa   : > { %v4153_v2 = vadd.f32 %v4115_v21, %v3867_v17  ;;  %4848 = vmatmul.f32.gmra.mxu2 %v4747_v15  ;;  %5134 = vmatmul.f32.gmra.mxu3 %v9911_v22  ;;  %v4748_v22 = vld [vmem:[#allocation2 + $0x89] sm:$0xff] }
 0x3ab   : > { %v5592_v15 = vld [vmem:[#allocation2 + $0x2b] sm:$0xff]  ;;  %6789 = vmatpush.msra.mxu1 %v6782_v8 }
 0x3ac   : > { %v4265_v1 = vadd.f32 %v9899_v16, %v4153_v2  ;;  %v6497_v16 = vld [vmem:[#allocation9 + $0x3e8] sm:$0xff]  ;;  %v5323_v2 = vld [vmem:[#allocation2 + $0xb2] sm:$0xff] }
 0x3ad   : > { %v4801_v40 = vpop.f32.mrf.mxu2  ;;  %v5087_v11 = vpop.f32.mrf.mxu3  ;;  %6502 = vmatpush.msra.mxu0 %v6497_v16  ;;  %v4752_v16 = vld [vmem:[#allocation2 + $0xa9] sm:$0xff] }
 0x3ae   : > { %v4301_v20 = vmax.f32 %v4265_v1, 0.0  ;;  %v4909_v24 = vadd.f32 %v4801_v40, %v9207_v38  ;;  %v9944_v5 = vpop.f32.mrf.mxu1  ;;  %v5376_v7 = vpop.f32.mrf.mxu0  ;;  %v4751_v1 = vld [vmem:[#allocation2 + $0xa1] sm:$0xff] }
 0x3af   : > { %6503 = vmatpush.msra.mxu0 %v6496_v3 }
 0x3b0   : > { %v4337_v57 = vsel %vm1574_vm7, %v4301_v20, 0.0  ;;  %v5195_v21 = vadd.f32 %v5087_v11, %v4909_v24 }
 0x3b1   : > { %4373 = vst [vmem:[#allocation2 + $0x12b] sm:$0xff] %v4337_v57  ;;  %5658 = vmatmul.f32.vlgmr.msrb.gmra.mxu1 %v5589_v18  ;;  %5423 = vmatmul.f32.gmra.mxu0 %v5320_v44  ;;  %v5593_v57 = vld [vmem:[#allocation2 + $0x33] sm:$0xff] }
 0x3b2   : > { %4851 = vmatmul.f32.gmra.mxu2 %v4748_v22  ;;  %5137 = vmatmul.f32.gmra.mxu3 %v5318_v0  ;;  %v9946_v13 = vadd.f32 %v5373_v51, %v5195_v21  ;;  %v5924_v0 = vld [vmem:[#allocation9 + $0x2e0] sm:$0xff]  ;;  %v6209_v22 = vld [vmem:[#allocation9 + $0x358] sm:$0xff] }
 0x3b3   : > { %5931 = vmatpush.msra.mxu2 %v5924_v0  ;;  %v6210_v51 = vld [vmem:[#allocation9 + $0x360] sm:$0xff] }
 0x3b4   : > { %6217 = vmatpush.msra.mxu3 %v6210_v51  ;;  %v5324_v18 = vld [vmem:[#allocation2 + $0xba] sm:$0xff]  ;;  %v4753_v0 = vld [vmem:[#allocation2 + $0xb1] sm:$0xff]  ;;  %v5595_v51 = vld [vmem:[#allocation2 + $0x43] sm:$0xff] }
 0x3b5   : > { %v4804_v26 = vpop.f32.mrf.mxu2  ;;  %v5090_v53 = vpop.f32.mrf.mxu3 }
 0x3b6   : > { %v4910_v38 = vadd.f32 %v4804_v26, %v9261_v42  ;;  %v9949_v62 = vpop.f32.mrf.mxu1  ;;  %v5379_v27 = vpop.f32.mrf.mxu0  ;;  %6218 = vmatpush.msra.mxu3 %v6209_v22 }
 0x3b8   : > { %v5196_v9 = vadd.f32 %v5090_v53, %v4910_v38 }
 0x3b9   : > { %5661 = vmatmul.f32.gmra.mxu1 %v5590_v31  ;;  %5426 = vmatmul.f32.gmra.mxu0 %v5321_v55 }
 0x3ba   : > { %4854 = vmatmul.f32.gmra.mxu2 %v4749_v33  ;;  %5140 = vmatmul.f32.gmra.mxu3 %v5319_v60  ;;  %v9951_v19 = vadd.f32 %v5376_v7, %v5196_v9  ;;  %v6495_v33 = vld [vmem:[#allocation9 + $0x3d8] sm:$0xff] }
 0x3bb   : > { %6504 = vmatpush.msra.mxu0 %v6495_v33 }
 0x3bd   : > { %v4807_v37 = vpop.f32.mrf.mxu2  ;;  %v5093_v6 = vpop.f32.mrf.mxu3 }
 0x3be   : > { %v4911_v42 = vadd.f32 %v4807_v37, %v9313_v46  ;;  %v9954_v50 = vpop.f32.mrf.mxu1  ;;  %v5382_v10 = vpop.f32.mrf.mxu0  ;;  %v6781_v37 = vld [vmem:[#allocation9 + $0x458] sm:$0xff] }
 0x3bf   : > { %6790 = vmatpush.msra.mxu1 %v6781_v37 }
 0x3c0   : > { %v5197_v14 = vadd.f32 %v5093_v6, %v4911_v42 }
 0x3c1   : > { %5664 = vmatmul.f32.gmra.mxu1 %v5591_v34  ;;  %5429 = vmatmul.f32.gmra.mxu0 %v5322_v30 }
 0x3c2   : > { %4857 = vmatmul.f32.gmra.mxu2 %v4750_v54  ;;  %5143 = vmatmul.f32.gmra.mxu3 %v5320_v44  ;;  %v9956_v48 = vadd.f32 %v5379_v27, %v5197_v14  ;;  %v5923_v44 = vld [vmem:[#allocation9 + $0x2d8] sm:$0xff] }
 0x3c3   : > { %5932 = vmatpush.msra.mxu2 %v5923_v44  ;;  %v5326_v54 = vld [vmem:[#allocation2 + $0xca] sm:$0xff] }
 0x3c5   : > { %v4810_v17 = vpop.f32.mrf.mxu2  ;;  %v5096_v41 = vpop.f32.mrf.mxu3 }
 0x3c6   : > { %v4912_v60 = vadd.f32 %v4810_v17, %v9367_v61  ;;  %v9959_v46 = vpop.f32.mrf.mxu1  ;;  %v5385_v59 = vpop.f32.mrf.mxu0  ;;  %v5922_v17 = vld [vmem:[#allocation9 + $0x2d0] sm:$0xff] }
 0x3c7   : > { %5933 = vmatpush.msra.mxu2 %v5922_v17 }
 0x3c8   : > { %v5198_v12 = vadd.f32 %v5096_v41, %v4912_v60  ;;  %v4754_v41 = vld [vmem:[#allocation2 + $0xb9] sm:$0xff]  ;;  %v6208_v60 = vld [vmem:[#allocation9 + $0x350] sm:$0xff] }
 0x3c9   : > { %5667 = vmatmul.f32.gmra.mxu1 %v5592_v15  ;;  %5432 = vmatmul.f32.gmra.mxu0 %v5323_v2 }
 0x3ca   : > { %4860 = vmatmul.f32.gmra.mxu2 %v4751_v1  ;;  %5146 = vmatmul.f32.gmra.mxu3 %v5321_v55  ;;  %v9961_v40 = vadd.f32 %v5382_v10, %v5198_v12  ;;  %v5594_v55 = vld [vmem:[#allocation2 + $0x3b] sm:$0xff]  ;;  %v5596_v1 = vld [vmem:[#allocation2 + $0x4b] sm:$0xff] }
 0x3cb   : > { %6219 = vmatpush.msra.mxu3 %v6208_v60 }
 0x3cd   : > { %v4813_v11 = vpop.f32.mrf.mxu2  ;;  %v5099_v20 = vpop.f32.mrf.mxu3 }
 0x3ce   : > { %v4913_v61 = vadd.f32 %v4813_v11, %v9406_v25  ;;  %v9964_v24 = vpop.f32.mrf.mxu1  ;;  %v5388_v7 = vpop.f32.mrf.mxu0  ;;  %v5327_v11 = vld [vmem:[#allocation2 + $0xd2] sm:$0xff] }
 0x3d0   : > { %v5199_v21 = vadd.f32 %v5099_v20, %v4913_v61  ;;  %v4755_v20 = vld [vmem:[#allocation2 + $0xc1] sm:$0xff] }
 0x3d1   : > { %5670 = vmatmul.f32.gmra.mxu1 %v5593_v57  ;;  %5435 = vmatmul.f32.gmra.mxu0 %v5324_v18  ;;  %v6494_v61 = vld [vmem:[#allocation9 + $0x3d0] sm:$0xff] }
 0x3d2   : > { %4863 = vmatmul.f32.gmra.mxu2 %v4752_v16  ;;  %5149 = vmatmul.f32.gmra.mxu3 %v5322_v30  ;;  %v9966_v26 = vadd.f32 %v5385_v59, %v5199_v21 }
 0x3d3   : > { %6505 = vmatpush.msra.mxu0 %v6494_v61 }
 0x3d5   : > { %v4816_v53 = vpop.f32.mrf.mxu2  ;;  %v5102_v38 = vpop.f32.mrf.mxu3 }
 0x3d6   : > { %v4914_v25 = vadd.f32 %v4816_v53, %v9458_v63  ;;  %v9969_v27 = vpop.f32.mrf.mxu1  ;;  %v5391_v9 = vpop.f32.mrf.mxu0  ;;  %v5597_v53 = vld [vmem:[#allocation2 + $0x53] sm:$0xff] }
 0x3d8   : > { %v5200_v31 = vadd.f32 %v5102_v38, %v4914_v25  ;;  %v5328_v38 = vld [vmem:[#allocation2 + $0xda] sm:$0xff]  ;;  %v4756_v25 = vld [vmem:[#allocation2 + $0xc9] sm:$0xff] }
 0x3d9   : > { %5673 = vmatmul.f32.gmra.mxu1 %v5594_v55  ;;  %5438 = vmatmul.f32.gmra.mxu0 %v5325_v43 }
 0x3da   : > { %4866 = vmatmul.f32.gmra.mxu2 %v4753_v0  ;;  %5152 = vmatmul.f32.gmra.mxu3 %v5323_v2  ;;  %v9971_v6 = vadd.f32 %v5388_v7, %v5200_v31  ;;  %v6780_v7 = vld [vmem:[#allocation9 + $0x450] sm:$0xff]  ;;  %v6207_v31 = vld [vmem:[#allocation9 + $0x348] sm:$0xff] }
 0x3db   : > { %6791 = vmatpush.msra.mxu1 %v6780_v7  ;;  %6220 = vmatpush.msra.mxu3 %v6207_v31 }
 0x3dd   : > { %v4819_v42 = vpop.f32.mrf.mxu2  ;;  %v5105_v10 = vpop.f32.mrf.mxu3 }
 0x3de   : > { %v4915_v63 = vadd.f32 %v4819_v42, %v9495_v49  ;;  %v9974_v14 = vpop.f32.mrf.mxu1  ;;  %v5394_v34 = vpop.f32.mrf.mxu0 }
 0x3e0   : > { %v5201_v30 = vadd.f32 %v5105_v10, %v4915_v63  ;;  %v5598_v10 = vld [vmem:[#allocation2 + $0x5b] sm:$0xff] }
 0x3e1   : > { %5676 = vmatmul.f32.gmra.mxu1 %v5595_v51  ;;  %5441 = vmatmul.f32.gmra.mxu0 %v5326_v54  ;;  %v5329_v63 = vld [vmem:[#allocation2 + $0xe2] sm:$0xff] }
 0x3e2   : > { %4869 = vmatmul.f32.gmra.mxu2 %v4754_v41  ;;  %5155 = vmatmul.f32.gmra.mxu3 %v5324_v18  ;;  %v9976_v59 = vadd.f32 %v5391_v9, %v5201_v30  ;;  %v5921_v9 = vld [vmem:[#allocation9 + $0x2c8] sm:$0xff] }
 0x3e3   : > { %5934 = vmatpush.msra.mxu2 %v5921_v9  ;;  %v6493_v30 = vld [vmem:[#allocation9 + $0x3c8] sm:$0xff] }
 0x3e4   : > { %6506 = vmatpush.msra.mxu0 %v6493_v30 }
 0x3e5   : > { %v4822_v15 = vpop.f32.mrf.mxu2  ;;  %v5108_v12 = vpop.f32.mrf.mxu3 }
 0x3e6   : > { %v4916_v49 = vadd.f32 %v4822_v15, %v9541_v28  ;;  %v9979_v2 = vpop.f32.mrf.mxu1  ;;  %v5397_v3 = vpop.f32.mrf.mxu0 }
 0x3e8   : > { %v5202_v8 = vadd.f32 %v5108_v12, %v4916_v49  ;;  %v5599_v12 = vld [vmem:[#allocation2 + $0x63] sm:$0xff] }
 0x3e9   : > { %5679 = vmatmul.f32.gmra.mxu1 %v5596_v1  ;;  %5444 = vmatmul.f32.gmra.mxu0 %v5327_v11  ;;  %v5330_v49 = vld [vmem:[#allocation2 + $0xea] sm:$0xff]  ;;  %v5920_v1 = vld [vmem:[#allocation9 + $0x2c0] sm:$0xff] }
 0x3ea   : > { %4872 = vmatmul.f32.gmra.mxu2 %v4755_v20  ;;  %5158 = vmatmul.f32.gmra.mxu3 %v5325_v43  ;;  %v9981_v57 = vadd.f32 %v5394_v34, %v5202_v8  ;;  %v4757_v34 = vld [vmem:[#allocation2 + $0xd1] sm:$0xff]  ;;  %v4758_v8 = vld [vmem:[#allocation2 + $0xd9] sm:$0xff] }
 0x3eb   : > { %5935 = vmatpush.msra.mxu2 %v5920_v1  ;;  %v4761_v1 = vld [vmem:[#allocation2 + $0xf1] sm:$0xff] }
 0x3ed   : > { %v4825_v21 = vpop.f32.mrf.mxu2  ;;  %v5111_v18 = vpop.f32.mrf.mxu3 }
 0x3ee   : > { %v4917_v28 = vadd.f32 %v4825_v21, %v9580_v39  ;;  %v9984_v44 = vpop.f32.mrf.mxu1  ;;  %v5400_v22 = vpop.f32.mrf.mxu0 }
 0x3f0   : > { %v5203_v16 = vadd.f32 %v5111_v18, %v4917_v28  ;;  %v5600_v28 = vld [vmem:[#allocation2 + $0x6b] sm:$0xff] }
 0x3f1   : > { %5682 = vmatmul.f32.gmra.mxu1 %v5597_v53  ;;  %5447 = vmatmul.f32.gmra.mxu0 %v5328_v38  ;;  %v4759_v53 = vld [vmem:[#allocation2 + $0xe1] sm:$0xff] }
 0x3f2   : > { %4875 = vmatmul.f32.gmra.mxu2 %v4756_v25  ;;  %5161 = vmatmul.f32.gmra.mxu3 %v5326_v54  ;;  %v9986_v55 = vadd.f32 %v5397_v3, %v5203_v16  ;;  %v6779_v3 = vld [vmem:[#allocation9 + $0x448] sm:$0xff]  ;;  %v6206_v16 = vld [vmem:[#allocation9 + $0x340] sm:$0xff] }
 0x3f3   : > { %6792 = vmatpush.msra.mxu1 %v6779_v3  ;;  %6221 = vmatpush.msra.mxu3 %v6206_v16  ;;  %v5919_v3 = vld [vmem:[#allocation9 + $0x2b8] sm:$0xff] }
 0x3f4   : > { %5936 = vmatpush.msra.mxu2 %v5919_v3 }
 0x3f5   : > { %v4828_v43 = vpop.f32.mrf.mxu2  ;;  %v5114_v33 = vpop.f32.mrf.mxu3 }
 0x3f6   : > { %v4918_v39 = vadd.f32 %v4828_v43, %v9612_v58  ;;  %v9989_v0 = vpop.f32.mrf.mxu1  ;;  %v5403_v37 = vpop.f32.mrf.mxu0 }
 0x3f8   : > { %v5204_v42 = vadd.f32 %v5114_v33, %v4918_v39  ;;  %v5601_v33 = vld [vmem:[#allocation2 + $0x73] sm:$0xff] }
 0x3f9   : > { %5685 = vmatmul.f32.gmra.mxu1 %v5598_v10  ;;  %5450 = vmatmul.f32.gmra.mxu0 %v5329_v63  ;;  %v6778_v10 = vld [vmem:[#allocation9 + $0x440] sm:$0xff] }
 0x3fa   : > { %4878 = vmatmul.f32.gmra.mxu2 %v4757_v34  ;;  %5164 = vmatmul.f32.gmra.mxu3 %v5327_v11  ;;  %v9991_v51 = vadd.f32 %v5400_v22, %v5204_v42  ;;  %v5331_v22 = vld [vmem:[#allocation2 + $0xf2] sm:$0xff]  ;;  %v4760_v34 = vld [vmem:[#allocation2 + $0xe9] sm:$0xff] }
 0x3fb   : > { %v6492_v42 = vld [vmem:[#allocation9 + $0x3c0] sm:$0xff]  ;;  %6793 = vmatpush.msra.mxu1 %v6778_v10 }
 0x3fc   : > { %6507 = vmatpush.msra.mxu0 %v6492_v42  ;;  %v6777_v42 = vld [vmem:[#allocation9 + $0x438] sm:$0xff]  ;;  %v5916_v10 = vld [vmem:[#allocation9 + $0x2a0] sm:$0xff] }
 0x3fd   : > { %v4831_v54 = vpop.f32.mrf.mxu2  ;;  %v5117_v17 = vpop.f32.mrf.mxu3  ;;  %6794 = vmatpush.msra.mxu1 %v6777_v42  ;;  %v5605_v42 = vld [vmem:[#allocation2 + $0x93] sm:$0xff] }
 0x3fe   : > { %v4919_v41 = vadd.f32 %v4831_v54, %v9647_v23  ;;  %v9994_v58 = vpop.f32.mrf.mxu1  ;;  %v5406_v60 = vpop.f32.mrf.mxu0 }
 0x400   : > { %v5205_v15 = vadd.f32 %v5117_v17, %v4919_v41 }
 0x401   : > { %5688 = vmatmul.f32.gmra.mxu1 %v5599_v12  ;;  %5453 = vmatmul.f32.gmra.mxu0 %v5330_v49  ;;  %v5333_v12 = vld [vmem:[#allocation2 + $0x102] sm:$0xff] }
 0x402   : > { %4881 = vmatmul.f32.gmra.mxu2 %v4758_v8  ;;  %5167 = vmatmul.f32.gmra.mxu3 %v5328_v38  ;;  %v9996_v11 = vadd.f32 %v5403_v37, %v5205_v15  ;;  %v5332_v37 = vld [vmem:[#allocation2 + $0xfa] sm:$0xff]  ;;  %v6205_v8 = vld [vmem:[#allocation9 + $0x338] sm:$0xff] }
 0x403   : > { %6222 = vmatpush.msra.mxu3 %v6205_v8  ;;  %v5335_v8 = vld [vmem:[#allocation2 + $0x112] sm:$0xff] }
 0x405   : > { %v4834_v20 = vpop.f32.mrf.mxu2  ;;  %v5120_v61 = vpop.f32.mrf.mxu3 }
 0x406   : > { %v4920_v23 = vadd.f32 %v4834_v20, %v9688_v56  ;;  %v9999_v7 = vpop.f32.mrf.mxu1  ;;  %v5409_v21 = vpop.f32.mrf.mxu0 }
 0x408   : > { %v5206_v18 = vadd.f32 %v5120_v61, %v4920_v23 }
 0x409   : > { %5691 = vmatmul.f32.gmra.mxu1 %v5600_v28  ;;  %5456 = vmatmul.f32.gmra.mxu0 %v5331_v22  ;;  %v5603_v28 = vld [vmem:[#allocation2 + $0x83] sm:$0xff] }
 0x40a   : > { %4884 = vmatmul.f32.gmra.mxu2 %v4759_v53  ;;  %5170 = vmatmul.f32.gmra.mxu3 %v5329_v63  ;;  %v10001_v38 = vadd.f32 %v5406_v60, %v5206_v18  ;;  %v5602_v60 = vld [vmem:[#allocation2 + $0x7b] sm:$0xff]  ;;  %v10016_v53 = vld [vmem:[#allocation2 + $0x10a] sm:$0xff] }
 0x40d   : > { %v4837_v25 = vpop.f32.mrf.mxu2  ;;  %v5123_v9 = vpop.f32.mrf.mxu3 }
 0x40e   : > { %v4921_v31 = vadd.f32 %v4837_v25, %v9718_v29  ;;  %v10004_v56 = vpop.f32.mrf.mxu1  ;;  %v5412_v43 = vpop.f32.mrf.mxu0  ;;  %v5918_v25 = vld [vmem:[#allocation9 + $0x2b0] sm:$0xff] }
 0x40f   : > { %5937 = vmatpush.msra.mxu2 %v5918_v25  ;;  %v5913_v25 = vld [vmem:[#allocation9 + $0x288] sm:$0xff] }
 0x410   : > { %v5207_v39 = vadd.f32 %v5123_v9, %v4921_v31  ;;  %v6204_v9 = vld [vmem:[#allocation9 + $0x330] sm:$0xff] }
 0x411   : > { %5694 = vmatmul.f32.gmra.mxu1 %v5601_v33  ;;  %5459 = vmatmul.f32.gmra.mxu0 %v5332_v37  ;;  %v6490_v31 = vld [vmem:[#allocation9 + $0x3b0] sm:$0xff]  ;;  %v6203_v33 = vld [vmem:[#allocation9 + $0x328] sm:$0xff] }
 0x412   : > { %4887 = vmatmul.f32.gmra.mxu2 %v4760_v34  ;;  %5173 = vmatmul.f32.gmra.mxu3 %v5330_v49  ;;  %v10006_v63 = vadd.f32 %v5409_v21, %v5207_v39  ;;  %v6491_v49 = vld [vmem:[#allocation9 + $0x3b8] sm:$0xff]  ;;  %v6202_v34 = vld [vmem:[#allocation9 + $0x320] sm:$0xff] }
 0x413   : > { %6508 = vmatpush.msra.mxu0 %v6491_v49  ;;  %6223 = vmatpush.msra.mxu3 %v6204_v9  ;;  %v6201_v49 = vld [vmem:[#allocation9 + $0x318] sm:$0xff]  ;;  %v6199_v9 = vld [vmem:[#allocation9 + $0x308] sm:$0xff] }
 0x415   : > { %v4840_v30 = vpop.f32.mrf.mxu2  ;;  %v5126_v54 = vpop.f32.mrf.mxu3  ;;  %6509 = vmatpush.msra.mxu0 %v6490_v31  ;;  %6224 = vmatpush.msra.mxu3 %v6203_v33 }
 0x416   : > { %v4922_v29 = vadd.f32 %v4840_v30, %v9755_v52  ;;  %v10009_v17 = vpop.f32.mrf.mxu1  ;;  %v5415_v41 = vpop.f32.mrf.mxu0 }
 0x417   : > { %6225 = vmatpush.msra.mxu3 %v6202_v34  ;;  %v5912_v34 = vld [vmem:[#allocation9 + $0x280] sm:$0xff] }
 0x418   : > { %v5208_v15 = vadd.f32 %v5126_v54, %v4922_v29  ;;  %v6488_v29 = vld [vmem:[#allocation9 + $0x3a0] sm:$0xff] }
 0x419   : > { %5697 = vmatmul.f32.gmra.mxu1 %v5602_v60  ;;  %5462 = vmatmul.f32.gmra.mxu0 %v5333_v12 }
 0x41a   : > { %4890 = vmatmul.f32.gmra.mxu2 %v4761_v1  ;;  %5176 = vmatmul.f32.gmra.mxu3 %v5331_v22  ;;  %v10011_v20 = vadd.f32 %v5412_v43, %v5208_v15  ;;  %v4762_v22 = vld [vmem:[#allocation2 + $0xf9] sm:$0xff]  ;;  %v5915_v1 = vld [vmem:[#allocation9 + $0x298] sm:$0xff] }
 0x41b   : > { %v5917_v43 = vld [vmem:[#allocation9 + $0x2a8] sm:$0xff]  ;;  %6226 = vmatpush.msra.mxu3 %v6201_v49 }
 0x41c   : > { %5938 = vmatpush.msra.mxu2 %v5917_v43  ;;  %v6485_v43 = vld [vmem:[#allocation9 + $0x388] sm:$0xff] }
 0x41d   : > { %v4843_v52 = vpop.f32.mrf.mxu2  ;;  %v5129_v61 = vpop.f32.mrf.mxu3 }
 0x41e   : > { %v4923_v23 = vadd.f32 %v4843_v52, %v9794_v4  ;;  %v10014_v21 = vpop.f32.mrf.mxu1  ;;  %v5418_v18 = vpop.f32.mrf.mxu0  ;;  %v6489_v4 = vld [vmem:[#allocation9 + $0x3a8] sm:$0xff]  ;;  %5939 = vmatpush.msra.mxu2 %v5916_v10 }
 0x41f   : > { %6510 = vmatpush.msra.mxu0 %v6489_v4  ;;  %v4763_v52 = vld [vmem:[#allocation2 + $0x101] sm:$0xff] }
 0x420   : > { %v5209_v16 = vadd.f32 %v5129_v61, %v4923_v23  ;;  %v6487_v61 = vld [vmem:[#allocation9 + $0x398] sm:$0xff]  ;;  %v5914_v23 = vld [vmem:[#allocation9 + $0x290] sm:$0xff]  ;;  %5940 = vmatpush.msra.mxu2 %v5915_v1  ;;  %v5336_v10 = vld [vmem:[#allocation2 + $0x11a] sm:$0xff] }
 0x421   : > { %5700 = vmatmul.f32.gmra.mxu1 %v5603_v28  ;;  %5465 = vmatmul.f32.gmra.mxu0 %v10016_v53 }
 0x422   : > { %4893 = vmatmul.f32.gmra.mxu2 %v4762_v22  ;;  %5179 = vmatmul.f32.gmra.mxu3 %v5332_v37  ;;  %v10019_v39 = vadd.f32 %v5415_v41, %v5209_v16  ;;  %v5604_v41 = vld [vmem:[#allocation2 + $0x8b] sm:$0xff] }
 0x423   : > { %6511 = vmatpush.msra.mxu0 %v6488_v29  ;;  %v6486_v16 = vld [vmem:[#allocation9 + $0x390] sm:$0xff]  ;;  %5941 = vmatpush.msra.mxu2 %v5914_v23  ;;  %v6484_v29 = vld [vmem:[#allocation9 + $0x380] sm:$0xff] }
 0x424   : > { %v5606_v23 = vld [vmem:[#allocation2 + $0x9b] sm:$0xff] }
 0x425   : > { %v4846_v30 = vpop.f32.mrf.mxu2  ;;  %v5132_v54 = vpop.f32.mrf.mxu3  ;;  %6512 = vmatpush.msra.mxu0 %v6487_v61  ;;  %5942 = vmatpush.msra.mxu2 %v5913_v25 }
 0x426   : > { %v4924_v60 = vadd.f32 %v4846_v30, %v9832_v32  ;;  %v10022_v37 = vpop.f32.mrf.mxu1  ;;  %v5421_v15 = vpop.f32.mrf.mxu0  ;;  %v6200_v32 = vld [vmem:[#allocation9 + $0x310] sm:$0xff]  ;;  %v6198_v30 = vld [vmem:[#allocation9 + $0x300] sm:$0xff] }
 0x427   : > { %6227 = vmatpush.msra.mxu3 %v6200_v32  ;;  %6513 = vmatpush.msra.mxu0 %v6486_v16  ;;  %v5337_v32 = vld [vmem:[#allocation2 + $0x122] sm:$0xff]  ;;  %v4765_v16 = vld [vmem:[#allocation2 + $0x111] sm:$0xff] }
 0x428   : > { %v5210_v3 = vadd.f32 %v5132_v54, %v4924_v60  ;;  %v4764_v54 = vld [vmem:[#allocation2 + $0x109] sm:$0xff]  ;;  %5943 = vmatpush.msra.mxu2 %v5912_v34 }
 0x429   : > { %5703 = vmatmul.f32.gmra.mxu1 %v5604_v41  ;;  %5468 = vmatmul.f32.gmra.mxu0 %v5335_v8 }
 0x42a   : > { %4896 = vmatmul.f32.gmra.mxu2 %v4763_v52  ;;  %5182 = vmatmul.f32.gmra.mxu3 %v5333_v12  ;;  %v10024_v28 = vadd.f32 %v5418_v18, %v5210_v3 }
 0x42b   : > { %6228 = vmatpush.msra.mxu3 %v6199_v9  ;;  %6514 = vmatpush.msra.mxu0 %v6485_v43  ;;  %v5607_v43 = vld [vmem:[#allocation2 + $0xa3] sm:$0xff] }
 0x42d   : > { %v4849_v22 = vpop.f32.mrf.mxu2  ;;  %v5135_v31 = vpop.f32.mrf.mxu3  ;;  %6229 = vmatpush.msra.mxu3 %v6198_v30  ;;  %6515 = vmatpush.msra.mxu0 %v6484_v29  ;;  %v5608_v29 = vld [vmem:[#allocation2 + $0xab] sm:$0xff] }
 0x42e   : > { %v4925_v33 = vadd.f32 %v4849_v22, %v9867_v36  ;;  %v10027_v4 = vpop.f32.mrf.mxu1  ;;  %v5424_v12 = vpop.f32.mrf.mxu0  ;;  %v6776_v36 = vld [vmem:[#allocation9 + $0x430] sm:$0xff] }
 0x42f   : > { %6795 = vmatpush.msra.mxu1 %v6776_v36  ;;  %v6447_v36 = vld [vmem:[#allocation2 + $0x25] sm:$0xff] }
 0x430   : > { %v5211_v18 = vadd.f32 %v5135_v31, %v4925_v33  ;;  %v5338_v33 = vld [vmem:[#allocation2 + $0x12a] sm:$0xff] }
 0x431   : > { %5706 = vmatmul.f32.gmra.mxu1 %v5605_v42  ;;  %5471 = vmatmul.f32.gmra.mxu0 %v5336_v10  ;;  %v4766_v42 = vld [vmem:[#allocation2 + $0x119] sm:$0xff] }
 0x432   : > { %4899 = vmatmul.f32.gmra.mxu2 %v4764_v54  ;;  %5185 = vmatmul.f32.gmra.mxu3 %v10016_v53  ;;  %v10030_v60 = vadd.f32 %v5421_v15, %v5211_v18 }
 0x435   : > { %v4852_v41 = vpop.f32.mrf.mxu2  ;;  %v5138_v3 = vpop.f32.mrf.mxu3 }
 0x436   : > { %v4926_v1 = vadd.f32 %v4852_v41, %v9907_v35  ;;  %v10033_v49 = vpop.f32.mrf.mxu1  ;;  %v5427_v52 = vpop.f32.mrf.mxu0  ;;  %v6775_v41 = vld [vmem:[#allocation9 + $0x428] sm:$0xff] }
 0x437   : > { %6796 = vmatpush.msra.mxu1 %v6775_v41 }
 0x438   : > { %v5212_v61 = vadd.f32 %v5138_v3, %v4926_v1  ;;  %v5875_v3 = vld [vmem:[#allocation2 + $0x14] sm:$0xff]  ;;  %v6161_v1 = vld [vmem:[#allocation2 + $0x24] sm:$0xff] }
 0x439   : > { %5709 = vmatmul.f32.gmra.mxu1 %v5606_v23  ;;  %5474 = vmatmul.f32.gmra.mxu0 %v5337_v32 }
 0x43a   : > { %4902 = vmatmul.f32.gmra.mxu2 %v4765_v16  ;;  %5188 = vmatmul.f32.gmra.mxu3 %v5335_v8  ;;  %v10035_v53 = vadd.f32 %v5424_v12, %v5212_v61 }
 0x43d   : > { %v4855_v15 = vpop.f32.mrf.mxu2  ;;  %v5141_v25 = vpop.f32.mrf.mxu3 }
 0x43e   : > { %v4927_v9 = vadd.f32 %v4855_v15, %v9926_v47  ;;  %v10038_v22 = vpop.f32.mrf.mxu1  ;;  %v5430_v35 = vpop.f32.mrf.mxu0  ;;  %v5609_v15 = vld [vmem:[#allocation2 + $0xb3] sm:$0xff] }
 0x440   : > { %v5213_v31 = vadd.f32 %v5141_v25, %v4927_v9  ;;  %v6448_v25 = vld [vmem:[#allocation2 + $0x2d] sm:$0xff]  ;;  %v5876_v9 = vld [vmem:[#allocation2 + $0x1c] sm:$0xff] }
 0x441   : > { %5712 = vmatmul.f32.gmra.mxu1 %v5607_v43  ;;  %5477 = vmatmul.f32.gmra.mxu0 %v5338_v33 }
 0x442   : > { %4905 = vmatmul.f32.gmra.mxu2 %v4766_v42  ;;  %5191 = vmatmul.f32.gmra.mxu3 %v5336_v10  ;;  %v10040_v18 = vadd.f32 %v5427_v52, %v5213_v31  ;;  %v6162_v31 = vld [vmem:[#allocation2 + $0x2c] sm:$0xff] }
 0x445   : > { %v4858_v8 = vpop.f32.mrf.mxu2  ;;  %v5144_v12 = vpop.f32.mrf.mxu3 }
 0x446   : > { %v4928_v34 = vadd.f32 %v4858_v8, %v9938_v45  ;;  %v10043_v30 = vpop.f32.mrf.mxu1  ;;  %v5433_v47 = vpop.f32.mrf.mxu0 }
 0x448   : > { %v5214_v54 = vadd.f32 %v5144_v12, %v4928_v34  ;;  %v5610_v34 = vld [vmem:[#allocation2 + $0xbb] sm:$0xff] }
 0x449   : > { %5715 = vmatmul.f32.gmra.mxu1 %v5608_v29  ;;  %6516 = vmatmul.f32.vlgmr.msra.gmra.mxu0 %v6447_v36  ;;  %v6774_v29 = vld [vmem:[#allocation9 + $0x420] sm:$0xff] }
 0x44a   : > { %5944 = vmatmul.f32.vlgmr.msra.gmra.mxu2 %v5875_v3  ;;  %6230 = vmatmul.f32.vlgmr.msra.gmra.mxu3 %v6161_v1  ;;  %v10045_v10 = vadd.f32 %v5430_v35, %v5214_v54  ;;  %v6449_v54 = vld [vmem:[#allocation2 + $0x35] sm:$0xff] }
 0x44b   : > { %v6163_v36 = vld [vmem:[#allocation2 + $0x34] sm:$0xff]  ;;  %6797 = vmatpush.msra.mxu1 %v6774_v29 }
 0x44c   : > { %v6773_v29 = vld [vmem:[#allocation9 + $0x418] sm:$0xff] }
 0x44d   : > { %v4861_v52 = vpop.f32.mrf.mxu2  ;;  %v5147_v61 = vpop.f32.mrf.mxu3  ;;  %6798 = vmatpush.msra.mxu1 %v6773_v29  ;;  %v6453_v29 = vld [vmem:[#allocation2 + $0x55] sm:$0xff] }
 0x44e   : > { %v4929_v45 = vadd.f32 %v4861_v52, %v9944_v5  ;;  %v10048_v23 = vpop.f32.mrf.mxu1  ;;  %v5436_v32 = vpop.f32.mrf.mxu0 }
 0x450   : > { %v5215_v16 = vadd.f32 %v5147_v61, %v4929_v45 }
 0x451   : > { %5718 = vmatmul.f32.gmra.mxu1 %v5609_v15  ;;  %6519 = vmatmul.f32.gmra.mxu0 %v6448_v25  ;;  %v6450_v15 = vld [vmem:[#allocation2 + $0x3d] sm:$0xff] }
 0x452   : > { %5947 = vmatmul.f32.gmra.mxu2 %v5876_v9  ;;  %6233 = vmatmul.f32.gmra.mxu3 %v6162_v31  ;;  %v10050_v43 = vadd.f32 %v5433_v47, %v5215_v16  ;;  %v5611_v16 = vld [vmem:[#allocation2 + $0xc3] sm:$0xff] }
 0x453   : > { %v6164_v25 = vld [vmem:[#allocation2 + $0x3c] sm:$0xff] }
 0x455   : > { %v4864_v35 = vpop.f32.mrf.mxu2  ;;  %v5150_v33 = vpop.f32.mrf.mxu3 }
 0x456   : > { %v4930_v42 = vadd.f32 %v4864_v35, %v9949_v62  ;;  %v10053_v8 = vpop.f32.mrf.mxu1  ;;  %v5439_v5 = vpop.f32.mrf.mxu0 }
 0x458   : > { %v5216_v12 = vadd.f32 %v5150_v33, %v4930_v42 }
 0x459   : > { %5721 = vmatmul.f32.gmra.mxu1 %v5610_v34  ;;  %6522 = vmatmul.f32.gmra.mxu0 %v6449_v54  ;;  %v6451_v34 = vld [vmem:[#allocation2 + $0x45] sm:$0xff] }
 0x45a   : > { %5950 = vmatmul.f32.gmra.mxu2 %v6161_v1  ;;  %6236 = vmatmul.f32.gmra.mxu3 %v6163_v36  ;;  %v10055_v41 = vadd.f32 %v5436_v32, %v5216_v12  ;;  %v5612_v12 = vld [vmem:[#allocation2 + $0xcb] sm:$0xff] }
 0x45b   : > { %v6165_v54 = vld [vmem:[#allocation2 + $0x44] sm:$0xff] }
 0x45d   : > { %v4867_v47 = vpop.f32.mrf.mxu2  ;;  %v5153_v3 = vpop.f32.mrf.mxu3 }
 0x45e   : > { %v4931_v52 = vadd.f32 %v4867_v47, %v9954_v50  ;;  %v10058_v62 = vpop.f32.mrf.mxu1  ;;  %v5442_v61 = vpop.f32.mrf.mxu0 }
 0x460   : > { %v5217_v45 = vadd.f32 %v5153_v3, %v4931_v52 }
 0x461   : > { %5724 = vmatmul.f32.gmra.mxu1 %v5611_v16  ;;  %6525 = vmatmul.f32.gmra.mxu0 %v6450_v15  ;;  %v5613_v16 = vld [vmem:[#allocation2 + $0xd3] sm:$0xff] }
 0x462   : > { %5953 = vmatmul.f32.gmra.mxu2 %v6162_v31  ;;  %6239 = vmatmul.f32.gmra.mxu3 %v6164_v25  ;;  %v10060_v1 = vadd.f32 %v5439_v5, %v5217_v45  ;;  %v6452_v15 = vld [vmem:[#allocation2 + $0x4d] sm:$0xff] }
 0x465   : > { %v4870_v32 = vpop.f32.mrf.mxu2  ;;  %v5156_v9 = vpop.f32.mrf.mxu3 }
 0x466   : > { %v4932_v35 = vadd.f32 %v4870_v32, %v9959_v46  ;;  %v10063_v33 = vpop.f32.mrf.mxu1  ;;  %v5445_v50 = vpop.f32.mrf.mxu0  ;;  %v6166_v32 = vld [vmem:[#allocation2 + $0x4c] sm:$0xff] }
 0x468   : > { %v5218_v42 = vadd.f32 %v5156_v9, %v4932_v35 }
 0x469   : > { %5727 = vmatmul.f32.gmra.mxu1 %v5612_v12  ;;  %6528 = vmatmul.f32.gmra.mxu0 %v6451_v34  ;;  %v5614_v34 = vld [vmem:[#allocation2 + $0xdb] sm:$0xff] }
 0x46a   : > { %5956 = vmatmul.f32.gmra.mxu2 %v6163_v36  ;;  %6242 = vmatmul.f32.gmra.mxu3 %v6165_v54  ;;  %v10065_v31 = vadd.f32 %v5442_v61, %v5218_v42 }
 0x46d   : > { %v4873_v5 = vpop.f32.mrf.mxu2  ;;  %v5159_v47 = vpop.f32.mrf.mxu3 }
 0x46e   : > { %v4933_v3 = vadd.f32 %v4873_v5, %v9964_v24  ;;  %v10068_v46 = vpop.f32.mrf.mxu1  ;;  %v5448_v52 = vpop.f32.mrf.mxu0  ;;  %v6167_v5 = vld [vmem:[#allocation2 + $0x54] sm:$0xff] }
 0x470   : > { %v5219_v45 = vadd.f32 %v5159_v47, %v4933_v3  ;;  %v6772_v47 = vld [vmem:[#allocation9 + $0x410] sm:$0xff] }
 0x471   : > { %5730 = vmatmul.f32.gmra.mxu1 %v5613_v16  ;;  %6531 = vmatmul.f32.gmra.mxu0 %v6452_v15 }
 0x472   : > { %5959 = vmatmul.f32.gmra.mxu2 %v6164_v25  ;;  %6245 = vmatmul.f32.gmra.mxu3 %v6166_v32  ;;  %v10070_v36 = vadd.f32 %v5445_v50, %v5219_v45 }
 0x473   : > { %6799 = vmatpush.msra.mxu1 %v6772_v47 }
 0x475   : > { %v4876_v61 = vpop.f32.mrf.mxu2  ;;  %v5162_v9 = vpop.f32.mrf.mxu3 }
 0x476   : > { %v4934_v35 = vadd.f32 %v4876_v61, %v9969_v27  ;;  %v10073_v42 = vpop.f32.mrf.mxu1  ;;  %v5451_v24 = vpop.f32.mrf.mxu0  ;;  %v5615_v61 = vld [vmem:[#allocation2 + $0xe3] sm:$0xff] }
 0x478   : > { %v5220_v12 = vadd.f32 %v5162_v9, %v4934_v35  ;;  %v6454_v9 = vld [vmem:[#allocation2 + $0x5d] sm:$0xff] }
 0x479   : > { %5733 = vmatmul.f32.gmra.mxu1 %v5614_v34  ;;  %6534 = vmatmul.f32.gmra.mxu0 %v6453_v29  ;;  %v6168_v35 = vld [vmem:[#allocation2 + $0x5c] sm:$0xff] }
 0x47a   : > { %5962 = vmatmul.f32.gmra.mxu2 %v6165_v54  ;;  %6248 = vmatmul.f32.gmra.mxu3 %v6167_v5  ;;  %v10075_v25 = vadd.f32 %v5448_v52, %v5220_v12 }
 0x47c   : > { %10688 = vst [vmem:[#allocation21_spill] sm:$0xff] %v10075_v25  ;;  %v6455_v25 = vld [vmem:[#allocation2 + $0x65] sm:$0xff] }
 0x47d   : > { %v4879_v50 = vpop.f32.mrf.mxu2  ;;  %v5165_v3 = vpop.f32.mrf.mxu3 }
 0x47e   : > { %v4935_v45 = vadd.f32 %v4879_v50, %v9974_v14  ;;  %v10078_v27 = vpop.f32.mrf.mxu1  ;;  %v5454_v16 = vpop.f32.mrf.mxu0  ;;  %v5616_v50 = vld [vmem:[#allocation2 + $0xeb] sm:$0xff] }
 0x480   : > { %v5221_v15 = vadd.f32 %v5165_v3, %v4935_v45  ;;  %v6169_v3 = vld [vmem:[#allocation2 + $0x64] sm:$0xff] }
 0x481   : > { %5736 = vmatmul.f32.gmra.mxu1 %v5615_v61  ;;  %6537 = vmatmul.f32.gmra.mxu0 %v6454_v9 }
 0x482   : > { %5965 = vmatmul.f32.gmra.mxu2 %v6166_v32  ;;  %6251 = vmatmul.f32.gmra.mxu3 %v6168_v35  ;;  %v10080_v54 = vadd.f32 %v5451_v24, %v5221_v15 }
 0x484   : > { %10689 = vst [vmem:[#allocation14_spill] sm:$0xff] %v10080_v54  ;;  %v6456_v54 = vld [vmem:[#allocation2 + $0x6d] sm:$0xff] }
 0x485   : > { %v4882_v52 = vpop.f32.mrf.mxu2  ;;  %v5168_v12 = vpop.f32.mrf.mxu3 }
 0x486   : > { %v4936_v34 = vadd.f32 %v4882_v52, %v9979_v2  ;;  %v10083_v29 = vpop.f32.mrf.mxu1  ;;  %v5457_v14 = vpop.f32.mrf.mxu0  ;;  %v5617_v52 = vld [vmem:[#allocation2 + $0xf3] sm:$0xff] }
 0x488   : > { %v5222_v47 = vadd.f32 %v5168_v12, %v4936_v34  ;;  %v6771_v12 = vld [vmem:[#allocation9 + $0x408] sm:$0xff]  ;;  %v6170_v34 = vld [vmem:[#allocation2 + $0x6c] sm:$0xff] }
 0x489   : > { %5739 = vmatmul.f32.gmra.mxu1 %v5616_v50  ;;  %6540 = vmatmul.f32.gmra.mxu0 %v6455_v25 }
 0x48a   : > { %5968 = vmatmul.f32.gmra.mxu2 %v6167_v5  ;;  %6254 = vmatmul.f32.gmra.mxu3 %v6169_v3  ;;  %v10085_v45 = vadd.f32 %v5454_v16, %v5222_v47 }
 0x48b   : > { %6800 = vmatpush.msra.mxu1 %v6771_v12 }
 0x48c   : > { %10690 = vst [vmem:[#allocation22_spill] sm:$0xff] %v10085_v45  ;;  %v6171_v45 = vld [vmem:[#allocation2 + $0x74] sm:$0xff] }
 0x48d   : > { %v4885_v32 = vpop.f32.mrf.mxu2  ;;  %v5171_v24 = vpop.f32.mrf.mxu3 }
 0x48e   : > { %v4937_v15 = vadd.f32 %v4885_v32, %v9984_v44  ;;  %v10088_v61 = vpop.f32.mrf.mxu1  ;;  %v5460_v2 = vpop.f32.mrf.mxu0 }
 0x490   : > { %v5223_v9 = vadd.f32 %v5171_v24, %v4937_v15  ;;  %v5618_v24 = vld [vmem:[#allocation2 + $0xfb] sm:$0xff] }
 0x491   : > { %5742 = vmatmul.f32.gmra.mxu1 %v5617_v52  ;;  %6543 = vmatmul.f32.gmra.mxu0 %v6456_v54  ;;  %v6457_v15 = vld [vmem:[#allocation2 + $0x75] sm:$0xff] }
 0x492   : > { %5971 = vmatmul.f32.gmra.mxu2 %v6168_v35  ;;  %6257 = vmatmul.f32.gmra.mxu3 %v6170_v34  ;;  %v10090_v5 = vadd.f32 %v5457_v14, %v5223_v9 }
 0x494   : > { %10691 = vst [vmem:[#allocation23_spill] sm:$0xff] %v10090_v5  ;;  %v6458_v5 = vld [vmem:[#allocation2 + $0x7d] sm:$0xff] }
 0x495   : > { %v4888_v25 = vpop.f32.mrf.mxu2  ;;  %v5174_v16 = vpop.f32.mrf.mxu3 }
 0x496   : > { %v4938_v47 = vadd.f32 %v4888_v25, %v9989_v0  ;;  %v10093_v44 = vpop.f32.mrf.mxu1  ;;  %v5463_v50 = vpop.f32.mrf.mxu0  ;;  %v5619_v25 = vld [vmem:[#allocation2 + $0x103] sm:$0xff] }
 0x498   : > { %v5224_v32 = vadd.f32 %v5174_v16, %v4938_v47  ;;  %v6770_v16 = vld [vmem:[#allocation9 + $0x400] sm:$0xff] }
 0x499   : > { %5745 = vmatmul.f32.gmra.mxu1 %v5618_v24  ;;  %6546 = vmatmul.f32.gmra.mxu0 %v6457_v15  ;;  %v6172_v47 = vld [vmem:[#allocation2 + $0x7c] sm:$0xff] }
 0x49a   : > { %5974 = vmatmul.f32.gmra.mxu2 %v6169_v3  ;;  %6260 = vmatmul.f32.gmra.mxu3 %v6171_v45  ;;  %v10095_v35 = vadd.f32 %v5460_v2, %v5224_v32 }
 0x49b   : > { %6801 = vmatpush.msra.mxu1 %v6770_v16 }
 0x49c   : > { %10692 = vst [vmem:[#allocation24_spill] sm:$0xff] %v10095_v35  ;;  %v6173_v35 = vld [vmem:[#allocation2 + $0x84] sm:$0xff] }
 0x49d   : > { %v4891_v54 = vpop.f32.mrf.mxu2  ;;  %v5177_v14 = vpop.f32.mrf.mxu3 }
 0x49e   : > { %v4939_v9 = vadd.f32 %v4891_v54, %v9994_v58  ;;  %v10098_v52 = vpop.f32.mrf.mxu1  ;;  %v5466_v0 = vpop.f32.mrf.mxu0 }
 0x4a0   : > { %v5225_v12 = vadd.f32 %v5177_v14, %v4939_v9  ;;  %v5620_v14 = vld [vmem:[#allocation2 + $0x10b] sm:$0xff] }
 0x4a1   : > { %5748 = vmatmul.f32.gmra.mxu1 %v5619_v25  ;;  %6549 = vmatmul.f32.gmra.mxu0 %v6458_v5  ;;  %v6459_v9 = vld [vmem:[#allocation2 + $0x85] sm:$0xff] }
 0x4a2   : > { %5977 = vmatmul.f32.gmra.mxu2 %v6170_v34  ;;  %6263 = vmatmul.f32.gmra.mxu3 %v6172_v47  ;;  %v10100_v3 = vadd.f32 %v5463_v50, %v5225_v12 }
 0x4a4   : > { %10693 = vst [vmem:[#allocation15_spill] sm:$0xff] %v10100_v3  ;;  %v6460_v3 = vld [vmem:[#allocation2 + $0x8d] sm:$0xff] }
 0x4a5   : > { %v4894_v2 = vpop.f32.mrf.mxu2  ;;  %v5180_v32 = vpop.f32.mrf.mxu3 }
 0x4a6   : > { %v4940_v24 = vadd.f32 %v4894_v2, %v9999_v7  ;;  %v10103_v58 = vpop.f32.mrf.mxu1  ;;  %v5469_v15 = vpop.f32.mrf.mxu0  ;;  %v5621_v2 = vld [vmem:[#allocation2 + $0x113] sm:$0xff] }
 0x4a8   : > { %v5226_v54 = vadd.f32 %v5180_v32, %v4940_v24  ;;  %v6174_v32 = vld [vmem:[#allocation2 + $0x8c] sm:$0xff] }
 0x4a9   : > { %5751 = vmatmul.f32.gmra.mxu1 %v5620_v14  ;;  %6552 = vmatmul.f32.gmra.mxu0 %v6459_v9 }
 0x4aa   : > { %5980 = vmatmul.f32.gmra.mxu2 %v6171_v45  ;;  %6266 = vmatmul.f32.gmra.mxu3 %v6173_v35  ;;  %v10105_v34 = vadd.f32 %v5466_v0, %v5226_v54 }
 0x4ac   : > { %10694 = vst [vmem:[#allocation16_spill] sm:$0xff] %v10105_v34  ;;  %v6461_v34 = vld [vmem:[#allocation2 + $0x95] sm:$0xff] }
 0x4ad   : > { %v4897_v5 = vpop.f32.mrf.mxu2  ;;  %v5183_v50 = vpop.f32.mrf.mxu3 }
 0x4ae   : > { %v4941_v12 = vadd.f32 %v4897_v5, %v10004_v56  ;;  %v10108_v25 = vpop.f32.mrf.mxu1  ;;  %v5472_v7 = vpop.f32.mrf.mxu0  ;;  %v5622_v5 = vld [vmem:[#allocation2 + $0x11b] sm:$0xff] }
 0x4b0   : > { %v5227_v16 = vadd.f32 %v5183_v50, %v4941_v12  ;;  %v6175_v50 = vld [vmem:[#allocation2 + $0x94] sm:$0xff] }
 0x4b1   : > { %5754 = vmatmul.f32.gmra.mxu1 %v5621_v2  ;;  %6555 = vmatmul.f32.gmra.mxu0 %v6460_v3 }
 0x4b2   : > { %5983 = vmatmul.f32.gmra.mxu2 %v6172_v47  ;;  %6269 = vmatmul.f32.gmra.mxu3 %v6174_v32  ;;  %v10110_v24 = vadd.f32 %v5469_v15, %v5227_v16 }
 0x4b4   : > { %10695 = vst [vmem:[#allocation25_spill] sm:$0xff] %v10110_v24  ;;  %v6462_v24 = vld [vmem:[#allocation2 + $0x9d] sm:$0xff] }
 0x4b5   : > { %v4900_v45 = vpop.f32.mrf.mxu2  ;;  %v5186_v0 = vpop.f32.mrf.mxu3 }
 0x4b6   : > { %v4942_v54 = vadd.f32 %v4900_v45, %v10009_v17  ;;  %v10113_v14 = vpop.f32.mrf.mxu1  ;;  %v5475_v56 = vpop.f32.mrf.mxu0  ;;  %v5623_v45 = vld [vmem:[#allocation2 + $0x123] sm:$0xff] }
 0x4b8   : > { %v5228_v9 = vadd.f32 %v5186_v0, %v4942_v54  ;;  %v6176_v0 = vld [vmem:[#allocation2 + $0x9c] sm:$0xff] }
 0x4b9   : > { %5757 = vmatmul.f32.gmra.mxu1 %v5622_v5  ;;  %6558 = vmatmul.f32.gmra.mxu0 %v6461_v34 }
 0x4ba   : > { %5986 = vmatmul.f32.gmra.mxu2 %v6173_v35  ;;  %6272 = vmatmul.f32.gmra.mxu3 %v6175_v50  ;;  %v10115_v3 = vadd.f32 %v5472_v7, %v5228_v9 }
 0x4bc   : > { %10696 = vst [vmem:[#allocation17_spill] sm:$0xff] %v10115_v3  ;;  %v6463_v3 = vld [vmem:[#allocation2 + $0xa5] sm:$0xff] }
 0x4bd   : > { %v4903_v47 = vpop.f32.mrf.mxu2  ;;  %v5189_v15 = vpop.f32.mrf.mxu3 }
 0x4be   : > { %v4943_v12 = vadd.f32 %v4903_v47, %v10014_v21  ;;  %v10118_v16 = vpop.f32.mrf.mxu1  ;;  %v5478_v17 = vpop.f32.mrf.mxu0  ;;  %v5624_v47 = vld [vmem:[#allocation2 + $0x12b] sm:$0xff] }
 0x4c0   : > { %v5229_v2 = vadd.f32 %v5189_v15, %v4943_v12  ;;  %v6177_v15 = vld [vmem:[#allocation2 + $0xa4] sm:$0xff] }
 0x4c1   : > { %5760 = vmatmul.f32.gmra.mxu1 %v5623_v45  ;;  %6561 = vmatmul.f32.gmra.mxu0 %v6462_v24 }
 0x4c2   : > { %5989 = vmatmul.f32.gmra.mxu2 %v6174_v32  ;;  %6275 = vmatmul.f32.gmra.mxu3 %v6176_v0  ;;  %v10120_v34 = vadd.f32 %v5475_v56, %v5229_v2  ;;  %v5767_v32 = vadd.f32 %v10027_v4, %v9946_v13 }
 0x4c4   : > { %10697 = vst [vmem:[#allocation26_spill] sm:$0xff] %v10120_v34 }
 0x4c5   : > { %v4906_v35 = vpop.f32.mrf.mxu2  ;;  %v5192_v7 = vpop.f32.mrf.mxu3 }
 0x4c6   : > { %v4944_v54 = vadd.f32 %v4906_v35, %v10022_v37  ;;  %v10123_v9 = vpop.f32.mrf.mxu1  ;;  %v6517_v21 = vpop.f32.mrf.mxu0 }
 0x4c8   : > { %v5230_v5 = vadd.f32 %v5192_v7, %v4944_v54  ;;  %v6733_v7 = vld [vmem:[#allocation2 + $0x26] sm:$0xff] }
 0x4c9   : > { %5763 = vmatmul.f32.gmra.mxu1 %v5624_v47  ;;  %6564 = vmatmul.f32.gmra.mxu0 %v6463_v3  ;;  %v6464_v54 = vld [vmem:[#allocation2 + $0xad] sm:$0xff]  ;;  %v5768_v3 = vadd.f32 %v10033_v49, %v9951_v19 }
 0x4ca   : > { %5992 = vmatmul.f32.gmra.mxu2 %v6175_v50  ;;  %6278 = vmatmul.f32.gmra.mxu3 %v6177_v15  ;;  %v10125_v24 = vadd.f32 %v5478_v17, %v5230_v5  ;;  %v6178_v47 = vld [vmem:[#allocation2 + $0xac] sm:$0xff] }
 0x4cc   : > { %10698 = vst [vmem:[#allocation18_spill] sm:$0xff] %v10125_v24  ;;  %v6984_v24 = vld [vmem:[%s7747_s8 + $0x1b] sm:$0xff] }
 0x4cd   : > { %v5945_v56 = vpop.f32.mrf.mxu2  ;;  %v6231_v12 = vpop.f32.mrf.mxu3 }
 0x4ce   : > { %v6053_v2 = vadd.f32 %v5945_v56, %v5767_v32  ;;  %v10129_v37 = vpop.f32.mrf.mxu1  ;;  %v6520_v45 = vpop.f32.mrf.mxu0 }
 0x4d0   : > { %v6339_v35 = vadd.f32 %v6231_v12, %v6053_v2  ;;  %v6734_v12 = vld [vmem:[#allocation2 + $0x2e] sm:$0xff] }
 0x4d1   : > { %6802 = vmatmul.f32.vlgmr.msra.gmra.mxu1 %v6733_v7  ;;  %6567 = vmatmul.f32.gmra.mxu0 %v6464_v54  ;;  %v6465_v2 = vld [vmem:[#allocation2 + $0xb5] sm:$0xff] }
 0x4d2   : > { %5995 = vmatmul.f32.gmra.mxu2 %v6176_v0  ;;  %6281 = vmatmul.f32.gmra.mxu3 %v6178_v47  ;;  %v10131_v50 = vadd.f32 %v6517_v21, %v6339_v35  ;;  %v6179_v7 = vld [vmem:[#allocation2 + $0xb4] sm:$0xff]  ;;  %v5769_v21 = vadd.f32 %v10038_v22, %v9956_v48 }
 0x4d5   : > { %v5948_v13 = vpop.f32.mrf.mxu2  ;;  %v6234_v4 = vpop.f32.mrf.mxu3 }
 0x4d6   : > { %v6054_v17 = vadd.f32 %v5948_v13, %v5768_v3  ;;  %v10135_v5 = vpop.f32.mrf.mxu1  ;;  %v6523_v32 = vpop.f32.mrf.mxu0 }
 0x4d8   : > { %v6340_v56 = vadd.f32 %v6234_v4, %v6054_v17  ;;  %v6735_v4 = vld [vmem:[#allocation2 + $0x36] sm:$0xff] }
 0x4d9   : > { %6805 = vmatmul.f32.gmra.mxu1 %v6734_v12  ;;  %6570 = vmatmul.f32.gmra.mxu0 %v6465_v2  ;;  %v6466_v17 = vld [vmem:[#allocation2 + $0xbd] sm:$0xff] }
 0x4da   : > { %5998 = vmatmul.f32.gmra.mxu2 %v6177_v15  ;;  %6284 = vmatmul.f32.gmra.mxu3 %v6179_v7  ;;  %v10137_v0 = vadd.f32 %v6520_v45, %v6340_v56  ;;  %v6180_v12 = vld [vmem:[#allocation2 + $0xbc] sm:$0xff]  ;;  %v5770_v45 = vadd.f32 %v10043_v30, %v9961_v40 }
 0x4dd   : > { %v5951_v19 = vpop.f32.mrf.mxu2  ;;  %v6237_v49 = vpop.f32.mrf.mxu3 }
 0x4de   : > { %v6055_v35 = vadd.f32 %v5951_v19, %v5769_v21  ;;  %v10141_v54 = vpop.f32.mrf.mxu1  ;;  %v6526_v3 = vpop.f32.mrf.mxu0 }
 0x4e0   : > { %v6341_v13 = vadd.f32 %v6237_v49, %v6055_v35  ;;  %v6736_v49 = vld [vmem:[#allocation2 + $0x3e] sm:$0xff] }
 0x4e1   : > { %6808 = vmatmul.f32.gmra.mxu1 %v6735_v4  ;;  %6573 = vmatmul.f32.gmra.mxu0 %v6466_v17  ;;  %v6467_v35 = vld [vmem:[#allocation2 + $0xc5] sm:$0xff] }
 0x4e2   : > { %6001 = vmatmul.f32.gmra.mxu2 %v6178_v47  ;;  %6287 = vmatmul.f32.gmra.mxu3 %v6180_v12  ;;  %v10143_v15 = vadd.f32 %v6523_v32, %v6341_v13  ;;  %v6181_v4 = vld [vmem:[#allocation2 + $0xc4] sm:$0xff]  ;;  %v5771_v32 = vadd.f32 %v10048_v23, %v9966_v26 }
 0x4e5   : > { %v5954_v48 = vpop.f32.mrf.mxu2  ;;  %v6240_v22 = vpop.f32.mrf.mxu3 }
 0x4e6   : > { %v6056_v56 = vadd.f32 %v5954_v48, %v5770_v45  ;;  %v10147_v2 = vpop.f32.mrf.mxu1  ;;  %v6529_v21 = vpop.f32.mrf.mxu0 }
 0x4e8   : > { %v6342_v19 = vadd.f32 %v6240_v22, %v6056_v56  ;;  %v6737_v22 = vld [vmem:[#allocation2 + $0x46] sm:$0xff] }
 0x4e9   : > { %6811 = vmatmul.f32.gmra.mxu1 %v6736_v49  ;;  %6576 = vmatmul.f32.gmra.mxu0 %v6467_v35  ;;  %v6468_v56 = vld [vmem:[#allocation2 + $0xcd] sm:$0xff] }
 0x4ea   : > { %6004 = vmatmul.f32.gmra.mxu2 %v6179_v7  ;;  %6290 = vmatmul.f32.gmra.mxu3 %v6181_v4  ;;  %v10149_v47 = vadd.f32 %v6526_v3, %v6342_v19  ;;  %v6182_v49 = vld [vmem:[#allocation2 + $0xcc] sm:$0xff]  ;;  %v5772_v3 = vadd.f32 %v10053_v8, %v9971_v6 }
 0x4ed   : > { %v5957_v40 = vpop.f32.mrf.mxu2  ;;  %v6243_v30 = vpop.f32.mrf.mxu3 }
 0x4ee   : > { %v6057_v13 = vadd.f32 %v5957_v40, %v5771_v32  ;;  %v10153_v17 = vpop.f32.mrf.mxu1  ;;  %v6532_v45 = vpop.f32.mrf.mxu0 }
 0x4f0   : > { %v6343_v48 = vadd.f32 %v6243_v30, %v6057_v13  ;;  %v6738_v30 = vld [vmem:[#allocation2 + $0x4e] sm:$0xff] }
 0x4f1   : > { %6814 = vmatmul.f32.gmra.mxu1 %v6737_v22  ;;  %6579 = vmatmul.f32.gmra.mxu0 %v6468_v56  ;;  %v6469_v13 = vld [vmem:[#allocation2 + $0xd5] sm:$0xff] }
 0x4f2   : > { %6007 = vmatmul.f32.gmra.mxu2 %v6180_v12  ;;  %6293 = vmatmul.f32.gmra.mxu3 %v6182_v49  ;;  %v10155_v7 = vadd.f32 %v6529_v21, %v6343_v48  ;;  %v6183_v22 = vld [vmem:[#allocation2 + $0xd4] sm:$0xff]  ;;  %v5773_v21 = vadd.f32 %v10058_v62, %v9976_v59 }
 0x4f5   : > { %v5960_v26 = vpop.f32.mrf.mxu2  ;;  %v6246_v23 = vpop.f32.mrf.mxu3 }
 0x4f6   : > { %v6058_v19 = vadd.f32 %v5960_v26, %v5772_v3  ;;  %v10159_v35 = vpop.f32.mrf.mxu1  ;;  %v6535_v32 = vpop.f32.mrf.mxu0 }
 0x4f8   : > { %v6344_v40 = vadd.f32 %v6246_v23, %v6058_v19  ;;  %v6739_v23 = vld [vmem:[#allocation2 + $0x56] sm:$0xff] }
 0x4f9   : > { %6817 = vmatmul.f32.gmra.mxu1 %v6738_v30  ;;  %6582 = vmatmul.f32.gmra.mxu0 %v6469_v13  ;;  %v6470_v19 = vld [vmem:[#allocation2 + $0xdd] sm:$0xff] }
 0x4fa   : > { %6010 = vmatmul.f32.gmra.mxu2 %v6181_v4  ;;  %6296 = vmatmul.f32.gmra.mxu3 %v6183_v22  ;;  %v10161_v12 = vadd.f32 %v6532_v45, %v6344_v40  ;;  %v6184_v30 = vld [vmem:[#allocation2 + $0xdc] sm:$0xff]  ;;  %v5774_v45 = vadd.f32 %v10063_v33, %v9981_v57 }
 0x4fd   : > { %v5963_v6 = vpop.f32.mrf.mxu2  ;;  %v6249_v8 = vpop.f32.mrf.mxu3 }
 0x4fe   : > { %v6059_v48 = vadd.f32 %v5963_v6, %v5773_v21  ;;  %v10165_v56 = vpop.f32.mrf.mxu1  ;;  %v6538_v26 = vpop.f32.mrf.mxu0  ;;  %v6740_v6 = vld [vmem:[#allocation2 + $0x5e] sm:$0xff] }
 0x500   : > { %v6345_v3 = vadd.f32 %v6249_v8, %v6059_v48  ;;  %v6471_v8 = vld [vmem:[#allocation2 + $0xe5] sm:$0xff] }
 0x501   : > { %6820 = vmatmul.f32.gmra.mxu1 %v6739_v23  ;;  %6585 = vmatmul.f32.gmra.mxu0 %v6470_v19  ;;  %v6185_v48 = vld [vmem:[#allocation2 + $0xe4] sm:$0xff] }
 0x502   : > { %6013 = vmatmul.f32.gmra.mxu2 %v6182_v49  ;;  %6299 = vmatmul.f32.gmra.mxu3 %v6184_v30  ;;  %v10167_v4 = vadd.f32 %v6535_v32, %v6345_v3  ;;  %v5775_v32 = vadd.f32 %v10068_v46, %v9986_v55 }
 0x505   : > { %v5966_v59 = vpop.f32.mrf.mxu2  ;;  %v6252_v62 = vpop.f32.mrf.mxu3 }
 0x506   : > { %v6060_v40 = vadd.f32 %v5966_v59, %v5774_v45  ;;  %v10171_v13 = vpop.f32.mrf.mxu1  ;;  %v6541_v23 = vpop.f32.mrf.mxu0  ;;  %v6741_v59 = vld [vmem:[#allocation2 + $0x66] sm:$0xff] }
 0x508   : > { %v6346_v21 = vadd.f32 %v6252_v62, %v6060_v40  ;;  %v6472_v62 = vld [vmem:[#allocation2 + $0xed] sm:$0xff] }
 0x509   : > { %6823 = vmatmul.f32.gmra.mxu1 %v6740_v6  ;;  %6588 = vmatmul.f32.gmra.mxu0 %v6471_v8  ;;  %v6186_v40 = vld [vmem:[#allocation2 + $0xec] sm:$0xff] }
 0x50a   : > { %6016 = vmatmul.f32.gmra.mxu2 %v6183_v22  ;;  %6302 = vmatmul.f32.gmra.mxu3 %v6185_v48  ;;  %v10173_v49 = vadd.f32 %v6538_v26, %v6346_v21  ;;  %v5776_v26 = vadd.f32 %v10073_v42, %v9991_v51 }
 0x50d   : > { %v5969_v57 = vpop.f32.mrf.mxu2  ;;  %v6255_v33 = vpop.f32.mrf.mxu3 }
 0x50e   : > { %v6061_v3 = vadd.f32 %v5969_v57, %v5775_v32  ;;  %v10177_v19 = vpop.f32.mrf.mxu1  ;;  %v6544_v21 = vpop.f32.mrf.mxu0  ;;  %v6742_v57 = vld [vmem:[#allocation2 + $0x6e] sm:$0xff] }
 0x510   : > { %v6347_v45 = vadd.f32 %v6255_v33, %v6061_v3  ;;  %v6473_v33 = vld [vmem:[#allocation2 + $0xf5] sm:$0xff] }
 0x511   : > { %6826 = vmatmul.f32.gmra.mxu1 %v6741_v59  ;;  %6591 = vmatmul.f32.gmra.mxu0 %v6472_v62  ;;  %v6187_v3 = vld [vmem:[#allocation2 + $0xf4] sm:$0xff] }
 0x512   : > { %6019 = vmatmul.f32.gmra.mxu2 %v6184_v30  ;;  %6305 = vmatmul.f32.gmra.mxu3 %v6186_v40  ;;  %v10179_v22 = vadd.f32 %v6541_v23, %v6347_v45  ;;  %v5777_v23 = vadd.f32 %v10078_v27, %v9996_v11 }
 0x515   : > { %v5972_v55 = vpop.f32.mrf.mxu2  ;;  %v6258_v46 = vpop.f32.mrf.mxu3 }
 0x516   : > { %v6062_v6 = vadd.f32 %v5972_v55, %v5776_v26  ;;  %v10183_v8 = vpop.f32.mrf.mxu1  ;;  %v6547_v62 = vpop.f32.mrf.mxu0  ;;  %v6743_v55 = vld [vmem:[#allocation2 + $0x76] sm:$0xff] }
 0x518   : > { %v6348_v32 = vadd.f32 %v6258_v46, %v6062_v6  ;;  %v6474_v46 = vld [vmem:[#allocation2 + $0xfd] sm:$0xff] }
 0x519   : > { %6829 = vmatmul.f32.gmra.mxu1 %v6742_v57  ;;  %6594 = vmatmul.f32.gmra.mxu0 %v6473_v33  ;;  %v6188_v6 = vld [vmem:[#allocation2 + $0xfc] sm:$0xff] }
 0x51a   : > { %6022 = vmatmul.f32.gmra.mxu2 %v6185_v48  ;;  %6308 = vmatmul.f32.gmra.mxu3 %v6187_v3  ;;  %v10185_v30 = vadd.f32 %v6544_v21, %v6348_v32  ;;  %v5778_v21 = vadd.f32 %v10083_v29, %v10001_v38  ;;  %v6476_v38 = vld [vmem:[#allocation2 + $0x10d] sm:$0xff] }
 0x51b   : > { %v6190_v29 = vld [vmem:[#allocation2 + $0x10c] sm:$0xff] }
 0x51d   : > { %v5975_v51 = vpop.f32.mrf.mxu2  ;;  %v6261_v42 = vpop.f32.mrf.mxu3 }
 0x51e   : > { %v6063_v45 = vadd.f32 %v5975_v51, %v5777_v23  ;;  %v10189_v59 = vpop.f32.mrf.mxu1  ;;  %v6744_v23 = vld [vmem:[#allocation2 + $0x7e] sm:$0xff] }
 0x51f   : > { %v6475_v51 = vld [vmem:[#allocation2 + $0x105] sm:$0xff] }
 0x520   : > { %v6349_v26 = vadd.f32 %v6261_v42, %v6063_v45  ;;  %v6550_v42 = vpop.f32.mrf.mxu0  ;;  %v6189_v45 = vld [vmem:[#allocation2 + $0x104] sm:$0xff] }
 0x521   : > { %6832 = vmatmul.f32.gmra.mxu1 %v6743_v55  ;;  %6597 = vmatmul.f32.gmra.mxu0 %v6474_v46  ;;  %v6746_v46 = vld [vmem:[#allocation2 + $0x8e] sm:$0xff] }
 0x522   : > { %6025 = vmatmul.f32.gmra.mxu2 %v6186_v40  ;;  %6311 = vmatmul.f32.gmra.mxu3 %v6188_v6  ;;  %v10191_v48 = vadd.f32 %v6547_v62, %v6349_v26  ;;  %v6745_v26 = vld [vmem:[#allocation2 + $0x86] sm:$0xff] }
 0x525   : > { %v5978_v11 = vpop.f32.mrf.mxu2  ;;  %v6264_v57 = vpop.f32.mrf.mxu3 }
 0x526   : > { %v6064_v27 = vadd.f32 %v5978_v11, %v5778_v21  ;;  %v10195_v32 = vpop.f32.mrf.mxu1  ;;  %v6477_v21 = vld [vmem:[#allocation2 + $0x115] sm:$0xff] }
 0x527   : > { %v6191_v11 = vld [vmem:[#allocation2 + $0x114] sm:$0xff] }
 0x528   : > { %v6350_v33 = vadd.f32 %v6264_v57, %v6064_v27  ;;  %v6747_v27 = vld [vmem:[#allocation2 + $0x96] sm:$0xff] }
 0x529   : > { %6835 = vmatmul.f32.gmra.mxu1 %v6744_v23  ;;  %6600 = vmatmul.f32.gmra.mxu0 %v6475_v51  ;;  %v6478_v57 = vld [vmem:[#allocation2 + $0x11d] sm:$0xff]  ;;  %v6479_v51 = vld [vmem:[#allocation2 + $0x125] sm:$0xff] }
 0x52a   : > { %6028 = vmatmul.f32.gmra.mxu2 %v6187_v3  ;;  %6314 = vmatmul.f32.gmra.mxu3 %v6189_v45  ;;  %v10197_v40 = vadd.f32 %v6550_v42, %v6350_v33  ;;  %v6192_v33 = vld [vmem:[#allocation2 + $0x11c] sm:$0xff]  ;;  %v6193_v42 = vld [vmem:[#allocation2 + $0x124] sm:$0xff] }
 0x52b   : > { %v6748_v23 = vld [vmem:[#allocation2 + $0x9e] sm:$0xff] }
 0x52e   : > { %v10199_v62 = vpop.f32.mrf.mxu1 }
 0x531   : > { %6838 = vmatmul.f32.gmra.mxu1 %v6745_v26  ;;  %6603 = vmatmul.f32.gmra.mxu0 %v6476_v38 }
 0x532   : > { %6031 = vmatmul.f32.gmra.mxu2 %v6188_v6  ;;  %6317 = vmatmul.f32.gmra.mxu3 %v6190_v29 }
 0x536   : > { %v10201_v55 = vpop.f32.mrf.mxu1 }
 0x539   : > { %6841 = vmatmul.f32.gmra.mxu1 %v6746_v46  ;;  %6606 = vmatmul.f32.gmra.mxu0 %v6477_v21  ;;  %v6749_v46 = vld [vmem:[#allocation2 + $0xa6] sm:$0xff] }
 0x53a   : > { %6034 = vmatmul.f32.gmra.mxu2 %v6189_v45  ;;  %6320 = vmatmul.f32.gmra.mxu3 %v6191_v11  ;;  %v10210_v45 = vld [vmem:[%s10496_s4] ss:$0 sm:$0xff]  ;;  %v6480_v21 = vld [vmem:[#allocation2 + $0x12d] sm:$0xff] }
 0x53e   : > { %v10203_v3 = vpop.f32.mrf.mxu1 }
 0x53f   : > { %10699 = vst [vmem:[#allocation19_spill] sm:$0xff] %v10203_v3 }
 0x541   : > { %6844 = vmatmul.f32.gmra.mxu1 %v6747_v27  ;;  %6609 = vmatmul.f32.gmra.mxu0 %v6478_v57  ;;  %v6194_v57 = vld [vmem:[#allocation2 + $0x12c] sm:$0xff] }
 0x542   : > { %6037 = vmatmul.f32.gmra.mxu2 %v6190_v29  ;;  %6323 = vmatmul.f32.gmra.mxu3 %v6192_v33  ;;  %v6983_v29 = vld [vmem:[%s7747_s8 + $0x13] sm:$0xff] }
 0x546   : > { %v10205_v6 = vpop.f32.mrf.mxu1 }
 0x547   : > { %10700 = vst [vmem:[#allocation20_spill] sm:$0xff] %v10205_v6  ;;  %v6481_v6 = vld [vmem:[#allocation2 + $0x135] sm:$0xff] }
 0x549   : > { %6847 = vmatmul.f32.gmra.mxu1 %v6748_v23  ;;  %6612 = vmatmul.f32.gmra.mxu0 %v6479_v51 }
 0x54a   : > { %6040 = vmatmul.f32.gmra.mxu2 %v6191_v11  ;;  %6326 = vmatmul.f32.gmra.mxu3 %v6193_v42 }
 0x54e   : > { %v6803_v26 = vpop.f32.mrf.mxu1 }
 0x54f   : > { %v6911_v38 = vadd.f32 %v6803_v26, %v10131_v50  ;;  %v6195_v26 = vld [vmem:[#allocation2 + $0x134] sm:$0xff] }
 0x551   : > { %v7059_v27 = vadd.f32 %v10210_v45, %v6911_v38  ;;  %6850 = vmatmul.f32.gmra.mxu1 %v6749_v46  ;;  %6615 = vmatmul.f32.gmra.mxu0 %v6480_v21  ;;  %v6750_v38 = vld [vmem:[#allocation2 + $0xae] sm:$0xff] }
 0x552   : > { %6043 = vmatmul.f32.gmra.mxu2 %v6192_v33  ;;  %6329 = vmatmul.f32.gmra.mxu3 %v6194_v57 }
 0x553   : > { %v7095_v11 = vadd.f32 %v7059_v27, %v6983_v29  ;;  %v6482_v27 = vld [vmem:[#allocation2 + $0x13d] sm:$0xff] }
 0x555   : > { %v7131_v23 = vmax.f32 %v7095_v11, 0.0 }
 0x556   : > { %v6806_v51 = vpop.f32.mrf.mxu1 }
 0x557   : > { %7167 = vst [vmem:[%s10216_s26] sm:$0xff] %v7131_v23  ;;  %v6912_v50 = vadd.f32 %v6806_v51, %v10137_v0  ;;  %v6196_v0 = vld [vmem:[#allocation2 + $0x13c] sm:$0xff]  ;;  %v6985_v23 = vld [vmem:[%s7747_s8 + $0x23] sm:$0xff] }
 0x558   : > { %v6751_v51 = vld [vmem:[#allocation2 + $0xb6] sm:$0xff] }
 0x559   : > { %v7060_v46 = vadd.f32 %v10210_v45, %v6912_v50  ;;  %6853 = vmatmul.f32.gmra.mxu1 %v6750_v38  ;;  %6618 = vmatmul.f32.gmra.mxu0 %v6481_v6  ;;  %v6752_v38 = vld [vmem:[#allocation2 + $0xbe] sm:$0xff] }
 0x55a   : > { %6046 = vmatmul.f32.gmra.mxu2 %v6193_v42  ;;  %6332 = vmatmul.f32.gmra.mxu3 %v6195_v26  ;;  %v6986_v26 = vld [vmem:[%s7747_s8 + $0x2b] sm:$0xff] }
 0x55b   : > { %v7096_v33 = vadd.f32 %v7060_v46, %v6984_v24 }
 0x55d   : > { %v7132_v29 = vmax.f32 %v7096_v33, 0.0 }
 0x55e   : > { %v6809_v21 = vpop.f32.mrf.mxu1 }
 0x55f   : > { %7168 = vst [vmem:[%s10216_s26 + $0x8] sm:$0xff] %v7132_v29  ;;  %v6913_v11 = vadd.f32 %v6809_v21, %v10143_v15  ;;  %v6987_v21 = vld [vmem:[%s7747_s8 + $0x33] sm:$0xff] }
 0x561   : > { %v7061_v3 = vadd.f32 %v10210_v45, %v6913_v11  ;;  %6856 = vmatmul.f32.gmra.mxu1 %v6751_v51  ;;  %6621 = vmatmul.f32.gmra.mxu0 %v6482_v27 }
 0x562   : > { %6049 = vmatmul.f32.gmra.mxu2 %v6194_v57  ;;  %6335 = vmatmul.f32.gmra.mxu3 %v6196_v0 }
 0x563   : > { %v7097_v24 = vadd.f32 %v7061_v3, %v6985_v23  ;;  %v6753_v3 = vld [vmem:[#allocation2 + $0xc6] sm:$0xff] }
 0x565   : > { %v7133_v6 = vmax.f32 %v7097_v24, 0.0  ;;  %v6988_v24 = vld [vmem:[%s7747_s8 + $0x3b] sm:$0xff] }
 0x566   : > { %v6812_v42 = vpop.f32.mrf.mxu1 }
 0x567   : > { %7169 = vst [vmem:[%s10216_s26 + $0x10] sm:$0xff] %v7133_v6  ;;  %v6914_v50 = vadd.f32 %v6812_v42, %v10149_v47  ;;  %v10234_v47 = vpop.f32.mrf.mxu2  ;;  %v6754_v6 = vld [vmem:[#allocation2 + $0xce] sm:$0xff] }
 0x569   : > { %v7062_v15 = vadd.f32 %v10210_v45, %v6914_v50  ;;  %6859 = vmatmul.f32.gmra.mxu1 %v6752_v38 }
 0x56b   : > { %v7098_v46 = vadd.f32 %v7062_v15, %v6986_v26  ;;  %v10242_v26 = vpop.f32.mrf.mxu0 }
 0x56d   : > { %v7134_v33 = vmax.f32 %v7098_v46, 0.0 }
 0x56e   : > { %v6815_v29 = vpop.f32.mrf.mxu1 }
 0x56f   : > { %7170 = vst [vmem:[%s10216_s26 + $0x18] sm:$0xff] %v7134_v33  ;;  %v6915_v57 = vadd.f32 %v6815_v29, %v10155_v7  ;;  %v10240_v7 = vpop.f32.mrf.mxu3  ;;  %v10244_v15 = vpop.f32.mrf.mxu2  ;;  %v6755_v29 = vld [vmem:[#allocation2 + $0xd6] sm:$0xff] }
 0x571   : > { %v7063_v27 = vadd.f32 %v10210_v45, %v6915_v57  ;;  %6862 = vmatmul.f32.gmra.mxu1 %v6753_v3 }
 0x573   : > { %v7099_v11 = vadd.f32 %v7063_v27, %v6987_v21 }
 0x575   : > { %v7135_v0 = vmax.f32 %v7099_v11, 0.0 }
 0x576   : > { %v6818_v23 = vpop.f32.mrf.mxu1 }
 0x577   : > { %7171 = vst [vmem:[%s10216_s26 + $0x20] sm:$0xff] %v7135_v0  ;;  %v6916_v51 = vadd.f32 %v6818_v23, %v10161_v12  ;;  %v6989_v12 = vld [vmem:[%s7747_s8 + $0x43] sm:$0xff]  ;;  %v10250_v3 = vpop.f32.mrf.mxu3  ;;  %v10252_v0 = vpop.f32.mrf.mxu0 }
 0x579   : > { %v7064_v42 = vadd.f32 %v10210_v45, %v6916_v51  ;;  %6865 = vmatmul.f32.gmra.mxu1 %v6754_v6  ;;  %v10256_v51 = vpop.f32.mrf.mxu2 }
 0x57b   : > { %v7100_v50 = vadd.f32 %v7064_v42, %v6988_v24  ;;  %v6756_v24 = vld [vmem:[#allocation2 + $0xde] sm:$0xff] }
 0x57d   : > { %v7136_v38 = vmax.f32 %v7100_v50, 0.0 }
 0x57e   : > { %v6821_v46 = vpop.f32.mrf.mxu1 }
 0x57f   : > { %7172 = vst [vmem:[%s10216_s26 + $0x28] sm:$0xff] %v7136_v38  ;;  %v6917_v33 = vadd.f32 %v6821_v46, %v10167_v4  ;;  %v6990_v4 = vld [vmem:[%s7747_s8 + $0x4b] sm:$0xff]  ;;  %v10260_v38 = vpop.f32.mrf.mxu3 }
 0x581   : > { %v7065_v57 = vadd.f32 %v10210_v45, %v6917_v33  ;;  %6868 = vmatmul.f32.gmra.mxu1 %v6755_v29  ;;  %v6757_v29 = vld [vmem:[#allocation2 + $0xe6] sm:$0xff] }
 0x583   : > { %v7101_v21 = vadd.f32 %v7065_v57, %v6989_v12  ;;  %v6991_v12 = vld [vmem:[%s7747_s8 + $0x53] sm:$0xff] }
 0x585   : > { %v7137_v27 = vmax.f32 %v7101_v21, 0.0  ;;  %v10268_v21 = vpop.f32.mrf.mxu2 }
 0x586   : > { %v6824_v11 = vpop.f32.mrf.mxu1 }
 0x587   : > { %7173 = vst [vmem:[%s10216_s26 + $0x30] sm:$0xff] %v7137_v27  ;;  %v6918_v23 = vadd.f32 %v6824_v11, %v10173_v49  ;;  %v10265_v49 = vpop.f32.mrf.mxu0 }
 0x589   : > { %v7066_v6 = vadd.f32 %v10210_v45, %v6918_v23  ;;  %6871 = vmatmul.f32.gmra.mxu1 %v6756_v24  ;;  %v10272_v24 = vpop.f32.mrf.mxu3 }
 0x58b   : > { %v7102_v42 = vadd.f32 %v7066_v6, %v6990_v4  ;;  %v6758_v6 = vld [vmem:[#allocation2 + $0xee] sm:$0xff] }
 0x58d   : > { %v7138_v50 = vmax.f32 %v7102_v42, 0.0 }
 0x58e   : > { %v6827_v46 = vpop.f32.mrf.mxu1 }
 0x58f   : > { %7174 = vst [vmem:[%s10216_s26 + $0x38] sm:$0xff] %v7138_v50  ;;  %v6919_v33 = vadd.f32 %v6827_v46, %v10179_v22  ;;  %v6992_v22 = vld [vmem:[%s7747_s8 + $0x5b] sm:$0xff]  ;;  %v10276_v50 = vpop.f32.mrf.mxu0 }
 0x591   : > { %v7067_v57 = vadd.f32 %v10210_v45, %v6919_v33  ;;  %6874 = vmatmul.f32.gmra.mxu1 %v6757_v29  ;;  %v10278_v33 = vpop.f32.mrf.mxu2 }
 0x593   : > { %v7103_v27 = vadd.f32 %v7067_v57, %v6991_v12 }
 0x595   : > { %v7139_v11 = vmax.f32 %v7103_v27, 0.0  ;;  %v6759_v27 = vld [vmem:[#allocation2 + $0xf6] sm:$0xff] }
 0x596   : > { %v6830_v23 = vpop.f32.mrf.mxu1 }
 0x597   : > { %7175 = vst [vmem:[%s10216_s26 + $0x40] sm:$0xff] %v7139_v11  ;;  %v6920_v4 = vadd.f32 %v6830_v23, %v10185_v30  ;;  %v6993_v30 = vld [vmem:[%s7747_s8 + $0x63] sm:$0xff]  ;;  %v10284_v23 = vpop.f32.mrf.mxu3 }
 0x599   : > { %v7068_v42 = vadd.f32 %v10210_v45, %v6920_v4  ;;  %6877 = vmatmul.f32.gmra.mxu1 %v6758_v6  ;;  %v5779_v4 = vadd.f32 %v10088_v61, %v10006_v63  ;;  %v5780_v61 = vadd.f32 %v10093_v44, %v10011_v20 }
 0x59b   : > { %v7104_v46 = vadd.f32 %v7068_v42, %v6992_v22  ;;  %v6065_v6 = vadd.f32 %v10234_v47, %v5779_v4  ;;  %v10289_v42 = vpop.f32.mrf.mxu0 }
 0x59d   : > { %v7140_v29 = vmax.f32 %v7104_v46, 0.0 }
 0x59e   : > { %v6833_v12 = vpop.f32.mrf.mxu1 }
 0x59f   : > { %7176 = vst [vmem:[%s10216_s26 + $0x48] sm:$0xff] %v7140_v29  ;;  %v6921_v57 = vadd.f32 %v6833_v12, %v10191_v48  ;;  %v10291_v29 = vpop.f32.mrf.mxu2  ;;  %v6994_v12 = vld [vmem:[%s7747_s8 + $0x6b] sm:$0xff] }
 0x5a1   : > { %v7069_v11 = vadd.f32 %v10210_v45, %v6921_v57  ;;  %6880 = vmatmul.f32.gmra.mxu1 %v6759_v27  ;;  %v6760_v57 = vld [vmem:[#allocation2 + $0xfe] sm:$0xff]  ;;  %v6351_v27 = vadd.f32 %v10240_v7, %v6065_v6 }
 0x5a3   : > { %v7105_v22 = vadd.f32 %v7069_v11, %v6993_v30  ;;  %v10300_v30 = vpop.f32.mrf.mxu3  ;;  %v6066_v11 = vadd.f32 %v10244_v15, %v5780_v61  ;;  %v5781_v15 = vadd.f32 %v10098_v52, %v10019_v39 }
 0x5a5   : > { %v7141_v46 = vmax.f32 %v7105_v22, 0.0  ;;  %v6637_v22 = vadd.f32 %v10242_v26, %v6351_v27  ;;  %v6352_v20 = vadd.f32 %v10250_v3, %v6066_v11  ;;  %v6762_v3 = vld [vmem:[#allocation2 + $0x10e] sm:$0xff] }
 0x5a6   : > { %v6836_v34 = vpop.f32.mrf.mxu1 }
 0x5a7   : > { %7177 = vst [vmem:[%s10216_s26 + $0x50] sm:$0xff] %v7141_v46  ;;  %v6922_v48 = vadd.f32 %v6836_v34, %v10197_v40  ;;  %v10304_v40 = vpop.f32.mrf.mxu0  ;;  %v10307_v6 = vpop.f32.mrf.mxu2  ;;  %v6995_v46 = vld [vmem:[%s7747_s8 + $0x73] sm:$0xff]  ;;  %v6638_v27 = vadd.f32 %v10252_v0, %v6352_v20  ;;  %v5782_v0 = vadd.f32 %v10103_v58, %v10024_v28  ;;  %v5783_v28 = vadd.f32 %v10108_v25, %v10030_v60 }
 0x5a9   : > { %v7070_v63 = vadd.f32 %v10210_v45, %v6922_v48  ;;  %6883 = vmatmul.f32.gmra.mxu1 %v6760_v57  ;;  %v6761_v48 = vld [vmem:[#allocation2 + $0x106] sm:$0xff] }
 0x5ab   : > { %v7106_v47 = vadd.f32 %v7070_v63, %v6994_v12  ;;  %v6067_v12 = vadd.f32 %v10256_v51, %v5781_v15  ;;  %v10316_v63 = vpop.f32.mrf.mxu3  ;;  %v6763_v15 = vld [vmem:[#allocation2 + $0x116] sm:$0xff] }
 0x5ad   : > { %v7142_v4 = vmax.f32 %v7106_v47, 0.0  ;;  %v6353_v11 = vadd.f32 %v10260_v38, %v6067_v12 }
 0x5ae   : > { %v6839_v34 = vpop.f32.mrf.mxu1 }
 0x5af   : > { %7178 = vst [vmem:[%s10216_s26 + $0x58] sm:$0xff] %v7142_v4  ;;  %v6923_v7 = vadd.f32 %v6839_v34, %v6637_v22  ;;  %v6996_v4 = vld [vmem:[%s7747_s8 + $0x7b] sm:$0xff]  ;;  %v10321_v22 = vpop.f32.mrf.mxu0  ;;  %v10324_v52 = vpop.f32.mrf.mxu2  ;;  %v6068_v34 = vadd.f32 %v10268_v21, %v5782_v0 }
 0x5b1   : > { %v7071_v44 = vadd.f32 %v10210_v45, %v6923_v7  ;;  %6886 = vmatmul.f32.gmra.mxu1 %v6761_v48 }
 0x5b3   : > { %v7107_v26 = vadd.f32 %v7071_v44, %v6995_v46  ;;  %v6639_v46 = vadd.f32 %v10265_v49, %v6353_v11  ;;  %v10331_v20 = vpop.f32.mrf.mxu3  ;;  %v6997_v44 = vld [vmem:[%s7747_s8 + $0x83] sm:$0xff] }
 0x5b5   : > { %v7143_v57 = vmax.f32 %v7107_v26, 0.0  ;;  %v6354_v26 = vadd.f32 %v10272_v24, %v6068_v34  ;;  %v6998_v24 = vld [vmem:[%s7747_s8 + $0x8b] sm:$0xff] }
 0x5b6   : > { %v6842_v61 = vpop.f32.mrf.mxu1 }
 0x5b7   : > { %7179 = vst [vmem:[%s10216_s26 + $0x60] sm:$0xff] %v7143_v57  ;;  %v6924_v47 = vadd.f32 %v6842_v61, %v6638_v27  ;;  %v10338_v58 = vpop.f32.mrf.mxu0  ;;  %v6005_v21 = vpop.f32.mrf.mxu2  ;;  %v6069_v57 = vadd.f32 %v10278_v33, %v5783_v28  ;;  %v6640_v61 = vadd.f32 %v10276_v50, %v6354_v26 }
 0x5b9   : > { %v7072_v39 = vadd.f32 %v10210_v45, %v6924_v47  ;;  %6889 = vmatmul.f32.gmra.mxu1 %v6762_v3  ;;  %v6764_v3 = vld [vmem:[#allocation2 + $0x11e] sm:$0xff]  ;;  %v6355_v11 = vadd.f32 %v10284_v23, %v6069_v57 }
 0x5bb   : > { %v7108_v51 = vadd.f32 %v7072_v39, %v6996_v4  ;;  %v6291_v25 = vpop.f32.mrf.mxu3  ;;  %v5784_v39 = vadd.f32 %v10113_v14, %v10035_v53  ;;  %v6641_v34 = vadd.f32 %v10289_v42, %v6355_v11  ;;  %v5785_v14 = vadd.f32 %v10118_v16, %v10040_v18 }
 0x5bc   : > { %v5786_v16 = vadd.f32 %v10123_v9, %v10045_v10  ;;  %v5787_v9 = vadd.f32 %v10129_v37, %v10050_v43  ;;  %v5788_v43 = vadd.f32 %v10135_v5, %v10055_v41  ;;  %v5789_v41 = vadd.f32 %v10141_v54, %v10060_v1 }
 0x5bd   : > { %v7144_v7 = vmax.f32 %v7108_v51, 0.0  ;;  %v6070_v0 = vadd.f32 %v10291_v29, %v5784_v39  ;;  %v6071_v42 = vadd.f32 %v10307_v6, %v5785_v14 }
 0x5be   : > { %v6845_v48 = vpop.f32.mrf.mxu1 }
 0x5bf   : > { %7180 = vst [vmem:[%s10216_s26 + $0x68] sm:$0xff] %v7144_v7  ;;  %v6925_v38 = vadd.f32 %v6845_v48, %v6639_v46  ;;  %v10349_v50 = vpop.f32.mrf.mxu0  ;;  %v6008_v7 = vpop.f32.mrf.mxu2  ;;  %v6999_v48 = vld [vmem:[%s7747_s8 + $0x93] sm:$0xff] }
 0x5c1   : > { %v7073_v12 = vadd.f32 %v10210_v45, %v6925_v38  ;;  %6892 = vmatmul.f32.gmra.mxu1 %v6763_v15  ;;  %v6765_v38 = vld [vmem:[#allocation2 + $0x126] sm:$0xff] }
 0x5c3   : > { %v7109_v49 = vadd.f32 %v7073_v12, %v6997_v44  ;;  %v6356_v44 = vadd.f32 %v10300_v30, %v6070_v0  ;;  %v6294_v15 = vpop.f32.mrf.mxu3  ;;  %v7000_v30 = vld [vmem:[%s7747_s8 + $0x9b] sm:$0xff] }
 0x5c5   : > { %v7145_v27 = vmax.f32 %v7109_v49, 0.0  ;;  %v6642_v12 = vadd.f32 %v10304_v40, %v6356_v44  ;;  %v6072_v40 = vadd.f32 %v10324_v52, %v5786_v16  ;;  %v7002_v44 = vld [vmem:[%s7747_s8 + $0xab] sm:$0xff] }
 0x5c6   : > { %v6848_v47 = vpop.f32.mrf.mxu1 }
 0x5c7   : > { %7181 = vst [vmem:[%s10216_s26 + $0x70] sm:$0xff] %v7145_v27  ;;  %v6926_v4 = vadd.f32 %v6848_v47, %v6640_v61  ;;  %v6580_v49 = vpop.f32.mrf.mxu0  ;;  %v6011_v27 = vpop.f32.mrf.mxu2  ;;  %v6766_v61 = vld [vmem:[#allocation2 + $0x12e] sm:$0xff]  ;;  %v6357_v47 = vadd.f32 %v10316_v63, %v6071_v42  ;;  %v6358_v63 = vadd.f32 %v10331_v20, %v6072_v40  ;;  %v6074_v42 = vadd.f32 %v6008_v7, %v5788_v43 }
 0x5c9   : > { %v7074_v60 = vadd.f32 %v10210_v45, %v6926_v4  ;;  %6895 = vmatmul.f32.gmra.mxu1 %v6764_v3 }
 0x5cb   : > { %v7110_v33 = vadd.f32 %v7074_v60, %v6998_v24  ;;  %v6643_v24 = vadd.f32 %v10321_v22, %v6357_v47  ;;  %v6297_v3 = vpop.f32.mrf.mxu3  ;;  %v6767_v60 = vld [vmem:[#allocation2 + $0x136] sm:$0xff]  ;;  %v6073_v22 = vadd.f32 %v6005_v21, %v5787_v9  ;;  %v6075_v47 = vadd.f32 %v6011_v27, %v5789_v41 }
 0x5cc   : > { %v7005_v9 = vld [vmem:[%s7747_s8 + $0xc3] sm:$0xff] }
 0x5cd   : > { %v7146_v51 = vmax.f32 %v7110_v33, 0.0  ;;  %v7001_v33 = vld [vmem:[%s7747_s8 + $0xa3] sm:$0xff] }
 0x5ce   : > { %v6851_v46 = vpop.f32.mrf.mxu1 }
 0x5cf   : > { %7182 = vst [vmem:[%s10216_s26 + $0x78] sm:$0xff] %v7146_v51  ;;  %v6927_v23 = vadd.f32 %v6851_v46, %v6641_v34  ;;  %v6583_v0 = vpop.f32.mrf.mxu0  ;;  %v6014_v10 = vpop.f32.mrf.mxu2  ;;  %v6644_v46 = vadd.f32 %v10338_v58, %v6358_v63 }
 0x5d1   : > { %v7075_v53 = vadd.f32 %v10210_v45, %v6927_v23  ;;  %6898 = vmatmul.f32.gmra.mxu1 %v6765_v38 }
 0x5d3   : > { %v7111_v29 = vadd.f32 %v7075_v53, %v6999_v48  ;;  %v6768_v48 = vld [vmem:[#allocation2 + $0x13e] sm:$0xff]  ;;  %v6300_v20 = vpop.f32.mrf.mxu3  ;;  %v6359_v53 = vadd.f32 %v6291_v25, %v6073_v22  ;;  %v6360_v25 = vadd.f32 %v6294_v15, %v6074_v42  ;;  %v5791_v22 = vadd.f32 %v10153_v17, %v10070_v36 }
 0x5d5   : > { %v7147_v26 = vmax.f32 %v7111_v29, 0.0  ;;  %v6646_v16 = vadd.f32 %v6580_v49, %v6360_v25 }
 0x5d6   : > { %v6854_v28 = vpop.f32.mrf.mxu1 }
 0x5d7   : > { %7183 = vst [vmem:[%s10216_s26 + $0x80] sm:$0xff] %v7147_v26  ;;  %v6928_v57 = vadd.f32 %v6854_v28, %v6642_v12  ;;  %v6586_v37 = vpop.f32.mrf.mxu0  ;;  %v6017_v29 = vpop.f32.mrf.mxu2  ;;  %v6645_v26 = vadd.f32 %v10349_v50, %v6359_v53 }
 0x5d9   : > { %v7076_v18 = vadd.f32 %v10210_v45, %v6928_v57  ;;  %6901 = vmatmul.f32.gmra.mxu1 %v6766_v61  ;;  %v7003_v57 = vld [vmem:[%s7747_s8 + $0xb3] sm:$0xff] }
 0x5db   : > { %v7112_v6 = vadd.f32 %v7076_v18, %v7000_v30  ;;  %v6303_v61 = vpop.f32.mrf.mxu3 }
 0x5dd   : > { %v7148_v4 = vmax.f32 %v7112_v6, 0.0 }
 0x5de   : > { %v6857_v11 = vpop.f32.mrf.mxu1 }
 0x5df   : > { %7184 = vst [vmem:[%s10216_s26 + $0x88] sm:$0xff] %v7148_v4  ;;  %v6929_v39 = vadd.f32 %v6857_v11, %v6643_v24  ;;  %v6589_v18 = vpop.f32.mrf.mxu0  ;;  %v6020_v50 = vpop.f32.mrf.mxu2  ;;  %v7004_v4 = vld [vmem:[%s7747_s8 + $0xbb] sm:$0xff]  ;;  %v6361_v24 = vadd.f32 %v6297_v3, %v6075_v47  ;;  %v5790_v11 = vadd.f32 %v10147_v2, %v10065_v31  ;;  %v6077_v2 = vadd.f32 %v6017_v29, %v5791_v22 }
 0x5e1   : > { %v7077_v51 = vadd.f32 %v10210_v45, %v6929_v39  ;;  %6904 = vmatmul.f32.gmra.mxu1 %v6767_v60  ;;  %v6076_v54 = vadd.f32 %v6014_v10, %v5790_v11  ;;  %v6647_v39 = vadd.f32 %v6583_v0, %v6361_v24 }
 0x5e3   : > { %v7113_v52 = vadd.f32 %v7077_v51, %v7001_v33  ;;  %v6306_v1 = vpop.f32.mrf.mxu3 }
 0x5e5   : > { %v7149_v34 = vmax.f32 %v7113_v52, 0.0  ;;  %v6362_v52 = vadd.f32 %v6300_v20, %v6076_v54 }
 0x5e6   : > { %v6860_v23 = vpop.f32.mrf.mxu1 }
 0x5e7   : > { %7185 = vst [vmem:[%s10216_s26 + $0x90] sm:$0xff] %v7149_v34  ;;  %v6930_v38 = vadd.f32 %v6860_v23, %v6644_v46  ;;  %v6592_v33 = vpop.f32.mrf.mxu0  ;;  %v6023_v51 = vpop.f32.mrf.mxu2  ;;  %v6648_v10 = vadd.f32 %v6586_v37, %v6362_v52 }
 0x5e9   : > { %v7078_v14 = vadd.f32 %v10210_v45, %v6930_v38  ;;  %6907 = vmatmul.f32.gmra.mxu1 %v6768_v48  ;;  %v7006_v48 = vld [vmem:[%s7747_s8 + $0xcb] sm:$0xff]  ;;  %v6363_v38 = vadd.f32 %v6303_v61, %v6077_v2 }
 0x5eb   : > { %v7114_v21 = vadd.f32 %v7078_v14, %v7002_v44  ;;  %v6309_v0 = vpop.f32.mrf.mxu3  ;;  %v10701_v14 = vld [vmem:[#allocation21_spill] sm:$0xff]  ;;  %v6649_v29 = vadd.f32 %v6589_v18, %v6363_v38  ;;  %v10705_v38 = vld [vmem:[#allocation24_spill] sm:$0xff] }
 0x5ec   : > { %v5792_v43 = vadd.f32 %v10159_v35, %v10701_v14 }
 0x5ed   : > { %v7150_v58 = vmax.f32 %v7114_v21, 0.0 }
 0x5ee   : > { %v6863_v12 = vpop.f32.mrf.mxu1  ;;  %v6078_v17 = vadd.f32 %v6020_v50, %v5792_v43 }
 0x5ef   : > { %7186 = vst [vmem:[%s10216_s26 + $0x98] sm:$0xff] %v7150_v58  ;;  %v6931_v28 = vadd.f32 %v6863_v12, %v6645_v26  ;;  %v6595_v44 = vpop.f32.mrf.mxu0  ;;  %v6026_v53 = vpop.f32.mrf.mxu2  ;;  %v7007_v26 = vld [vmem:[%s7747_s8 + $0xd3] sm:$0xff] }
 0x5f0   : > { %v6364_v12 = vadd.f32 %v6306_v1, %v6078_v17 }
 0x5f1   : > { %v7079_v30 = vadd.f32 %v10210_v45, %v6931_v28 }
 0x5f2   : > { %v6650_v47 = vadd.f32 %v6592_v33, %v6364_v12 }
 0x5f3   : > { %v7115_v5 = vadd.f32 %v7079_v30, %v7003_v57  ;;  %v6312_v58 = vpop.f32.mrf.mxu3  ;;  %v10702_v57 = vld [vmem:[#allocation14_spill] sm:$0xff] }
 0x5f4   : > { %v5793_v25 = vadd.f32 %v10165_v56, %v10702_v57 }
 0x5f5   : > { %v7151_v7 = vmax.f32 %v7115_v5, 0.0 }
 0x5f6   : > { %v6866_v6 = vpop.f32.mrf.mxu1  ;;  %v6079_v41 = vadd.f32 %v6023_v51, %v5793_v25  ;;  %v10704_v51 = vld [vmem:[#allocation23_spill] sm:$0xff] }
 0x5f7   : > { %7187 = vst [vmem:[%s10216_s26 + $0xa0] sm:$0xff] %v7151_v7  ;;  %v6932_v40 = vadd.f32 %v6866_v6, %v6646_v16  ;;  %v6598_v30 = vpop.f32.mrf.mxu0  ;;  %v6029_v35 = vpop.f32.mrf.mxu2  ;;  %v7008_v16 = vld [vmem:[%s7747_s8 + $0xdb] sm:$0xff] }
 0x5f8   : > { %v6365_v50 = vadd.f32 %v6309_v0, %v6079_v41  ;;  %v7012_v41 = vld [vmem:[%s7747_s8 + $0xfb] sm:$0xff] }
 0x5f9   : > { %v7080_v15 = vadd.f32 %v10210_v45, %v6932_v40 }
 0x5fa   : > { %v6651_v1 = vadd.f32 %v6595_v44, %v6365_v50  ;;  %v5796_v44 = vadd.f32 %v10183_v8, %v10705_v38 }
 0x5fb   : > { %v7116_v60 = vadd.f32 %v7080_v15, %v7004_v4  ;;  %v6315_v40 = vpop.f32.mrf.mxu3  ;;  %v10703_v4 = vld [vmem:[#allocation22_spill] sm:$0xff] }
 0x5fc   : > { %v5794_v24 = vadd.f32 %v10171_v13, %v10703_v4 }
 0x5fd   : > { %v7152_v27 = vmax.f32 %v7116_v60, 0.0 }
 0x5fe   : > { %v6869_v49 = vpop.f32.mrf.mxu1  ;;  %v6080_v15 = vadd.f32 %v6026_v53, %v5794_v24 }
 0x5ff   : > { %7188 = vst [vmem:[%s10216_s26 + $0xa8] sm:$0xff] %v7152_v27  ;;  %v6933_v63 = vadd.f32 %v6869_v49, %v6647_v39  ;;  %v6601_v11 = vpop.f32.mrf.mxu0  ;;  %v6032_v54 = vpop.f32.mrf.mxu2  ;;  %v7009_v49 = vld [vmem:[%s7747_s8 + $0xe3] sm:$0xff] }
 0x600   : > { %v6366_v33 = vadd.f32 %v6312_v58, %v6080_v15  ;;  %v7013_v15 = vld [vmem:[%s7747_s8 + $0x103] sm:$0xff] }
 0x601   : > { %v7081_v3 = vadd.f32 %v10210_v45, %v6933_v63 }
 0x603   : > { %v7117_v31 = vadd.f32 %v7081_v3, %v7005_v9  ;;  %v5795_v9 = vadd.f32 %v10177_v19, %v10704_v51  ;;  %v6318_v13 = vpop.f32.mrf.mxu3 }
 0x605   : > { %v7153_v34 = vmax.f32 %v7117_v31, 0.0  ;;  %v6081_v3 = vadd.f32 %v6029_v35, %v5795_v9  ;;  %v6652_v31 = vadd.f32 %v6598_v30, %v6366_v33 }
 0x606   : > { %v6872_v46 = vpop.f32.mrf.mxu1 }
 0x607   : > { %7189 = vst [vmem:[%s10216_s26 + $0xb0] sm:$0xff] %v7153_v34  ;;  %v6934_v23 = vadd.f32 %v6872_v46, %v6648_v10  ;;  %v6604_v34 = vpop.f32.mrf.mxu0  ;;  %v6035_v0 = vpop.f32.mrf.mxu2  ;;  %v7010_v46 = vld [vmem:[%s7747_s8 + $0xeb] sm:$0xff] }
 0x609   : > { %v7082_v20 = vadd.f32 %v10210_v45, %v6934_v23  ;;  %v6367_v23 = vadd.f32 %v6315_v40, %v6081_v3 }
 0x60b   : > { %v7118_v36 = vadd.f32 %v7082_v20, %v7006_v48  ;;  %v6082_v20 = vadd.f32 %v6032_v54, %v5796_v44  ;;  %v6653_v14 = vadd.f32 %v6601_v11, %v6367_v23  ;;  %v6321_v43 = vpop.f32.mrf.mxu3  ;;  %v10708_v54 = vld [vmem:[#allocation25_spill] sm:$0xff] }
 0x60d   : > { %v7154_v21 = vmax.f32 %v7118_v36, 0.0 }
 0x60e   : > { %v6875_v37 = vpop.f32.mrf.mxu1 }
 0x60f   : > { %7190 = vst [vmem:[%s10216_s26 + $0xb8] sm:$0xff] %v7154_v21  ;;  %v6935_v42 = vadd.f32 %v6875_v37, %v6649_v29  ;;  %v7011_v21 = vld [vmem:[%s7747_s8 + $0xf3] sm:$0xff]  ;;  %v6368_v29 = vadd.f32 %v6318_v13, %v6082_v20  ;;  %v6607_v37 = vpop.f32.mrf.mxu0  ;;  %v6038_v58 = vpop.f32.mrf.mxu2  ;;  %v7014_v13 = vld [vmem:[%s7747_s8 + $0x10b] sm:$0xff] }
 0x611   : > { %v7083_v28 = vadd.f32 %v10210_v45, %v6935_v42  ;;  %v6654_v25 = vadd.f32 %v6604_v34, %v6368_v29 }
 0x613   : > { %v7119_v61 = vadd.f32 %v7083_v28, %v7007_v26  ;;  %v10706_v26 = vld [vmem:[#allocation15_spill] sm:$0xff]  ;;  %v6324_v35 = vpop.f32.mrf.mxu3 }
 0x614   : > { %v5797_v12 = vadd.f32 %v10189_v59, %v10706_v26 }
 0x615   : > { %v7155_v5 = vmax.f32 %v7119_v61, 0.0 }
 0x616   : > { %v6878_v18 = vpop.f32.mrf.mxu1  ;;  %v6083_v28 = vadd.f32 %v6035_v0, %v5797_v12  ;;  %v7016_v12 = vld [vmem:[%s7747_s8 + $0x11b] sm:$0xff] }
 0x617   : > { %7191 = vst [vmem:[%s10216_s26 + $0xc0] sm:$0xff] %v7155_v5  ;;  %v6936_v7 = vadd.f32 %v6878_v18, %v6650_v47  ;;  %v10707_v18 = vld [vmem:[#allocation16_spill] sm:$0xff]  ;;  %v6041_v59 = vpop.f32.mrf.mxu2 }
 0x618   : > { %v6369_v5 = vadd.f32 %v6321_v43, %v6083_v28  ;;  %v10711_v43 = vld [vmem:[#allocation19_spill] sm:$0xff] }
 0x619   : > { %v7084_v6 = vadd.f32 %v10210_v45, %v6936_v7  ;;  %v5798_v7 = vadd.f32 %v10195_v32, %v10707_v18 }
 0x61a   : > { %v6655_v4 = vadd.f32 %v6607_v37, %v6369_v5 }
 0x61b   : > { %v7120_v56 = vadd.f32 %v7084_v6, %v7008_v16  ;;  %v6610_v16 = vpop.f32.mrf.mxu0  ;;  %v6084_v6 = vadd.f32 %v6038_v58, %v5798_v7 }
 0x61d   : > { %v7156_v60 = vmax.f32 %v7120_v56, 0.0  ;;  %v6370_v11 = vadd.f32 %v6324_v35, %v6084_v6 }
 0x61e   : > { %v6881_v27 = vpop.f32.mrf.mxu1 }
 0x61f   : > { %7192 = vst [vmem:[%s10216_s26 + $0xc8] sm:$0xff] %v7156_v60  ;;  %v6937_v39 = vadd.f32 %v6881_v27, %v6651_v1  ;;  %v6327_v1 = vpop.f32.mrf.mxu3  ;;  %v5799_v27 = vadd.f32 %v10199_v62, %v10708_v54  ;;  %v6044_v51 = vpop.f32.mrf.mxu2 }
 0x621   : > { %v7085_v63 = vadd.f32 %v10210_v45, %v6937_v39 }
 0x623   : > { %v7121_v52 = vadd.f32 %v7085_v63, %v7009_v49  ;;  %v6613_v39 = vpop.f32.mrf.mxu0  ;;  %v6085_v49 = vadd.f32 %v6041_v59, %v5799_v27  ;;  %v6656_v63 = vadd.f32 %v6610_v16, %v6370_v11 }
 0x625   : > { %v7157_v22 = vmax.f32 %v7121_v52, 0.0  ;;  %v6371_v3 = vadd.f32 %v6327_v1, %v6085_v49 }
 0x626   : > { %v6884_v2 = vpop.f32.mrf.mxu1 }
 0x627   : > { %7193 = vst [vmem:[%s10216_s26 + $0xd0] sm:$0xff] %v7157_v22  ;;  %v6938_v10 = vadd.f32 %v6884_v2, %v6652_v31  ;;  %v10709_v31 = vld [vmem:[#allocation17_spill] sm:$0xff]  ;;  %v6330_v62 = vpop.f32.mrf.mxu3  ;;  %v6047_v44 = vpop.f32.mrf.mxu2 }
 0x628   : > { %v5800_v2 = vadd.f32 %v10201_v55, %v10709_v31 }
 0x629   : > { %v7086_v48 = vadd.f32 %v10210_v45, %v6938_v10 }
 0x62a   : > { %v6086_v10 = vadd.f32 %v6044_v51, %v5800_v2 }
 0x62b   : > { %v7122_v19 = vadd.f32 %v7086_v48, %v7010_v46  ;;  %v6657_v46 = vadd.f32 %v6613_v39, %v6371_v3  ;;  %v6616_v38 = vpop.f32.mrf.mxu0 }
 0x62c   : > { %v6372_v20 = vadd.f32 %v6330_v62, %v6086_v10 }
 0x62d   : > { %v7158_v53 = vmax.f32 %v7122_v19, 0.0  ;;  %v7015_v19 = vld [vmem:[%s7747_s8 + $0x113] sm:$0xff] }
 0x62e   : > { %v6887_v36 = vpop.f32.mrf.mxu1  ;;  %v6658_v37 = vadd.f32 %v6616_v38, %v6372_v20 }
 0x62f   : > { %7194 = vst [vmem:[%s10216_s26 + $0xd8] sm:$0xff] %v7158_v53  ;;  %v6939_v17 = vadd.f32 %v6887_v36, %v6653_v14  ;;  %v10710_v14 = vld [vmem:[#allocation26_spill] sm:$0xff] }
 0x630   : > { %v5801_v36 = vadd.f32 %v10711_v43, %v10710_v14 }
 0x631   : > { %v7087_v42 = vadd.f32 %v10210_v45, %v6939_v17  ;;  %v6333_v17 = vpop.f32.mrf.mxu3 }
 0x633   : > { %v7123_v8 = vadd.f32 %v7087_v42, %v7011_v21  ;;  %v6087_v21 = vadd.f32 %v6047_v44, %v5801_v36  ;;  %v6619_v26 = vpop.f32.mrf.mxu0 }
 0x635   : > { %v7159_v57 = vmax.f32 %v7123_v8, 0.0  ;;  %v6373_v8 = vadd.f32 %v6333_v17, %v6087_v21 }
 0x636   : > { %v6890_v30 = vpop.f32.mrf.mxu1 }
 0x637   : > { %7195 = vst [vmem:[%s10216_s26 + $0xe0] sm:$0xff] %v7159_v57  ;;  %v6940_v61 = vadd.f32 %v6890_v30, %v6654_v25  ;;  %v6050_v57 = vpop.f32.mrf.mxu2  ;;  %v10712_v25 = vld [vmem:[#allocation18_spill] sm:$0xff]  ;;  %v10713_v30 = vld [vmem:[#allocation20_spill] sm:$0xff] }
 0x639   : > { %v7088_v47 = vadd.f32 %v10210_v45, %v6940_v61  ;;  %v5802_v61 = vadd.f32 %v10713_v30, %v10712_v25  ;;  %v6336_v18 = vpop.f32.mrf.mxu3 }
 0x63b   : > { %v7124_v50 = vadd.f32 %v7088_v47, %v7012_v41  ;;  %v6659_v41 = vadd.f32 %v6619_v26, %v6373_v8  ;;  %v6088_v5 = vadd.f32 %v6050_v57, %v5802_v61 }
 0x63d   : > { %v7160_v40 = vmax.f32 %v7124_v50, 0.0  ;;  %v7017_v50 = vld [vmem:[%s7747_s8 + $0x123] sm:$0xff]  ;;  %v6374_v59 = vadd.f32 %v6336_v18, %v6088_v5 }
 0x63e   : > { %v6893_v24 = vpop.f32.mrf.mxu1 }
 0x63f   : > { %7196 = vst [vmem:[%s10216_s26 + $0xe8] sm:$0xff] %v7160_v40  ;;  %v6941_v56 = vadd.f32 %v6893_v24, %v6655_v4  ;;  %v6622_v40 = vpop.f32.mrf.mxu0 }
 0x640   : > { %v6660_v24 = vadd.f32 %v6622_v40, %v6374_v59 }
 0x641   : > { %v7089_v60 = vadd.f32 %v10210_v45, %v6941_v56 }
 0x643   : > { %v7125_v32 = vadd.f32 %v7089_v60, %v7013_v15  ;;  %v7018_v60 = vld [vmem:[%s7747_s8 + $0x12b] sm:$0xff]  ;;  %s7548_s8 = scalar_lea.hbm %s10497_s5, 576 }
 0x644   : > { %p7550_p9 = scmp.lt.s32.totalorder %s7548_s8, %s7544_s12 }
 0x645   : > { %v7161_v33 = vmax.f32 %v7125_v32, 0.0 }
 0x646   : > { %v6896_v9 = vpop.f32.mrf.mxu1  ;;  %p7551_p2 = por %p7550_p9, %p7549_p11 }
 0x647   : > { %7197 = vst [vmem:[%s10216_s26 + $0xf0] sm:$0xff] %v7161_v33  ;;  %v6942_v52 = vadd.f32 %v6896_v9, %v6656_v63 }
 0x648   : > { %p7552_p10 = pnand %p7551_p2, %p7547_p8 }
 0x649   : > { %v7090_v22 = vadd.f32 %v10210_v45, %v6942_v52 }
 0x64b   : > { %v7126_v34 = vadd.f32 %v7090_v22, %v7014_v13 }
 0x64d   : > { %v7162_v0 = vmax.f32 %v7126_v34, 0.0 }
 0x64e   : > { %v6899_v23 = vpop.f32.mrf.mxu1 }
 0x64f   : > { %7198 = vst [vmem:[%s10216_s26 + $0xf8] sm:$0xff] %v7162_v0  ;;  %v6943_v48 = vadd.f32 %v6899_v23, %v6657_v46 }
 0x651   : > { %v7091_v53 = vadd.f32 %v10210_v45, %v6943_v48 }
 0x653   : > { %v7127_v55 = vadd.f32 %v7091_v53, %v7015_v19 }
 0x655   : > { %v7163_v29 = vmax.f32 %v7127_v55, 0.0 }
 0x656   : > { %v6902_v42 = vpop.f32.mrf.mxu1 }
 0x657   : > { %7199 = vst [vmem:[%s10216_s26 + $0x100] sm:$0xff] %v7163_v29  ;;  %v6944_v58 = vadd.f32 %v6902_v42, %v6658_v37 }
 0x659   : > { %v7092_v28 = vadd.f32 %v10210_v45, %v6944_v58 }
 0x65b   : > { %v7128_v35 = vadd.f32 %v7092_v28, %v7016_v12 }
 0x65d   : > { %v7164_v47 = vmax.f32 %v7128_v35, 0.0 }
 0x65e   : > { %v6905_v7 = vpop.f32.mrf.mxu1 }
 0x65f   : > { %7200 = vst [vmem:[%s10216_s26 + $0x108] sm:$0xff] %v7164_v47  ;;  %v6945_v16 = vadd.f32 %v6905_v7, %v6659_v41 }
 0x661   : > { %v7093_v6 = vadd.f32 %v10210_v45, %v6945_v16 }
 0x663   : > { %v7129_v4 = vadd.f32 %v7093_v6, %v7017_v50 }
 0x665   : > { %v7165_v56 = vmax.f32 %v7129_v4, 0.0 }
 0x666   : > { %v6908_v15 = vpop.f32.mrf.mxu1 }
 0x667   : > { %7201 = vst [vmem:[%s10216_s26 + $0x110] sm:$0xff] %v7165_v56  ;;  %v6946_v11 = vadd.f32 %v6908_v15, %v6660_v24 }
 0x669   : > { %v7094_v1 = vadd.f32 %v10210_v45, %v6946_v11 }
 0x66b   : > { %v7130_v54 = vadd.f32 %v7094_v1, %v7018_v60 }
 0x66d   : > { %v7166_v27 = vmax.f32 %v7130_v54, 0.0 }
 0x66f   : > { %7202 = vst [vmem:[%s10216_s26 + $0x118] sm:$0xff] %v7166_v27 }
 0x670   : > { %7555 = shalt.err (!%p7552_p10)
}
 0x671   : > { %s7606_s1 = smov 128   ;;  %s7607_s7 = smov 8  }
 0x672   : > { %7370 = dma.vmem_to_hbm [thread:$0]  (%p7710_p3), %s7217_s29, 4608, %s7219_s30, %s7204_s22, %s7606_s1, %s7606_s1, %s7607_s7  }
 0x673 PF: > { %s7233_s28 = sand.u32 1, %s7586_s18   ;;  %p10714_p12 = scmp.ge.s32.totalorder %s7598_s21, 2 }
 0x674   : > { %s7234_s26 = scalar_lea.sflag [#allocation6], %s7233_s28 }
 0x675   : > { %p7384_p13 = pnand %p10714_p12, %p7673_p6 }
 0x677   : > { %p7385_p0 = pneg %p7384_p13 }
 0x679   : > { %7581 = dma.done.wait (%p7385_p0), %s7234_s26, 4608  }
 0x67a   : > { %7583 = vsyncadd (%p7385_p0), %s7234_s26, 4294962688  ;;  %p19_p5 = scmp.ge.s32.totalorder %s7700_s14, 4   ;;  %s10715_s18 = smov %s7590_s19 }
 0x67b   : > { %s10716_s19 = smov %s7594_s20  ;;  %s10717_s20 = smov %s7716_s23 }
 0x67c   : > { %s10718_s21 = smov %s7700_s14  ;;  %21 = sbr.rel (!%p19_p5) target bundleno = 8 (0x8), region = 109 }
 0x681   :  { %7240 = vsyncpa [#allocation5], 1 }
 0x682   :  { %7242 = vsyncpa [#allocation5 + $0x1], 1 }
 0x683   :  { %7243 = vsyncpa [#allocation8], 1 }
 0x684   :  { %7244 = vsyncpa [#allocation6], 1 }
 0x685   :  { %7246 = vsyncpa [#allocation6 + $0x1], 1 }

</bundles_post_ra>
